<compile_context>
chip_gen: v7x
topology: tpu7x:2x2x1
jax: 0.10.0
libtpu: 0.0.40
codegen_flags: <defaults>
</compile_context>

<pallas_src>
import functools

import jax
import jax.numpy as jnp
import numpy as np
from jax import lax
from jax.experimental import pallas as pl
from jax.experimental.pallas import tpu as pltpu

C_PAD = 128      # channel padding (lane width)
K = 5            # conv kernel size


def _round_up(x, m):
    return ((x + m - 1) // m) * m


# ------------------------------------------------------------------ kernel --

def _convnet_kernel(x_ref, w1_ref, b1_ref, w2_ref, b2_ref, pool_ref,
                    fw1_ref, fb1_ref, fw2_ref, fb2_ref,
                    out_ref, a_ref, b_ref,
                    *, grid_s, rows, row_tile):
    S, R = grid_s, rows
    r_pad = a_ref.shape[0]

    # Zero only the pad-tail rows [R, r_pad): shifted reads and the avg-pool
    # selection matmul touch them, so they must be finite (zero).  Valid rows
    # [0, R) are fully overwritten below -- no full-slab zeroing.
    a_ref[pl.ds(R, r_pad - R), :] = jnp.zeros((r_pad - R, C_PAD), a_ref.dtype)
    b_ref[pl.ds(R, r_pad - R), :] = jnp.zeros((r_pad - R, C_PAD), b_ref.dtype)

    # ---- conv1 + BN + ReLU: ONE im2col matmul (patches built in the wrapper,
    #      all 25 taps folded into a single bf16 weight tile); bias + ReLU
    #      fused into the single store.
    y1 = jnp.dot(x_ref[pl.ds(0, R), :], w1_ref[...],
                 preferred_element_type=jnp.float32)
    a_ref[pl.ds(0, R), :] = jnp.maximum(y1 + b1_ref[...], 0.0).astype(a_ref.dtype)

    def maxpool2x2(src, dst, dil):
        # 2x2 / stride-2 max pool on the dilated flat grid; results stay on the
        # same flat grid at dilation 2*dil (no compaction / gather).
        m = jnp.maximum(src[pl.ds(0, R), :], src[pl.ds(dil, R), :])
        m = jnp.maximum(m, src[pl.ds(dil * S, R), :])
        m = jnp.maximum(m, src[pl.ds(dil * S + dil, R), :])
        dst[pl.ds(0, R), :] = m

    maxpool2x2(a_ref, b_ref, dil=1)                     # MaxPool2d(2)

    # ---- conv2 + BN + ReLU: shift-and-accumulate over the 25 taps with a
    #      value-resident f32 accumulator per row tile; bias + ReLU fused into
    #      the one store per tile (no per-tap VMEM read-modify-write).
    dil = 2
    for r0 in range(0, R, row_tile):
        acc = None
        for kh in range(K):
            for kw in range(K):
                shift = dil * (kh * S + kw)
                d = jnp.dot(b_ref[pl.ds(r0 + shift, row_tile), :],
                            w2_ref[kh * K + kw],
                            preferred_element_type=jnp.float32)
                acc = d if acc is None else acc + d
        a_ref[pl.ds(r0, row_tile), :] = jnp.maximum(
            acc + b2_ref[...], 0.0).astype(a_ref.dtype)

    maxpool2x2(a_ref, b_ref, dil=2)                     # MaxPool2d(2)

    # ---- AdaptiveAvgPool2d(1): lane-dense selection-matrix matmul.
    #      P[n, r] = 1/(final_hw^2) at the surviving dilation-4 grid rows of
    #      image n (built host-side); the MXU is idle here so this is free.
    feat = jnp.dot(pool_ref[...], b_ref[...],
                   preferred_element_type=jnp.float32)   # (out_rows, C_PAD) f32

    # ---- MLP head: Linear(hidden, 200) -> ReLU -> Linear(200, num_classes).
    h = jnp.dot(feat.astype(fw1_ref.dtype), fw1_ref[...],
                preferred_element_type=jnp.float32) + fb1_ref[...]
    h = jnp.maximum(h, 0.0)
    out_ref[...] = (jnp.dot(h.astype(fw2_ref.dtype), fw2_ref[...],
                            preferred_element_type=jnp.float32) + fb2_ref[...])


# ----------------------------------------------------------------- wrapper --

def convnet_forward(x, p, num_classes=10):
    """x: (N, C, H, W) NCHW float32 -> logits (N, num_classes)."""
    N, C, H, W = x.shape
    assert H == W, "square inputs only"
    S = H
    R = N * S * S

    # Spatial-schedule validity: the flat-grid shift/dilation trick needs an
    # even number of valid conv outputs before each 2x2 pool (true for S=16,K=5).
    assert (S - K + 1) >= 2 and (S - K + 1) % 2 == 0, "unsupported spatial size"
    hw1 = (S - K + 1) // 2
    assert (hw1 - K + 1) >= 2 and (hw1 - K + 1) % 2 == 0, "unsupported spatial size"
    final_hw = (hw1 - K + 1) // 2

    # Slab pad derived programmatically from the actual maximum read offset.
    read_offsets = (
        S + 1,                        # maxpool1 (dil=1) window
        2 * ((K - 1) * S + (K - 1)),  # conv2 taps at dil=2
        2 * (S + 1),                  # maxpool2 (dil=2) window
    )
    r_pad = _round_up(R + max(read_offsets), 128)

    out_rows = max(8, _round_up(N, 8))
    kk_pad = p["w1"].shape[0]          # K*K*Cin padded to lanes
    assert kk_pad >= K * K * C
    head_pad = p["fw1"].shape[1]
    rows_x = _round_up(R, 8)

    row_tile = R
    for cand in (256, 128, 64):
        if R % cand == 0:
            row_tile = cand
            break

    # conv1 im2col: row = n*S*S + h*S + w, lane = kh*K*C + kw*C + c, zero-padded
    # to 128 lanes, bf16 (MXU-native operands).  Out-of-bound taps read zeros.
    x_nhwc = jnp.transpose(x, (0, 2, 3, 1))
    xp = jnp.pad(x_nhwc, ((0, 0), (0, K - 1), (0, K - 1), (0, 0)))
    patches = jnp.concatenate(
        [xp[:, kh:kh + S, kw:kw + S, :] for kh in range(K) for kw in range(K)],
        axis=-1).reshape(R, K * K * C)
    x_flat = jnp.zeros((rows_x, kk_pad), jnp.bfloat16)
    x_flat = x_flat.at[:R, :K * K * C].set(patches.astype(jnp.bfloat16))

    # AdaptiveAvgPool2d(1) selection matrix (consumed as a lane-dense matmul).
    inv = 1.0 / float(final_hw * final_hw)
    pool_np = np.zeros((out_rows, r_pad), np.float32)
    for n in range(N):
        for i in range(final_hw):
            for j in range(final_hw):
                pool_np[n, n * S * S + 4 * (i * S + j)] = inv
    pool_mat = jnp.asarray(pool_np, jnp.bfloat16)

    kernel = functools.partial(_convnet_kernel, grid_s=S, rows=R,
                               row_tile=row_tile)

    # NOTE: weights are tiny (~1 MiB bf16), so default double-buffering at
    # grid=(1,) is harmless; revisit with pl.Buffered(1) + a "parallel" batch
    # row-tile axis when scaling the batch.
    out = pl.pallas_call(
        kernel,
        out_shape=jax.ShapeDtypeStruct((out_rows, C_PAD), jnp.float32),
        grid=(1,),
        in_specs=[
            pl.BlockSpec((rows_x, kk_pad), lambda i: (0, 0)),            # im2col x
            pl.BlockSpec((kk_pad, C_PAD), lambda i: (0, 0)),             # conv1 W (folded taps)
            pl.BlockSpec((1, C_PAD), lambda i: (0, 0)),                  # bias1 (f32)
            pl.BlockSpec((K * K, C_PAD, C_PAD), lambda i: (0, 0, 0)),    # conv2 taps
            pl.BlockSpec((1, C_PAD), lambda i: (0, 0)),                  # bias2 (f32)
            pl.BlockSpec((out_rows, r_pad), lambda i: (0, 0)),           # avg-pool select
            pl.BlockSpec((C_PAD, head_pad), lambda i: (0, 0)),           # head W1
            pl.BlockSpec((1, head_pad), lambda i: (0, 0)),               # head b1 (f32)
            pl.BlockSpec((head_pad, C_PAD), lambda i: (0, 0)),           # head W2
            pl.BlockSpec((1, C_PAD), lambda i: (0, 0)),                  # head b2 (f32)
        ],
        out_specs=pl.BlockSpec((out_rows, C_PAD), lambda i: (0, 0)),
        scratch_shapes=[
            pltpu.VMEM((r_pad, C_PAD), jnp.bfloat16),
            pltpu.VMEM((r_pad, C_PAD), jnp.bfloat16),
        ],
        compiler_params=pltpu.CompilerParams(
            dimension_semantics=("arbitrary",)),
    )(x_flat, p["w1"], p["b1"], p["w2"], p["b2"], pool_mat,
      p["fw1"], p["fb1"], p["fw2"], p["fb2"])

    return out[:N, :num_classes]


# ------------------------------------------------- parameter prep / folding --

def _fold_bn(conv_b, gamma, beta, mean, var, eps=1e-5):
    scale = gamma * lax.rsqrt(var + eps)
    bias = (conv_b - mean) * scale + beta
    return scale, bias


def _prep_conv1(w, conv_b, gamma, beta, mean, var):
    """Fold eval-mode BN into conv1 and pack ALL taps into one im2col tile."""
    cout, cin, k, _ = w.shape
    scale, bias = _fold_bn(conv_b, gamma, beta, mean, var)
    wt = (jnp.transpose(w, (2, 3, 1, 0)).reshape(k * k * cin, cout)
          * scale[None, :])
    kk_pad = _round_up(k * k * cin, C_PAD)
    w_p = jnp.zeros((kk_pad, C_PAD), jnp.float32).at[:k * k * cin, :cout].set(wt)
    b_p = jnp.zeros((1, C_PAD), jnp.float32).at[0, :cout].set(bias)
    return w_p.astype(jnp.bfloat16), b_p


def _prep_conv_taps(w, conv_b, gamma, beta, mean, var):
    """Fold eval-mode BN; one padded (128,128) bf16 weight tile per tap."""
    cout, cin, k, _ = w.shape
    scale, bias = _fold_bn(conv_b, gamma, beta, mean, var)
    taps = (jnp.transpose(w, (2, 3, 1, 0)).reshape(k * k, cin, cout)
            * scale[None, None, :])
    w_p = jnp.zeros((k * k, C_PAD, C_PAD), jnp.float32).at[:, :cin, :cout].set(taps)
    b_p = jnp.zeros((1, C_PAD), jnp.float32).at[0, :cout].set(bias)
    return w_p.astype(jnp.bfloat16), b_p


def _pad2d(m, rows, cols, dtype=jnp.float32):
    z = jnp.zeros((rows, cols), jnp.float32).at[:m.shape[0], :m.shape[1]].set(m)
    return z.astype(dtype)


def init_params(key, num_channels=3, hidden_dim=32, num_classes=10, k=5):
    ks = jax.random.split(key, 16)
    # conv1 + BN1
    w1 = 0.1 * jax.random.normal(ks[0], (hidden_dim, num_channels, k, k), jnp.float32)
    cb1 = 0.1 * jax.random.normal(ks[1], (hidden_dim,), jnp.float32)
    g1 = 1.0 + 0.1 * jax.random.normal(ks[2], (hidden_dim,), jnp.float32)
    be1 = 0.1 * jax.random.normal(ks[3], (hidden_dim,), jnp.float32)
    rm1 = 0.1 * jax.random.normal(ks[4], (hidden_dim,), jnp.float32)
    rv1 = 1.0 + 0.1 * jax.random.uniform(ks[5], (hidden_dim,), jnp.float32)
    # conv2 + BN2
    w2 = 0.05 * jax.random.normal(ks[6], (hidden_dim, hidden_dim, k, k), jnp.float32)
    cb2 = 0.1 * jax.random.normal(ks[7], (hidden_dim,), jnp.float32)
    g2 = 1.0 + 0.1 * jax.random.normal(ks[8], (hidden_dim,), jnp.float32)
    be2 = 0.1 * jax.random.normal(ks[9], (hidden_dim,), jnp.float32)
    rm2 = 0.1 * jax.random.normal(ks[10], (hidden_dim,), jnp.float32)
    rv2 = 1.0 + 0.1 * jax.random.uniform(ks[11], (hidden_dim,), jnp.float32)
    # head: Linear(hidden_dim, 200) -> ReLU -> Linear(200, num_classes)
    fw1 = 0.05 * jax.random.normal(ks[12], (hidden_dim, 200), jnp.float32)
    fb1 = 0.1 * jax.random.normal(ks[13], (200,), jnp.float32)
    fw2 = 0.05 * jax.random.normal(ks[14], (200, num_classes), jnp.float32)
    fb2 = 0.1 * jax.random.normal(ks[15], (num_classes,), jnp.float32)

    raw = dict(w1=w1, cb1=cb1, g1=g1, be1=be1, rm1=rm1, rv1=rv1,
               w2=w2, cb2=cb2, g2=g2, be2=be2, rm2=rm2, rv2=rv2,
               fw1=fw1, fb1=fb1, fw2=fw2, fb2=fb2)

    head_pad = _round_up(200, 128)
    pw1, pb1 = _prep_conv1(w1, cb1, g1, be1, rm1, rv1)
    pw2, pb2 = _prep_conv_taps(w2, cb2, g2, be2, rm2, rv2)
    kernel_params = dict(
        w1=pw1, b1=pb1, w2=pw2, b2=pb2,
        fw1=_pad2d(fw1, C_PAD, head_pad, jnp.bfloat16),
        fb1=_pad2d(fb1.reshape(1, -1), 1, head_pad),
        fw2=_pad2d(fw2, head_pad, C_PAD, jnp.bfloat16),
        fb2=_pad2d(fb2.reshape(1, -1), 1, C_PAD),
    )
    return kernel_params, raw


# --------------------------------------------------- pure-JAX reference -----

def reference_forward(x, raw, eps=1e-5):
    def conv_bn_relu(x, w, b, g, beta, mean, var):
        y = lax.conv_general_dilated(x, w, (1, 1), "VALID",
                                     dimension_numbers=("NCHW", "OIHW", "NCHW"))
        y = y + b[None, :, None, None]
        s = (g * lax.rsqrt(var + eps))[None, :, None, None]
        y = (y - mean[None, :, None, None]) * s + beta[None, :, None, None]
        return jnp.maximum(y, 0.0)

    def maxpool2(x):
        n, c, h, w = x.shape
        x = x[:, :, :(h // 2) * 2, :(w // 2) * 2]
        return x.reshape(n, c, h // 2, 2, w // 2, 2).max(axis=(3, 5))

    out = conv_bn_relu(x, raw["w1"], raw["cb1"], raw["g1"], raw["be1"], raw["rm1"], raw["rv1"])
    out = maxpool2(out)
    out = conv_bn_relu(out, raw["w2"], raw["cb2"], raw["g2"], raw["be2"], raw["rm2"], raw["rv2"])
    out = maxpool2(out)
    feat = out.mean(axis=(2, 3))
    h = jnp.maximum(feat @ raw["fw1"] + raw["fb1"], 0.0)
    return h @ raw["fw2"] + raw["fb2"]


# --------------------------------------------------------------------- main --

if __name__ == "__main__":
    key = jax.random.PRNGKey(0)
    kx, kp = jax.random.split(key)

    batch, num_channels, spatial = 2, 3, 16
    hidden_dim, num_classes = 32, 10

    x = jax.random.normal(kx, (batch, num_channels, spatial, spatial), jnp.float32)
    params, raw = init_params(kp, num_channels=num_channels, hidden_dim=hidden_dim,
                              num_classes=num_classes)

    fwd = jax.jit(convnet_forward, static_argnames=("num_classes",))
    logits = fwd(x, params, num_classes=num_classes)
    jax.block_until_ready(logits)
    assert logits.shape == (batch, num_classes)

    ref = reference_forward(x, raw)
    max_err = float(jnp.max(jnp.abs(logits - ref)))
    # bf16 matmul operands (f32 accumulation) -> slightly looser tolerance.
    assert jnp.allclose(logits, ref, atol=5e-2, rtol=5e-2), (
        f"kernel/reference mismatch, max abs err {max_err}")

    print("KERNEL_OK")
</pallas_src>

<mosaic_0001>
module attributes {stable_mosaic.version = 11 : i64} {
  func.func @_convnet_kernel(%arg0: i32, %arg1: memref<512x128xbf16, #tpu.memory_space<vmem>>, %arg2: memref<128x128xbf16, #tpu.memory_space<vmem>>, %arg3: memref<1x128xf32, #tpu.memory_space<vmem>>, %arg4: memref<25x128x128xbf16, #tpu.memory_space<vmem>>, %arg5: memref<1x128xf32, #tpu.memory_space<vmem>>, %arg6: memref<8x768xbf16, #tpu.memory_space<vmem>>, %arg7: memref<128x256xbf16, #tpu.memory_space<vmem>>, %arg8: memref<1x256xf32, #tpu.memory_space<vmem>>, %arg9: memref<256x128xbf16, #tpu.memory_space<vmem>>, %arg10: memref<1x128xf32, #tpu.memory_space<vmem>>, %arg11: memref<8x128xf32, #tpu.memory_space<vmem>>, %arg12: memref<768x128xbf16, #tpu.memory_space<vmem>>, %arg13: memref<768x128xbf16, #tpu.memory_space<vmem>>) attributes {dimension_semantics = [#tpu.dimension_semantics<arbitrary>], iteration_bounds = array<i64: 1>, scalar_prefetch = 0 : i64, scratch_operands = 2 : i64, tpu.core_type = #tpu.core_type<tc>, window_params = [{pipeline_mode = #tpu.pipeline_mode<synchronous>, transform_indices = @transform_0, window_bounds = array<i64: 512, 128>}, {pipeline_mode = #tpu.pipeline_mode<synchronous>, transform_indices = @transform_1, window_bounds = array<i64: 128, 128>}, {pipeline_mode = #tpu.pipeline_mode<synchronous>, transform_indices = @transform_2, window_bounds = array<i64: 1, 128>}, {pipeline_mode = #tpu.pipeline_mode<synchronous>, transform_indices = @transform_3, window_bounds = array<i64: 25, 128, 128>}, {pipeline_mode = #tpu.pipeline_mode<synchronous>, transform_indices = @transform_4, window_bounds = array<i64: 1, 128>}, {pipeline_mode = #tpu.pipeline_mode<synchronous>, transform_indices = @transform_5, window_bounds = array<i64: 8, 768>}, {pipeline_mode = #tpu.pipeline_mode<synchronous>, transform_indices = @transform_6, window_bounds = array<i64: 128, 256>}, {pipeline_mode = #tpu.pipeline_mode<synchronous>, transform_indices = @transform_7, window_bounds = array<i64: 1, 256>}, {pipeline_mode = #tpu.pipeline_mode<synchronous>, transform_indices = @transform_8, window_bounds = array<i64: 256, 128>}, {pipeline_mode = #tpu.pipeline_mode<synchronous>, transform_indices = @transform_9, window_bounds = array<i64: 1, 128>}, {pipeline_mode = #tpu.pipeline_mode<synchronous>, transform_indices = @transform_10, window_bounds = array<i64: 8, 128>}]} {
    %cst = arith.constant 0.000000e+00 : bf16
    %0 = vector.broadcast %cst : bf16 to vector<256x128xbf16>
    %c512 = arith.constant 512 : index
    %c0 = arith.constant 0 : index
    %1 = vector.load %arg12[%c512, %c0] : memref<768x128xbf16, #tpu.memory_space<vmem>>, vector<256x128xbf16>
    tpu.vector_store %arg12[%c512, %c0], %0 {strides = array<i32>} : memref<768x128xbf16, #tpu.memory_space<vmem>>, vector<256x128xbf16>,
    %cst_0 = arith.constant 0.000000e+00 : bf16
    %2 = vector.broadcast %cst_0 : bf16 to vector<256x128xbf16>
    %c512_1 = arith.constant 512 : index
    %c0_2 = arith.constant 0 : index
    %3 = vector.load %arg13[%c512_1, %c0_2] : memref<768x128xbf16, #tpu.memory_space<vmem>>, vector<256x128xbf16>
    tpu.vector_store %arg13[%c512_1, %c0_2], %2 {strides = array<i32>} : memref<768x128xbf16, #tpu.memory_space<vmem>>, vector<256x128xbf16>,
    %c0_3 = arith.constant 0 : index
    %c0_4 = arith.constant 0 : index
    %4 = vector.load %arg1[%c0_3, %c0_4] : memref<512x128xbf16, #tpu.memory_space<vmem>>, vector<512x128xbf16>
    %c0_5 = arith.constant 0 : index
    %c0_6 = arith.constant 0 : index
    %5 = vector.load %arg2[%c0_5, %c0_6] : memref<128x128xbf16, #tpu.memory_space<vmem>>, vector<128x128xbf16>
    %cst_7 = arith.constant dense<0.000000e+00> : vector<512x128xf32>
    %6 = tpu.matmul %4, %5, %cst_7 {dimension_numbers = #tpu.dot_dimension_numbers<[1], [0], [0], [1], [0, 0, 1, 1], [], []>} : vector<512x128xbf16>, vector<128x128xbf16>, vector<512x128xf32> -> vector<512x128xf32>
    %c0_8 = arith.constant 0 : index
    %c0_9 = arith.constant 0 : index
    %7 = vector.load %arg3[%c0_8, %c0_9] : memref<1x128xf32, #tpu.memory_space<vmem>>, vector<1x128xf32>
    %8 = vector.broadcast %7 : vector<1x128xf32> to vector<512x128xf32>
    %9 = arith.addf %6, %8 : vector<512x128xf32>
    %cst_10 = arith.constant 0.000000e+00 : f32
    %10 = vector.broadcast %cst_10 : f32 to vector<512x128xf32>
    %11 = arith.maximumf %9, %10 : vector<512x128xf32>
    %12 = arith.truncf %11 : vector<512x128xf32> to vector<512x128xbf16>
    %c0_11 = arith.constant 0 : index
    %c0_12 = arith.constant 0 : index
    %13 = vector.load %arg12[%c0_11, %c0_12] : memref<768x128xbf16, #tpu.memory_space<vmem>>, vector<512x128xbf16>
    tpu.vector_store %arg12[%c0_11, %c0_12], %12 {strides = array<i32>} : memref<768x128xbf16, #tpu.memory_space<vmem>>, vector<512x128xbf16>,
    %c0_13 = arith.constant 0 : index
    %c0_14 = arith.constant 0 : index
    %14 = vector.load %arg12[%c0_13, %c0_14] : memref<768x128xbf16, #tpu.memory_space<vmem>>, vector<512x128xbf16>
    %c1 = arith.constant 1 : index
    %c0_15 = arith.constant 0 : index
    %15 = vector.load %arg12[%c1, %c0_15] : memref<768x128xbf16, #tpu.memory_space<vmem>>, vector<512x128xbf16>
    %16 = arith.maximumf %14, %15 : vector<512x128xbf16>
    %c16 = arith.constant 16 : index
    %c0_16 = arith.constant 0 : index
    %17 = vector.load %arg12[%c16, %c0_16] : memref<768x128xbf16, #tpu.memory_space<vmem>>, vector<512x128xbf16>
    %18 = arith.maximumf %16, %17 : vector<512x128xbf16>
    %c17 = arith.constant 17 : index
    %c0_17 = arith.constant 0 : index
    %19 = vector.load %arg12[%c17, %c0_17] : memref<768x128xbf16, #tpu.memory_space<vmem>>, vector<512x128xbf16>
    %20 = arith.maximumf %18, %19 : vector<512x128xbf16>
    %c0_18 = arith.constant 0 : index
    %c0_19 = arith.constant 0 : index
    %21 = vector.load %arg13[%c0_18, %c0_19] : memref<768x128xbf16, #tpu.memory_space<vmem>>, vector<512x128xbf16>
    tpu.vector_store %arg13[%c0_18, %c0_19], %20 {strides = array<i32>} : memref<768x128xbf16, #tpu.memory_space<vmem>>, vector<512x128xbf16>,
    %c0_20 = arith.constant 0 : index
    %c0_21 = arith.constant 0 : index
    %22 = vector.load %arg13[%c0_20, %c0_21] : memref<768x128xbf16, #tpu.memory_space<vmem>>, vector<256x128xbf16>
    %c0_22 = arith.constant 0 : index
    %c0_23 = arith.constant 0 : index
    %c0_24 = arith.constant 0 : index
    %23 = vector.load %arg4[%c0_22, %c0_23, %c0_24] : memref<25x128x128xbf16, #tpu.memory_space<vmem>>, vector<1x128x128xbf16>
    %24 = vector.shape_cast %23 : vector<1x128x128xbf16> to vector<128x128xbf16>
    %cst_25 = arith.constant dense<0.000000e+00> : vector<256x128xf32>
    %25 = tpu.matmul %22, %24, %cst_25 {dimension_numbers = #tpu.dot_dimension_numbers<[1], [0], [0], [1], [0, 0, 1, 1], [], []>} : vector<256x128xbf16>, vector<128x128xbf16>, vector<256x128xf32> -> vector<256x128xf32>
    %c2 = arith.constant 2 : index
    %c0_26 = arith.constant 0 : index
    %26 = vector.load %arg13[%c2, %c0_26] : memref<768x128xbf16, #tpu.memory_space<vmem>>, vector<256x128xbf16>
    %c1_27 = arith.constant 1 : index
    %c0_28 = arith.constant 0 : index
    %c0_29 = arith.constant 0 : index
    %27 = vector.load %arg4[%c1_27, %c0_28, %c0_29] : memref<25x128x128xbf16, #tpu.memory_space<vmem>>, vector<1x128x128xbf16>
    %28 = vector.shape_cast %27 : vector<1x128x128xbf16> to vector<128x128xbf16>
    %cst_30 = arith.constant dense<0.000000e+00> : vector<256x128xf32>
    %29 = tpu.matmul %26, %28, %cst_30 {dimension_numbers = #tpu.dot_dimension_numbers<[1], [0], [0], [1], [0, 0, 1, 1], [], []>} : vector<256x128xbf16>, vector<128x128xbf16>, vector<256x128xf32> -> vector<256x128xf32>
    %30 = arith.addf %25, %29 : vector<256x128xf32>
    %c4 = arith.constant 4 : index
    %c0_31 = arith.constant 0 : index
    %31 = vector.load %arg13[%c4, %c0_31] : memref<768x128xbf16, #tpu.memory_space<vmem>>, vector<256x128xbf16>
    %c2_32 = arith.constant 2 : index
    %c0_33 = arith.constant 0 : index
    %c0_34 = arith.constant 0 : index
    %32 = vector.load %arg4[%c2_32, %c0_33, %c0_34] : memref<25x128x128xbf16, #tpu.memory_space<vmem>>, vector<1x128x128xbf16>
    %33 = vector.shape_cast %32 : vector<1x128x128xbf16> to vector<128x128xbf16>
    %cst_35 = arith.constant dense<0.000000e+00> : vector<256x128xf32>
    %34 = tpu.matmul %31, %33, %cst_35 {dimension_numbers = #tpu.dot_dimension_numbers<[1], [0], [0], [1], [0, 0, 1, 1], [], []>} : vector<256x128xbf16>, vector<128x128xbf16>, vector<256x128xf32> -> vector<256x128xf32>
    %35 = arith.addf %30, %34 : vector<256x128xf32>
    %c6 = arith.constant 6 : index
    %c0_36 = arith.constant 0 : index
    %36 = vector.load %arg13[%c6, %c0_36] : memref<768x128xbf16, #tpu.memory_space<vmem>>, vector<256x128xbf16>
    %c3 = arith.constant 3 : index
    %c0_37 = arith.constant 0 : index
    %c0_38 = arith.constant 0 : index
    %37 = vector.load %arg4[%c3, %c0_37, %c0_38] : memref<25x128x128xbf16, #tpu.memory_space<vmem>>, vector<1x128x128xbf16>
    %38 = vector.shape_cast %37 : vector<1x128x128xbf16> to vector<128x128xbf16>
    %cst_39 = arith.constant dense<0.000000e+00> : vector<256x128xf32>
    %39 = tpu.matmul %36, %38, %cst_39 {dimension_numbers = #tpu.dot_dimension_numbers<[1], [0], [0], [1], [0, 0, 1, 1], [], []>} : vector<256x128xbf16>, vector<128x128xbf16>, vector<256x128xf32> -> vector<256x128xf32>
    %40 = arith.addf %35, %39 : vector<256x128xf32>
    %c8 = arith.constant 8 : index
    %c0_40 = arith.constant 0 : index
    %41 = vector.load %arg13[%c8, %c0_40] : memref<768x128xbf16, #tpu.memory_space<vmem>>, vector<256x128xbf16>
    %c4_41 = arith.constant 4 : index
    %c0_42 = arith.constant 0 : index
    %c0_43 = arith.constant 0 : index
    %42 = vector.load %arg4[%c4_41, %c0_42, %c0_43] : memref<25x128x128xbf16, #tpu.memory_space<vmem>>, vector<1x128x128xbf16>
    %43 = vector.shape_cast %42 : vector<1x128x128xbf16> to vector<128x128xbf16>
    %cst_44 = arith.constant dense<0.000000e+00> : vector<256x128xf32>
    %44 = tpu.matmul %41, %43, %cst_44 {dimension_numbers = #tpu.dot_dimension_numbers<[1], [0], [0], [1], [0, 0, 1, 1], [], []>} : vector<256x128xbf16>, vector<128x128xbf16>, vector<256x128xf32> -> vector<256x128xf32>
    %45 = arith.addf %40, %44 : vector<256x128xf32>
    %c32 = arith.constant 32 : index
    %c0_45 = arith.constant 0 : index
    %46 = vector.load %arg13[%c32, %c0_45] : memref<768x128xbf16, #tpu.memory_space<vmem>>, vector<256x128xbf16>
    %c5 = arith.constant 5 : index
    %c0_46 = arith.constant 0 : index
    %c0_47 = arith.constant 0 : index
    %47 = vector.load %arg4[%c5, %c0_46, %c0_47] : memref<25x128x128xbf16, #tpu.memory_space<vmem>>, vector<1x128x128xbf16>
    %48 = vector.shape_cast %47 : vector<1x128x128xbf16> to vector<128x128xbf16>
    %cst_48 = arith.constant dense<0.000000e+00> : vector<256x128xf32>
    %49 = tpu.matmul %46, %48, %cst_48 {dimension_numbers = #tpu.dot_dimension_numbers<[1], [0], [0], [1], [0, 0, 1, 1], [], []>} : vector<256x128xbf16>, vector<128x128xbf16>, vector<256x128xf32> -> vector<256x128xf32>
    %50 = arith.addf %45, %49 : vector<256x128xf32>
    %c34 = arith.constant 34 : index
    %c0_49 = arith.constant 0 : index
    %51 = vector.load %arg13[%c34, %c0_49] : memref<768x128xbf16, #tpu.memory_space<vmem>>, vector<256x128xbf16>
    %c6_50 = arith.constant 6 : index
    %c0_51 = arith.constant 0 : index
    %c0_52 = arith.constant 0 : index
    %52 = vector.load %arg4[%c6_50, %c0_51, %c0_52] : memref<25x128x128xbf16, #tpu.memory_space<vmem>>, vector<1x128x128xbf16>
    %53 = vector.shape_cast %52 : vector<1x128x128xbf16> to vector<128x128xbf16>
    %cst_53 = arith.constant dense<0.000000e+00> : vector<256x128xf32>
    %54 = tpu.matmul %51, %53, %cst_53 {dimension_numbers = #tpu.dot_dimension_numbers<[1], [0], [0], [1], [0, 0, 1, 1], [], []>} : vector<256x128xbf16>, vector<128x128xbf16>, vector<256x128xf32> -> vector<256x128xf32>
    %55 = arith.addf %50, %54 : vector<256x128xf32>
    %c36 = arith.constant 36 : index
    %c0_54 = arith.constant 0 : index
    %56 = vector.load %arg13[%c36, %c0_54] : memref<768x128xbf16, #tpu.memory_space<vmem>>, vector<256x128xbf16>
    %c7 = arith.constant 7 : index
    %c0_55 = arith.constant 0 : index
    %c0_56 = arith.constant 0 : index
    %57 = vector.load %arg4[%c7, %c0_55, %c0_56] : memref<25x128x128xbf16, #tpu.memory_space<vmem>>, vector<1x128x128xbf16>
    %58 = vector.shape_cast %57 : vector<1x128x128xbf16> to vector<128x128xbf16>
    %cst_57 = arith.constant dense<0.000000e+00> : vector<256x128xf32>
    %59 = tpu.matmul %56, %58, %cst_57 {dimension_numbers = #tpu.dot_dimension_numbers<[1], [0], [0], [1], [0, 0, 1, 1], [], []>} : vector<256x128xbf16>, vector<128x128xbf16>, vector<256x128xf32> -> vector<256x128xf32>
    %60 = arith.addf %55, %59 : vector<256x128xf32>
    %c38 = arith.constant 38 : index
    %c0_58 = arith.constant 0 : index
    %61 = vector.load %arg13[%c38, %c0_58] : memref<768x128xbf16, #tpu.memory_space<vmem>>, vector<256x128xbf16>
    %c8_59 = arith.constant 8 : index
    %c0_60 = arith.constant 0 : index
    %c0_61 = arith.constant 0 : index
    %62 = vector.load %arg4[%c8_59, %c0_60, %c0_61] : memref<25x128x128xbf16, #tpu.memory_space<vmem>>, vector<1x128x128xbf16>
    %63 = vector.shape_cast %62 : vector<1x128x128xbf16> to vector<128x128xbf16>
    %cst_62 = arith.constant dense<0.000000e+00> : vector<256x128xf32>
    %64 = tpu.matmul %61, %63, %cst_62 {dimension_numbers = #tpu.dot_dimension_numbers<[1], [0], [0], [1], [0, 0, 1, 1], [], []>} : vector<256x128xbf16>, vector<128x128xbf16>, vector<256x128xf32> -> vector<256x128xf32>
    %65 = arith.addf %60, %64 : vector<256x128xf32>
    %c40 = arith.constant 40 : index
    %c0_63 = arith.constant 0 : index
    %66 = vector.load %arg13[%c40, %c0_63] : memref<768x128xbf16, #tpu.memory_space<vmem>>, vector<256x128xbf16>
    %c9 = arith.constant 9 : index
    %c0_64 = arith.constant 0 : index
    %c0_65 = arith.constant 0 : index
    %67 = vector.load %arg4[%c9, %c0_64, %c0_65] : memref<25x128x128xbf16, #tpu.memory_space<vmem>>, vector<1x128x128xbf16>
    %68 = vector.shape_cast %67 : vector<1x128x128xbf16> to vector<128x128xbf16>
    %cst_66 = arith.constant dense<0.000000e+00> : vector<256x128xf32>
    %69 = tpu.matmul %66, %68, %cst_66 {dimension_numbers = #tpu.dot_dimension_numbers<[1], [0], [0], [1], [0, 0, 1, 1], [], []>} : vector<256x128xbf16>, vector<128x128xbf16>, vector<256x128xf32> -> vector<256x128xf32>
    %70 = arith.addf %65, %69 : vector<256x128xf32>
    %c64 = arith.constant 64 : index
    %c0_67 = arith.constant 0 : index
    %71 = vector.load %arg13[%c64, %c0_67] : memref<768x128xbf16, #tpu.memory_space<vmem>>, vector<256x128xbf16>
    %c10 = arith.constant 10 : index
    %c0_68 = arith.constant 0 : index
    %c0_69 = arith.constant 0 : index
    %72 = vector.load %arg4[%c10, %c0_68, %c0_69] : memref<25x128x128xbf16, #tpu.memory_space<vmem>>, vector<1x128x128xbf16>
    %73 = vector.shape_cast %72 : vector<1x128x128xbf16> to vector<128x128xbf16>
    %cst_70 = arith.constant dense<0.000000e+00> : vector<256x128xf32>
    %74 = tpu.matmul %71, %73, %cst_70 {dimension_numbers = #tpu.dot_dimension_numbers<[1], [0], [0], [1], [0, 0, 1, 1], [], []>} : vector<256x128xbf16>, vector<128x128xbf16>, vector<256x128xf32> -> vector<256x128xf32>
    %75 = arith.addf %70, %74 : vector<256x128xf32>
    %c66 = arith.constant 66 : index
    %c0_71 = arith.constant 0 : index
    %76 = vector.load %arg13[%c66, %c0_71] : memref<768x128xbf16, #tpu.memory_space<vmem>>, vector<256x128xbf16>
    %c11 = arith.constant 11 : index
    %c0_72 = arith.constant 0 : index
    %c0_73 = arith.constant 0 : index
    %77 = vector.load %arg4[%c11, %c0_72, %c0_73] : memref<25x128x128xbf16, #tpu.memory_space<vmem>>, vector<1x128x128xbf16>
    %78 = vector.shape_cast %77 : vector<1x128x128xbf16> to vector<128x128xbf16>
    %cst_74 = arith.constant dense<0.000000e+00> : vector<256x128xf32>
    %79 = tpu.matmul %76, %78, %cst_74 {dimension_numbers = #tpu.dot_dimension_numbers<[1], [0], [0], [1], [0, 0, 1, 1], [], []>} : vector<256x128xbf16>, vector<128x128xbf16>, vector<256x128xf32> -> vector<256x128xf32>
    %80 = arith.addf %75, %79 : vector<256x128xf32>
    %c68 = arith.constant 68 : index
    %c0_75 = arith.constant 0 : index
    %81 = vector.load %arg13[%c68, %c0_75] : memref<768x128xbf16, #tpu.memory_space<vmem>>, vector<256x128xbf16>
    %c12 = arith.constant 12 : index
    %c0_76 = arith.constant 0 : index
    %c0_77 = arith.constant 0 : index
    %82 = vector.load %arg4[%c12, %c0_76, %c0_77] : memref<25x128x128xbf16, #tpu.memory_space<vmem>>, vector<1x128x128xbf16>
    %83 = vector.shape_cast %82 : vector<1x128x128xbf16> to vector<128x128xbf16>
    %cst_78 = arith.constant dense<0.000000e+00> : vector<256x128xf32>
    %84 = tpu.matmul %81, %83, %cst_78 {dimension_numbers = #tpu.dot_dimension_numbers<[1], [0], [0], [1], [0, 0, 1, 1], [], []>} : vector<256x128xbf16>, vector<128x128xbf16>, vector<256x128xf32> -> vector<256x128xf32>
    %85 = arith.addf %80, %84 : vector<256x128xf32>
    %c70 = arith.constant 70 : index
    %c0_79 = arith.constant 0 : index
    %86 = vector.load %arg13[%c70, %c0_79] : memref<768x128xbf16, #tpu.memory_space<vmem>>, vector<256x128xbf16>
    %c13 = arith.constant 13 : index
    %c0_80 = arith.constant 0 : index
    %c0_81 = arith.constant 0 : index
    %87 = vector.load %arg4[%c13, %c0_80, %c0_81] : memref<25x128x128xbf16, #tpu.memory_space<vmem>>, vector<1x128x128xbf16>
    %88 = vector.shape_cast %87 : vector<1x128x128xbf16> to vector<128x128xbf16>
    %cst_82 = arith.constant dense<0.000000e+00> : vector<256x128xf32>
    %89 = tpu.matmul %86, %88, %cst_82 {dimension_numbers = #tpu.dot_dimension_numbers<[1], [0], [0], [1], [0, 0, 1, 1], [], []>} : vector<256x128xbf16>, vector<128x128xbf16>, vector<256x128xf32> -> vector<256x128xf32>
    %90 = arith.addf %85, %89 : vector<256x128xf32>
    %c72 = arith.constant 72 : index
    %c0_83 = arith.constant 0 : index
    %91 = vector.load %arg13[%c72, %c0_83] : memref<768x128xbf16, #tpu.memory_space<vmem>>, vector<256x128xbf16>
    %c14 = arith.constant 14 : index
    %c0_84 = arith.constant 0 : index
    %c0_85 = arith.constant 0 : index
    %92 = vector.load %arg4[%c14, %c0_84, %c0_85] : memref<25x128x128xbf16, #tpu.memory_space<vmem>>, vector<1x128x128xbf16>
    %93 = vector.shape_cast %92 : vector<1x128x128xbf16> to vector<128x128xbf16>
    %cst_86 = arith.constant dense<0.000000e+00> : vector<256x128xf32>
    %94 = tpu.matmul %91, %93, %cst_86 {dimension_numbers = #tpu.dot_dimension_numbers<[1], [0], [0], [1], [0, 0, 1, 1], [], []>} : vector<256x128xbf16>, vector<128x128xbf16>, vector<256x128xf32> -> vector<256x128xf32>
    %95 = arith.addf %90, %94 : vector<256x128xf32>
    %c96 = arith.constant 96 : index
    %c0_87 = arith.constant 0 : index
    %96 = vector.load %arg13[%c96, %c0_87] : memref<768x128xbf16, #tpu.memory_space<vmem>>, vector<256x128xbf16>
    %c15 = arith.constant 15 : index
    %c0_88 = arith.constant 0 : index
    %c0_89 = arith.constant 0 : index
    %97 = vector.load %arg4[%c15, %c0_88, %c0_89] : memref<25x128x128xbf16, #tpu.memory_space<vmem>>, vector<1x128x128xbf16>
    %98 = vector.shape_cast %97 : vector<1x128x128xbf16> to vector<128x128xbf16>
    %cst_90 = arith.constant dense<0.000000e+00> : vector<256x128xf32>
    %99 = tpu.matmul %96, %98, %cst_90 {dimension_numbers = #tpu.dot_dimension_numbers<[1], [0], [0], [1], [0, 0, 1, 1], [], []>} : vector<256x128xbf16>, vector<128x128xbf16>, vector<256x128xf32> -> vector<256x128xf32>
    %100 = arith.addf %95, %99 : vector<256x128xf32>
    %c98 = arith.constant 98 : index
    %c0_91 = arith.constant 0 : index
    %101 = vector.load %arg13[%c98, %c0_91] : memref<768x128xbf16, #tpu.memory_space<vmem>>, vector<256x128xbf16>
    %c16_92 = arith.constant 16 : index
    %c0_93 = arith.constant 0 : index
    %c0_94 = arith.constant 0 : index
    %102 = vector.load %arg4[%c16_92, %c0_93, %c0_94] : memref<25x128x128xbf16, #tpu.memory_space<vmem>>, vector<1x128x128xbf16>
    %103 = vector.shape_cast %102 : vector<1x128x128xbf16> to vector<128x128xbf16>
    %cst_95 = arith.constant dense<0.000000e+00> : vector<256x128xf32>
    %104 = tpu.matmul %101, %103, %cst_95 {dimension_numbers = #tpu.dot_dimension_numbers<[1], [0], [0], [1], [0, 0, 1, 1], [], []>} : vector<256x128xbf16>, vector<128x128xbf16>, vector<256x128xf32> -> vector<256x128xf32>
    %105 = arith.addf %100, %104 : vector<256x128xf32>
    %c100 = arith.constant 100 : index
    %c0_96 = arith.constant 0 : index
    %106 = vector.load %arg13[%c100, %c0_96] : memref<768x128xbf16, #tpu.memory_space<vmem>>, vector<256x128xbf16>
    %c17_97 = arith.constant 17 : index
    %c0_98 = arith.constant 0 : index
    %c0_99 = arith.constant 0 : index
    %107 = vector.load %arg4[%c17_97, %c0_98, %c0_99] : memref<25x128x128xbf16, #tpu.memory_space<vmem>>, vector<1x128x128xbf16>
    %108 = vector.shape_cast %107 : vector<1x128x128xbf16> to vector<128x128xbf16>
    %cst_100 = arith.constant dense<0.000000e+00> : vector<256x128xf32>
    %109 = tpu.matmul %106, %108, %cst_100 {dimension_numbers = #tpu.dot_dimension_numbers<[1], [0], [0], [1], [0, 0, 1, 1], [], []>} : vector<256x128xbf16>, vector<128x128xbf16>, vector<256x128xf32> -> vector<256x128xf32>
    %110 = arith.addf %105, %109 : vector<256x128xf32>
    %c102 = arith.constant 102 : index
    %c0_101 = arith.constant 0 : index
    %111 = vector.load %arg13[%c102, %c0_101] : memref<768x128xbf16, #tpu.memory_space<vmem>>, vector<256x128xbf16>
    %c18 = arith.constant 18 : index
    %c0_102 = arith.constant 0 : index
    %c0_103 = arith.constant 0 : index
    %112 = vector.load %arg4[%c18, %c0_102, %c0_103] : memref<25x128x128xbf16, #tpu.memory_space<vmem>>, vector<1x128x128xbf16>
    %113 = vector.shape_cast %112 : vector<1x128x128xbf16> to vector<128x128xbf16>
    %cst_104 = arith.constant dense<0.000000e+00> : vector<256x128xf32>
    %114 = tpu.matmul %111, %113, %cst_104 {dimension_numbers = #tpu.dot_dimension_numbers<[1], [0], [0], [1], [0, 0, 1, 1], [], []>} : vector<256x128xbf16>, vector<128x128xbf16>, vector<256x128xf32> -> vector<256x128xf32>
    %115 = arith.addf %110, %114 : vector<256x128xf32>
    %c104 = arith.constant 104 : index
    %c0_105 = arith.constant 0 : index
    %116 = vector.load %arg13[%c104, %c0_105] : memref<768x128xbf16, #tpu.memory_space<vmem>>, vector<256x128xbf16>
    %c19 = arith.constant 19 : index
    %c0_106 = arith.constant 0 : index
    %c0_107 = arith.constant 0 : index
    %117 = vector.load %arg4[%c19, %c0_106, %c0_107] : memref<25x128x128xbf16, #tpu.memory_space<vmem>>, vector<1x128x128xbf16>
    %118 = vector.shape_cast %117 : vector<1x128x128xbf16> to vector<128x128xbf16>
    %cst_108 = arith.constant dense<0.000000e+00> : vector<256x128xf32>
    %119 = tpu.matmul %116, %118, %cst_108 {dimension_numbers = #tpu.dot_dimension_numbers<[1], [0], [0], [1], [0, 0, 1, 1], [], []>} : vector<256x128xbf16>, vector<128x128xbf16>, vector<256x128xf32> -> vector<256x128xf32>
    %120 = arith.addf %115, %119 : vector<256x128xf32>
    %c128 = arith.constant 128 : index
    %c0_109 = arith.constant 0 : index
    %121 = vector.load %arg13[%c128, %c0_109] : memref<768x128xbf16, #tpu.memory_space<vmem>>, vector<256x128xbf16>
    %c20 = arith.constant 20 : index
    %c0_110 = arith.constant 0 : index
    %c0_111 = arith.constant 0 : index
    %122 = vector.load %arg4[%c20, %c0_110, %c0_111] : memref<25x128x128xbf16, #tpu.memory_space<vmem>>, vector<1x128x128xbf16>
    %123 = vector.shape_cast %122 : vector<1x128x128xbf16> to vector<128x128xbf16>
    %cst_112 = arith.constant dense<0.000000e+00> : vector<256x128xf32>
    %124 = tpu.matmul %121, %123, %cst_112 {dimension_numbers = #tpu.dot_dimension_numbers<[1], [0], [0], [1], [0, 0, 1, 1], [], []>} : vector<256x128xbf16>, vector<128x128xbf16>, vector<256x128xf32> -> vector<256x128xf32>
    %125 = arith.addf %120, %124 : vector<256x128xf32>
    %c130 = arith.constant 130 : index
    %c0_113 = arith.constant 0 : index
    %126 = vector.load %arg13[%c130, %c0_113] : memref<768x128xbf16, #tpu.memory_space<vmem>>, vector<256x128xbf16>
    %c21 = arith.constant 21 : index
    %c0_114 = arith.constant 0 : index
    %c0_115 = arith.constant 0 : index
    %127 = vector.load %arg4[%c21, %c0_114, %c0_115] : memref<25x128x128xbf16, #tpu.memory_space<vmem>>, vector<1x128x128xbf16>
    %128 = vector.shape_cast %127 : vector<1x128x128xbf16> to vector<128x128xbf16>
    %cst_116 = arith.constant dense<0.000000e+00> : vector<256x128xf32>
    %129 = tpu.matmul %126, %128, %cst_116 {dimension_numbers = #tpu.dot_dimension_numbers<[1], [0], [0], [1], [0, 0, 1, 1], [], []>} : vector<256x128xbf16>, vector<128x128xbf16>, vector<256x128xf32> -> vector<256x128xf32>
    %130 = arith.addf %125, %129 : vector<256x128xf32>
    %c132 = arith.constant 132 : index
    %c0_117 = arith.constant 0 : index
    %131 = vector.load %arg13[%c132, %c0_117] : memref<768x128xbf16, #tpu.memory_space<vmem>>, vector<256x128xbf16>
    %c22 = arith.constant 22 : index
    %c0_118 = arith.constant 0 : index
    %c0_119 = arith.constant 0 : index
    %132 = vector.load %arg4[%c22, %c0_118, %c0_119] : memref<25x128x128xbf16, #tpu.memory_space<vmem>>, vector<1x128x128xbf16>
    %133 = vector.shape_cast %132 : vector<1x128x128xbf16> to vector<128x128xbf16>
    %cst_120 = arith.constant dense<0.000000e+00> : vector<256x128xf32>
    %134 = tpu.matmul %131, %133, %cst_120 {dimension_numbers = #tpu.dot_dimension_numbers<[1], [0], [0], [1], [0, 0, 1, 1], [], []>} : vector<256x128xbf16>, vector<128x128xbf16>, vector<256x128xf32> -> vector<256x128xf32>
    %135 = arith.addf %130, %134 : vector<256x128xf32>
    %c134 = arith.constant 134 : index
    %c0_121 = arith.constant 0 : index
    %136 = vector.load %arg13[%c134, %c0_121] : memref<768x128xbf16, #tpu.memory_space<vmem>>, vector<256x128xbf16>
    %c23 = arith.constant 23 : index
    %c0_122 = arith.constant 0 : index
    %c0_123 = arith.constant 0 : index
    %137 = vector.load %arg4[%c23, %c0_122, %c0_123] : memref<25x128x128xbf16, #tpu.memory_space<vmem>>, vector<1x128x128xbf16>
    %138 = vector.shape_cast %137 : vector<1x128x128xbf16> to vector<128x128xbf16>
    %cst_124 = arith.constant dense<0.000000e+00> : vector<256x128xf32>
    %139 = tpu.matmul %136, %138, %cst_124 {dimension_numbers = #tpu.dot_dimension_numbers<[1], [0], [0], [1], [0, 0, 1, 1], [], []>} : vector<256x128xbf16>, vector<128x128xbf16>, vector<256x128xf32> -> vector<256x128xf32>
    %140 = arith.addf %135, %139 : vector<256x128xf32>
    %c136 = arith.constant 136 : index
    %c0_125 = arith.constant 0 : index
    %141 = vector.load %arg13[%c136, %c0_125] : memref<768x128xbf16, #tpu.memory_space<vmem>>, vector<256x128xbf16>
    %c24 = arith.constant 24 : index
    %c0_126 = arith.constant 0 : index
    %c0_127 = arith.constant 0 : index
    %142 = vector.load %arg4[%c24, %c0_126, %c0_127] : memref<25x128x128xbf16, #tpu.memory_space<vmem>>, vector<1x128x128xbf16>
    %143 = vector.shape_cast %142 : vector<1x128x128xbf16> to vector<128x128xbf16>
    %cst_128 = arith.constant dense<0.000000e+00> : vector<256x128xf32>
    %144 = tpu.matmul %141, %143, %cst_128 {dimension_numbers = #tpu.dot_dimension_numbers<[1], [0], [0], [1], [0, 0, 1, 1], [], []>} : vector<256x128xbf16>, vector<128x128xbf16>, vector<256x128xf32> -> vector<256x128xf32>
    %145 = arith.addf %140, %144 : vector<256x128xf32>
    %c0_129 = arith.constant 0 : index
    %c0_130 = arith.constant 0 : index
    %146 = vector.load %arg5[%c0_129, %c0_130] : memref<1x128xf32, #tpu.memory_space<vmem>>, vector<1x128xf32>
    %147 = vector.broadcast %146 : vector<1x128xf32> to vector<256x128xf32>
    %148 = arith.addf %145, %147 : vector<256x128xf32>
    %cst_131 = arith.constant 0.000000e+00 : f32
    %149 = vector.broadcast %cst_131 : f32 to vector<256x128xf32>
    %150 = arith.maximumf %148, %149 : vector<256x128xf32>
    %151 = arith.truncf %150 : vector<256x128xf32> to vector<256x128xbf16>
    %c0_132 = arith.constant 0 : index
    %c0_133 = arith.constant 0 : index
    %152 = vector.load %arg12[%c0_132, %c0_133] : memref<768x128xbf16, #tpu.memory_space<vmem>>, vector<256x128xbf16>
    tpu.vector_store %arg12[%c0_132, %c0_133], %151 {strides = array<i32>} : memref<768x128xbf16, #tpu.memory_space<vmem>>, vector<256x128xbf16>,
    %c256 = arith.constant 256 : index
    %c0_134 = arith.constant 0 : index
    %153 = vector.load %arg13[%c256, %c0_134] : memref<768x128xbf16, #tpu.memory_space<vmem>>, vector<256x128xbf16>
    %c0_135 = arith.constant 0 : index
    %c0_136 = arith.constant 0 : index
    %c0_137 = arith.constant 0 : index
    %154 = vector.load %arg4[%c0_135, %c0_136, %c0_137] : memref<25x128x128xbf16, #tpu.memory_space<vmem>>, vector<1x128x128xbf16>
    %155 = vector.shape_cast %154 : vector<1x128x128xbf16> to vector<128x128xbf16>
    %cst_138 = arith.constant dense<0.000000e+00> : vector<256x128xf32>
    %156 = tpu.matmul %153, %155, %cst_138 {dimension_numbers = #tpu.dot_dimension_numbers<[1], [0], [0], [1], [0, 0, 1, 1], [], []>} : vector<256x128xbf16>, vector<128x128xbf16>, vector<256x128xf32> -> vector<256x128xf32>
    %c258 = arith.constant 258 : index
    %c0_139 = arith.constant 0 : index
    %157 = vector.load %arg13[%c258, %c0_139] : memref<768x128xbf16, #tpu.memory_space<vmem>>, vector<256x128xbf16>
    %c1_140 = arith.constant 1 : index
    %c0_141 = arith.constant 0 : index
    %c0_142 = arith.constant 0 : index
    %158 = vector.load %arg4[%c1_140, %c0_141, %c0_142] : memref<25x128x128xbf16, #tpu.memory_space<vmem>>, vector<1x128x128xbf16>
    %159 = vector.shape_cast %158 : vector<1x128x128xbf16> to vector<128x128xbf16>
    %cst_143 = arith.constant dense<0.000000e+00> : vector<256x128xf32>
    %160 = tpu.matmul %157, %159, %cst_143 {dimension_numbers = #tpu.dot_dimension_numbers<[1], [0], [0], [1], [0, 0, 1, 1], [], []>} : vector<256x128xbf16>, vector<128x128xbf16>, vector<256x128xf32> -> vector<256x128xf32>
    %161 = arith.addf %156, %160 : vector<256x128xf32>
    %c260 = arith.constant 260 : index
    %c0_144 = arith.constant 0 : index
    %162 = vector.load %arg13[%c260, %c0_144] : memref<768x128xbf16, #tpu.memory_space<vmem>>, vector<256x128xbf16>
    %c2_145 = arith.constant 2 : index
    %c0_146 = arith.constant 0 : index
    %c0_147 = arith.constant 0 : index
    %163 = vector.load %arg4[%c2_145, %c0_146, %c0_147] : memref<25x128x128xbf16, #tpu.memory_space<vmem>>, vector<1x128x128xbf16>
    %164 = vector.shape_cast %163 : vector<1x128x128xbf16> to vector<128x128xbf16>
    %cst_148 = arith.constant dense<0.000000e+00> : vector<256x128xf32>
    %165 = tpu.matmul %162, %164, %cst_148 {dimension_numbers = #tpu.dot_dimension_numbers<[1], [0], [0], [1], [0, 0, 1, 1], [], []>} : vector<256x128xbf16>, vector<128x128xbf16>, vector<256x128xf32> -> vector<256x128xf32>
    %166 = arith.addf %161, %165 : vector<256x128xf32>
    %c262 = arith.constant 262 : index
    %c0_149 = arith.constant 0 : index
    %167 = vector.load %arg13[%c262, %c0_149] : memref<768x128xbf16, #tpu.memory_space<vmem>>, vector<256x128xbf16>
    %c3_150 = arith.constant 3 : index
    %c0_151 = arith.constant 0 : index
    %c0_152 = arith.constant 0 : index
    %168 = vector.load %arg4[%c3_150, %c0_151, %c0_152] : memref<25x128x128xbf16, #tpu.memory_space<vmem>>, vector<1x128x128xbf16>
    %169 = vector.shape_cast %168 : vector<1x128x128xbf16> to vector<128x128xbf16>
    %cst_153 = arith.constant dense<0.000000e+00> : vector<256x128xf32>
    %170 = tpu.matmul %167, %169, %cst_153 {dimension_numbers = #tpu.dot_dimension_numbers<[1], [0], [0], [1], [0, 0, 1, 1], [], []>} : vector<256x128xbf16>, vector<128x128xbf16>, vector<256x128xf32> -> vector<256x128xf32>
    %171 = arith.addf %166, %170 : vector<256x128xf32>
    %c264 = arith.constant 264 : index
    %c0_154 = arith.constant 0 : index
    %172 = vector.load %arg13[%c264, %c0_154] : memref<768x128xbf16, #tpu.memory_space<vmem>>, vector<256x128xbf16>
    %c4_155 = arith.constant 4 : index
    %c0_156 = arith.constant 0 : index
    %c0_157 = arith.constant 0 : index
    %173 = vector.load %arg4[%c4_155, %c0_156, %c0_157] : memref<25x128x128xbf16, #tpu.memory_space<vmem>>, vector<1x128x128xbf16>
    %174 = vector.shape_cast %173 : vector<1x128x128xbf16> to vector<128x128xbf16>
    %cst_158 = arith.constant dense<0.000000e+00> : vector<256x128xf32>
    %175 = tpu.matmul %172, %174, %cst_158 {dimension_numbers = #tpu.dot_dimension_numbers<[1], [0], [0], [1], [0, 0, 1, 1], [], []>} : vector<256x128xbf16>, vector<128x128xbf16>, vector<256x128xf32> -> vector<256x128xf32>
    %176 = arith.addf %171, %175 : vector<256x128xf32>
    %c288 = arith.constant 288 : index
    %c0_159 = arith.constant 0 : index
    %177 = vector.load %arg13[%c288, %c0_159] : memref<768x128xbf16, #tpu.memory_space<vmem>>, vector<256x128xbf16>
    %c5_160 = arith.constant 5 : index
    %c0_161 = arith.constant 0 : index
    %c0_162 = arith.constant 0 : index
    %178 = vector.load %arg4[%c5_160, %c0_161, %c0_162] : memref<25x128x128xbf16, #tpu.memory_space<vmem>>, vector<1x128x128xbf16>
    %179 = vector.shape_cast %178 : vector<1x128x128xbf16> to vector<128x128xbf16>
    %cst_163 = arith.constant dense<0.000000e+00> : vector<256x128xf32>
    %180 = tpu.matmul %177, %179, %cst_163 {dimension_numbers = #tpu.dot_dimension_numbers<[1], [0], [0], [1], [0, 0, 1, 1], [], []>} : vector<256x128xbf16>, vector<128x128xbf16>, vector<256x128xf32> -> vector<256x128xf32>
    %181 = arith.addf %176, %180 : vector<256x128xf32>
    %c290 = arith.constant 290 : index
    %c0_164 = arith.constant 0 : index
    %182 = vector.load %arg13[%c290, %c0_164] : memref<768x128xbf16, #tpu.memory_space<vmem>>, vector<256x128xbf16>
    %c6_165 = arith.constant 6 : index
    %c0_166 = arith.constant 0 : index
    %c0_167 = arith.constant 0 : index
    %183 = vector.load %arg4[%c6_165, %c0_166, %c0_167] : memref<25x128x128xbf16, #tpu.memory_space<vmem>>, vector<1x128x128xbf16>
    %184 = vector.shape_cast %183 : vector<1x128x128xbf16> to vector<128x128xbf16>
    %cst_168 = arith.constant dense<0.000000e+00> : vector<256x128xf32>
    %185 = tpu.matmul %182, %184, %cst_168 {dimension_numbers = #tpu.dot_dimension_numbers<[1], [0], [0], [1], [0, 0, 1, 1], [], []>} : vector<256x128xbf16>, vector<128x128xbf16>, vector<256x128xf32> -> vector<256x128xf32>
    %186 = arith.addf %181, %185 : vector<256x128xf32>
    %c292 = arith.constant 292 : index
    %c0_169 = arith.constant 0 : index
    %187 = vector.load %arg13[%c292, %c0_169] : memref<768x128xbf16, #tpu.memory_space<vmem>>, vector<256x128xbf16>
    %c7_170 = arith.constant 7 : index
    %c0_171 = arith.constant 0 : index
    %c0_172 = arith.constant 0 : index
    %188 = vector.load %arg4[%c7_170, %c0_171, %c0_172] : memref<25x128x128xbf16, #tpu.memory_space<vmem>>, vector<1x128x128xbf16>
    %189 = vector.shape_cast %188 : vector<1x128x128xbf16> to vector<128x128xbf16>
    %cst_173 = arith.constant dense<0.000000e+00> : vector<256x128xf32>
    %190 = tpu.matmul %187, %189, %cst_173 {dimension_numbers = #tpu.dot_dimension_numbers<[1], [0], [0], [1], [0, 0, 1, 1], [], []>} : vector<256x128xbf16>, vector<128x128xbf16>, vector<256x128xf32> -> vector<256x128xf32>
    %191 = arith.addf %186, %190 : vector<256x128xf32>
    %c294 = arith.constant 294 : index
    %c0_174 = arith.constant 0 : index
    %192 = vector.load %arg13[%c294, %c0_174] : memref<768x128xbf16, #tpu.memory_space<vmem>>, vector<256x128xbf16>
    %c8_175 = arith.constant 8 : index
    %c0_176 = arith.constant 0 : index
    %c0_177 = arith.constant 0 : index
    %193 = vector.load %arg4[%c8_175, %c0_176, %c0_177] : memref<25x128x128xbf16, #tpu.memory_space<vmem>>, vector<1x128x128xbf16>
    %194 = vector.shape_cast %193 : vector<1x128x128xbf16> to vector<128x128xbf16>
    %cst_178 = arith.constant dense<0.000000e+00> : vector<256x128xf32>
    %195 = tpu.matmul %192, %194, %cst_178 {dimension_numbers = #tpu.dot_dimension_numbers<[1], [0], [0], [1], [0, 0, 1, 1], [], []>} : vector<256x128xbf16>, vector<128x128xbf16>, vector<256x128xf32> -> vector<256x128xf32>
    %196 = arith.addf %191, %195 : vector<256x128xf32>
    %c296 = arith.constant 296 : index
    %c0_179 = arith.constant 0 : index
    %197 = vector.load %arg13[%c296, %c0_179] : memref<768x128xbf16, #tpu.memory_space<vmem>>, vector<256x128xbf16>
    %c9_180 = arith.constant 9 : index
    %c0_181 = arith.constant 0 : index
    %c0_182 = arith.constant 0 : index
    %198 = vector.load %arg4[%c9_180, %c0_181, %c0_182] : memref<25x128x128xbf16, #tpu.memory_space<vmem>>, vector<1x128x128xbf16>
    %199 = vector.shape_cast %198 : vector<1x128x128xbf16> to vector<128x128xbf16>
    %cst_183 = arith.constant dense<0.000000e+00> : vector<256x128xf32>
    %200 = tpu.matmul %197, %199, %cst_183 {dimension_numbers = #tpu.dot_dimension_numbers<[1], [0], [0], [1], [0, 0, 1, 1], [], []>} : vector<256x128xbf16>, vector<128x128xbf16>, vector<256x128xf32> -> vector<256x128xf32>
    %201 = arith.addf %196, %200 : vector<256x128xf32>
    %c320 = arith.constant 320 : index
    %c0_184 = arith.constant 0 : index
    %202 = vector.load %arg13[%c320, %c0_184] : memref<768x128xbf16, #tpu.memory_space<vmem>>, vector<256x128xbf16>
    %c10_185 = arith.constant 10 : index
    %c0_186 = arith.constant 0 : index
    %c0_187 = arith.constant 0 : index
    %203 = vector.load %arg4[%c10_185, %c0_186, %c0_187] : memref<25x128x128xbf16, #tpu.memory_space<vmem>>, vector<1x128x128xbf16>
    %204 = vector.shape_cast %203 : vector<1x128x128xbf16> to vector<128x128xbf16>
    %cst_188 = arith.constant dense<0.000000e+00> : vector<256x128xf32>
    %205 = tpu.matmul %202, %204, %cst_188 {dimension_numbers = #tpu.dot_dimension_numbers<[1], [0], [0], [1], [0, 0, 1, 1], [], []>} : vector<256x128xbf16>, vector<128x128xbf16>, vector<256x128xf32> -> vector<256x128xf32>
    %206 = arith.addf %201, %205 : vector<256x128xf32>
    %c322 = arith.constant 322 : index
    %c0_189 = arith.constant 0 : index
    %207 = vector.load %arg13[%c322, %c0_189] : memref<768x128xbf16, #tpu.memory_space<vmem>>, vector<256x128xbf16>
    %c11_190 = arith.constant 11 : index
    %c0_191 = arith.constant 0 : index
    %c0_192 = arith.constant 0 : index
    %208 = vector.load %arg4[%c11_190, %c0_191, %c0_192] : memref<25x128x128xbf16, #tpu.memory_space<vmem>>, vector<1x128x128xbf16>
    %209 = vector.shape_cast %208 : vector<1x128x128xbf16> to vector<128x128xbf16>
    %cst_193 = arith.constant dense<0.000000e+00> : vector<256x128xf32>
    %210 = tpu.matmul %207, %209, %cst_193 {dimension_numbers = #tpu.dot_dimension_numbers<[1], [0], [0], [1], [0, 0, 1, 1], [], []>} : vector<256x128xbf16>, vector<128x128xbf16>, vector<256x128xf32> -> vector<256x128xf32>
    %211 = arith.addf %206, %210 : vector<256x128xf32>
    %c324 = arith.constant 324 : index
    %c0_194 = arith.constant 0 : index
    %212 = vector.load %arg13[%c324, %c0_194] : memref<768x128xbf16, #tpu.memory_space<vmem>>, vector<256x128xbf16>
    %c12_195 = arith.constant 12 : index
    %c0_196 = arith.constant 0 : index
    %c0_197 = arith.constant 0 : index
    %213 = vector.load %arg4[%c12_195, %c0_196, %c0_197] : memref<25x128x128xbf16, #tpu.memory_space<vmem>>, vector<1x128x128xbf16>
    %214 = vector.shape_cast %213 : vector<1x128x128xbf16> to vector<128x128xbf16>
    %cst_198 = arith.constant dense<0.000000e+00> : vector<256x128xf32>
    %215 = tpu.matmul %212, %214, %cst_198 {dimension_numbers = #tpu.dot_dimension_numbers<[1], [0], [0], [1], [0, 0, 1, 1], [], []>} : vector<256x128xbf16>, vector<128x128xbf16>, vector<256x128xf32> -> vector<256x128xf32>
    %216 = arith.addf %211, %215 : vector<256x128xf32>
    %c326 = arith.constant 326 : index
    %c0_199 = arith.constant 0 : index
    %217 = vector.load %arg13[%c326, %c0_199] : memref<768x128xbf16, #tpu.memory_space<vmem>>, vector<256x128xbf16>
    %c13_200 = arith.constant 13 : index
    %c0_201 = arith.constant 0 : index
    %c0_202 = arith.constant 0 : index
    %218 = vector.load %arg4[%c13_200, %c0_201, %c0_202] : memref<25x128x128xbf16, #tpu.memory_space<vmem>>, vector<1x128x128xbf16>
    %219 = vector.shape_cast %218 : vector<1x128x128xbf16> to vector<128x128xbf16>
    %cst_203 = arith.constant dense<0.000000e+00> : vector<256x128xf32>
    %220 = tpu.matmul %217, %219, %cst_203 {dimension_numbers = #tpu.dot_dimension_numbers<[1], [0], [0], [1], [0, 0, 1, 1], [], []>} : vector<256x128xbf16>, vector<128x128xbf16>, vector<256x128xf32> -> vector<256x128xf32>
    %221 = arith.addf %216, %220 : vector<256x128xf32>
    %c328 = arith.constant 328 : index
    %c0_204 = arith.constant 0 : index
    %222 = vector.load %arg13[%c328, %c0_204] : memref<768x128xbf16, #tpu.memory_space<vmem>>, vector<256x128xbf16>
    %c14_205 = arith.constant 14 : index
    %c0_206 = arith.constant 0 : index
    %c0_207 = arith.constant 0 : index
    %223 = vector.load %arg4[%c14_205, %c0_206, %c0_207] : memref<25x128x128xbf16, #tpu.memory_space<vmem>>, vector<1x128x128xbf16>
    %224 = vector.shape_cast %223 : vector<1x128x128xbf16> to vector<128x128xbf16>
    %cst_208 = arith.constant dense<0.000000e+00> : vector<256x128xf32>
    %225 = tpu.matmul %222, %224, %cst_208 {dimension_numbers = #tpu.dot_dimension_numbers<[1], [0], [0], [1], [0, 0, 1, 1], [], []>} : vector<256x128xbf16>, vector<128x128xbf16>, vector<256x128xf32> -> vector<256x128xf32>
    %226 = arith.addf %221, %225 : vector<256x128xf32>
    %c352 = arith.constant 352 : index
    %c0_209 = arith.constant 0 : index
    %227 = vector.load %arg13[%c352, %c0_209] : memref<768x128xbf16, #tpu.memory_space<vmem>>, vector<256x128xbf16>
    %c15_210 = arith.constant 15 : index
    %c0_211 = arith.constant 0 : index
    %c0_212 = arith.constant 0 : index
    %228 = vector.load %arg4[%c15_210, %c0_211, %c0_212] : memref<25x128x128xbf16, #tpu.memory_space<vmem>>, vector<1x128x128xbf16>
    %229 = vector.shape_cast %228 : vector<1x128x128xbf16> to vector<128x128xbf16>
    %cst_213 = arith.constant dense<0.000000e+00> : vector<256x128xf32>
    %230 = tpu.matmul %227, %229, %cst_213 {dimension_numbers = #tpu.dot_dimension_numbers<[1], [0], [0], [1], [0, 0, 1, 1], [], []>} : vector<256x128xbf16>, vector<128x128xbf16>, vector<256x128xf32> -> vector<256x128xf32>
    %231 = arith.addf %226, %230 : vector<256x128xf32>
    %c354 = arith.constant 354 : index
    %c0_214 = arith.constant 0 : index
    %232 = vector.load %arg13[%c354, %c0_214] : memref<768x128xbf16, #tpu.memory_space<vmem>>, vector<256x128xbf16>
    %c16_215 = arith.constant 16 : index
    %c0_216 = arith.constant 0 : index
    %c0_217 = arith.constant 0 : index
    %233 = vector.load %arg4[%c16_215, %c0_216, %c0_217] : memref<25x128x128xbf16, #tpu.memory_space<vmem>>, vector<1x128x128xbf16>
    %234 = vector.shape_cast %233 : vector<1x128x128xbf16> to vector<128x128xbf16>
    %cst_218 = arith.constant dense<0.000000e+00> : vector<256x128xf32>
    %235 = tpu.matmul %232, %234, %cst_218 {dimension_numbers = #tpu.dot_dimension_numbers<[1], [0], [0], [1], [0, 0, 1, 1], [], []>} : vector<256x128xbf16>, vector<128x128xbf16>, vector<256x128xf32> -> vector<256x128xf32>
    %236 = arith.addf %231, %235 : vector<256x128xf32>
    %c356 = arith.constant 356 : index
    %c0_219 = arith.constant 0 : index
    %237 = vector.load %arg13[%c356, %c0_219] : memref<768x128xbf16, #tpu.memory_space<vmem>>, vector<256x128xbf16>
    %c17_220 = arith.constant 17 : index
    %c0_221 = arith.constant 0 : index
    %c0_222 = arith.constant 0 : index
    %238 = vector.load %arg4[%c17_220, %c0_221, %c0_222] : memref<25x128x128xbf16, #tpu.memory_space<vmem>>, vector<1x128x128xbf16>
    %239 = vector.shape_cast %238 : vector<1x128x128xbf16> to vector<128x128xbf16>
    %cst_223 = arith.constant dense<0.000000e+00> : vector<256x128xf32>
    %240 = tpu.matmul %237, %239, %cst_223 {dimension_numbers = #tpu.dot_dimension_numbers<[1], [0], [0], [1], [0, 0, 1, 1], [], []>} : vector<256x128xbf16>, vector<128x128xbf16>, vector<256x128xf32> -> vector<256x128xf32>
    %241 = arith.addf %236, %240 : vector<256x128xf32>
    %c358 = arith.constant 358 : index
    %c0_224 = arith.constant 0 : index
    %242 = vector.load %arg13[%c358, %c0_224] : memref<768x128xbf16, #tpu.memory_space<vmem>>, vector<256x128xbf16>
    %c18_225 = arith.constant 18 : index
    %c0_226 = arith.constant 0 : index
    %c0_227 = arith.constant 0 : index
    %243 = vector.load %arg4[%c18_225, %c0_226, %c0_227] : memref<25x128x128xbf16, #tpu.memory_space<vmem>>, vector<1x128x128xbf16>
    %244 = vector.shape_cast %243 : vector<1x128x128xbf16> to vector<128x128xbf16>
    %cst_228 = arith.constant dense<0.000000e+00> : vector<256x128xf32>
    %245 = tpu.matmul %242, %244, %cst_228 {dimension_numbers = #tpu.dot_dimension_numbers<[1], [0], [0], [1], [0, 0, 1, 1], [], []>} : vector<256x128xbf16>, vector<128x128xbf16>, vector<256x128xf32> -> vector<256x128xf32>
    %246 = arith.addf %241, %245 : vector<256x128xf32>
    %c360 = arith.constant 360 : index
    %c0_229 = arith.constant 0 : index
    %247 = vector.load %arg13[%c360, %c0_229] : memref<768x128xbf16, #tpu.memory_space<vmem>>, vector<256x128xbf16>
    %c19_230 = arith.constant 19 : index
    %c0_231 = arith.constant 0 : index
    %c0_232 = arith.constant 0 : index
    %248 = vector.load %arg4[%c19_230, %c0_231, %c0_232] : memref<25x128x128xbf16, #tpu.memory_space<vmem>>, vector<1x128x128xbf16>
    %249 = vector.shape_cast %248 : vector<1x128x128xbf16> to vector<128x128xbf16>
    %cst_233 = arith.constant dense<0.000000e+00> : vector<256x128xf32>
    %250 = tpu.matmul %247, %249, %cst_233 {dimension_numbers = #tpu.dot_dimension_numbers<[1], [0], [0], [1], [0, 0, 1, 1], [], []>} : vector<256x128xbf16>, vector<128x128xbf16>, vector<256x128xf32> -> vector<256x128xf32>
    %251 = arith.addf %246, %250 : vector<256x128xf32>
    %c384 = arith.constant 384 : index
    %c0_234 = arith.constant 0 : index
    %252 = vector.load %arg13[%c384, %c0_234] : memref<768x128xbf16, #tpu.memory_space<vmem>>, vector<256x128xbf16>
    %c20_235 = arith.constant 20 : index
    %c0_236 = arith.constant 0 : index
    %c0_237 = arith.constant 0 : index
    %253 = vector.load %arg4[%c20_235, %c0_236, %c0_237] : memref<25x128x128xbf16, #tpu.memory_space<vmem>>, vector<1x128x128xbf16>
    %254 = vector.shape_cast %253 : vector<1x128x128xbf16> to vector<128x128xbf16>
    %cst_238 = arith.constant dense<0.000000e+00> : vector<256x128xf32>
    %255 = tpu.matmul %252, %254, %cst_238 {dimension_numbers = #tpu.dot_dimension_numbers<[1], [0], [0], [1], [0, 0, 1, 1], [], []>} : vector<256x128xbf16>, vector<128x128xbf16>, vector<256x128xf32> -> vector<256x128xf32>
    %256 = arith.addf %251, %255 : vector<256x128xf32>
    %c386 = arith.constant 386 : index
    %c0_239 = arith.constant 0 : index
    %257 = vector.load %arg13[%c386, %c0_239] : memref<768x128xbf16, #tpu.memory_space<vmem>>, vector<256x128xbf16>
    %c21_240 = arith.constant 21 : index
    %c0_241 = arith.constant 0 : index
    %c0_242 = arith.constant 0 : index
    %258 = vector.load %arg4[%c21_240, %c0_241, %c0_242] : memref<25x128x128xbf16, #tpu.memory_space<vmem>>, vector<1x128x128xbf16>
    %259 = vector.shape_cast %258 : vector<1x128x128xbf16> to vector<128x128xbf16>
    %cst_243 = arith.constant dense<0.000000e+00> : vector<256x128xf32>
    %260 = tpu.matmul %257, %259, %cst_243 {dimension_numbers = #tpu.dot_dimension_numbers<[1], [0], [0], [1], [0, 0, 1, 1], [], []>} : vector<256x128xbf16>, vector<128x128xbf16>, vector<256x128xf32> -> vector<256x128xf32>
    %261 = arith.addf %256, %260 : vector<256x128xf32>
    %c388 = arith.constant 388 : index
    %c0_244 = arith.constant 0 : index
    %262 = vector.load %arg13[%c388, %c0_244] : memref<768x128xbf16, #tpu.memory_space<vmem>>, vector<256x128xbf16>
    %c22_245 = arith.constant 22 : index
    %c0_246 = arith.constant 0 : index
    %c0_247 = arith.constant 0 : index
    %263 = vector.load %arg4[%c22_245, %c0_246, %c0_247] : memref<25x128x128xbf16, #tpu.memory_space<vmem>>, vector<1x128x128xbf16>
    %264 = vector.shape_cast %263 : vector<1x128x128xbf16> to vector<128x128xbf16>
    %cst_248 = arith.constant dense<0.000000e+00> : vector<256x128xf32>
    %265 = tpu.matmul %262, %264, %cst_248 {dimension_numbers = #tpu.dot_dimension_numbers<[1], [0], [0], [1], [0, 0, 1, 1], [], []>} : vector<256x128xbf16>, vector<128x128xbf16>, vector<256x128xf32> -> vector<256x128xf32>
    %266 = arith.addf %261, %265 : vector<256x128xf32>
    %c390 = arith.constant 390 : index
    %c0_249 = arith.constant 0 : index
    %267 = vector.load %arg13[%c390, %c0_249] : memref<768x128xbf16, #tpu.memory_space<vmem>>, vector<256x128xbf16>
    %c23_250 = arith.constant 23 : index
    %c0_251 = arith.constant 0 : index
    %c0_252 = arith.constant 0 : index
    %268 = vector.load %arg4[%c23_250, %c0_251, %c0_252] : memref<25x128x128xbf16, #tpu.memory_space<vmem>>, vector<1x128x128xbf16>
    %269 = vector.shape_cast %268 : vector<1x128x128xbf16> to vector<128x128xbf16>
    %cst_253 = arith.constant dense<0.000000e+00> : vector<256x128xf32>
    %270 = tpu.matmul %267, %269, %cst_253 {dimension_numbers = #tpu.dot_dimension_numbers<[1], [0], [0], [1], [0, 0, 1, 1], [], []>} : vector<256x128xbf16>, vector<128x128xbf16>, vector<256x128xf32> -> vector<256x128xf32>
    %271 = arith.addf %266, %270 : vector<256x128xf32>
    %c392 = arith.constant 392 : index
    %c0_254 = arith.constant 0 : index
    %272 = vector.load %arg13[%c392, %c0_254] : memref<768x128xbf16, #tpu.memory_space<vmem>>, vector<256x128xbf16>
    %c24_255 = arith.constant 24 : index
    %c0_256 = arith.constant 0 : index
    %c0_257 = arith.constant 0 : index
    %273 = vector.load %arg4[%c24_255, %c0_256, %c0_257] : memref<25x128x128xbf16, #tpu.memory_space<vmem>>, vector<1x128x128xbf16>
    %274 = vector.shape_cast %273 : vector<1x128x128xbf16> to vector<128x128xbf16>
    %cst_258 = arith.constant dense<0.000000e+00> : vector<256x128xf32>
    %275 = tpu.matmul %272, %274, %cst_258 {dimension_numbers = #tpu.dot_dimension_numbers<[1], [0], [0], [1], [0, 0, 1, 1], [], []>} : vector<256x128xbf16>, vector<128x128xbf16>, vector<256x128xf32> -> vector<256x128xf32>
    %276 = arith.addf %271, %275 : vector<256x128xf32>
    %c0_259 = arith.constant 0 : index
    %c0_260 = arith.constant 0 : index
    %277 = vector.load %arg5[%c0_259, %c0_260] : memref<1x128xf32, #tpu.memory_space<vmem>>, vector<1x128xf32>
    %278 = vector.broadcast %277 : vector<1x128xf32> to vector<256x128xf32>
    %279 = arith.addf %276, %278 : vector<256x128xf32>
    %cst_261 = arith.constant 0.000000e+00 : f32
    %280 = vector.broadcast %cst_261 : f32 to vector<256x128xf32>
    %281 = arith.maximumf %279, %280 : vector<256x128xf32>
    %282 = arith.truncf %281 : vector<256x128xf32> to vector<256x128xbf16>
    %c256_262 = arith.constant 256 : index
    %c0_263 = arith.constant 0 : index
    %283 = vector.load %arg12[%c256_262, %c0_263] : memref<768x128xbf16, #tpu.memory_space<vmem>>, vector<256x128xbf16>
    tpu.vector_store %arg12[%c256_262, %c0_263], %282 {strides = array<i32>} : memref<768x128xbf16, #tpu.memory_space<vmem>>, vector<256x128xbf16>,
    %c0_264 = arith.constant 0 : index
    %c0_265 = arith.constant 0 : index
    %284 = vector.load %arg12[%c0_264, %c0_265] : memref<768x128xbf16, #tpu.memory_space<vmem>>, vector<512x128xbf16>
    %c2_266 = arith.constant 2 : index
    %c0_267 = arith.constant 0 : index
    %285 = vector.load %arg12[%c2_266, %c0_267] : memref<768x128xbf16, #tpu.memory_space<vmem>>, vector<512x128xbf16>
    %286 = arith.maximumf %284, %285 : vector<512x128xbf16>
    %c32_268 = arith.constant 32 : index
    %c0_269 = arith.constant 0 : index
    %287 = vector.load %arg12[%c32_268, %c0_269] : memref<768x128xbf16, #tpu.memory_space<vmem>>, vector<512x128xbf16>
    %288 = arith.maximumf %286, %287 : vector<512x128xbf16>
    %c34_270 = arith.constant 34 : index
    %c0_271 = arith.constant 0 : index
    %289 = vector.load %arg12[%c34_270, %c0_271] : memref<768x128xbf16, #tpu.memory_space<vmem>>, vector<512x128xbf16>
    %290 = arith.maximumf %288, %289 : vector<512x128xbf16>
    %c0_272 = arith.constant 0 : index
    %c0_273 = arith.constant 0 : index
    %291 = vector.load %arg13[%c0_272, %c0_273] : memref<768x128xbf16, #tpu.memory_space<vmem>>, vector<512x128xbf16>
    tpu.vector_store %arg13[%c0_272, %c0_273], %290 {strides = array<i32>} : memref<768x128xbf16, #tpu.memory_space<vmem>>, vector<512x128xbf16>,
    %c0_274 = arith.constant 0 : index
    %c0_275 = arith.constant 0 : index
    %292 = vector.load %arg6[%c0_274, %c0_275] : memref<8x768xbf16, #tpu.memory_space<vmem>>, vector<8x768xbf16>
    %c0_276 = arith.constant 0 : index
    %c0_277 = arith.constant 0 : index
    %293 = vector.load %arg13[%c0_276, %c0_277] : memref<768x128xbf16, #tpu.memory_space<vmem>>, vector<768x128xbf16>
    %cst_278 = arith.constant dense<0.000000e+00> : vector<8x128xf32>
    %294 = tpu.matmul %292, %293, %cst_278 {dimension_numbers = #tpu.dot_dimension_numbers<[1], [0], [0], [1], [0, 0, 1, 1], [], []>} : vector<8x768xbf16>, vector<768x128xbf16>, vector<8x128xf32> -> vector<8x128xf32>
    %295 = arith.truncf %294 : vector<8x128xf32> to vector<8x128xbf16>
    %c0_279 = arith.constant 0 : index
    %c0_280 = arith.constant 0 : index
    %296 = vector.load %arg7[%c0_279, %c0_280] : memref<128x256xbf16, #tpu.memory_space<vmem>>, vector<128x256xbf16>
    %cst_281 = arith.constant dense<0.000000e+00> : vector<8x256xf32>
    %297 = tpu.matmul %295, %296, %cst_281 {dimension_numbers = #tpu.dot_dimension_numbers<[1], [0], [0], [1], [0, 0, 1, 1], [], []>} : vector<8x128xbf16>, vector<128x256xbf16>, vector<8x256xf32> -> vector<8x256xf32>
    %c0_282 = arith.constant 0 : index
    %c0_283 = arith.constant 0 : index
    %298 = vector.load %arg8[%c0_282, %c0_283] : memref<1x256xf32, #tpu.memory_space<vmem>>, vector<1x256xf32>
    %299 = vector.broadcast %298 : vector<1x256xf32> to vector<8x256xf32>
    %300 = arith.addf %297, %299 : vector<8x256xf32>
    %cst_284 = arith.constant 0.000000e+00 : f32
    %301 = vector.broadcast %cst_284 : f32 to vector<8x256xf32>
    %302 = arith.maximumf %300, %301 : vector<8x256xf32>
    %303 = arith.truncf %302 : vector<8x256xf32> to vector<8x256xbf16>
    %c0_285 = arith.constant 0 : index
    %c0_286 = arith.constant 0 : index
    %304 = vector.load %arg9[%c0_285, %c0_286] : memref<256x128xbf16, #tpu.memory_space<vmem>>, vector<256x128xbf16>
    %cst_287 = arith.constant dense<0.000000e+00> : vector<8x128xf32>
    %305 = tpu.matmul %303, %304, %cst_287 {dimension_numbers = #tpu.dot_dimension_numbers<[1], [0], [0], [1], [0, 0, 1, 1], [], []>} : vector<8x256xbf16>, vector<256x128xbf16>, vector<8x128xf32> -> vector<8x128xf32>
    %c0_288 = arith.constant 0 : index
    %c0_289 = arith.constant 0 : index
    %306 = vector.load %arg10[%c0_288, %c0_289] : memref<1x128xf32, #tpu.memory_space<vmem>>, vector<1x128xf32>
    %307 = vector.broadcast %306 : vector<1x128xf32> to vector<8x128xf32>
    %308 = arith.addf %305, %307 : vector<8x128xf32>
    %c0_290 = arith.constant 0 : index
    %c0_291 = arith.constant 0 : index
    %309 = vector.load %arg11[%c0_290, %c0_291] : memref<8x128xf32, #tpu.memory_space<vmem>>, vector<8x128xf32>
    tpu.vector_store %arg11[%c0_290, %c0_291], %308 {strides = array<i32>} : memref<8x128xf32, #tpu.memory_space<vmem>>, vector<8x128xf32>,
    return
  }
  func.func @transform_0(%arg0: i32) -> (i32, i32) {
    %c0_i32 = arith.constant 0 : i32
    %c0_i32_0 = arith.constant 0 : i32
    %c0_i32_1 = arith.constant 0 : i32
    return %c0_i32, %c0_i32_0 : i32, i32
  }
  func.func @transform_1(%arg0: i32) -> (i32, i32) {
    %c0_i32 = arith.constant 0 : i32
    %c0_i32_0 = arith.constant 0 : i32
    %c0_i32_1 = arith.constant 0 : i32
    return %c0_i32, %c0_i32_0 : i32, i32
  }
  func.func @transform_2(%arg0: i32) -> (i32, i32) {
    %c0_i32 = arith.constant 0 : i32
    %c0_i32_0 = arith.constant 0 : i32
    %c0_i32_1 = arith.constant 0 : i32
    return %c0_i32, %c0_i32_0 : i32, i32
  }
  func.func @transform_3(%arg0: i32) -> (i32, i32, i32) {
    %c0_i32 = arith.constant 0 : i32
    %c0_i32_0 = arith.constant 0 : i32
    %c0_i32_1 = arith.constant 0 : i32
    %c0_i32_2 = arith.constant 0 : i32
    return %c0_i32, %c0_i32_0, %c0_i32_1 : i32, i32, i32
  }
  func.func @transform_4(%arg0: i32) -> (i32, i32) {
    %c0_i32 = arith.constant 0 : i32
    %c0_i32_0 = arith.constant 0 : i32
    %c0_i32_1 = arith.constant 0 : i32
    return %c0_i32, %c0_i32_0 : i32, i32
  }
  func.func @transform_5(%arg0: i32) -> (i32, i32) {
    %c0_i32 = arith.constant 0 : i32
    %c0_i32_0 = arith.constant 0 : i32
    %c0_i32_1 = arith.constant 0 : i32
    return %c0_i32, %c0_i32_0 : i32, i32
  }
  func.func @transform_6(%arg0: i32) -> (i32, i32) {
    %c0_i32 = arith.constant 0 : i32
    %c0_i32_0 = arith.constant 0 : i32
    %c0_i32_1 = arith.constant 0 : i32
    return %c0_i32, %c0_i32_0 : i32, i32
  }
  func.func @transform_7(%arg0: i32) -> (i32, i32) {
    %c0_i32 = arith.constant 0 : i32
    %c0_i32_0 = arith.constant 0 : i32
    %c0_i32_1 = arith.constant 0 : i32
    return %c0_i32, %c0_i32_0 : i32, i32
  }
  func.func @transform_8(%arg0: i32) -> (i32, i32) {
    %c0_i32 = arith.constant 0 : i32
    %c0_i32_0 = arith.constant 0 : i32
    %c0_i32_1 = arith.constant 0 : i32
    return %c0_i32, %c0_i32_0 : i32, i32
  }
  func.func @transform_9(%arg0: i32) -> (i32, i32) {
    %c0_i32 = arith.constant 0 : i32
    %c0_i32_0 = arith.constant 0 : i32
    %c0_i32_1 = arith.constant 0 : i32
    return %c0_i32, %c0_i32_0 : i32, i32
  }
  func.func @transform_10(%arg0: i32) -> (i32, i32) {
    %c0_i32 = arith.constant 0 : i32
    %c0_i32_0 = arith.constant 0 : i32
    %c0_i32_1 = arith.constant 0 : i32
    return %c0_i32, %c0_i32_0 : i32, i32
  }
}

</mosaic_0001>

<bundles_post_ra>
// kernel: convnet_forward.1
= control target key start
LH: loop header
LB: loop body
LE: loop exit
PB: predicated region body
PF: predicated region fallthrough
CT: control target
= control target key end

     0   :  { %vm845_vm0 = vsmask.f32 7424  ;;  %vm1351_vm1 = vcmask 1046528   ;;  %vm1840_vm2 = vcmask 1045504   ;;  %vm2152_vm3 = vcmask 1044480   ;;  %s28450_s1 = inlined_call_operand.vmem [shape: bf16[128,128], index: 1, kind: input, shape index: {}]   ;;  %s28451_s0 = inlined_call_operand.vmem [shape: bf16[512,128], index: 0, kind: input, shape index: {}]   ;;  %s28452_s3 = inlined_call_operand.vmem [shape: bf16[25,128,128], index: 3, kind: input, shape index: {}]   ;;  %s28453_s2 = inlined_call_operand.vmem [shape: f32[1,128], index: 2, kind: input, shape index: {}]   ;;  %s28454_s4 = inlined_call_operand.vmem [shape: f32[1,128], index: 4, kind: input, shape index: {}]   ;;  %s28455_s5 = inlined_call_operand.vmem [shape: bf16[8,768], index: 5, kind: input, shape index: {}]   ;;  %s28456_s6 = inlined_call_operand.vmem [shape: bf16[128,256], index: 6, kind: input, shape index: {}]   ;;  %s28457_s8 = inlined_call_operand.vmem [shape: bf16[256,128], index: 8, kind: input, shape index: {}]   ;;  %s28458_s7 = inlined_call_operand.vmem [shape: f32[1,256], index: 7, kind: input, shape index: {}]   ;;  %s28459_s9 = inlined_call_operand.vmem [shape: f32[1,128], index: 9, kind: input, shape index: {}]   ;;  %s28460_s10 = inlined_call_operand.vmem [shape: f32[8,128], index: 10, kind: output, shape index: {}]  }
   0x1   :  { %v24222_v0 = vld [vmem:[%s28450_s1] sm:$0xff]   ;;  %v24223_v1 = vld [vmem:[%s28450_s1 + $0x8] sm:$0xff]   ;;  %v24224_v2 = vld [vmem:[%s28450_s1 + $0x10] sm:$0xff]   ;;  %vm2464_vm4 = vcmask 1043456  }
   0x2   :  { %20205 = vmatprep.subr.bf16.mxu0 %v24222_v0  ;;  %v24225_v3 = vld [vmem:[%s28450_s1 + $0x18] sm:$0xff]   ;;  %v24230_v4 = vld [vmem:[%s28451_s0] sm:$0xff]   ;;  %v24227_v6 = vld [vmem:[%s28450_s1 + $0x28] sm:$0xff]  }
   0x3   :  { %20206 = vmatpush3.bf16.msra.mxu0 %v24222_v0  ;;  %20221 = vmatprep.mubr.bf16.mxu0 %v24230_v4  ;;  %v24226_v5 = vld [vmem:[%s28450_s1 + $0x20] sm:$0xff]   ;;  %v24228_v7 = vld [vmem:[%s28450_s1 + $0x30] sm:$0xff]   ;;  %v24229_v8 = vld [vmem:[%s28450_s1 + $0x38] sm:$0xff]  }
   0x4   :  { %20207 = vmatprep.subr.bf16.mxu0 %v24223_v1  ;;  %v24231_v9 = vld [vmem:[%s28451_s0 + $0x8] sm:$0xff]   ;;  %v24232_v10 = vld [vmem:[%s28451_s0 + $0x10] sm:$0xff]   ;;  %v24233_v11 = vld [vmem:[%s28451_s0 + $0x18] sm:$0xff]  }
   0x5   :  { %v24234_v12 = vld [vmem:[%s28451_s0 + $0x20] sm:$0xff]   ;;  %v24235_v14 = vld [vmem:[%s28451_s0 + $0x28] sm:$0xff]   ;;  %v24236_v15 = vld [vmem:[%s28451_s0 + $0x30] sm:$0xff]  }
   0x6   :  { %v24262_v13 = vld [vmem:[%s28452_s3 + $0x40] sm:$0xff]   ;;  %v24237_v16 = vld [vmem:[%s28451_s0 + $0x38] sm:$0xff]   ;;  %v24239_v18 = vld [vmem:[%s28451_s0 + $0x48] sm:$0xff]  }
   0x7   :  { %20208 = vmatpush3.bf16.msra.mxu0 %v24223_v1  ;;  %v24238_v17 = vld [vmem:[%s28451_s0 + $0x40] sm:$0xff]   ;;  %v24240_v19 = vld [vmem:[%s28451_s0 + $0x50] sm:$0xff]   ;;  %v24241_v20 = vld [vmem:[%s28451_s0 + $0x58] sm:$0xff]   ;;  %v24823_v1 = vmov 0  }
   0x8   :  { %20209 = vmatprep.subr.bf16.mxu0 %v24224_v2  ;;  %v24242_v21 = vld [vmem:[%s28451_s0 + $0x60] sm:$0xff]   ;;  %v24243_v22 = vld [vmem:[%s28451_s0 + $0x68] sm:$0xff]   ;;  %v24244_v23 = vld [vmem:[%s28451_s0 + $0x70] sm:$0xff]   ;;  %36 = vst [vmem:[#allocation2 + $0x100] sm:$0xff] %v24823_v1 }
   0x9   :  { %v24245_v24 = vld [vmem:[%s28451_s0 + $0x78] sm:$0xff]   ;;  %v24246_v25 = vld [vmem:[%s28451_s0 + $0x80] sm:$0xff]   ;;  %v24247_v26 = vld [vmem:[%s28451_s0 + $0x88] sm:$0xff]   ;;  %37 = vst [vmem:[#allocation2 + $0x108] sm:$0xff] %v24823_v1 }
   0xa   :  { %v24248_v27 = vld [vmem:[%s28451_s0 + $0x90] sm:$0xff]   ;;  %v24249_v28 = vld [vmem:[%s28451_s0 + $0x98] sm:$0xff]   ;;  %v24250_v29 = vld [vmem:[%s28451_s0 + $0xa0] sm:$0xff]   ;;  %38 = vst [vmem:[#allocation2 + $0x110] sm:$0xff] %v24823_v1 }
   0xb   :  { %20210 = vmatpush3.bf16.msra.mxu0 %v24224_v2  ;;  %v24251_v30 = vld [vmem:[%s28451_s0 + $0xa8] sm:$0xff]   ;;  %v24252_v31 = vld [vmem:[%s28451_s0 + $0xb0] sm:$0xff]   ;;  %v24253_v32 = vld [vmem:[%s28451_s0 + $0xb8] sm:$0xff]   ;;  %52 = vst [vmem:[#allocation3 + $0x100] sm:$0xff] %v24823_v1 }
   0xc   :  { %20211 = vmatprep.subr.bf16.mxu0 %v24225_v3  ;;  %v24254_v33 = vld [vmem:[%s28451_s0 + $0xc0] sm:$0xff]   ;;  %v24255_v35 = vld [vmem:[%s28451_s0 + $0xc8] sm:$0xff]   ;;  %v24256_v37 = vld [vmem:[%s28451_s0 + $0xd0] sm:$0xff]   ;;  %54 = vst [vmem:[#allocation3 + $0x110] sm:$0xff] %v24823_v1 }
   0xd   :  { %v24265_v34 = vld [vmem:[%s28452_s3 + $0x40] sm:$0xff]   ;;  %v24266_v36 = vld [vmem:[%s28452_s3 + $0x48] sm:$0xff]   ;;  %v24267_v38 = vld [vmem:[%s28452_s3 + $0x50] sm:$0xff]   ;;  %56 = vst [vmem:[#allocation3 + $0x120] sm:$0xff] %v24823_v1 }
   0xe   :  { %20285 = vmatprep.subr.bf16.mxu1 %v24265_v34  ;;  %v24257_v39 = vld [vmem:[%s28451_s0 + $0xd8] sm:$0xff]   ;;  %v24258_v40 = vld [vmem:[%s28451_s0 + $0xe0] sm:$0xff]   ;;  %v24263_v42 = vld [vmem:[%s28452_s3 + $0x48] sm:$0xff]   ;;  %58 = vst [vmem:[#allocation3 + $0x130] sm:$0xff] %v24823_v1 }
   0xf   :  { %20212 = vmatpush3.bf16.msra.mxu0 %v24225_v3  ;;  %20286 = vmatpush3.bf16.msra.mxu1 %v24265_v34  ;;  %v24268_v41 = vld [vmem:[%s28452_s3 + $0x58] sm:$0xff]   ;;  %v24270_v43 = vld [vmem:[%s28452_s3 + $0x60] sm:$0xff]   ;;  %v24259_v44 = vld [vmem:[%s28451_s0 + $0xe8] sm:$0xff]   ;;  %60 = vst [vmem:[#allocation3 + $0x140] sm:$0xff] %v24823_v1 }
  0x10   :  { %20213 = vmatprep.subr.bf16.mxu0 %v24226_v5  ;;  %20287 = vmatprep.subr.bf16.mxu1 %v24266_v36  ;;  %v24260_v45 = vld [vmem:[%s28451_s0 + $0xf0] sm:$0xff]   ;;  %v24271_v46 = vld [vmem:[%s28452_s3 + $0x68] sm:$0xff]   ;;  %v24261_v48 = vld [vmem:[%s28451_s0 + $0xf8] sm:$0xff]  }
  0x11   :  { %v24272_v47 = vld [vmem:[%s28452_s3 + $0x70] sm:$0xff]   ;;  %v24273_v49 = vld [vmem:[%s28452_s3 + $0x78] sm:$0xff]   ;;  %v24274_v52 = vld [vmem:[%s28452_s3 + $0x60] sm:$0xff]  }
  0x12   :  { %v24264_v50 = vld [vmem:[%s28452_s3 + $0x50] sm:$0xff]   ;;  %v24269_v51 = vld [vmem:[%s28452_s3 + $0x58] sm:$0xff]   ;;  %v25041_v53 = vld [vmem:[%s28452_s3] sm:$0xff]  }
  0x13   :  { %20214 = vmatpush3.bf16.msra.mxu0 %v24226_v5  ;;  %20288 = vmatpush3.bf16.msra.mxu1 %v24266_v36  ;;  %v24275_v54 = vld [vmem:[%s28452_s3 + $0x68] sm:$0xff]   ;;  %v24277_v55 = vld [vmem:[%s28452_s3 + $0x70] sm:$0xff]   ;;  %v24281_v56 = vld [vmem:[%s28452_s3 + $0x78] sm:$0xff]  }
  0x14   :  { %20215 = vmatprep.subr.bf16.mxu0 %v24227_v6  ;;  %20289 = vmatprep.subr.bf16.mxu1 %v24267_v38  ;;  %v25056_v57 = vld [vmem:[%s28453_s2] ss:$0 sm:$0xff] }
  0x15   :  { %v24286_v5 = vld [vmem:[%s28452_s3] sm:$0xff]  }
  0x17   :  { %20216 = vmatpush3.bf16.msra.mxu0 %v24227_v6  ;;  %20290 = vmatpush3.bf16.msra.mxu1 %v24267_v38 }
  0x18   :  { %20217 = vmatprep.subr.bf16.mxu0 %v24228_v7  ;;  %20291 = vmatprep.subr.bf16.mxu1 %v24268_v41 }
  0x1b   :  { %20218 = vmatpush3.bf16.msra.mxu0 %v24228_v7  ;;  %20292 = vmatpush3.bf16.msra.mxu1 %v24268_v41 }
  0x1c   :  { %20219 = vmatprep.subr.bf16.mxu0 %v24229_v8  ;;  %20293 = vmatprep.subr.bf16.mxu1 %v24270_v43 }
  0x1f   :  { %20220 = vmatpush3.bf16.msra.mxu0 %v24229_v8  ;;  %20294 = vmatpush3.bf16.msra.mxu1 %v24270_v43 }
  0x20   :  { %21485 = vmatprep.subr.bf16.mxu0 %v24262_v13  ;;  %20295 = vmatprep.subr.bf16.mxu1 %v24271_v46 }
  0x22   :  { %20222 = vmatmul.mubr.bf16.vlgmr.msra.gmra.mrb[0].mxu0 %v24231_v9 }
  0x23   :  { %20225 = vmatprep.mubr.bf16.mxu0 %v24232_v10  ;;  %21486 = vmatpush3.bf16.msra.mxu0 %v24262_v13 }
  0x24   :  { %21487 = vmatprep.subr.bf16.mxu0 %v24263_v42  ;;  %20296 = vmatpush3.bf16.msra.mxu1 %v24271_v46 }
  0x25   :  { %20297 = vmatprep.subr.bf16.mxu1 %v24272_v47 }
  0x27   :  { %21488 = vmatpush3.bf16.msra.mxu0 %v24263_v42 }
  0x28   :  { %20298 = vmatpush3.bf16.msra.mxu1 %v24272_v47  ;;  %21489 = vmatprep.subr.bf16.mxu0 %v24264_v50 }
  0x29   :  { %20299 = vmatprep.subr.bf16.mxu1 %v24273_v49 }
  0x2a   :  { %20226 = vmatmul.mubr.bf16.gmra.mrb[4].mxu0 %v24233_v11 }
  0x2b   :  { %20229 = vmatprep.mubr.bf16.mxu0 %v24234_v12  ;;  %21490 = vmatpush3.bf16.msra.mxu0 %v24264_v50 }
  0x2c   :  { %20300 = vmatpush3.bf16.msra.mxu1 %v24273_v49  ;;  %21491 = vmatprep.subr.bf16.mxu0 %v24269_v51 }
  0x2d   :  { %20333 = vmatprep.subr.bf16.mxu1 %v25041_v53 }
  0x2f   :  { %21492 = vmatpush3.bf16.msra.mxu0 %v24269_v51 }
  0x30   :  { %21493 = vmatprep.subr.bf16.mxu0 %v24274_v52 }
  0x32   :  { %20230 = vmatmul.mubr.bf16.gmra.mrb[8].mxu0 %v24235_v14 }
  0x33   :  { %20233 = vmatprep.mubr.bf16.mxu0 %v24236_v15  ;;  %21494 = vmatpush3.bf16.msra.mxu0 %v24274_v52 }
  0x34   :  { %21495 = vmatprep.subr.bf16.mxu0 %v24275_v54 }
  0x37   :  { %21496 = vmatpush3.bf16.msra.mxu0 %v24275_v54 }
  0x38   :  { %21497 = vmatprep.subr.bf16.mxu0 %v24277_v55 }
  0x3a   :  { %20234 = vmatmul.mubr.bf16.gmra.mrb[12].mxu0 %v24237_v16 }
  0x3b   :  { %20237 = vmatprep.mubr.bf16.mxu0 %v24238_v17  ;;  %21498 = vmatpush3.bf16.msra.mxu0 %v24277_v55 }
  0x3c   :  { %21499 = vmatprep.subr.bf16.mxu0 %v24281_v56 }
  0x3f   :  { %21500 = vmatpush3.bf16.msra.mxu0 %v24281_v56 }
  0x40   :  { %21533 = vmatprep.subr.bf16.mxu0 %v24286_v5 }
  0x42   :  { %20238 = vmatmul.mubr.bf16.gmra.mrb[16].mxu0 %v24239_v18 }
  0x43   :  { %20241 = vmatprep.mubr.bf16.mxu0 %v24240_v19 }
  0x4a   :  { %20242 = vmatmul.mubr.bf16.gmra.mrb[20].mxu0 %v24241_v20 }
  0x4b   :  { %20245 = vmatprep.mubr.bf16.mxu0 %v24242_v21 }
  0x52   :  { %20246 = vmatmul.mubr.bf16.gmra.mrb[24].mxu0 %v24243_v22 }
  0x53   :  { %20249 = vmatprep.mubr.bf16.mxu0 %v24244_v23 }
  0x5a   :  { %20250 = vmatmul.mubr.bf16.gmra.mrb[28].mxu0 %v24245_v24 }
  0x5b   :  { %20253 = vmatprep.mubr.bf16.mxu0 %v24246_v25 }
  0x62   :  { %20254 = vmatmul.mubr.bf16.gmra.mrb[32].mxu0 %v24247_v26 }
  0x63   :  { %20257 = vmatprep.mubr.bf16.mxu0 %v24248_v27 }
  0x6a   :  { %20258 = vmatmul.mubr.bf16.gmra.mrb[36].mxu0 %v24249_v28 }
  0x6b   :  { %20261 = vmatprep.mubr.bf16.mxu0 %v24250_v29 }
  0x72   :  { %20262 = vmatmul.mubr.bf16.gmra.mrb[40].mxu0 %v24251_v30 }
  0x73   :  { %20265 = vmatprep.mubr.bf16.mxu0 %v24252_v31 }
  0x7a   :  { %20266 = vmatmul.mubr.bf16.gmra.mrb[44].mxu0 %v24253_v32 }
  0x7b   :  { %20269 = vmatprep.mubr.bf16.mxu0 %v24254_v33 }
  0x82   :  { %20270 = vmatmul.mubr.bf16.gmra.mrb[48].mxu0 %v24255_v35 }
  0x83   :  { %20273 = vmatprep.mubr.bf16.mxu0 %v24256_v37 }
  0x8a   :  { %20274 = vmatmul.mubr.bf16.gmra.mrb[52].mxu0 %v24257_v39 }
  0x8b   :  { %20277 = vmatprep.mubr.bf16.mxu0 %v24258_v40 }
  0x92   :  { %20278 = vmatmul.mubr.bf16.gmra.mrb[56].mxu0 %v24259_v44 }
  0x93   :  { %20281 = vmatprep.mubr.bf16.mxu0 %v24260_v45 }
  0x9a   :  { %20282 = vmatmul.mubr.bf16.gmra.mrb[60].mxu0 %v24261_v48 }
  0xf5   :  { %v20223_v58 = vpop.f32.mrb[0].mxu0 }
  0xf6   :  { %v438_v59 = vadd.f32 %v20223_v58, %v25056_v57  ;;  %v429_v60 = vpop.f32.mrb[1].mxu0 }
  0xf7   :  { %v430_v61 = vadd.f32 %v25056_v57, %v429_v60  ;;  %v20224_v62 = vpop.f32.mrb[2].mxu0 }
  0xf8   :  { %v441_v63 = vadd.f32 %v20224_v62, %v25056_v57  ;;  %v432_v0 = vpop.f32.mrb[3].mxu0  ;;  %v686_v2 = vmax.f32 %v438_v59, 0.0 }
  0xf9   :  { %v433_v3 = vadd.f32 %v25056_v57, %v432_v0  ;;  %v684_v6 = vmax.f32 %v430_v61, 0.0 }
  0xfa   :  { %v687_v4 = vmax.f32 %v441_v63, 0.0 }
  0xfb   :  { %v685_v7 = vmax.f32 %v433_v3, 0.0 }
  0xfc   :  { %v25065_v8 = vpack.c.bf16 %v687_v4, %v686_v2 }
  0xfd   :  { %v748_v9 = vpack.c.bf16 %v685_v7, %v684_v6  ;;  %v20227_v10 = vpop.f32.mrb[4].mxu0 }
  0xfe   :  { %v854_v11 = vshll.u32 %v25065_v8, 16  ;;  %v454_v12 = vadd.f32 %v20227_v10, %v25056_v57  ;;  %v445_v13 = vpop.f32.mrb[5].mxu0  ;;  %v858_v36 = vshrl.u32 %v25065_v8, 16 }
  0xff   :  { %v849_v14 = vshll.u32 %v748_v9, 16  ;;  %v446_v15 = vadd.f32 %v25056_v57, %v445_v13  ;;  %v20228_v16 = vpop.f32.mrb[6].mxu0  ;;  %v847_v19 = vshrl.u32 %v748_v9, 16 }
 0x100   :  { %v457_v17 = vadd.f32 %v20228_v16, %v25056_v57  ;;  %v448_v18 = vpop.f32.mrb[7].mxu0  ;;  %v856_v22 = vrot.slane %v854_v11, 1  ;;  %v690_v23 = vmax.f32 %v454_v12, 0.0 }
 0x101   :  { %v851_v20 = vrot.slane %v849_v14, 1  ;;  %v449_v21 = vadd.f32 %v25056_v57, %v448_v18  ;;  %v688_v26 = vmax.f32 %v446_v15, 0.0 }
 0x102   :  { %v691_v24 = vmax.f32 %v457_v17, 0.0  ;;  %v860_v46 = vor.u32 %v858_v36, %v856_v22 }
 0x103   :  { %v852_v25 = vor.u32 %v851_v20, %v847_v19  ;;  %v689_v27 = vmax.f32 %v449_v21, 0.0 }
 0x104   :  { %v25072_v28 = vpack.c.bf16 %v691_v24, %v690_v23 }
 0x105   :  { %v857_v29 = vsel %vm845_vm0, %v852_v25, %v856_v22  ;;  %v750_v30 = vpack.c.bf16 %v689_v27, %v688_v26  ;;  %v20231_v31 = vpop.f32.mrb[8].mxu0 }
 0x106   :  { %v1138_v32 = vmax.bf16 %v857_v29, %v748_v9  ;;  %v870_v33 = vshll.u32 %v25072_v28, 16  ;;  %v470_v34 = vadd.f32 %v20231_v31, %v25056_v57  ;;  %v461_v35 = vpop.f32.mrb[9].mxu0  ;;  %v874_v62 = vshrl.u32 %v25072_v28, 16 }
 0x107   :  { %v862_v37 = vshll.u32 %v750_v30, 16  ;;  %v462_v38 = vadd.f32 %v25056_v57, %v461_v35  ;;  %v20232_v39 = vpop.f32.mrb[10].mxu0  ;;  %v866_v44 = vshrl.u32 %v750_v30, 16 }
 0x108   :  { %v473_v40 = vadd.f32 %v20232_v39, %v25056_v57  ;;  %v464_v41 = vpop.f32.mrb[11].mxu0  ;;  %v1171_v42 = vmax.bf16 %v1138_v32, %v25065_v8  ;;  %v872_v47 = vrot.slane %v870_v33, 1  ;;  %v694_v48 = vmax.f32 %v470_v34, 0.0 }
 0x109   :  { %v864_v43 = vrot.slane %v862_v37, 1  ;;  %v465_v45 = vadd.f32 %v25056_v57, %v464_v41  ;;  %v692_v51 = vmax.f32 %v462_v38, 0.0 }
 0x10a   :  { %v695_v49 = vmax.f32 %v473_v40, 0.0  ;;  %v876_v7 = vor.u32 %v874_v62, %v872_v47 }
 0x10b   :  { %v868_v50 = vor.u32 %v866_v44, %v864_v43  ;;  %v693_v52 = vmax.f32 %v465_v45, 0.0  ;;  %v865_v54 = vsel %vm845_vm0, %v860_v46, %v864_v43 }
 0x10c   :  { %v25083_v55 = vpack.c.bf16 %v695_v49, %v694_v48  ;;  %v1139_v56 = vmax.bf16 %v865_v54, %v25065_v8  ;;  %v25086_v58 = vmax.bf16 %v1171_v42, %v865_v54  ;;  %v24278_v54 = vld [vmem:[%s28452_s3 + $0x8] sm:$0xff]  }
 0x10d   :  { %v873_v59 = vsel %vm845_vm0, %v868_v50, %v872_v47  ;;  %v752_v60 = vpack.c.bf16 %v693_v52, %v692_v51  ;;  %v20235_v61 = vpop.f32.mrb[12].mxu0 }
 0x10e   :  { %v1140_v63 = vmax.bf16 %v873_v59, %v750_v30  ;;  %v886_v0 = vshll.u32 %v25083_v55, 16  ;;  %v486_v1 = vadd.f32 %v20235_v61, %v25056_v57  ;;  %v477_v2 = vpop.f32.mrb[13].mxu0  ;;  %1251 = vst [vmem:[#allocation3] sm:$0xff] %v25086_v58  ;;  %v1172_v6 = vmax.bf16 %v1139_v56, %v750_v30 }
 0x10f   :  { %v878_v3 = vshll.u32 %v752_v60, 16  ;;  %v478_v4 = vadd.f32 %v25056_v57, %v477_v2  ;;  %v20236_v5 = vpop.f32.mrb[14].mxu0  ;;  %v882_v9 = vshrl.u32 %v752_v60, 16  ;;  %v890_v22 = vshrl.u32 %v25083_v55, 16 }
 0x110   :  { %v1173_v8 = vmax.bf16 %v1140_v63, %v25072_v28  ;;  %v489_v10 = vadd.f32 %v20236_v5, %v25056_v57  ;;  %v480_v11 = vpop.f32.mrb[15].mxu0  ;;  %v888_v12 = vrot.slane %v886_v0, 1  ;;  %v25097_v15 = vmax.bf16 %v1172_v6, %v873_v59 }
 0x111   :  { %v880_v13 = vrot.slane %v878_v3, 1  ;;  %v481_v14 = vadd.f32 %v25056_v57, %v480_v11  ;;  %v698_v16 = vmax.f32 %v486_v1, 0.0  ;;  %v696_v20 = vmax.f32 %v478_v4, 0.0 }
 0x112   :  { %v699_v17 = vmax.f32 %v489_v10, 0.0  ;;  %v892_v30 = vor.u32 %v890_v22, %v888_v12  ;;  %v1353_v39 = vrot.slane %v25097_v15, 1 }
 0x113   :  { %v881_v18 = vsel %vm845_vm0, %v876_v7, %v880_v13  ;;  %v884_v19 = vor.u32 %v882_v9, %v880_v13  ;;  %v697_v21 = vmax.f32 %v481_v14, 0.0 }
 0x114   :  { %v1141_v23 = vmax.bf16 %v881_v18, %v25072_v28  ;;  %v1221_v24 = vmax.bf16 %v1173_v8, %v881_v18  ;;  %v25102_v25 = vpack.c.bf16 %v699_v17, %v698_v16 }
 0x115   :  { %v889_v26 = vsel %vm845_vm0, %v884_v19, %v888_v12  ;;  %v754_v27 = vpack.c.bf16 %v697_v21, %v696_v20  ;;  %v20239_v29 = vpop.f32.mrb[16].mxu0  ;;  %v1315_v38 = vld [vmem:[#allocation3] sm:$0xfe]  ;;  %v24279_v21 = vld [vmem:[%s28452_s3 + $0x10] sm:$0xff]  }
 0x116   :  { %v1142_v31 = vmax.bf16 %v889_v26, %v752_v60  ;;  %v1174_v32 = vmax.bf16 %v1141_v23, %v752_v60  ;;  %1253 = vst [vmem:[#allocation3 + $0x10] sm:$0xff] %v1221_v24  ;;  %v902_v33 = vshll.u32 %v25102_v25, 16  ;;  %v493_v34 = vpop.f32.mrb[17].mxu0  ;;  %v502_v36 = vadd.f32 %v20239_v29, %v25056_v57 }
 0x117   :  { %v894_v35 = vshll.u32 %v754_v27, 16  ;;  %v494_v28 = vadd.f32 %v25056_v57, %v493_v34  ;;  %v20240_v37 = vpop.f32.mrb[18].mxu0  ;;  %v898_v42 = vshrl.u32 %v754_v27, 16  ;;  %v1352_v51 = vrot.slane %v1315_v38, 1 }
 0x118   :  { %v1175_v40 = vmax.bf16 %v1142_v31, %v25083_v55  ;;  %v25110_v41 = vmax.bf16 %v1174_v32, %v889_v26  ;;  %v505_v43 = vadd.f32 %v20240_v37, %v25056_v57  ;;  %v496_v44 = vpop.f32.mrb[19].mxu0  ;;  %v904_v45 = vrot.slane %v902_v33, 1  ;;  %v24280_v31 = vld [vmem:[%s28452_s3 + $0x18] sm:$0xff]  }
 0x119   :  { %v896_v46 = vrot.slane %v894_v35, 1  ;;  %v702_v47 = vmax.f32 %v502_v36, 0.0  ;;  %v497_v48 = vadd.f32 %v25056_v57, %v496_v44  ;;  %v700_v49 = vmax.f32 %v494_v28, 0.0 }
 0x11a   :  { %1254 = vst [vmem:[#allocation3 + $0x18] sm:$0xff] %v25110_v41  ;;  %v703_v50 = vmax.f32 %v505_v43, 0.0  ;;  %v1355_v52 = vrot.slane %v1221_v24, 1  ;;  %v1357_v61 = vrot.slane %v25110_v41, 1  ;;  %v1354_v1 = vsel %vm1351_vm1, %v1352_v51, %v1353_v39 }
 0x11b   :  { %v897_v56 = vsel %vm845_vm0, %v892_v30, %v896_v46  ;;  %v900_v59 = vor.u32 %v898_v42, %v896_v46  ;;  %v701_v60 = vmax.f32 %v497_v48, 0.0  ;;  %20301 = vmatprep.mubr.bf16.mxu1 %v1354_v1  ;;  %v906_v7 = vshrl.u32 %v25102_v25, 16 }
 0x11c   :  { %v1143_v62 = vmax.bf16 %v897_v56, %v25083_v55  ;;  %v1223_v63 = vmax.bf16 %v1175_v40, %v897_v56  ;;  %v25121_v0 = vpack.c.bf16 %v703_v50, %v702_v47  ;;  %v1356_v5 = vsel %vm1351_vm1, %v1353_v39, %v1355_v52 }
 0x11d   :  { %v905_v2 = vsel %vm845_vm0, %v900_v59, %v904_v45  ;;  %v25125_v3 = vpack.c.bf16 %v701_v60, %v700_v49  ;;  %v20243_v4 = vpop.f32.mrb[20].mxu0  ;;  %v1358_v6 = vsel %vm1351_vm1, %v1355_v52, %v1357_v61  ;;  %20302 = vmatmul.mubr.bf16.vlgmr.msra.gmra.mrb[0].mxu1 %v1356_v5  ;;  %v908_v16 = vor.u32 %v906_v7, %v904_v45  ;;  %v24282_v60 = vld [vmem:[%s28452_s3 + $0x20] sm:$0xff]  }
 0x11e   :  { %v1144_v8 = vmax.bf16 %v905_v2, %v754_v27  ;;  %v1176_v9 = vmax.bf16 %v1143_v62, %v754_v27  ;;  %1255 = vst [vmem:[#allocation3 + $0x20] sm:$0xff] %v1223_v63  ;;  %v918_v55 = vshll.u32 %v25121_v0, 16  ;;  %v509_v10 = vpop.f32.mrb[21].mxu0  ;;  %v518_v12 = vadd.f32 %v20243_v4, %v25056_v57  ;;  %20305 = vmatprep.mubr.bf16.mxu1 %v1358_v6  ;;  %v24283_v6 = vld [vmem:[%s28452_s3 + $0x28] sm:$0xff]  }
 0x11f   :  { %v910_v11 = vshll.u32 %v25125_v3, 16  ;;  %v510_v13 = vadd.f32 %v25056_v57, %v509_v10  ;;  %v20244_v14 = vpop.f32.mrb[22].mxu0  ;;  %20334 = vmatpush3.bf16.msra.mxu1 %v25041_v53  ;;  %v914_v24 = vshrl.u32 %v25125_v3, 16  ;;  %v1359_v29 = vrot.slane %v1223_v63, 1 }
 0x120   :  { %v1177_v17 = vmax.bf16 %v1144_v8, %v25102_v25  ;;  %v25136_v18 = vmax.bf16 %v1176_v9, %v905_v2  ;;  %v521_v19 = vadd.f32 %v20244_v14, %v25056_v57  ;;  %v512_v20 = vpop.f32.mrb[23].mxu0  ;;  %20335 = vmatprep.subr.bf16.mxu1 %v24278_v54  ;;  %v920_v22 = vrot.slane %v918_v55, 1 }
 0x121   :  { %v912_v23 = vrot.slane %v910_v11, 1  ;;  %v513_v26 = vadd.f32 %v25056_v57, %v512_v20  ;;  %v706_v53 = vmax.f32 %v518_v12, 0.0  ;;  %v704_v34 = vmax.f32 %v510_v13, 0.0 }
 0x122   :  { %1256 = vst [vmem:[#allocation3 + $0x28] sm:$0xff] %v25136_v18  ;;  %v707_v27 = vmax.f32 %v521_v19, 0.0  ;;  %v1361_v30 = vrot.slane %v25136_v18, 1  ;;  %v1360_v38 = vsel %vm1351_vm1, %v1357_v61, %v1359_v29  ;;  %v922_v43 = vshrl.u32 %v25121_v0, 16 }
 0x123   :  { %v913_v32 = vsel %vm845_vm0, %v908_v16, %v912_v23  ;;  %v916_v33 = vor.u32 %v914_v24, %v912_v23  ;;  %v705_v35 = vmax.f32 %v513_v26, 0.0  ;;  %20336 = vmatpush3.bf16.msra.mxu1 %v24278_v54 }
 0x124   :  { %v1145_v36 = vmax.bf16 %v913_v32, %v25102_v25  ;;  %v1225_v28 = vmax.bf16 %v1177_v17, %v913_v32  ;;  %v25151_v37 = vpack.c.bf16 %v707_v27, %v706_v53  ;;  %20337 = vmatprep.subr.bf16.mxu1 %v24279_v21  ;;  %v1362_v42 = vsel %vm1351_vm1, %v1359_v29, %v1361_v30 }
 0x125   :  { %v921_v39 = vsel %vm845_vm0, %v916_v33, %v920_v22  ;;  %v758_v40 = vpack.c.bf16 %v705_v35, %v704_v34  ;;  %v20247_v41 = vpop.f32.mrb[24].mxu0  ;;  %20306 = vmatmul.mubr.bf16.gmra.mrb[4].mxu1 %v1360_v38  ;;  %v924_v51 = vor.u32 %v922_v43, %v920_v22  ;;  %v24284_v33 = vld [vmem:[%s28452_s3 + $0x30] sm:$0xff]  }
 0x126   :  { %v1146_v44 = vmax.bf16 %v921_v39, %v25125_v3  ;;  %v1178_v45 = vmax.bf16 %v1145_v36, %v25125_v3  ;;  %1257 = vst [vmem:[#allocation3 + $0x30] sm:$0xff] %v1225_v28  ;;  %v934_v25 = vshll.u32 %v25151_v37, 16  ;;  %v525_v46 = vpop.f32.mrb[25].mxu0  ;;  %v534_v48 = vadd.f32 %v20247_v41, %v25056_v57  ;;  %20309 = vmatprep.mubr.bf16.mxu1 %v1362_v42  ;;  %v24285_v42 = vld [vmem:[%s28452_s3 + $0x38] sm:$0xff]  }
 0x127   :  { %v926_v47 = vshll.u32 %v758_v40, 16  ;;  %v526_v49 = vadd.f32 %v25056_v57, %v525_v46  ;;  %v20248_v50 = vpop.f32.mrb[26].mxu0  ;;  %20338 = vmatpush3.bf16.msra.mxu1 %v24279_v21  ;;  %v930_v63 = vshrl.u32 %v758_v40, 16  ;;  %v1363_v4 = vrot.slane %v1225_v28, 1 }
 0x128   :  { %v1179_v52 = vmax.bf16 %v1146_v44, %v25121_v0  ;;  %v25163_v54 = vmax.bf16 %v1178_v45, %v921_v39  ;;  %v537_v56 = vadd.f32 %v20248_v50, %v25056_v57  ;;  %v528_v59 = vpop.f32.mrb[27].mxu0  ;;  %20339 = vmatprep.subr.bf16.mxu1 %v24280_v31  ;;  %v936_v61 = vrot.slane %v934_v25, 1 }
 0x129   :  { %v928_v62 = vrot.slane %v926_v47, 1  ;;  %v529_v1 = vadd.f32 %v25056_v57, %v528_v59  ;;  %v710_v2 = vmax.f32 %v534_v48, 0.0  ;;  %v708_v9 = vmax.f32 %v526_v49, 0.0 }
 0x12a   :  { %1258 = vst [vmem:[#allocation3 + $0x38] sm:$0xff] %v25163_v54  ;;  %v711_v3 = vmax.f32 %v537_v56, 0.0  ;;  %v1365_v5 = vrot.slane %v25163_v54, 1  ;;  %v1364_v13 = vsel %vm1351_vm1, %v1361_v30, %v1363_v4  ;;  %v938_v19 = vshrl.u32 %v25151_v37, 16 }
 0x12b   :  { %v929_v7 = vsel %vm845_vm0, %v924_v51, %v928_v62  ;;  %v932_v8 = vor.u32 %v930_v63, %v928_v62  ;;  %v709_v55 = vmax.f32 %v529_v1, 0.0  ;;  %20340 = vmatpush3.bf16.msra.mxu1 %v24280_v31 }
 0x12c   :  { %v1147_v10 = vmax.bf16 %v929_v7, %v25121_v0  ;;  %v1227_v11 = vmax.bf16 %v1179_v52, %v929_v7  ;;  %v25177_v12 = vpack.c.bf16 %v711_v3, %v710_v2  ;;  %20341 = vmatprep.subr.bf16.mxu1 %v24282_v60  ;;  %v1366_v18 = vsel %vm1351_vm1, %v1363_v4, %v1365_v5 }
 0x12d   :  { %v937_v14 = vsel %vm845_vm0, %v932_v8, %v936_v61  ;;  %v760_v16 = vpack.c.bf16 %v709_v55, %v708_v9  ;;  %v20251_v17 = vpop.f32.mrb[28].mxu0  ;;  %20310 = vmatmul.mubr.bf16.gmra.mrb[8].mxu1 %v1364_v13  ;;  %v940_v27 = vor.u32 %v938_v19, %v936_v61  ;;  %v25217_v8 = vld [vmem:[%s28452_s3 + $0x80] sm:$0xff]  }
 0x12e   :  { %v1148_v20 = vmax.bf16 %v937_v14, %v758_v40  ;;  %v1180_v21 = vmax.bf16 %v1147_v10, %v758_v40  ;;  %1259 = vst [vmem:[#allocation3 + $0x40] sm:$0xff] %v1227_v11  ;;  %v950_v22 = vshll.u32 %v25177_v12, 16  ;;  %v541_v0 = vpop.f32.mrb[29].mxu0  ;;  %v550_v24 = vadd.f32 %v20251_v17, %v25056_v57  ;;  %20313 = vmatprep.mubr.bf16.mxu1 %v1366_v18 }
 0x12f   :  { %v942_v23 = vshll.u32 %v760_v16, 16  ;;  %v542_v26 = vadd.f32 %v25056_v57, %v541_v0  ;;  %v20252_v53 = vpop.f32.mrb[30].mxu0  ;;  %20342 = vmatpush3.bf16.msra.mxu1 %v24282_v60  ;;  %v946_v36 = vshrl.u32 %v760_v16, 16  ;;  %v1367_v40 = vrot.slane %v1227_v11, 1 }
 0x130   :  { %v1181_v29 = vmax.bf16 %v1148_v20, %v25151_v37  ;;  %v25187_v30 = vmax.bf16 %v1180_v21, %v937_v14  ;;  %v553_v31 = vadd.f32 %v20252_v53, %v25056_v57  ;;  %v544_v32 = vpop.f32.mrb[31].mxu0  ;;  %20343 = vmatprep.subr.bf16.mxu1 %v24283_v6  ;;  %v952_v34 = vrot.slane %v950_v22, 1 }
 0x131   :  { %v944_v35 = vrot.slane %v942_v23, 1  ;;  %v545_v28 = vadd.f32 %v25056_v57, %v544_v32  ;;  %v714_v38 = vmax.f32 %v550_v24, 0.0  ;;  %v712_v45 = vmax.f32 %v542_v26, 0.0 }
 0x132   :  { %1260 = vst [vmem:[#allocation3 + $0x48] sm:$0xff] %v25187_v30  ;;  %v715_v39 = vmax.f32 %v553_v31, 0.0  ;;  %v1369_v41 = vrot.slane %v25187_v30, 1  ;;  %v1368_v49 = vsel %vm1351_vm1, %v1365_v5, %v1367_v40  ;;  %v954_v56 = vshrl.u32 %v25177_v12, 16 }
 0x133   :  { %v945_v43 = vsel %vm845_vm0, %v940_v27, %v944_v35  ;;  %v948_v44 = vor.u32 %v946_v36, %v944_v35  ;;  %v713_v25 = vmax.f32 %v545_v28, 0.0  ;;  %20344 = vmatpush3.bf16.msra.mxu1 %v24283_v6 }
 0x134   :  { %v1149_v46 = vmax.bf16 %v945_v43, %v25151_v37  ;;  %v1229_v47 = vmax.bf16 %v1181_v29, %v945_v43  ;;  %v25201_v48 = vpack.c.bf16 %v715_v39, %v714_v38  ;;  %20345 = vmatprep.subr.bf16.mxu1 %v24284_v33  ;;  %v1370_v54 = vsel %vm1351_vm1, %v1367_v40, %v1369_v41 }
 0x135   :  { %v953_v50 = vsel %vm845_vm0, %v948_v44, %v952_v34  ;;  %v762_v51 = vpack.c.bf16 %v713_v25, %v712_v45  ;;  %v20255_v52 = vpop.f32.mrb[32].mxu0  ;;  %20314 = vmatmul.mubr.bf16.gmra.mrb[12].mxu1 %v1368_v49  ;;  %v956_v3 = vor.u32 %v954_v56, %v952_v34 }
 0x136   :  { %v1150_v59 = vmax.bf16 %v953_v50, %v760_v16  ;;  %v1182_v60 = vmax.bf16 %v1149_v46, %v760_v16  ;;  %1261 = vst [vmem:[#allocation3 + $0x50] sm:$0xff] %v1229_v47  ;;  %v966_v61 = vshll.u32 %v25201_v48, 16  ;;  %v557_v37 = vpop.f32.mrb[33].mxu0  ;;  %v566_v63 = vadd.f32 %v20255_v52, %v25056_v57  ;;  %20317 = vmatprep.mubr.bf16.mxu1 %v1370_v54 }
 0x137   :  { %v958_v62 = vshll.u32 %v762_v51, 16  ;;  %v558_v1 = vadd.f32 %v25056_v57, %v557_v37  ;;  %v20256_v2 = vpop.f32.mrb[34].mxu0  ;;  %20346 = vmatpush3.bf16.msra.mxu1 %v24284_v33  ;;  %v962_v10 = vshrl.u32 %v762_v51, 16  ;;  %v1371_v16 = vrot.slane %v1229_v47, 1 }
 0x138   :  { %v1183_v4 = vmax.bf16 %v1150_v59, %v25177_v12  ;;  %v25211_v5 = vmax.bf16 %v1182_v60, %v953_v50  ;;  %v569_v6 = vadd.f32 %v20256_v2, %v25056_v57  ;;  %v560_v7 = vpop.f32.mrb[35].mxu0  ;;  %20347 = vmatprep.subr.bf16.mxu1 %v24285_v42  ;;  %v968_v9 = vrot.slane %v966_v61, 1 }
 0x139   :  { %v960_v55 = vrot.slane %v958_v62, 1  ;;  %v561_v11 = vadd.f32 %v25056_v57, %v560_v7  ;;  %v718_v13 = vmax.f32 %v566_v63, 0.0  ;;  %v716_v20 = vmax.f32 %v558_v1, 0.0 }
 0x13a   :  { %1262 = vst [vmem:[#allocation3 + $0x58] sm:$0xff] %v25211_v5  ;;  %v719_v14 = vmax.f32 %v569_v6, 0.0  ;;  %v1373_v17 = vrot.slane %v25211_v5, 1  ;;  %v1372_v24 = vsel %vm1351_vm1, %v1369_v41, %v1371_v16  ;;  %v970_v26 = vshrl.u32 %v25201_v48, 16 }
 0x13b   :  { %v961_v18 = vsel %vm845_vm0, %v956_v3, %v960_v55  ;;  %v964_v19 = vor.u32 %v962_v10, %v960_v55  ;;  %v717_v21 = vmax.f32 %v561_v11, 0.0  ;;  %20348 = vmatpush3.bf16.msra.mxu1 %v24285_v42  ;;  %v25266_v10 = vld [vmem:[%s28453_s2] ss:$0 sm:$0xff] }
 0x13c   :  { %v1151_v22 = vmax.bf16 %v961_v18, %v25177_v12  ;;  %v25224_v0 = vmax.bf16 %v1183_v4, %v961_v18  ;;  %v25226_v23 = vpack.c.bf16 %v719_v14, %v718_v13  ;;  %20381 = vmatprep.subr.bf16.mxu1 %v25217_v8  ;;  %v1374_v30 = vsel %vm1351_vm1, %v1371_v16, %v1373_v17 }
 0x13d   :  { %v969_v53 = vsel %vm845_vm0, %v964_v19, %v968_v9  ;;  %v25232_v27 = vpack.c.bf16 %v717_v21, %v716_v20  ;;  %v20259_v29 = vpop.f32.mrb[36].mxu0  ;;  %20318 = vmatmul.mubr.bf16.gmra.mrb[16].mxu1 %v1372_v24  ;;  %v972_v34 = vor.u32 %v970_v26, %v968_v9 }
 0x13e   :  { %v1152_v31 = vmax.bf16 %v969_v53, %v762_v51  ;;  %v1184_v32 = vmax.bf16 %v1151_v22, %v762_v51  ;;  %1263 = vst [vmem:[#allocation3 + $0x60] sm:$0xff] %v25224_v0  ;;  %v982_v12 = vshll.u32 %v25226_v23, 16  ;;  %v573_v33 = vpop.f32.mrb[37].mxu0  ;;  %v582_v36 = vadd.f32 %v20259_v29, %v25056_v57  ;;  %20321 = vmatprep.mubr.bf16.mxu1 %v1374_v30 }
 0x13f   :  { %v974_v35 = vshll.u32 %v25232_v27, 16  ;;  %v574_v28 = vadd.f32 %v25056_v57, %v573_v33  ;;  %v20260_v38 = vpop.f32.mrb[38].mxu0  ;;  %v986_v41 = vshrl.u32 %v25226_v23, 16  ;;  %v978_v25 = vshrl.u32 %v25232_v27, 16 }
 0x140   :  { %v1185_v39 = vmax.bf16 %v1152_v31, %v25201_v48  ;;  %v25241_v40 = vmax.bf16 %v1184_v32, %v969_v53  ;;  %v585_v42 = vadd.f32 %v20260_v38, %v25056_v57  ;;  %v576_v43 = vpop.f32.mrb[39].mxu0  ;;  %v984_v44 = vrot.slane %v982_v12, 1 }
 0x141   :  { %v976_v45 = vrot.slane %v974_v35, 1  ;;  %v577_v46 = vadd.f32 %v25056_v57, %v576_v43  ;;  %v722_v47 = vmax.f32 %v582_v36, 0.0  ;;  %v1375_v50 = vrot.slane %v25224_v0, 1  ;;  %v25286_v36 = vld [vmem:[#allocation2 + $0x100] sm:$0x1] }
 0x142   :  { %1264 = vst [vmem:[#allocation3 + $0x68] sm:$0xff] %v25241_v40  ;;  %v723_v49 = vmax.f32 %v585_v42, 0.0  ;;  %v1377_v51 = vrot.slane %v25241_v40, 1  ;;  %v720_v56 = vmax.f32 %v574_v28, 0.0  ;;  %v988_v3 = vor.u32 %v986_v41, %v984_v44  ;;  %v25291_v42 = vld [vmem:[#allocation2 + $0x100] sm:$0xff] }
 0x143   :  { %v977_v52 = vsel %vm845_vm0, %v972_v34, %v976_v45  ;;  %v980_v54 = vor.u32 %v978_v25, %v976_v45  ;;  %v721_v59 = vmax.f32 %v577_v46, 0.0  ;;  %v1376_v57 = vsel %vm1351_vm1, %v1373_v17, %v1375_v50 }
 0x144   :  { %v1153_v60 = vmax.bf16 %v977_v52, %v25201_v48  ;;  %v25252_v61 = vmax.bf16 %v1185_v39, %v977_v52  ;;  %v25254_v37 = vpack.c.bf16 %v723_v49, %v722_v47  ;;  %v1378_v2 = vsel %vm1351_vm1, %v1375_v50, %v1377_v51 }
 0x145   :  { %v985_v62 = vsel %vm845_vm0, %v980_v54, %v984_v44  ;;  %v766_v63 = vpack.c.bf16 %v721_v59, %v720_v56  ;;  %v20263_v1 = vpop.f32.mrb[40].mxu0  ;;  %20322 = vmatmul.mubr.bf16.gmra.mrb[20].mxu1 %v1376_v57  ;;  %v1205_v43 = vshll.u32 %v25291_v42, 16  ;;  %v1102_v52 = vshll.u32 %v25286_v36, 16 }
 0x146   :  { %v1154_v4 = vmax.bf16 %v985_v62, %v25232_v27  ;;  %v1186_v6 = vmax.bf16 %v1153_v60, %v25232_v27  ;;  %1265 = vst [vmem:[#allocation3 + $0x70] sm:$0xff] %v25252_v61  ;;  %v998_v48 = vshll.u32 %v25254_v37, 16  ;;  %v589_v7 = vpop.f32.mrb[41].mxu0  ;;  %v598_v11 = vadd.f32 %v25266_v10, %v20263_v1  ;;  %20325 = vmatprep.mubr.bf16.mxu1 %v1378_v2 }
 0x147   :  { %v990_v9 = vshll.u32 %v766_v63, 16  ;;  %v994_v55 = vshrl.u32 %v766_v63, 16  ;;  %v590_v13 = vadd.f32 %v25266_v10, %v589_v7  ;;  %v20264_v14 = vpop.f32.mrb[42].mxu0  ;;  %v1379_v20 = vrot.slane %v25252_v61, 1 }
 0x148   :  { %v25270_v16 = vmax.bf16 %v1186_v6, %v985_v62  ;;  %v1000_v17 = vrot.slane %v998_v48, 1  ;;  %v601_v18 = vadd.f32 %v25266_v10, %v20264_v14  ;;  %v592_v19 = vpop.f32.mrb[43].mxu0  ;;  %v726_v22 = vmax.f32 %v598_v11, 0.0 }
 0x149   :  { %v992_v21 = vrot.slane %v990_v9, 1  ;;  %v724_v24 = vmax.f32 %v590_v13, 0.0  ;;  %v593_v26 = vadd.f32 %v25266_v10, %v592_v19  ;;  %v1380_v27 = vsel %vm1351_vm1, %v1377_v51, %v1379_v20 }
 0x14a   :  { %1266 = vst [vmem:[#allocation3 + $0x78] sm:$0xff] %v25270_v16  ;;  %v727_v53 = vmax.f32 %v601_v18, 0.0  ;;  %v1381_v29 = vrot.slane %v25270_v16, 1  ;;  %v1187_v12 = vmax.bf16 %v1154_v4, %v25226_v23  ;;  %v1002_v44 = vshrl.u32 %v25254_v37, 16 }
 0x14b   :  { %v996_v30 = vor.u32 %v994_v55, %v992_v21  ;;  %v725_v31 = vmax.f32 %v593_v26, 0.0  ;;  %v993_v32 = vsel %vm845_vm0, %v988_v3, %v992_v21  ;;  %v25312_v14 = vrot.slane %v1205_v43, 1 }
 0x14c   :  { %v25280_v33 = vpack.c.bf16 %v727_v53, %v726_v22  ;;  %v1382_v34 = vsel %vm1351_vm1, %v1379_v20, %v1381_v29  ;;  %v1155_v35 = vmax.bf16 %v993_v32, %v25226_v23  ;;  %v25289_v41 = vmax.bf16 %v1187_v12, %v993_v32 }
 0x14d   :  { %v1001_v28 = vsel %vm845_vm0, %v996_v30, %v1000_v17  ;;  %v768_v38 = vpack.c.bf16 %v725_v31, %v724_v24  ;;  %v20267_v39 = vpop.f32.mrb[44].mxu0  ;;  %20326 = vmatmul.mubr.bf16.gmra.mrb[24].mxu1 %v1380_v27  ;;  %v1004_v54 = vor.u32 %v1002_v44, %v1000_v17 }
 0x14e   :  { %v1156_v45 = vmax.bf16 %v1001_v28, %v766_v63  ;;  %v1014_v25 = vshll.u32 %v25280_v33, 16  ;;  %v614_v46 = vadd.f32 %v25266_v10, %v20267_v39  ;;  %v605_v23 = vpop.f32.mrb[45].mxu0  ;;  %20329 = vmatprep.mubr.bf16.mxu1 %v1382_v34  ;;  %v1188_v51 = vmax.bf16 %v1155_v35, %v766_v63  ;;  %1267 = vst [vmem:[#allocation3 + $0x80] sm:$0xff] %v25289_v41 }
 0x14f   :  { %v1006_v47 = vshll.u32 %v768_v38, 16  ;;  %v606_v49 = vadd.f32 %v25266_v10, %v605_v23  ;;  %v20268_v50 = vpop.f32.mrb[46].mxu0  ;;  %v1010_v1 = vshrl.u32 %v768_v38, 16  ;;  %v1018_v17 = vshrl.u32 %v25280_v33, 16 }
 0x150   :  { %v1189_v56 = vmax.bf16 %v1156_v45, %v25254_v37  ;;  %v730_v59 = vmax.f32 %v614_v46, 0.0  ;;  %v617_v60 = vadd.f32 %v25266_v10, %v20268_v50  ;;  %v608_v57 = vpop.f32.mrb[47].mxu0  ;;  %v25303_v3 = vmax.bf16 %v1188_v51, %v1001_v28 }
 0x151   :  { %v1008_v62 = vrot.slane %v1006_v47, 1  ;;  %v609_v2 = vadd.f32 %v25266_v10, %v608_v57  ;;  %v1016_v4 = vrot.slane %v1014_v25, 1  ;;  %v728_v7 = vmax.f32 %v606_v49, 0.0 }
 0x152   :  { %v731_v6 = vmax.f32 %v617_v60, 0.0  ;;  %1268 = vst [vmem:[#allocation3 + $0x88] sm:$0xff] %v25303_v3  ;;  %v9118_v21 = vrot.slane %v25303_v3, 1 }
 0x153   :  { %v1009_v63 = vsel %vm845_vm0, %v1004_v54, %v1008_v62  ;;  %v1012_v48 = vor.u32 %v1010_v1, %v1008_v62  ;;  %v729_v9 = vmax.f32 %v609_v2, 0.0  ;;  %v1020_v27 = vor.u32 %v1018_v17, %v1016_v4 }
 0x154   :  { %v1157_v55 = vmax.bf16 %v1009_v63, %v25254_v37  ;;  %v25308_v11 = vmax.bf16 %v1189_v56, %v1009_v63  ;;  %v25310_v13 = vpack.c.bf16 %v731_v6, %v730_v59 }
 0x155   :  { %v1017_v18 = vsel %vm845_vm0, %v1012_v48, %v1016_v4  ;;  %v770_v19 = vpack.c.bf16 %v729_v9, %v728_v7  ;;  %v20271_v20 = vpop.f32.mrb[48].mxu0  ;;  %v1316_v34 = vld [vmem:[#allocation3 + $0x80] sm:$0x1]  ;;  %v9082_v35 = vld [vmem:[#allocation3 + $0x80] sm:$0xfe] }
 0x156   :  { %v1158_v22 = vmax.bf16 %v1017_v18, %v768_v38  ;;  %v1190_v24 = vmax.bf16 %v1157_v55, %v768_v38  ;;  %1269 = vst [vmem:[#allocation3 + $0x90] sm:$0xff] %v25308_v11  ;;  %v1030_v37 = vshll.u32 %v25310_v13, 16  ;;  %v1034_v26 = vshrl.u32 %v25310_v13, 16  ;;  %v621_v53 = vpop.f32.mrb[49].mxu0 }
 0x157   :  { %v1022_v30 = vshll.u32 %v770_v19, 16  ;;  %v630_v31 = vadd.f32 %v25266_v10, %v20271_v20  ;;  %v622_v32 = vadd.f32 %v25266_v10, %v621_v53  ;;  %v20272_v12 = vpop.f32.mrb[50].mxu0  ;;  %v1026_v38 = vshrl.u32 %v770_v19, 16 }
 0x158   :  { %v1191_v28 = vmax.bf16 %v1158_v22, %v25280_v33  ;;  %v25323_v39 = vmax.bf16 %v1190_v24, %v1017_v18  ;;  %v633_v43 = vadd.f32 %v25266_v10, %v20272_v12  ;;  %v624_v44 = vpop.f32.mrb[51].mxu0  ;;  %v1032_v45 = vrot.slane %v1030_v37, 1 }
 0x159   :  { %v1024_v25 = vrot.slane %v1022_v30, 1  ;;  %v734_v46 = vmax.f32 %v630_v31, 0.0  ;;  %v625_v23 = vadd.f32 %v25266_v10, %v624_v44  ;;  %v732_v47 = vmax.f32 %v622_v32, 0.0 }
 0x15a   :  { %1270 = vst [vmem:[#allocation3 + $0x98] sm:$0xff] %v25323_v39  ;;  %v735_v49 = vmax.f32 %v633_v43, 0.0  ;;  %v1383_v50 = vrot.slane %v1316_v34, 1  ;;  %v9117_v51 = vrot.slane %v9082_v35, 1  ;;  %v9120_v60 = vrot.slane %v25308_v11, 1  ;;  %v24288_v35 = vld [vmem:[%s28452_s3 + $0x10] sm:$0xff]  }
 0x15b   :  { %v1025_v54 = vsel %vm845_vm0, %v1020_v27, %v1024_v25  ;;  %v1028_v56 = vor.u32 %v1026_v38, %v1024_v25  ;;  %v733_v59 = vmax.f32 %v625_v23, 0.0  ;;  %v1036_v9 = vor.u32 %v1034_v26, %v1032_v45 }
 0x15c   :  { %v1159_v57 = vmax.bf16 %v1025_v54, %v25280_v33  ;;  %v25331_v62 = vmax.bf16 %v1191_v28, %v1025_v54  ;;  %v25333_v1 = vpack.c.bf16 %v735_v49, %v734_v46  ;;  %v1384_v2 = vsel %vm1351_vm1, %v1381_v29, %v1383_v50  ;;  %v24287_v33 = vld [vmem:[%s28452_s3 + $0x8] sm:$0xff]  }
 0x15d   :  { %v1033_v4 = vsel %vm845_vm0, %v1028_v56, %v1032_v45  ;;  %v25339_v6 = vpack.c.bf16 %v733_v59, %v732_v47  ;;  %v20275_v63 = vpop.f32.mrb[52].mxu0  ;;  %20330 = vmatmul.mubr.bf16.gmra.mrb[28].mxu1 %v1384_v2  ;;  %v9119_v48 = vsel %vm1351_vm1, %v9117_v51, %v9118_v21  ;;  %v9121_v7 = vsel %vm1351_vm1, %v9118_v21, %v9120_v60  ;;  %v24292_v54 = vld [vmem:[%s28452_s3 + $0x88] sm:$0xff]   ;;  %v24289_v2 = vld [vmem:[%s28452_s3 + $0x18] sm:$0xff]  }
 0x15e   :  { %v1160_v55 = vmax.bf16 %v1033_v4, %v770_v19  ;;  %v1192_v17 = vmax.bf16 %v1159_v57, %v770_v19  ;;  %1271 = vst [vmem:[#allocation3 + $0xa0] sm:$0xff] %v25331_v62  ;;  %v1046_v29 = vshll.u32 %v25333_v1, 16  ;;  %v637_v18 = vpop.f32.mrb[53].mxu0  ;;  %20349 = vmatprep.mubr.bf16.mxu1 %v25086_v58  ;;  %21501 = vmatprep.mubr.bf16.mxu0 %v9119_v48  ;;  %v1050_v20 = vshrl.u32 %v25333_v1, 16  ;;  %v24710_v58 = vld [vmem:[%s28452_s3] sm:$0xff]  }
 0x15f   :  { %v1038_v22 = vshll.u32 %v25339_v6, 16  ;;  %v646_v21 = vadd.f32 %v25266_v10, %v20275_v63  ;;  %v638_v24 = vadd.f32 %v25266_v10, %v637_v18  ;;  %v20276_v37 = vpop.f32.mrb[54].mxu0  ;;  %21502 = vmatmul.mubr.bf16.vlgmr.msra.gmra.mrb[64].mxu0 %v9121_v7  ;;  %v1042_v32 = vshrl.u32 %v25339_v6, 16  ;;  %v25390_v7 = vld [vmem:[#allocation3 + $0x10] sm:$0xff] }
 0x160   :  { %v1193_v19 = vmax.bf16 %v1160_v55, %v25310_v13  ;;  %v25354_v26 = vmax.bf16 %v1192_v17, %v1033_v4  ;;  %v1048_v53 = vrot.slane %v1046_v29, 1  ;;  %v649_v27 = vadd.f32 %v25266_v10, %v20276_v37  ;;  %v640_v30 = vpop.f32.mrb[55].mxu0  ;;  %21534 = vmatpush3.bf16.msra.mxu0 %v24710_v58 }
 0x161   :  { %v1040_v31 = vrot.slane %v1038_v22, 1  ;;  %v738_v12 = vmax.f32 %v646_v21, 0.0  ;;  %v641_v34 = vadd.f32 %v25266_v10, %v640_v30  ;;  %21535 = vmatprep.subr.bf16.mxu0 %v24287_v33  ;;  %v736_v28 = vmax.f32 %v638_v24, 0.0  ;;  %v24294_v30 = vld [vmem:[%s28452_s3 + $0x90] sm:$0xff]  }
 0x162   :  { %1272 = vst [vmem:[#allocation3 + $0xa8] sm:$0xff] %v25354_v26  ;;  %v739_v38 = vmax.f32 %v649_v27, 0.0  ;;  %v9122_v43 = vrot.slane %v25323_v39, 1  ;;  %v9124_v44 = vrot.slane %v25331_v62, 1  ;;  %v1052_v45 = vor.u32 %v1050_v20, %v1048_v53 }
 0x163   :  { %v1041_v25 = vsel %vm845_vm0, %v1036_v9, %v1040_v31  ;;  %v1044_v46 = vor.u32 %v1042_v32, %v1040_v31  ;;  %v737_v23 = vmax.f32 %v641_v34, 0.0 }
 0x164   :  { %v1161_v47 = vmax.bf16 %v1041_v25, %v25310_v13  ;;  %v25370_v49 = vmax.bf16 %v1193_v19, %v1041_v25  ;;  %v25372_v50 = vpack.c.bf16 %v739_v38, %v738_v12  ;;  %v9123_v51 = vsel %vm1351_vm1, %v9120_v60, %v9122_v43  ;;  %21536 = vmatpush3.bf16.msra.mxu0 %v24287_v33 }
 0x165   :  { %v1049_v56 = vsel %vm845_vm0, %v1044_v46, %v1048_v53  ;;  %v25379_v59 = vpack.c.bf16 %v737_v23, %v736_v28  ;;  %v20279_v57 = vpop.f32.mrb[56].mxu0  ;;  %20350 = vmatmul.mubr.bf16.vlgmr.msra.gmra.mrb[0].mxu1 %v25097_v15  ;;  %21505 = vmatprep.mubr.bf16.mxu0 %v9123_v51  ;;  %v9125_v13 = vsel %vm1351_vm1, %v9122_v43, %v9124_v44  ;;  %v9126_v33 = vrot.slane %v25354_v26, 1  ;;  %v25420_v46 = vld [vmem:[#allocation2 + $0x108] sm:$0x1] }
 0x166   :  { %v1162_v60 = vmax.bf16 %v1049_v56, %v25339_v6  ;;  %v1194_v4 = vmax.bf16 %v1161_v47, %v25339_v6  ;;  %1273 = vst [vmem:[#allocation3 + $0xb0] sm:$0xff] %v25370_v49  ;;  %v1062_v63 = vshll.u32 %v25372_v50, 16  ;;  %v653_v48 = vpop.f32.mrb[57].mxu0  ;;  %20353 = vmatprep.mubr.bf16.mxu1 %v25390_v7  ;;  %21537 = vmatprep.subr.bf16.mxu0 %v24288_v35  ;;  %v9128_v32 = vrot.slane %v25370_v49, 1 }
 0x167   :  { %v1054_v9 = vshll.u32 %v25379_v59, 16  ;;  %v1058_v55 = vshrl.u32 %v25379_v59, 16  ;;  %v662_v17 = vadd.f32 %v25266_v10, %v20279_v57  ;;  %v654_v6 = vadd.f32 %v25266_v10, %v653_v48  ;;  %v20280_v29 = vpop.f32.mrb[58].mxu0  ;;  %21506 = vmatmul.mubr.bf16.gmra.mrb[68].mxu0 %v9125_v13  ;;  %20382 = vmatpush3.bf16.msra.mxu1 %v25217_v8  ;;  %v24291_v8 = vld [vmem:[%s28452_s3 + $0x20] sm:$0xff]   ;;  %v24295_v57 = vld [vmem:[%s28452_s3 + $0x98] sm:$0xff]  }
 0x168   :  { %v1195_v18 = vmax.bf16 %v1162_v60, %v25333_v1  ;;  %v25400_v20 = vmax.bf16 %v1194_v4, %v1049_v56  ;;  %v1064_v22 = vrot.slane %v1062_v63, 1  ;;  %v665_v21 = vadd.f32 %v25266_v10, %v20280_v29  ;;  %v656_v24 = vpop.f32.mrb[59].mxu0  ;;  %21538 = vmatpush3.bf16.msra.mxu0 %v24288_v35  ;;  %20383 = vmatprep.subr.bf16.mxu1 %v24292_v54  ;;  %v25427_v56 = vld [vmem:[#allocation3 + $0x18] sm:$0xff]  ;;  %v25447_v48 = vld [vmem:[#allocation3 + $0x20] sm:$0xff] }
 0x169   :  { %v1056_v37 = vrot.slane %v1054_v9, 1  ;;  %v742_v19 = vmax.f32 %v662_v17, 0.0  ;;  %v740_v53 = vmax.f32 %v654_v6, 0.0  ;;  %v657_v27 = vadd.f32 %v25266_v10, %v656_v24  ;;  %21539 = vmatprep.subr.bf16.mxu0 %v24289_v2 }
 0x16a   :  { %1274 = vst [vmem:[#allocation3 + $0xb8] sm:$0xff] %v25400_v20  ;;  %v743_v58 = vmax.f32 %v665_v21, 0.0  ;;  %v9127_v31 = vsel %vm1351_vm1, %v9124_v44, %v9126_v33  ;;  %v9130_v28 = vrot.slane %v25400_v20, 1  ;;  %v9129_v44 = vsel %vm1351_vm1, %v9126_v33, %v9128_v32 }
 0x16b   :  { %v1057_v12 = vsel %vm845_vm0, %v1052_v45, %v1056_v37  ;;  %v1060_v34 = vor.u32 %v1058_v55, %v1056_v37  ;;  %v741_v35 = vmax.f32 %v657_v27, 0.0  ;;  %21509 = vmatprep.mubr.bf16.mxu0 %v9127_v31  ;;  %20384 = vmatpush3.bf16.msra.mxu1 %v24292_v54  ;;  %v1066_v23 = vshrl.u32 %v25372_v50, 16  ;;  %v24293_v54 = vld [vmem:[%s28452_s3 + $0x28] sm:$0xff]  }
 0x16c   :  { %v1163_v38 = vmax.bf16 %v1057_v12, %v25333_v1  ;;  %v25416_v43 = vmax.bf16 %v1195_v18, %v1057_v12  ;;  %v25418_v25 = vpack.c.bf16 %v743_v58, %v742_v19  ;;  %21540 = vmatpush3.bf16.msra.mxu0 %v24289_v2  ;;  %v9131_v1 = vsel %vm1351_vm1, %v9128_v32, %v9130_v28  ;;  %v24296_v19 = vld [vmem:[%s28452_s3 + $0x30] sm:$0xff]   ;;  %v24297_v58 = vld [vmem:[%s28452_s3 + $0xa0] sm:$0xff]  }
 0x16d   :  { %v1065_v45 = vsel %vm845_vm0, %v1060_v34, %v1064_v22  ;;  %v25425_v47 = vpack.c.bf16 %v741_v35, %v740_v53  ;;  %v20283_v51 = vpop.f32.mrb[60].mxu0  ;;  %20354 = vmatmul.mubr.bf16.gmra.mrb[4].mxu1 %v25427_v56  ;;  %21541 = vmatprep.subr.bf16.mxu0 %v24291_v8  ;;  %v25445_v63 = vrot.slane %v1102_v52, 1  ;;  %v1068_v33 = vor.u32 %v1066_v23, %v1064_v22 }
 0x16e   :  { %v1164_v13 = vmax.bf16 %v1065_v45, %v25379_v59  ;;  %v1196_v2 = vmax.bf16 %v1163_v38, %v25379_v59  ;;  %1275 = vst [vmem:[#allocation3 + $0xc0] sm:$0xff] %v25416_v43  ;;  %v1078_v60 = vshll.u32 %v25418_v25, 16  ;;  %v669_v4 = vpop.f32.mrb[61].mxu0  ;;  %20357 = vmatprep.mubr.bf16.mxu1 %v25447_v48  ;;  %20385 = vmatprep.subr.bf16.mxu1 %v24294_v30  ;;  %v1213_v29 = vshll.u32 %v25420_v46, 16 }
 0x16f   :  { %v1070_v9 = vshll.u32 %v25425_v47, 16  ;;  %v678_v55 = vadd.f32 %v25266_v10, %v20283_v51  ;;  %v670_v59 = vadd.f32 %v25266_v10, %v669_v4  ;;  %v20284_v17 = vpop.f32.mrb[62].mxu0  ;;  %21510 = vmatmul.mubr.bf16.gmra.mrb[72].mxu0 %v9129_v44  ;;  %20386 = vmatpush3.bf16.msra.mxu1 %v24294_v30  ;;  %v1074_v21 = vshrl.u32 %v25425_v47, 16  ;;  %v24298_v44 = vld [vmem:[%s28452_s3 + $0xa8] sm:$0xff]  }
 0x170   :  { %v1197_v6 = vmax.bf16 %v1164_v13, %v25372_v50  ;;  %v25454_v36 = vmax.bf16 %v1196_v2, %v1065_v45  ;;  %v681_v52 = vadd.f32 %v25266_v10, %v20284_v17  ;;  %v672_v18 = vpop.f32.mrb[63].mxu0  ;;  %21513 = vmatprep.mubr.bf16.mxu0 %v9131_v1  ;;  %21542 = vmatpush3.bf16.msra.mxu0 %v24291_v8  ;;  %v1080_v53 = vrot.slane %v1078_v60, 1  ;;  %v25483_v1 = vld [vmem:[#allocation3 + $0x28] sm:$0xff]  ;;  %v25494_v60 = vld [vmem:[#allocation3 + $0x30] sm:$0xff] }
 0x171   :  { %v1072_v22 = vrot.slane %v1070_v9, 1  ;;  %v746_v24 = vmax.f32 %v678_v55, 0.0  ;;  %v673_v37 = vadd.f32 %v25266_v10, %v672_v18  ;;  %21543 = vmatprep.subr.bf16.mxu0 %v24293_v54  ;;  %20387 = vmatprep.subr.bf16.mxu1 %v24295_v57  ;;  %v9132_v30 = vrot.slane %v25416_v43, 1 }
 0x172   :  { %1276 = vst [vmem:[#allocation3 + $0xc8] sm:$0xff] %v25454_v36  ;;  %v747_v27 = vmax.f32 %v681_v52, 0.0  ;;  %v9134_v8 = vrot.slane %v25454_v36, 1  ;;  %v744_v32 = vmax.f32 %v670_v59, 0.0  ;;  %v1209_v45 = vshrl.u32 %v25291_v42, 16 }
 0x173   :  { %v1073_v10 = vsel %vm845_vm0, %v1068_v33, %v1072_v22  ;;  %v1076_v31 = vor.u32 %v1074_v21, %v1072_v22  ;;  %v745_v12 = vmax.f32 %v673_v37, 0.0  ;;  %20388 = vmatpush3.bf16.msra.mxu1 %v24295_v57  ;;  %v9133_v46 = vsel %vm1351_vm1, %v9130_v28, %v9132_v30  ;;  %v24299_v28 = vld [vmem:[%s28452_s3 + $0x38] sm:$0xff]   ;;  %v25512_v37 = vld [vmem:[%s28452_s3 + $0x80] sm:$0xff]  }
 0x174   :  { %v1165_v34 = vmax.bf16 %v1073_v10, %v25372_v50  ;;  %v25471_v35 = vmax.bf16 %v1197_v6, %v1073_v10  ;;  %v25473_v38 = vpack.c.bf16 %v747_v27, %v746_v24  ;;  %21544 = vmatpush3.bf16.msra.mxu0 %v24293_v54  ;;  %v9135_v50 = vsel %vm1351_vm1, %v9132_v30, %v9134_v8 }
 0x175   :  { %v1081_v23 = vsel %vm845_vm0, %v1076_v31, %v1080_v53  ;;  %v778_v51 = vpack.c.bf16 %v745_v12, %v744_v32  ;;  %20358 = vmatmul.mubr.bf16.gmra.mrb[8].mxu1 %v25483_v1  ;;  %21545 = vmatprep.subr.bf16.mxu0 %v24296_v19  ;;  %v1215_v2 = vrot.slane %v1213_v29, 1  ;;  %v1082_v4 = vshrl.u32 %v25418_v25, 16  ;;  %v24301_v31 = vld [vmem:[%s28452_s3 + $0xb8] sm:$0xff]  }
 0x176   :  { %v1166_v54 = vmax.bf16 %v1081_v23, %v25425_v47  ;;  %v1198_v57 = vmax.bf16 %v1165_v34, %v25425_v47  ;;  %1277 = vst [vmem:[#allocation3 + $0xd0] sm:$0xff] %v25471_v35  ;;  %v1094_v13 = vshll.u32 %v25473_v38, 16  ;;  %20361 = vmatprep.mubr.bf16.mxu1 %v25494_v60  ;;  %20389 = vmatprep.subr.bf16.mxu1 %v24297_v58  ;;  %v1098_v33 = vshrl.u32 %v25473_v38, 16  ;;  %v24300_v47 = vld [vmem:[%s28452_s3 + $0xb0] sm:$0xff]   ;;  %v25526_v34 = vld [vmem:[#allocation3 + $0x38] sm:$0xff] }
 0x177   :  { %v1086_v9 = vshll.u32 %v778_v51, 16  ;;  %21514 = vmatmul.mubr.bf16.gmra.mrb[76].mxu0 %v9133_v46  ;;  %20390 = vmatpush3.bf16.msra.mxu1 %v24297_v58  ;;  %v9136_v6 = vrot.slane %v25471_v35, 1  ;;  %v1084_v52 = vor.u32 %v1082_v4, %v1080_v53  ;;  %v1090_v18 = vshrl.u32 %v778_v51, 16  ;;  %v25559_v4 = vld [vmem:[#allocation3 + $0x50] sm:$0xff] }
 0x178   :  { %v1199_v55 = vmax.bf16 %v1166_v54, %v25418_v25  ;;  %v25503_v59 = vmax.bf16 %v1198_v57, %v1081_v23  ;;  %v1096_v17 = vrot.slane %v1094_v13, 1  ;;  %21517 = vmatprep.mubr.bf16.mxu0 %v9135_v50  ;;  %21546 = vmatpush3.bf16.msra.mxu0 %v24296_v19  ;;  %v1211_v21 = vor.u32 %v1209_v45, %v25312_v14 }
 0x179   :  { %v1088_v29 = vrot.slane %v1086_v9, 1  ;;  %20391 = vmatprep.subr.bf16.mxu1 %v24298_v44  ;;  %21547 = vmatprep.subr.bf16.mxu0 %v24299_v28  ;;  %v9137_v10 = vsel %vm1351_vm1, %v9134_v8, %v9136_v6 }
 0x17a   :  { %1278 = vst [vmem:[#allocation3 + $0xd8] sm:$0xff] %v25503_v59  ;;  %v1100_v22 = vor.u32 %v1098_v33, %v1096_v17  ;;  %v9138_v24 = vrot.slane %v25503_v59, 1 }
 0x17b   :  { %v1089_v27 = vsel %vm845_vm0, %v1084_v52, %v1088_v29  ;;  %v1092_v19 = vor.u32 %v1090_v18, %v1088_v29  ;;  %20392 = vmatpush3.bf16.msra.mxu1 %v24298_v44  ;;  %v25532_v44 = vld [vmem:[#allocation3 + $0x40] sm:$0xff] }
 0x17c   :  { %v1105_v53 = vsel %vm845_vm0, %v1100_v22, %v25445_v63  ;;  %v1167_v30 = vmax.bf16 %v1089_v27, %v25418_v25  ;;  %v25518_v58 = vmax.bf16 %v1199_v55, %v1089_v27  ;;  %20393 = vmatprep.subr.bf16.mxu1 %v24300_v47  ;;  %v9139_v63 = vsel %vm1351_vm1, %v9136_v6, %v9138_v24  ;;  %v1819_v29 = vld [vmem:[#allocation3] sm:$0xfc]  ;;  %v24310_v27 = vld [vmem:[%s28452_s3 + $0xd0] sm:$0xff]  }
 0x17d   :  { %v1169_v32 = vmax.bf16 %v1105_v53, %v25473_v38  ;;  %v1097_v12 = vsel %vm845_vm0, %v1092_v19, %v1096_v17  ;;  %20362 = vmatmul.mubr.bf16.gmra.mrb[12].mxu1 %v25526_v34  ;;  %21548 = vmatpush3.bf16.msra.mxu0 %v24299_v28  ;;  %v1216_v25 = vsel %vm845_vm0, %v1211_v21, %v1215_v2  ;;  %v25555_v2 = vld [vmem:[#allocation3 + $0x48] sm:$0xff]  ;;  %v9083_v17 = vld [vmem:[#allocation3 + $0x100] sm:$0x1]  ;;  %v1848_v19 = vrot.slane %v25447_v48, 2 }
 0x17e   :  { %v1168_v46 = vmax.bf16 %v1097_v12, %v778_v51  ;;  %v1200_v8 = vmax.bf16 %v1167_v30, %v778_v51  ;;  %1279 = vst [vmem:[#allocation3 + $0xe0] sm:$0xff] %v25518_v58  ;;  %20365 = vmatprep.mubr.bf16.mxu1 %v25532_v44  ;;  %21581 = vmatprep.subr.bf16.mxu0 %v25512_v37  ;;  %v9140_v28 = vrot.slane %v25518_v58, 1  ;;  %v24306_v51 = vld [vmem:[%s28452_s3 + $0xc0] sm:$0xff]   ;;  %v9148_v6 = vrot.slane %v9083_v17, 1 }
 0x17f   :  { %v1202_v23 = vmax.bf16 %v25291_v42, %v1169_v32  ;;  %21518 = vmatmul.mubr.bf16.gmra.mrb[80].mxu0 %v9137_v10  ;;  %20394 = vmatpush3.bf16.msra.mxu1 %v24300_v47  ;;  %v1208_v57 = vsel %vm845_vm0, %v1100_v22, %v25312_v14  ;;  %v24308_v22 = vld [vmem:[%s28452_s3 + $0xc8] sm:$0xff]   ;;  %v1850_v53 = vrot.slane %v25483_v1, 2  ;;  %v24307_v30 = vld [vmem:[%s28452_s3 + $0xa0] sm:$0xff]   ;;  %v24311_v10 = vld [vmem:[%s28452_s3 + $0xd8] sm:$0xff]   ;;  %v1860_v17 = vrot.slane %v25559_v4, 2 }
 0x180   :  { %v1201_v45 = vmax.bf16 %v1168_v46, %v25473_v38  ;;  %v25538_v50 = vmax.bf16 %v1200_v8, %v1097_v12  ;;  %21521 = vmatprep.mubr.bf16.mxu0 %v9139_v63  ;;  %20395 = vmatprep.subr.bf16.mxu1 %v24301_v31  ;;  %v9141_v13 = vsel %vm1351_vm1, %v9138_v24, %v9140_v28  ;;  %v24309_v12 = vld [vmem:[%s28452_s3 + $0xa8] sm:$0xff]   ;;  %v24313_v63 = vld [vmem:[%s28452_s3 + $0xe0] sm:$0xff]   ;;  %v1854_v46 = vrot.slane %v25526_v34, 2  ;;  %v24312_v8 = vld [vmem:[%s28452_s3 + $0xb0] sm:$0xff]  }
 0x181   :  { %v25544_v54 = vmax.bf16 %v1216_v25, %v1202_v23  ;;  %v1851_v32 = vsel %vm1840_vm2, %v1848_v19, %v1850_v53  ;;  %v1852_v25 = vrot.slane %v25494_v60, 2  ;;  %v24314_v23 = vld [vmem:[%s28452_s3 + $0xe8] sm:$0xff]  }
 0x182   :  { %v25548_v42 = vmax.bf16 %v1208_v57, %v1201_v45  ;;  %1280 = vst [vmem:[#allocation3 + $0xe8] sm:$0xff] %v25538_v50  ;;  %v9142_v38 = vrot.slane %v25538_v50, 1  ;;  %v24316_v57 = vld [vmem:[%s28452_s3 + $0xf0] sm:$0xff]  }
 0x183   :  { %1282 = vst [vmem:[#allocation3 + $0xf8] sm:$0xff] %v25544_v54  ;;  %20396 = vmatpush3.bf16.msra.mxu1 %v24301_v31  ;;  %v9146_v9 = vrot.slane %v25544_v54, 1  ;;  %v1853_v45 = vsel %vm1840_vm2, %v1850_v53, %v1852_v25 }
 0x184   :  { %1281 = vst [vmem:[#allocation3 + $0xf0] sm:$0xff] %v25548_v42  ;;  %20429 = vmatprep.subr.bf16.mxu1 %v24306_v51  ;;  %v9143_v14 = vsel %vm1351_vm1, %v9140_v28, %v9142_v38  ;;  %v9144_v33 = vrot.slane %v25548_v42, 1  ;;  %v1855_v28 = vsel %vm1840_vm2, %v1852_v25, %v1854_v46 }
 0x185   :  { %20366 = vmatmul.mubr.bf16.gmra.mrb[16].mxu1 %v25555_v2  ;;  %v9149_v52 = vsel %vm1351_vm1, %v9146_v9, %v9148_v6  ;;  %v25656_v6 = vld [vmem:[#allocation3 + $0x58] sm:$0xff] }
 0x186   :  { %20369 = vmatprep.mubr.bf16.mxu1 %v25559_v4  ;;  %v9145_v47 = vsel %vm1351_vm1, %v9142_v38, %v9144_v33  ;;  %v9147_v55 = vsel %vm1351_vm1, %v9144_v33, %v9146_v9  ;;  %v1856_v38 = vrot.slane %v25532_v44, 2  ;;  %v24317_v33 = vld [vmem:[%s28452_s3 + $0xf8] sm:$0xff]  }
 0x187   :  { %21522 = vmatmul.mubr.bf16.gmra.mrb[84].mxu0 %v9141_v13  ;;  %v1858_v13 = vrot.slane %v25555_v2, 2 }
 0x188   :  { %21525 = vmatprep.mubr.bf16.mxu0 %v9143_v14  ;;  %v25640_v14 = vld [vmem:[%s28452_s3 + $0xc0] sm:$0xff]   ;;  %v1857_v9 = vsel %vm1840_vm2, %v1854_v46, %v1856_v38  ;;  %v9607_v46 = vrot.slane %v25308_v11, 2 }
 0x18d   :  { %20370 = vmatmul.mubr.bf16.gmra.mrb[20].mxu1 %v25211_v5  ;;  %v1841_v5 = vrot.slane %v1819_v29, 2  ;;  %v1861_v29 = vsel %vm1840_vm2, %v1858_v13, %v1860_v17 }
 0x18e   :  { %20373 = vmatprep.mubr.bf16.mxu1 %v25224_v0  ;;  %v1842_v0 = vrot.slane %v25097_v15, 2 }
 0x18f   :  { %21526 = vmatmul.mubr.bf16.gmra.mrb[88].mxu0 %v9145_v47  ;;  %v1859_v47 = vsel %vm1840_vm2, %v1856_v38, %v1858_v13  ;;  %v24320_v38 = vld [vmem:[%s28452_s3 + $0xd0] sm:$0xff]   ;;  %v9611_v13 = vrot.slane %v25331_v62, 2 }
 0x190   :  { %21529 = vmatprep.mubr.bf16.mxu0 %v9147_v55  ;;  %v1843_v18 = vsel %vm1840_vm2, %v1841_v5, %v1842_v0  ;;  %v25652_v55 = vld [vmem:[%s28452_s3 + $0x100] sm:$0xff]  }
 0x195   :  { %20374 = vmatmul.mubr.bf16.gmra.mrb[24].mxu1 %v25241_v40  ;;  %v24303_v40 = vld [vmem:[%s28452_s3 + $0x88] sm:$0xff]  }
 0x196   :  { %20377 = vmatprep.mubr.bf16.mxu1 %v25252_v61  ;;  %v1844_v61 = vrot.slane %v25390_v7, 2 }
 0x197   :  { %21530 = vmatmul.mubr.bf16.gmra.mrb[92].mxu0 %v9149_v52  ;;  %v1862_v52 = vrot.slane %v25656_v6, 2 }
 0x198   :  { %21549 = vmatprep.mubr.bf16.mxu0 %v25289_v41  ;;  %v1846_v41 = vrot.slane %v25427_v56, 2  ;;  %v1845_v21 = vsel %vm1840_vm2, %v1842_v0, %v1844_v61  ;;  %v25663_v0 = vld [vmem:[#allocation3 + $0x60] sm:$0xff] }
 0x199   :  { %v1863_v5 = vsel %vm1840_vm2, %v1860_v17, %v1862_v52  ;;  %v24326_v17 = vld [vmem:[%s28452_s3 + $0x110] sm:$0xff]  }
 0x19a   :  { %v1847_v24 = vsel %vm1840_vm2, %v1844_v61, %v1846_v41  ;;  %v1849_v31 = vsel %vm1840_vm2, %v1846_v41, %v1848_v19 }
 0x19d   :  { %20378 = vmatmul.mubr.bf16.gmra.mrb[28].mxu1 %v25270_v16  ;;  %v24304_v16 = vld [vmem:[%s28452_s3 + $0x90] sm:$0xff]  }
 0x19e   :  { %20397 = vmatprep.mubr.bf16.mxu1 %v1843_v18  ;;  %v1864_v18 = vrot.slane %v25663_v0, 2 }
 0x19f   :  { %21550 = vmatmul.mubr.bf16.vlgmr.msra.gmra.mrb[64].mxu0 %v25303_v3 }
 0x1a0   :  { %21582 = vmatpush3.bf16.msra.mxu0 %v25512_v37  ;;  %21553 = vmatprep.mubr.bf16.mxu0 %v25308_v11  ;;  %v24305_v37 = vld [vmem:[%s28452_s3 + $0x98] sm:$0xff]   ;;  %v1865_v41 = vsel %vm1840_vm2, %v1862_v52, %v1864_v18  ;;  %v2156_v11 = vrot.slane %v25390_v7, 3  ;;  %v2160_v52 = vrot.slane %v25447_v48, 3 }
 0x1a1   :  { %21583 = vmatprep.subr.bf16.mxu0 %v24303_v40 }
 0x1a4   :  { %21584 = vmatpush3.bf16.msra.mxu0 %v24303_v40  ;;  %v25667_v40 = vld [vmem:[#allocation3 + $0x68] sm:$0xff] }
 0x1a5   :  { %20398 = vmatmul.mubr.bf16.vlgmr.msra.gmra.mrb[0].mxu1 %v1845_v21  ;;  %21585 = vmatprep.subr.bf16.mxu0 %v24304_v16  ;;  %v1866_v61 = vrot.slane %v25667_v40, 2 }
 0x1a6   :  { %20401 = vmatprep.mubr.bf16.mxu1 %v1847_v24  ;;  %20430 = vmatpush3.bf16.msra.mxu1 %v24306_v51  ;;  %v24315_v51 = vld [vmem:[%s28452_s3 + $0xb8] sm:$0xff]   ;;  %v9584_v24 = vld [vmem:[#allocation3 + $0x80] sm:$0xfc] }
 0x1a7   :  { %21554 = vmatmul.mubr.bf16.gmra.mrb[68].mxu0 %v25323_v39  ;;  %20431 = vmatprep.subr.bf16.mxu1 %v24308_v22  ;;  %v9604_v19 = vrot.slane %v9584_v24, 2  ;;  %v24329_v24 = vld [vmem:[%s28452_s3 + $0x120] sm:$0xff]  }
 0x1a8   :  { %21557 = vmatprep.mubr.bf16.mxu0 %v25331_v62  ;;  %21586 = vmatpush3.bf16.msra.mxu0 %v24304_v16  ;;  %v1867_v16 = vsel %vm1840_vm2, %v1864_v18, %v1866_v61  ;;  %v9617_v18 = vrot.slane %v25400_v20, 2 }
 0x1a9   :  { %21587 = vmatprep.subr.bf16.mxu0 %v24305_v37 }
 0x1aa   :  { %20432 = vmatpush3.bf16.msra.mxu1 %v24308_v22  ;;  %v25673_v22 = vld [vmem:[#allocation3 + $0x70] sm:$0xff] }
 0x1ab   :  { %20433 = vmatprep.subr.bf16.mxu1 %v24310_v27  ;;  %v1868_v21 = vrot.slane %v25673_v22, 2 }
 0x1ac   :  { %21588 = vmatpush3.bf16.msra.mxu0 %v24305_v37  ;;  %v25677_v37 = vld [vmem:[#allocation3 + $0x78] sm:$0xff] }
 0x1ad   :  { %20402 = vmatmul.mubr.bf16.gmra.mrb[4].mxu1 %v1849_v31  ;;  %21589 = vmatprep.subr.bf16.mxu0 %v24307_v30  ;;  %v1869_v53 = vsel %vm1840_vm2, %v1866_v61, %v1868_v21  ;;  %v9605_v31 = vrot.slane %v25303_v3, 2  ;;  %v24327_v61 = vld [vmem:[%s28452_s3 + $0x118] sm:$0xff]  }
 0x1ae   :  { %20405 = vmatprep.mubr.bf16.mxu1 %v1851_v32  ;;  %20434 = vmatpush3.bf16.msra.mxu1 %v24310_v27  ;;  %v1870_v27 = vrot.slane %v25677_v37, 2  ;;  %v2131_v32 = vld [vmem:[#allocation3] sm:$0xf8] }
 0x1af   :  { %21558 = vmatmul.mubr.bf16.gmra.mrb[72].mxu0 %v25354_v26  ;;  %20435 = vmatprep.subr.bf16.mxu1 %v24311_v10  ;;  %v2153_v25 = vrot.slane %v2131_v32, 3 }
 0x1b0   :  { %21561 = vmatprep.mubr.bf16.mxu0 %v25370_v49  ;;  %21590 = vmatpush3.bf16.msra.mxu0 %v24307_v30  ;;  %v1871_v30 = vsel %vm1840_vm2, %v1868_v21, %v1870_v27  ;;  %v24325_v21 = vld [vmem:[%s28452_s3 + $0xe8] sm:$0xff]  }
 0x1b1   :  { %21591 = vmatprep.subr.bf16.mxu0 %v24309_v12 }
 0x1b2   :  { %20436 = vmatpush3.bf16.msra.mxu1 %v24311_v10  ;;  %v1820_v10 = vld [vmem:[#allocation3 + $0x80] sm:$0x3] }
 0x1b3   :  { %20437 = vmatprep.subr.bf16.mxu1 %v24313_v63 }
 0x1b4   :  { %21592 = vmatpush3.bf16.msra.mxu0 %v24309_v12  ;;  %v9606_v12 = vsel %vm1840_vm2, %v9604_v19, %v9605_v31  ;;  %v2166_v19 = vrot.slane %v25526_v34, 3 }
 0x1b5   :  { %20406 = vmatmul.mubr.bf16.gmra.mrb[8].mxu1 %v1853_v45  ;;  %21593 = vmatprep.subr.bf16.mxu0 %v24312_v8 }
 0x1b6   :  { %20409 = vmatprep.mubr.bf16.mxu1 %v1855_v28  ;;  %20438 = vmatpush3.bf16.msra.mxu1 %v24313_v63  ;;  %v1872_v63 = vrot.slane %v1820_v10, 2  ;;  %v24319_v28 = vld [vmem:[%s28452_s3 + $0xc8] sm:$0xff]   ;;  %v9621_v10 = vrot.slane %v25454_v36, 2 }
 0x1b7   :  { %21562 = vmatmul.mubr.bf16.gmra.mrb[76].mxu0 %v25400_v20  ;;  %20439 = vmatprep.subr.bf16.mxu1 %v24314_v23 }
 0x1b8   :  { %21565 = vmatprep.mubr.bf16.mxu0 %v25416_v43  ;;  %21594 = vmatpush3.bf16.msra.mxu0 %v24312_v8  ;;  %v2154_v8 = vrot.slane %v25097_v15, 3  ;;  %v1873_v45 = vsel %vm1840_vm2, %v1870_v27, %v1872_v63  ;;  %v2164_v27 = vrot.slane %v25494_v60, 3  ;;  %v24331_v63 = vld [vmem:[%s28452_s3 + $0xf8] sm:$0xff]  }
 0x1b9   :  { %21595 = vmatprep.subr.bf16.mxu0 %v24315_v51 }
 0x1ba   :  { %20440 = vmatpush3.bf16.msra.mxu1 %v24314_v23  ;;  %v9609_v23 = vrot.slane %v25323_v39, 2  ;;  %v2155_v3 = vsel %vm2152_vm3, %v2153_v25, %v2154_v8  ;;  %v2158_v39 = vrot.slane %v25427_v56, 3  ;;  %v2157_v7 = vsel %vm2152_vm3, %v2154_v8, %v2156_v11 }
 0x1bb   :  { %20441 = vmatprep.subr.bf16.mxu1 %v24316_v57  ;;  %v2168_v8 = vrot.slane %v25532_v44, 3 }
 0x1bc   :  { %21596 = vmatpush3.bf16.msra.mxu0 %v24315_v51  ;;  %v9608_v51 = vsel %vm1840_vm2, %v9605_v31, %v9607_v46  ;;  %v9612_v62 = vsel %vm1840_vm2, %v9609_v23, %v9611_v13  ;;  %v24330_v31 = vld [vmem:[%s28452_s3 + $0x128] sm:$0xff]  }
 0x1bd   :  { %20410 = vmatmul.mubr.bf16.gmra.mrb[12].mxu1 %v1857_v9  ;;  %21629 = vmatprep.subr.bf16.mxu0 %v25640_v14  ;;  %v24324_v9 = vld [vmem:[%s28452_s3 + $0x108] sm:$0xff]  }
 0x1be   :  { %20413 = vmatprep.mubr.bf16.mxu1 %v1859_v47  ;;  %20442 = vmatpush3.bf16.msra.mxu1 %v24316_v57  ;;  %v9610_v57 = vsel %vm1840_vm2, %v9607_v46, %v9609_v23  ;;  %v24321_v47 = vld [vmem:[%s28452_s3 + $0xd8] sm:$0xff]   ;;  %v24332_v46 = vld [vmem:[%s28452_s3 + $0x130] sm:$0xff]   ;;  %v2170_v23 = vrot.slane %v25555_v2, 3 }
 0x1bf   :  { %21566 = vmatmul.mubr.bf16.gmra.mrb[80].mxu0 %v25454_v36  ;;  %20443 = vmatprep.subr.bf16.mxu1 %v24317_v33 }
 0x1c0   :  { %21569 = vmatprep.mubr.bf16.mxu0 %v25471_v35 }
 0x1c2   :  { %20444 = vmatpush3.bf16.msra.mxu1 %v24317_v33  ;;  %v9613_v33 = vrot.slane %v25354_v26, 2 }
 0x1c3   :  { %20477 = vmatprep.subr.bf16.mxu1 %v25652_v55 }
 0x1c4   :  { %v9614_v26 = vsel %vm1840_vm2, %v9611_v13, %v9613_v33  ;;  %v25777_v13 = vld [vmem:[%s28452_s3 + $0x140] sm:$0xff]  }
 0x1c5   :  { %20414 = vmatmul.mubr.bf16.gmra.mrb[16].mxu1 %v1861_v29  ;;  %v2162_v29 = vrot.slane %v25483_v1, 3 }
 0x1c6   :  { %20417 = vmatprep.mubr.bf16.mxu1 %v1863_v5  ;;  %v24323_v5 = vld [vmem:[%s28452_s3 + $0xe0] sm:$0xff]  }
 0x1c7   :  { %21570 = vmatmul.mubr.bf16.gmra.mrb[84].mxu0 %v25503_v59  ;;  %v2165_v32 = vsel %vm2152_vm3, %v2162_v29, %v2164_v27 }
 0x1c8   :  { %21573 = vmatprep.mubr.bf16.mxu0 %v25518_v58 }
 0x1cd   :  { %20418 = vmatmul.mubr.bf16.gmra.mrb[20].mxu1 %v1865_v41  ;;  %v2161_v41 = vsel %vm2152_vm3, %v2158_v39, %v2160_v52 }
 0x1ce   :  { %20421 = vmatprep.mubr.bf16.mxu1 %v1867_v16  ;;  %v2163_v16 = vsel %vm2152_vm3, %v2160_v52, %v2162_v29  ;;  %v2176_v52 = vrot.slane %v25663_v0, 3  ;;  %v2178_v29 = vrot.slane %v25667_v40, 3 }
 0x1cf   :  { %21574 = vmatmul.mubr.bf16.gmra.mrb[88].mxu0 %v25538_v50 }
 0x1d0   :  { %21577 = vmatprep.mubr.bf16.mxu0 %v25548_v42 }
 0x1d5   :  { %20422 = vmatmul.mubr.bf16.gmra.mrb[24].mxu1 %v1869_v53  ;;  %v24328_v53 = vld [vmem:[%s28452_s3 + $0xf0] sm:$0xff]  }
 0x1d6   :  { %20425 = vmatprep.mubr.bf16.mxu1 %v1871_v30  ;;  %v9619_v30 = vrot.slane %v25416_v43, 2 }
 0x1d7   :  { %21578 = vmatmul.mubr.bf16.gmra.mrb[92].mxu0 %v25544_v54 }
 0x1d8   :  { %21597 = vmatprep.mubr.bf16.mxu0 %v9606_v12  ;;  %v2167_v12 = vsel %vm2152_vm3, %v2164_v27, %v2166_v19  ;;  %v9620_v43 = vsel %vm1840_vm2, %v9617_v18, %v9619_v30  ;;  %v9622_v25 = vsel %vm1840_vm2, %v9619_v30, %v9621_v10 }
 0x1dd   :  { %20426 = vmatmul.mubr.bf16.gmra.mrb[28].mxu1 %v1873_v45  ;;  %v25762_v45 = vld [vmem:[%s28452_s3 + $0x100] sm:$0xff]  }
 0x1de   :  { %20445 = vmatprep.mubr.bf16.mxu1 %v2155_v3  ;;  %v9623_v3 = vrot.slane %v25471_v35, 2 }
 0x1df   :  { %21598 = vmatmul.mubr.bf16.vlgmr.msra.gmra.mrb[64].mxu0 %v9608_v51  ;;  %v24333_v51 = vld [vmem:[%s28452_s3 + $0x138] sm:$0xff]  }
 0x1e0   :  { %21630 = vmatpush3.bf16.msra.mxu0 %v25640_v14  ;;  %21601 = vmatprep.mubr.bf16.mxu0 %v9610_v57  ;;  %v2159_v14 = vsel %vm2152_vm3, %v2156_v11, %v2158_v39  ;;  %v2169_v57 = vsel %vm2152_vm3, %v2166_v19, %v2168_v8  ;;  %v2171_v11 = vsel %vm2152_vm3, %v2168_v8, %v2170_v23  ;;  %v25805_v8 = vld [vmem:[#allocation3 + $0x90] sm:$0xff] }
 0x1e1   :  { %21631 = vmatprep.subr.bf16.mxu0 %v24319_v28  ;;  %v9624_v39 = vsel %vm1840_vm2, %v9621_v10, %v9623_v3  ;;  %v2132_v10 = vld [vmem:[#allocation3 + $0x80] sm:$0x7] }
 0x1e4   :  { %21632 = vmatpush3.bf16.msra.mxu0 %v24319_v28  ;;  %v9625_v28 = vrot.slane %v25503_v59, 2 }
 0x1e5   :  { %20446 = vmatmul.mubr.bf16.vlgmr.msra.gmra.mrb[0].mxu1 %v2157_v7  ;;  %21633 = vmatprep.subr.bf16.mxu0 %v24320_v38  ;;  %v9627_v7 = vrot.slane %v25518_v58, 2 }
 0x1e6   :  { %20449 = vmatprep.mubr.bf16.mxu1 %v2159_v14  ;;  %20478 = vmatpush3.bf16.msra.mxu1 %v25652_v55  ;;  %v9615_v55 = vrot.slane %v25370_v49, 2  ;;  %v9629_v14 = vrot.slane %v25538_v50, 2 }
 0x1e7   :  { %21602 = vmatmul.mubr.bf16.gmra.mrb[68].mxu0 %v9612_v62  ;;  %20479 = vmatprep.subr.bf16.mxu1 %v24324_v9 }
 0x1e8   :  { %21605 = vmatprep.mubr.bf16.mxu0 %v9614_v26  ;;  %21634 = vmatpush3.bf16.msra.mxu0 %v24320_v38  ;;  %v9616_v49 = vsel %vm1840_vm2, %v9613_v33, %v9615_v55  ;;  %v9618_v20 = vsel %vm1840_vm2, %v9615_v55, %v9617_v18  ;;  %v9626_v38 = vsel %vm1840_vm2, %v9623_v3, %v9625_v28  ;;  %v2172_v33 = vrot.slane %v25559_v4, 3 }
 0x1e9   :  { %21635 = vmatprep.subr.bf16.mxu0 %v24321_v47  ;;  %v9628_v26 = vsel %vm1840_vm2, %v9625_v28, %v9627_v7  ;;  %v9633_v55 = vrot.slane %v25544_v54, 2  ;;  %v2466_v3 = vrot.slane %v25097_v15, 4  ;;  %v25809_v28 = vld [vmem:[#allocation3 + $0x98] sm:$0xff]  ;;  %v24728_v15 = vld [vmem:[#allocation3 + $0x10] sm:$0xff] }
 0x1ea   :  { %20480 = vmatpush3.bf16.msra.mxu1 %v24324_v9  ;;  %v2174_v9 = vrot.slane %v25656_v6, 3 }
 0x1eb   :  { %20481 = vmatprep.subr.bf16.mxu1 %v24326_v17 }
 0x1ec   :  { %21636 = vmatpush3.bf16.msra.mxu0 %v24321_v47  ;;  %v2173_v47 = vsel %vm2152_vm3, %v2170_v23, %v2172_v33  ;;  %v2175_v62 = vsel %vm2152_vm3, %v2172_v33, %v2174_v9  ;;  %v2177_v18 = vsel %vm2152_vm3, %v2174_v9, %v2176_v52  ;;  %v9917_v23 = vrot.slane %v25805_v8, 3 }
 0x1ed   :  { %20450 = vmatmul.mubr.bf16.gmra.mrb[4].mxu1 %v2161_v41  ;;  %21637 = vmatprep.subr.bf16.mxu0 %v24323_v5  ;;  %v2468_v9 = vrot.slane %v24728_v15, 4 }
 0x1ee   :  { %20453 = vmatprep.mubr.bf16.mxu1 %v2163_v16  ;;  %20482 = vmatpush3.bf16.msra.mxu1 %v24326_v17  ;;  %v9630_v17 = vsel %vm1840_vm2, %v9627_v7, %v9629_v14  ;;  %v2470_v7 = vrot.slane %v25427_v56, 4 }
 0x1ef   :  { %21606 = vmatmul.mubr.bf16.gmra.mrb[72].mxu0 %v9616_v49  ;;  %20483 = vmatprep.subr.bf16.mxu1 %v24327_v61  ;;  %v2180_v49 = vrot.slane %v25673_v22, 3 }
 0x1f0   :  { %21609 = vmatprep.mubr.bf16.mxu0 %v9618_v20  ;;  %21638 = vmatpush3.bf16.msra.mxu0 %v24323_v5  ;;  %v9631_v5 = vrot.slane %v25548_v42, 2  ;;  %v9894_v20 = vld [vmem:[#allocation3 + $0x80] sm:$0xf8]  ;;  %v2471_v56 = vsel %vm2464_vm4, %v2468_v9, %v2470_v7 }
 0x1f1   :  { %21639 = vmatprep.subr.bf16.mxu0 %v24325_v21  ;;  %v9914_v19 = vrot.slane %v9894_v20, 3 }
 0x1f2   :  { %20484 = vmatpush3.bf16.msra.mxu1 %v24327_v61  ;;  %v2179_v61 = vsel %vm2152_vm3, %v2176_v52, %v2178_v29  ;;  %v9632_v41 = vsel %vm1840_vm2, %v9629_v14, %v9631_v5  ;;  %v9634_v16 = vsel %vm1840_vm2, %v9631_v5, %v9633_v55  ;;  %v24336_v14 = vld [vmem:[%s28452_s3 + $0x110] sm:$0xff]   ;;  %v2469_v52 = vsel %vm2464_vm4, %v2466_v3, %v2468_v9 }
 0x1f3   :  { %20485 = vmatprep.subr.bf16.mxu1 %v24329_v24 }
 0x1f4   :  { %21640 = vmatpush3.bf16.msra.mxu0 %v24325_v21  ;;  %v9585_v21 = vld [vmem:[#allocation3 + $0x100] sm:$0x3] }
 0x1f5   :  { %20454 = vmatmul.mubr.bf16.gmra.mrb[8].mxu1 %v2165_v32  ;;  %21641 = vmatprep.subr.bf16.mxu0 %v24328_v53  ;;  %v9635_v27 = vrot.slane %v9585_v21, 2 }
 0x1f6   :  { %20457 = vmatprep.mubr.bf16.mxu1 %v2167_v12  ;;  %20486 = vmatpush3.bf16.msra.mxu1 %v24329_v24  ;;  %v2182_v24 = vrot.slane %v25677_v37, 3 }
 0x1f7   :  { %21610 = vmatmul.mubr.bf16.gmra.mrb[76].mxu0 %v9620_v43  ;;  %20487 = vmatprep.subr.bf16.mxu1 %v24330_v31  ;;  %v9636_v12 = vsel %vm1840_vm2, %v9633_v55, %v9635_v27  ;;  %v24341_v27 = vld [vmem:[%s28452_s3 + $0x128] sm:$0xff]  }
 0x1f8   :  { %21613 = vmatprep.mubr.bf16.mxu0 %v9622_v25  ;;  %21642 = vmatpush3.bf16.msra.mxu0 %v24328_v53  ;;  %v2181_v53 = vsel %vm2152_vm3, %v2178_v29, %v2180_v49  ;;  %v2183_v30 = vsel %vm2152_vm3, %v2180_v49, %v2182_v24  ;;  %v2184_v25 = vrot.slane %v2132_v10, 3  ;;  %v24337_v29 = vld [vmem:[%s28452_s3 + $0x118] sm:$0xff]   ;;  %v2476_v10 = vrot.slane %v25494_v60, 4  ;;  %v24346_v60 = vld [vmem:[%s28452_s3 + $0x168] sm:$0xff]  }
 0x1f9   :  { %21643 = vmatprep.subr.bf16.mxu0 %v24331_v63  ;;  %v25852_v49 = vld [vmem:[#allocation3 + $0xb8] sm:$0xff] }
 0x1fa   :  { %20488 = vmatpush3.bf16.msra.mxu1 %v24330_v31  ;;  %v25800_v31 = vld [vmem:[#allocation3 + $0x88] sm:$0xff]  ;;  %v9927_v20 = vrot.slane %v25852_v49, 3 }
 0x1fb   :  { %20489 = vmatprep.subr.bf16.mxu1 %v24332_v46  ;;  %v9915_v32 = vrot.slane %v25800_v31, 3 }
 0x1fc   :  { %21644 = vmatpush3.bf16.msra.mxu0 %v24331_v63  ;;  %v2443_v63 = vld [vmem:[#allocation3] sm:$0xf0] }
 0x1fd   :  { %20458 = vmatmul.mubr.bf16.gmra.mrb[12].mxu1 %v2169_v57  ;;  %21677 = vmatprep.subr.bf16.mxu0 %v25762_v45  ;;  %v9916_v43 = vsel %vm2152_vm3, %v9914_v19, %v9915_v32  ;;  %v2185_v57 = vsel %vm2152_vm3, %v2182_v24, %v2184_v25  ;;  %v9931_v25 = vrot.slane %v25454_v36, 3 }
 0x1fe   :  { %20461 = vmatprep.mubr.bf16.mxu1 %v2171_v11  ;;  %20490 = vmatpush3.bf16.msra.mxu1 %v24332_v46  ;;  %v2465_v46 = vrot.slane %v2443_v63, 4  ;;  %v25873_v63 = vld [vmem:[#allocation3 + $0xc0] sm:$0xff] }
 0x1ff   :  { %21614 = vmatmul.mubr.bf16.gmra.mrb[80].mxu0 %v9624_v39  ;;  %20491 = vmatprep.subr.bf16.mxu1 %v24333_v51  ;;  %v24335_v39 = vld [vmem:[%s28452_s3 + $0x108] sm:$0xff]  }
 0x200   :  { %21617 = vmatprep.mubr.bf16.mxu0 %v9626_v38  ;;  %v2467_v11 = vsel %vm2464_vm4, %v2465_v46, %v2466_v3  ;;  %v9918_v38 = vsel %vm2152_vm3, %v9915_v32, %v9917_v23  ;;  %v2478_v32 = vrot.slane %v25526_v34, 4 }
 0x202   :  { %20492 = vmatpush3.bf16.msra.mxu1 %v24333_v51  ;;  %v9919_v51 = vrot.slane %v25809_v28, 3  ;;  %v2479_v34 = vsel %vm2464_vm4, %v2476_v10, %v2478_v32 }
 0x203   :  { %20525 = vmatprep.subr.bf16.mxu1 %v25777_v13 }
 0x204   :  { %v9920_v33 = vsel %vm2152_vm3, %v9917_v23, %v9919_v51  ;;  %v24347_v23 = vld [vmem:[%s28452_s3 + $0x138] sm:$0xff]  }
 0x205   :  { %20462 = vmatmul.mubr.bf16.gmra.mrb[16].mxu1 %v2173_v47  ;;  %v25824_v47 = vld [vmem:[#allocation3 + $0xa0] sm:$0xff] }
 0x206   :  { %20465 = vmatprep.mubr.bf16.mxu1 %v2175_v62  ;;  %v9921_v62 = vrot.slane %v25824_v47, 3 }
 0x207   :  { %21618 = vmatmul.mubr.bf16.gmra.mrb[84].mxu0 %v9628_v26  ;;  %v25827_v26 = vld [vmem:[#allocation3 + $0xa8] sm:$0xff] }
 0x208   :  { %21621 = vmatprep.mubr.bf16.mxu0 %v9630_v17  ;;  %v9923_v17 = vrot.slane %v25827_v26, 3  ;;  %v9922_v5 = vsel %vm2152_vm3, %v9919_v51, %v9921_v62  ;;  %v24348_v51 = vld [vmem:[%s28452_s3 + $0x170] sm:$0xff]  }
 0x20a   :  { %v9924_v55 = vsel %vm2152_vm3, %v9921_v62, %v9923_v17  ;;  %v9937_v62 = vrot.slane %v25518_v58, 3  ;;  %v2490_v58 = vrot.slane %v25667_v40, 4  ;;  %v10204_v40 = vld [vmem:[#allocation3 + $0x80] sm:$0xf0] }
 0x20d   :  { %20466 = vmatmul.mubr.bf16.gmra.mrb[20].mxu1 %v2177_v18  ;;  %v24342_v18 = vld [vmem:[%s28452_s3 + $0x150] sm:$0xff]  }
 0x20e   :  { %20469 = vmatprep.mubr.bf16.mxu1 %v2179_v61  ;;  %v2472_v61 = vrot.slane %v25447_v48, 4  ;;  %v24343_v48 = vld [vmem:[%s28452_s3 + $0x158] sm:$0xff]  }
 0x20f   :  { %21622 = vmatmul.mubr.bf16.gmra.mrb[88].mxu0 %v9632_v41  ;;  %v2474_v41 = vrot.slane %v25483_v1, 4 }
 0x210   :  { %21625 = vmatprep.mubr.bf16.mxu0 %v9634_v16  ;;  %v24339_v16 = vld [vmem:[%s28452_s3 + $0x120] sm:$0xff]   ;;  %v2473_v1 = vsel %vm2464_vm4, %v2470_v7, %v2472_v61  ;;  %v2484_v7 = vrot.slane %v25559_v4, 4 }
 0x211   :  { %v2475_v24 = vsel %vm2464_vm4, %v2472_v61, %v2474_v41  ;;  %v2477_v46 = vsel %vm2464_vm4, %v2474_v41, %v2476_v10  ;;  %v9895_v41 = vld [vmem:[#allocation3 + $0x100] sm:$0x7] }
 0x215   :  { %20470 = vmatmul.mubr.bf16.gmra.mrb[24].mxu1 %v2181_v53 }
 0x216   :  { %20473 = vmatprep.mubr.bf16.mxu1 %v2183_v30  ;;  %v24345_v30 = vld [vmem:[%s28452_s3 + $0x160] sm:$0xff]  }
 0x217   :  { %21626 = vmatmul.mubr.bf16.gmra.mrb[92].mxu0 %v9636_v12  ;;  %v24344_v12 = vld [vmem:[%s28452_s3 + $0x130] sm:$0xff]  }
 0x218   :  { %21645 = vmatprep.mubr.bf16.mxu0 %v9916_v43  ;;  %v9929_v43 = vrot.slane %v25873_v63, 3 }
 0x21a   :  { %v9930_v3 = vsel %vm2152_vm3, %v9927_v20, %v9929_v43  ;;  %v9932_v36 = vsel %vm2152_vm3, %v9929_v43, %v9931_v25  ;;  %v24356_v43 = vld [vmem:[%s28452_s3 + $0x188] sm:$0xff]  }
 0x21d   :  { %20474 = vmatmul.mubr.bf16.gmra.mrb[28].mxu1 %v2185_v57  ;;  %v2480_v57 = vrot.slane %v25532_v44, 4  ;;  %v24349_v44 = vld [vmem:[%s28452_s3 + $0x178] sm:$0xff]  }
 0x21e   :  { %20493 = vmatprep.mubr.bf16.mxu1 %v2467_v11  ;;  %v2482_v11 = vrot.slane %v25555_v2, 4 }
 0x21f   :  { %21646 = vmatmul.mubr.bf16.vlgmr.msra.gmra.mrb[64].mxu0 %v9918_v38  ;;  %v9933_v38 = vrot.slane %v25471_v35, 3  ;;  %v2481_v15 = vsel %vm2464_vm4, %v2478_v32, %v2480_v57 }
 0x220   :  { %21678 = vmatpush3.bf16.msra.mxu0 %v25762_v45  ;;  %21649 = vmatprep.mubr.bf16.mxu0 %v9920_v33  ;;  %v24340_v45 = vld [vmem:[%s28452_s3 + $0x148] sm:$0xff]   ;;  %v9935_v33 = vrot.slane %v25503_v59, 3  ;;  %v2483_v2 = vsel %vm2464_vm4, %v2480_v57, %v2482_v11  ;;  %v25910_v59 = vld [vmem:[%s28452_s3 + $0x180] sm:$0xff]  }
 0x221   :  { %21679 = vmatprep.subr.bf16.mxu0 %v24335_v39  ;;  %v9934_v9 = vsel %vm2152_vm3, %v9931_v25, %v9933_v38  ;;  %v25953_v25 = vld [vmem:[#allocation3 + $0x18] sm:$0xff]  ;;  %v25976_v57 = vld [vmem:[#allocation3 + $0x28] sm:$0xff] }
 0x222   :  { %v9936_v35 = vsel %vm2152_vm3, %v9933_v38, %v9935_v33  ;;  %v24361_v38 = vld [vmem:[%s28452_s3 + $0x1a0] sm:$0xff]  }
 0x224   :  { %21680 = vmatpush3.bf16.msra.mxu0 %v24335_v39  ;;  %v25895_v39 = vld [vmem:[%s28452_s3 + $0x140] sm:$0xff]  }
 0x225   :  { %20494 = vmatmul.mubr.bf16.vlgmr.msra.gmra.mrb[0].mxu1 %v2469_v52  ;;  %21681 = vmatprep.subr.bf16.mxu0 %v24336_v14 }
 0x226   :  { %20497 = vmatprep.mubr.bf16.mxu1 %v2471_v56  ;;  %20526 = vmatpush3.bf16.msra.mxu1 %v25777_v13  ;;  %v25849_v13 = vld [vmem:[#allocation3 + $0xb0] sm:$0xff]  ;;  %v9938_v56 = vsel %vm2152_vm3, %v9935_v33, %v9937_v62 }
 0x227   :  { %21650 = vmatmul.mubr.bf16.gmra.mrb[68].mxu0 %v9922_v5  ;;  %20527 = vmatprep.subr.bf16.mxu1 %v24340_v45  ;;  %v9925_v21 = vrot.slane %v25849_v13, 3  ;;  %v24360_v33 = vld [vmem:[%s28452_s3 + $0x170] sm:$0xff]  }
 0x228   :  { %21653 = vmatprep.mubr.bf16.mxu0 %v9924_v55  ;;  %21682 = vmatpush3.bf16.msra.mxu0 %v24336_v14  ;;  %v2486_v14 = vrot.slane %v25656_v6, 4  ;;  %v2488_v6 = vrot.slane %v25663_v0, 4  ;;  %v2492_v0 = vrot.slane %v25673_v22, 4 }
 0x229   :  { %21683 = vmatprep.subr.bf16.mxu0 %v24337_v29  ;;  %v9926_v19 = vsel %vm2152_vm3, %v9923_v17, %v9925_v21  ;;  %v9928_v53 = vsel %vm2152_vm3, %v9925_v21, %v9927_v20  ;;  %v9939_v17 = vrot.slane %v25538_v50, 3  ;;  %v9941_v50 = vrot.slane %v25548_v42, 3 }
 0x22a   :  { %20528 = vmatpush3.bf16.msra.mxu1 %v24340_v45  ;;  %v2485_v45 = vsel %vm2464_vm4, %v2482_v11, %v2484_v7  ;;  %v2487_v52 = vsel %vm2464_vm4, %v2484_v7, %v2486_v14  ;;  %v2489_v5 = vsel %vm2464_vm4, %v2486_v14, %v2488_v6  ;;  %v2491_v55 = vsel %vm2464_vm4, %v2488_v6, %v2490_v58  ;;  %v25979_v11 = vld [vmem:[#allocation3 + $0x30] sm:$0xff]  ;;  %v24365_v6 = vld [vmem:[%s28452_s3 + $0x1b8] sm:$0xff]  }
 0x22b   :  { %20529 = vmatprep.subr.bf16.mxu1 %v24342_v18  ;;  %v9940_v4 = vsel %vm2152_vm3, %v9937_v62, %v9939_v17  ;;  %v2494_v42 = vrot.slane %v25677_v37, 4  ;;  %v2493_v21 = vsel %vm2464_vm4, %v2490_v58, %v2492_v0  ;;  %v10227_v37 = vrot.slane %v25805_v8, 4  ;;  %v24352_v8 = vld [vmem:[%s28452_s3 + $0x150] sm:$0xff]   ;;  %v26019_v58 = vld [vmem:[#allocation3 + $0x48] sm:$0xff] }
 0x22c   :  { %21684 = vmatpush3.bf16.msra.mxu0 %v24337_v29  ;;  %v9943_v29 = vrot.slane %v25544_v54, 3  ;;  %v10224_v54 = vrot.slane %v10204_v40, 4  ;;  %v24364_v62 = vld [vmem:[%s28452_s3 + $0x1b0] sm:$0xff]   ;;  %v26034_v40 = vld [vmem:[#allocation3 + $0x58] sm:$0xff] }
 0x22d   :  { %20498 = vmatmul.mubr.bf16.gmra.mrb[4].mxu1 %v2473_v1  ;;  %21685 = vmatprep.subr.bf16.mxu0 %v24339_v16  ;;  %v2495_v20 = vsel %vm2464_vm4, %v2492_v0, %v2494_v42  ;;  %v10225_v1 = vrot.slane %v25800_v31, 4  ;;  %v24351_v31 = vld [vmem:[%s28452_s3 + $0x148] sm:$0xff]  }
 0x22e   :  { %20501 = vmatprep.mubr.bf16.mxu1 %v2475_v24  ;;  %20530 = vmatpush3.bf16.msra.mxu1 %v24342_v18  ;;  %v9942_v18 = vsel %vm2152_vm3, %v9939_v17, %v9941_v50  ;;  %v9944_v61 = vsel %vm2152_vm3, %v9941_v50, %v9943_v29  ;;  %v26014_v17 = vld [vmem:[%s28452_s3 + $0x180] sm:$0xff]   ;;  %v26022_v50 = vld [vmem:[#allocation3 + $0x50] sm:$0xff] }
 0x22f   :  { %21654 = vmatmul.mubr.bf16.gmra.mrb[72].mxu0 %v9926_v19  ;;  %20531 = vmatprep.subr.bf16.mxu1 %v24343_v48  ;;  %v10226_v22 = vsel %vm2464_vm4, %v10224_v54, %v10225_v1  ;;  %v10229_v19 = vrot.slane %v25809_v28, 4  ;;  %v10228_v10 = vsel %vm2464_vm4, %v10225_v1, %v10227_v37  ;;  %v10231_v28 = vrot.slane %v25824_v47, 4 }
 0x230   :  { %21657 = vmatprep.mubr.bf16.mxu0 %v9928_v53  ;;  %21686 = vmatpush3.bf16.msra.mxu0 %v24339_v16  ;;  %v9945_v16 = vrot.slane %v9895_v41, 3  ;;  %v24738_v41 = vld [vmem:[#allocation3 + $0xe8] sm:$0xff] }
 0x231   :  { %21687 = vmatprep.subr.bf16.mxu0 %v24341_v27  ;;  %v10230_v32 = vsel %vm2464_vm4, %v10227_v37, %v10229_v19  ;;  %v10232_v47 = vsel %vm2464_vm4, %v10229_v19, %v10231_v28  ;;  %v10249_v0 = vrot.slane %v24738_v41, 4  ;;  %v10205_v19 = vld [vmem:[#allocation3 + $0x100] sm:$0xf]  ;;  %v26133_v41 = vld [vmem:[#allocation3 + $0xd0] sm:$0xff] }
 0x232   :  { %20532 = vmatpush3.bf16.msra.mxu1 %v24343_v48  ;;  %v2444_v48 = vld [vmem:[#allocation3 + $0x80] sm:$0xf]  ;;  %v9946_v24 = vsel %vm2152_vm3, %v9943_v29, %v9945_v16 }
 0x233   :  { %20533 = vmatprep.subr.bf16.mxu1 %v24345_v30 }
 0x234   :  { %21688 = vmatpush3.bf16.msra.mxu0 %v24341_v27  ;;  %v2496_v27 = vrot.slane %v2444_v48, 4  ;;  %v24740_v48 = vld [vmem:[#allocation3 + $0xf8] sm:$0xff] }
 0x235   :  { %20502 = vmatmul.mubr.bf16.gmra.mrb[8].mxu1 %v2477_v46  ;;  %21689 = vmatprep.subr.bf16.mxu0 %v24344_v12  ;;  %v24353_v46 = vld [vmem:[%s28452_s3 + $0x158] sm:$0xff]   ;;  %v10253_v1 = vrot.slane %v24740_v48, 4 }
 0x236   :  { %20505 = vmatprep.mubr.bf16.mxu1 %v2479_v34  ;;  %20534 = vmatpush3.bf16.msra.mxu1 %v24345_v30  ;;  %v2497_v53 = vsel %vm2464_vm4, %v2494_v42, %v2496_v27  ;;  %v2755_v30 = vld [vmem:[#allocation3 + $0x10] sm:$0xff]  ;;  %v26037_v42 = vld [vmem:[#allocation3 + $0x60] sm:$0xff] }
 0x237   :  { %21658 = vmatmul.mubr.bf16.gmra.mrb[76].mxu0 %v9930_v3  ;;  %20535 = vmatprep.subr.bf16.mxu1 %v24346_v60  ;;  %v24358_v34 = vld [vmem:[%s28452_s3 + $0x190] sm:$0xff]   ;;  %v10235_v3 = vrot.slane %v25849_v13, 4  ;;  %v24357_v13 = vld [vmem:[%s28452_s3 + $0x168] sm:$0xff]  }
 0x238   :  { %21661 = vmatprep.mubr.bf16.mxu0 %v9932_v36  ;;  %21690 = vmatpush3.bf16.msra.mxu0 %v24344_v12  ;;  %v10233_v12 = vrot.slane %v25827_v26, 4  ;;  %v10237_v36 = vrot.slane %v25852_v49, 4 }
 0x239   :  { %21691 = vmatprep.subr.bf16.mxu0 %v24347_v23 }
 0x23a   :  { %20536 = vmatpush3.bf16.msra.mxu1 %v24346_v60  ;;  %v25956_v60 = vld [vmem:[#allocation3 + $0x20] sm:$0xff]  ;;  %v10234_v26 = vsel %vm2464_vm4, %v10231_v28, %v10233_v12  ;;  %v10236_v49 = vsel %vm2464_vm4, %v10233_v12, %v10235_v3  ;;  %v3081_v28 = vrot.slane %v25953_v25, 1 }
 0x23b   :  { %20537 = vmatprep.subr.bf16.mxu1 %v24348_v51 }
 0x23c   :  { %21692 = vmatpush3.bf16.msra.mxu0 %v24347_v23  ;;  %v24355_v23 = vld [vmem:[%s28452_s3 + $0x160] sm:$0xff]  }
 0x23d   :  { %20506 = vmatmul.mubr.bf16.gmra.mrb[12].mxu1 %v2481_v15  ;;  %21725 = vmatprep.subr.bf16.mxu0 %v25895_v39  ;;  %v24734_v15 = vld [vmem:[#allocation3 + $0xc8] sm:$0xff] }
 0x23e   :  { %20509 = vmatprep.mubr.bf16.mxu1 %v2483_v2  ;;  %20538 = vmatpush3.bf16.msra.mxu1 %v24348_v51  ;;  %v24359_v51 = vld [vmem:[%s28452_s3 + $0x198] sm:$0xff]   ;;  %v10241_v2 = vrot.slane %v24734_v15, 4  ;;  %v3087_v15 = vrot.slane %v25979_v11, 1 }
 0x23f   :  { %21662 = vmatmul.mubr.bf16.gmra.mrb[80].mxu0 %v9934_v9  ;;  %20539 = vmatprep.subr.bf16.mxu1 %v24349_v44  ;;  %v24362_v9 = vld [vmem:[%s28452_s3 + $0x1a8] sm:$0xff]  }
 0x240   :  { %21665 = vmatprep.mubr.bf16.mxu0 %v9936_v35  ;;  %v25997_v35 = vld [vmem:[#allocation3 + $0x38] sm:$0xff] }
 0x242   :  { %20540 = vmatpush3.bf16.msra.mxu1 %v24349_v44  ;;  %v10239_v44 = vrot.slane %v25873_v63, 4  ;;  %v24363_v63 = vld [vmem:[%s28452_s3 + $0x178] sm:$0xff]  }
 0x243   :  { %20573 = vmatprep.subr.bf16.mxu1 %v25910_v59 }
 0x244   :  { %v10240_v7 = vsel %vm2464_vm4, %v10237_v36, %v10239_v44  ;;  %v10242_v14 = vsel %vm2464_vm4, %v10239_v44, %v10241_v2  ;;  %v24374_v44 = vld [vmem:[%s28452_s3 + $0x1d0] sm:$0xff]  }
 0x245   :  { %20510 = vmatmul.mubr.bf16.gmra.mrb[16].mxu1 %v2485_v45  ;;  %v24735_v45 = vld [vmem:[#allocation3 + $0xd0] sm:$0xff] }
 0x246   :  { %20513 = vmatprep.mubr.bf16.mxu1 %v2487_v52  ;;  %v10243_v52 = vrot.slane %v24735_v45, 4  ;;  %v26111_v45 = vld [vmem:[#allocation3 + $0xc0] sm:$0xff] }
 0x247   :  { %21666 = vmatmul.mubr.bf16.gmra.mrb[84].mxu0 %v9938_v56  ;;  %v24736_v56 = vld [vmem:[#allocation3 + $0xd8] sm:$0xff] }
 0x248   :  { %21669 = vmatprep.mubr.bf16.mxu0 %v9940_v4  ;;  %v10245_v4 = vrot.slane %v24736_v56, 4  ;;  %v10244_v29 = vsel %vm2464_vm4, %v10241_v2, %v10243_v52  ;;  %v3089_v2 = vrot.slane %v25997_v35, 1 }
 0x24d   :  { %20514 = vmatmul.mubr.bf16.gmra.mrb[20].mxu1 %v2489_v5  ;;  %v10246_v5 = vsel %vm2464_vm4, %v10243_v52, %v10245_v4  ;;  %v24377_v52 = vld [vmem:[%s28452_s3 + $0x1e0] sm:$0xff]  }
 0x24e   :  { %20517 = vmatprep.mubr.bf16.mxu1 %v2491_v55  ;;  %v26031_v55 = vld [vmem:[%s28452_s3 + $0x1c0] sm:$0xff]  }
 0x24f   :  { %21670 = vmatmul.mubr.bf16.gmra.mrb[88].mxu0 %v9942_v18  ;;  %v24737_v18 = vld [vmem:[#allocation3 + $0xe0] sm:$0xff] }
 0x250   :  { %21673 = vmatprep.mubr.bf16.mxu0 %v9944_v61  ;;  %v10247_v61 = vrot.slane %v24737_v18, 4  ;;  %v24379_v18 = vld [vmem:[%s28452_s3 + $0x1b8] sm:$0xff]  }
 0x252   :  { %v10248_v16 = vsel %vm2464_vm4, %v10245_v4, %v10247_v61  ;;  %v10250_v54 = vsel %vm2464_vm4, %v10247_v61, %v10249_v0  ;;  %v3093_v4 = vrot.slane %v26019_v58, 1  ;;  %v26130_v61 = vld [vmem:[#allocation3 + $0xc8] sm:$0xff] }
 0x255   :  { %20518 = vmatmul.mubr.bf16.gmra.mrb[24].mxu1 %v2493_v21  ;;  %v24739_v21 = vld [vmem:[#allocation3 + $0xf0] sm:$0xff] }
 0x256   :  { %20521 = vmatprep.mubr.bf16.mxu1 %v2495_v20  ;;  %v10251_v20 = vrot.slane %v24739_v21, 4  ;;  %v26144_v21 = vld [vmem:[%s28452_s3 + $0x1c0] sm:$0xff]  }
 0x257   :  { %21674 = vmatmul.mubr.bf16.gmra.mrb[92].mxu0 %v9946_v24  ;;  %v26042_v24 = vld [vmem:[#allocation3 + $0x68] sm:$0xff] }
 0x258   :  { %21693 = vmatprep.mubr.bf16.mxu0 %v10226_v22  ;;  %v26045_v22 = vld [vmem:[#allocation3 + $0x70] sm:$0xff]  ;;  %v10252_v27 = vsel %vm2464_vm4, %v10249_v0, %v10251_v20  ;;  %v10254_v37 = vsel %vm2464_vm4, %v10251_v20, %v10253_v1  ;;  %v24381_v20 = vld [vmem:[%s28452_s3 + $0x1f8] sm:$0xff]  }
 0x259   :  { %v24380_v0 = vld [vmem:[%s28452_s3 + $0x1f0] sm:$0xff]  }
 0x25d   :  { %20522 = vmatmul.mubr.bf16.gmra.mrb[28].mxu1 %v2497_v53  ;;  %v10255_v53 = vrot.slane %v10205_v19, 4  ;;  %v26160_v19 = vld [vmem:[%s28452_s3 + $0x200] sm:$0xff]  }
 0x25e   :  { %20541 = vmatprep.mubr.bf16.mxu1 %v2755_v30  ;;  %v26050_v30 = vld [vmem:[#allocation3 + $0x78] sm:$0xff] }
 0x25f   :  { %21694 = vmatmul.mubr.bf16.vlgmr.msra.gmra.mrb[64].mxu0 %v10228_v10  ;;  %v10256_v10 = vsel %vm2464_vm4, %v10253_v1, %v10255_v53  ;;  %v3099_v53 = vrot.slane %v26037_v42, 1 }
 0x260   :  { %21726 = vmatpush3.bf16.msra.mxu0 %v25895_v39  ;;  %21697 = vmatprep.mubr.bf16.mxu0 %v10230_v32  ;;  %v10238_v39 = vsel %vm2464_vm4, %v10235_v3, %v10237_v36  ;;  %v10514_v32 = vld [vmem:[#allocation3 + $0x90] sm:$0xff]  ;;  %v3085_v3 = vrot.slane %v25976_v57, 1 }
 0x261   :  { %21727 = vmatprep.subr.bf16.mxu0 %v24351_v31  ;;  %v24368_v36 = vld [vmem:[%s28452_s3 + $0x190] sm:$0xff]  }
 0x264   :  { %21728 = vmatpush3.bf16.msra.mxu0 %v24351_v31  ;;  %v26053_v31 = vld [vmem:[#allocation3 + $0x80] sm:$0xff] }
 0x265   :  { %20542 = vmatmul.mubr.bf16.vlgmr.msra.gmra.mrb[0].mxu1 %v25953_v25  ;;  %21729 = vmatprep.subr.bf16.mxu0 %v24352_v8 }
 0x266   :  { %20545 = vmatprep.mubr.bf16.mxu1 %v25956_v60  ;;  %20574 = vmatpush3.bf16.msra.mxu1 %v25910_v59  ;;  %v26000_v59 = vld [vmem:[#allocation3 + $0x40] sm:$0xff] }
 0x267   :  { %21698 = vmatmul.mubr.bf16.gmra.mrb[68].mxu0 %v10232_v47  ;;  %20575 = vmatprep.subr.bf16.mxu1 %v24356_v43  ;;  %v24367_v47 = vld [vmem:[%s28452_s3 + $0x188] sm:$0xff]   ;;  %v3091_v56 = vrot.slane %v26000_v59, 1 }
 0x268   :  { %21701 = vmatprep.mubr.bf16.mxu0 %v10234_v26  ;;  %21730 = vmatpush3.bf16.msra.mxu0 %v24352_v8  ;;  %v3029_v8 = vld [vmem:[#allocation3 + $0x10] sm:$0xfe]  ;;  %v26065_v26 = vld [vmem:[#allocation3 + $0x98] sm:$0xff] }
 0x269   :  { %21731 = vmatprep.subr.bf16.mxu0 %v24353_v46  ;;  %v3080_v12 = vrot.slane %v3029_v8, 1 }
 0x26a   :  { %20576 = vmatpush3.bf16.msra.mxu1 %v24356_v43  ;;  %v26058_v43 = vld [vmem:[#allocation3 + $0x88] sm:$0xff] }
 0x26b   :  { %20577 = vmatprep.subr.bf16.mxu1 %v24358_v34 }
 0x26c   :  { %21732 = vmatpush3.bf16.msra.mxu0 %v24353_v46  ;;  %v3082_v46 = vsel %vm1351_vm1, %v3080_v12, %v3081_v28  ;;  %v26171_v12 = vld [vmem:[#allocation3 + $0xf0] sm:$0xff] }
 0x26d   :  { %20546 = vmatmul.mubr.bf16.gmra.mrb[4].mxu1 %v25976_v57  ;;  %21733 = vmatprep.subr.bf16.mxu0 %v24355_v23 }
 0x26e   :  { %20549 = vmatprep.mubr.bf16.mxu1 %v25979_v11  ;;  %20578 = vmatpush3.bf16.msra.mxu1 %v24358_v34  ;;  %v26068_v34 = vld [vmem:[#allocation3 + $0xa0] sm:$0xff] }
 0x26f   :  { %21702 = vmatmul.mubr.bf16.gmra.mrb[72].mxu0 %v10236_v49  ;;  %20579 = vmatprep.subr.bf16.mxu1 %v24359_v51 }
 0x270   :  { %21705 = vmatprep.mubr.bf16.mxu0 %v10238_v39  ;;  %21734 = vmatpush3.bf16.msra.mxu0 %v24355_v23  ;;  %v3083_v23 = vrot.slane %v25956_v60, 1  ;;  %v24369_v39 = vld [vmem:[%s28452_s3 + $0x198] sm:$0xff]  }
 0x271   :  { %21735 = vmatprep.subr.bf16.mxu0 %v24357_v13 }
 0x272   :  { %20580 = vmatpush3.bf16.msra.mxu1 %v24359_v51  ;;  %v24372_v51 = vld [vmem:[%s28452_s3 + $0x1c8] sm:$0xff]   ;;  %v3086_v49 = vsel %vm1351_vm1, %v3083_v23, %v3085_v3 }
 0x273   :  { %20581 = vmatprep.subr.bf16.mxu1 %v24361_v38 }
 0x274   :  { %21736 = vmatpush3.bf16.msra.mxu0 %v24357_v13  ;;  %v3084_v13 = vsel %vm1351_vm1, %v3081_v28, %v3083_v23  ;;  %v26168_v28 = vld [vmem:[#allocation3 + $0xe8] sm:$0xff] }
 0x275   :  { %20550 = vmatmul.mubr.bf16.gmra.mrb[8].mxu1 %v25997_v35  ;;  %21737 = vmatprep.subr.bf16.mxu0 %v24360_v33 }
 0x276   :  { %20553 = vmatprep.mubr.bf16.mxu1 %v26000_v59  ;;  %20582 = vmatpush3.bf16.msra.mxu1 %v24361_v38  ;;  %v26085_v38 = vld [vmem:[#allocation3 + $0xa8] sm:$0xff] }
 0x277   :  { %21706 = vmatmul.mubr.bf16.gmra.mrb[76].mxu0 %v10240_v7  ;;  %20583 = vmatprep.subr.bf16.mxu1 %v24362_v9  ;;  %v3088_v7 = vsel %vm1351_vm1, %v3085_v3, %v3087_v15 }
 0x278   :  { %21709 = vmatprep.mubr.bf16.mxu0 %v10242_v14  ;;  %21738 = vmatpush3.bf16.msra.mxu0 %v24360_v33  ;;  %v26089_v33 = vld [vmem:[#allocation3 + $0xb0] sm:$0xff]  ;;  %v3090_v14 = vsel %vm1351_vm1, %v3087_v15, %v3089_v2 }
 0x279   :  { %21739 = vmatprep.subr.bf16.mxu0 %v24363_v63 }
 0x27a   :  { %20584 = vmatpush3.bf16.msra.mxu1 %v24362_v9  ;;  %v24371_v9 = vld [vmem:[%s28452_s3 + $0x1a0] sm:$0xff]  }
 0x27b   :  { %20585 = vmatprep.subr.bf16.mxu1 %v24364_v62 }
 0x27c   :  { %21740 = vmatpush3.bf16.msra.mxu0 %v24363_v63  ;;  %v24375_v63 = vld [vmem:[%s28452_s3 + $0x1d8] sm:$0xff]  }
 0x27d   :  { %20554 = vmatmul.mubr.bf16.gmra.mrb[12].mxu1 %v26019_v58  ;;  %21773 = vmatprep.subr.bf16.mxu0 %v26014_v17 }
 0x27e   :  { %20557 = vmatprep.mubr.bf16.mxu1 %v26022_v50  ;;  %20586 = vmatpush3.bf16.msra.mxu1 %v24364_v62  ;;  %v24373_v62 = vld [vmem:[%s28452_s3 + $0x1a8] sm:$0xff]  }
 0x27f   :  { %21710 = vmatmul.mubr.bf16.gmra.mrb[80].mxu0 %v10244_v29  ;;  %20587 = vmatprep.subr.bf16.mxu1 %v24365_v6  ;;  %v24378_v29 = vld [vmem:[%s28452_s3 + $0x1e8] sm:$0xff]  }
 0x280   :  { %21713 = vmatprep.mubr.bf16.mxu0 %v10246_v5  ;;  %v3092_v5 = vsel %vm1351_vm1, %v3089_v2, %v3091_v56 }
 0x282   :  { %20588 = vmatpush3.bf16.msra.mxu1 %v24365_v6  ;;  %v24376_v6 = vld [vmem:[%s28452_s3 + $0x1b0] sm:$0xff]  }
 0x283   :  { %20621 = vmatprep.subr.bf16.mxu1 %v26031_v55 }
 0x285   :  { %20558 = vmatmul.mubr.bf16.gmra.mrb[16].mxu1 %v26034_v40 }
 0x286   :  { %20561 = vmatprep.mubr.bf16.mxu1 %v26037_v42 }
 0x287   :  { %21714 = vmatmul.mubr.bf16.gmra.mrb[84].mxu0 %v10248_v16  ;;  %v3095_v16 = vrot.slane %v26022_v50, 1 }
 0x288   :  { %21717 = vmatprep.mubr.bf16.mxu0 %v10250_v54  ;;  %v3097_v54 = vrot.slane %v26034_v40, 1 }
 0x289   :  { %v3096_v48 = vsel %vm1351_vm1, %v3093_v4, %v3095_v16 }
 0x28a   :  { %v3098_v1 = vsel %vm1351_vm1, %v3095_v16, %v3097_v54  ;;  %v3394_v16 = vrot.slane %v25956_v60, 2 }
 0x28d   :  { %20562 = vmatmul.mubr.bf16.gmra.mrb[20].mxu1 %v26042_v24 }
 0x28e   :  { %20565 = vmatprep.mubr.bf16.mxu1 %v26045_v22 }
 0x28f   :  { %21718 = vmatmul.mubr.bf16.gmra.mrb[88].mxu0 %v10252_v27  ;;  %v26152_v27 = vld [vmem:[#allocation3 + $0xd8] sm:$0xff] }
 0x290   :  { %21721 = vmatprep.mubr.bf16.mxu0 %v10254_v37  ;;  %v26155_v37 = vld [vmem:[#allocation3 + $0xe0] sm:$0xff] }
 0x295   :  { %20566 = vmatmul.mubr.bf16.gmra.mrb[24].mxu1 %v26050_v30 }
 0x296   :  { %20569 = vmatprep.mubr.bf16.mxu1 %v26053_v31 }
 0x297   :  { %21722 = vmatmul.mubr.bf16.gmra.mrb[92].mxu0 %v10256_v10  ;;  %v3101_v10 = vrot.slane %v26042_v24, 1 }
 0x298   :  { %21741 = vmatprep.mubr.bf16.mxu0 %v10514_v32  ;;  %v3100_v32 = vsel %vm1351_vm1, %v3097_v54, %v3099_v53  ;;  %v3396_v54 = vrot.slane %v25976_v57, 2 }
 0x299   :  { %v3102_v8 = vsel %vm1351_vm1, %v3099_v53, %v3101_v10  ;;  %v24388_v53 = vld [vmem:[%s28452_s3 + $0x208] sm:$0xff]  }
 0x29d   :  { %20570 = vmatmul.mubr.bf16.gmra.mrb[28].mxu1 %v26058_v43 }
 0x29e   :  { %20589 = vmatprep.mubr.bf16.mxu1 %v3082_v46  ;;  %v3103_v46 = vrot.slane %v26045_v22, 1 }
 0x29f   :  { %21742 = vmatmul.mubr.bf16.vlgmr.msra.gmra.mrb[64].mxu0 %v26065_v26 }
 0x2a0   :  { %21774 = vmatpush3.bf16.msra.mxu0 %v26014_v17  ;;  %21745 = vmatprep.mubr.bf16.mxu0 %v26068_v34  ;;  %v26108_v17 = vld [vmem:[#allocation3 + $0xb8] sm:$0xff]  ;;  %v3104_v23 = vsel %vm1351_vm1, %v3101_v10, %v3103_v46 }
 0x2a1   :  { %21775 = vmatprep.subr.bf16.mxu0 %v24367_v47 }
 0x2a4   :  { %21776 = vmatpush3.bf16.msra.mxu0 %v24367_v47  ;;  %v3105_v47 = vrot.slane %v26050_v30, 1 }
 0x2a5   :  { %20590 = vmatmul.mubr.bf16.vlgmr.msra.gmra.mrb[0].mxu1 %v3084_v13  ;;  %21777 = vmatprep.subr.bf16.mxu0 %v24368_v36  ;;  %v26182_v13 = vld [vmem:[#allocation2 + $0x100] sm:$0xff] }
 0x2a6   :  { %20593 = vmatprep.mubr.bf16.mxu1 %v3086_v49  ;;  %20622 = vmatpush3.bf16.msra.mxu1 %v26031_v55  ;;  %v3094_v55 = vsel %vm1351_vm1, %v3091_v56, %v3093_v4  ;;  %v3106_v3 = vsel %vm1351_vm1, %v3103_v46, %v3105_v47  ;;  %v3109_v49 = vrot.slane %v26058_v43, 1  ;;  %v10840_v56 = vrot.slane %v26068_v34, 1 }
 0x2a7   :  { %21746 = vmatmul.mubr.bf16.gmra.mrb[68].mxu0 %v26085_v38  ;;  %20623 = vmatprep.subr.bf16.mxu1 %v24372_v51 }
 0x2a8   :  { %21749 = vmatprep.mubr.bf16.mxu0 %v26089_v33  ;;  %21778 = vmatpush3.bf16.msra.mxu0 %v24368_v36  ;;  %v26178_v36 = vld [vmem:[#allocation3 + $0xf8] sm:$0xff] }
 0x2a9   :  { %21779 = vmatprep.subr.bf16.mxu0 %v24369_v39 }
 0x2aa   :  { %20624 = vmatpush3.bf16.msra.mxu1 %v24372_v51  ;;  %v3107_v51 = vrot.slane %v26053_v31, 1 }
 0x2ab   :  { %20625 = vmatprep.subr.bf16.mxu1 %v24374_v44 }
 0x2ac   :  { %21780 = vmatpush3.bf16.msra.mxu0 %v24369_v39  ;;  %v10787_v39 = vld [vmem:[#allocation3 + $0x90] sm:$0xfe]  ;;  %v3108_v15 = vsel %vm1351_vm1, %v3105_v47, %v3107_v51  ;;  %v3110_v2 = vsel %vm1351_vm1, %v3107_v51, %v3109_v49  ;;  %v24387_v51 = vld [vmem:[%s28452_s3 + $0x1e0] sm:$0xff]  }
 0x2ad   :  { %20594 = vmatmul.mubr.bf16.gmra.mrb[4].mxu1 %v3088_v7  ;;  %21781 = vmatprep.subr.bf16.mxu0 %v24371_v9  ;;  %v24390_v47 = vld [vmem:[%s28452_s3 + $0x210] sm:$0xff]  }
 0x2ae   :  { %20597 = vmatprep.mubr.bf16.mxu1 %v3090_v14  ;;  %20626 = vmatpush3.bf16.msra.mxu1 %v24374_v44  ;;  %v10838_v44 = vrot.slane %v26065_v26, 1 }
 0x2af   :  { %21750 = vmatmul.mubr.bf16.gmra.mrb[72].mxu0 %v26108_v17  ;;  %20627 = vmatprep.subr.bf16.mxu1 %v24375_v63 }
 0x2b0   :  { %21753 = vmatprep.mubr.bf16.mxu0 %v26111_v45  ;;  %21782 = vmatpush3.bf16.msra.mxu0 %v24371_v9  ;;  %v3045_v9 = vld [vmem:[#allocation3 + $0x90] sm:$0x1] }
 0x2b1   :  { %21783 = vmatprep.subr.bf16.mxu0 %v24373_v62  ;;  %v3111_v14 = vrot.slane %v3045_v9, 1 }
 0x2b2   :  { %20628 = vmatpush3.bf16.msra.mxu1 %v24375_v63  ;;  %v10837_v63 = vrot.slane %v10787_v39, 1  ;;  %v24391_v39 = vld [vmem:[%s28452_s3 + $0x218] sm:$0xff]  }
 0x2b3   :  { %20629 = vmatprep.subr.bf16.mxu1 %v24377_v52 }
 0x2b4   :  { %21784 = vmatpush3.bf16.msra.mxu0 %v24373_v62  ;;  %v10839_v7 = vsel %vm1351_vm1, %v10837_v63, %v10838_v44  ;;  %v3370_v62 = vld [vmem:[#allocation3 + $0x10] sm:$0xfc] }
 0x2b5   :  { %20598 = vmatmul.mubr.bf16.gmra.mrb[8].mxu1 %v3092_v5  ;;  %21785 = vmatprep.subr.bf16.mxu0 %v24376_v6  ;;  %v3391_v4 = vrot.slane %v3370_v62, 2  ;;  %v3404_v62 = vrot.slane %v26019_v58, 2 }
 0x2b6   :  { %20601 = vmatprep.mubr.bf16.mxu1 %v3094_v55  ;;  %20630 = vmatpush3.bf16.msra.mxu1 %v24377_v52  ;;  %v3392_v52 = vrot.slane %v25953_v25, 2  ;;  %v24383_v55 = vld [vmem:[%s28452_s3 + $0x1c8] sm:$0xff]  }
 0x2b7   :  { %21754 = vmatmul.mubr.bf16.gmra.mrb[76].mxu0 %v26130_v61  ;;  %20631 = vmatprep.subr.bf16.mxu1 %v24378_v29 }
 0x2b8   :  { %21757 = vmatprep.mubr.bf16.mxu0 %v26133_v41  ;;  %21786 = vmatpush3.bf16.msra.mxu0 %v24376_v6  ;;  %v10842_v6 = vrot.slane %v26085_v38, 1  ;;  %v3393_v5 = vsel %vm1840_vm2, %v3391_v4, %v3392_v52  ;;  %v3395_v10 = vsel %vm1840_vm2, %v3392_v52, %v3394_v16  ;;  %v24392_v52 = vld [vmem:[%s28452_s3 + $0x1f0] sm:$0xff]   ;;  %v10854_v4 = vrot.slane %v26152_v27, 1 }
 0x2b9   :  { %21787 = vmatprep.subr.bf16.mxu0 %v24379_v18 }
 0x2ba   :  { %20632 = vmatpush3.bf16.msra.mxu1 %v24378_v29  ;;  %v3112_v29 = vsel %vm1351_vm1, %v3109_v49, %v3111_v14  ;;  %v10850_v49 = vrot.slane %v26130_v61, 1  ;;  %v3402_v14 = vrot.slane %v26000_v59, 2 }
 0x2bb   :  { %20633 = vmatprep.subr.bf16.mxu1 %v24380_v0 }
 0x2bc   :  { %21788 = vmatpush3.bf16.msra.mxu0 %v24379_v18  ;;  %v10841_v18 = vsel %vm1351_vm1, %v10838_v44, %v10840_v56 }
 0x2bd   :  { %20602 = vmatmul.mubr.bf16.gmra.mrb[12].mxu1 %v3096_v48  ;;  %21821 = vmatprep.subr.bf16.mxu0 %v26144_v21  ;;  %v10844_v48 = vrot.slane %v26089_v33, 1 }
 0x2be   :  { %20605 = vmatprep.mubr.bf16.mxu1 %v3098_v1  ;;  %20634 = vmatpush3.bf16.msra.mxu1 %v24380_v0  ;;  %v10843_v0 = vsel %vm1351_vm1, %v10840_v56, %v10842_v6  ;;  %v10846_v1 = vrot.slane %v26108_v17, 1  ;;  %v10852_v56 = vrot.slane %v26133_v41, 1 }
 0x2bf   :  { %21758 = vmatmul.mubr.bf16.gmra.mrb[80].mxu0 %v26152_v27  ;;  %20635 = vmatprep.subr.bf16.mxu1 %v24381_v20 }
 0x2c0   :  { %21761 = vmatprep.mubr.bf16.mxu0 %v26155_v37  ;;  %v10847_v46 = vsel %vm1351_vm1, %v10844_v48, %v10846_v1 }
 0x2c2   :  { %20636 = vmatpush3.bf16.msra.mxu1 %v24381_v20  ;;  %v24384_v20 = vld [vmem:[%s28452_s3 + $0x1d0] sm:$0xff]  }
 0x2c3   :  { %20669 = vmatprep.subr.bf16.mxu1 %v26160_v19 }
 0x2c5   :  { %20606 = vmatmul.mubr.bf16.gmra.mrb[16].mxu1 %v3100_v32  ;;  %v24385_v32 = vld [vmem:[%s28452_s3 + $0x1d8] sm:$0xff]  }
 0x2c6   :  { %20609 = vmatprep.mubr.bf16.mxu1 %v3102_v8  ;;  %v10845_v8 = vsel %vm1351_vm1, %v10842_v6, %v10844_v48  ;;  %v24394_v6 = vld [vmem:[%s28452_s3 + $0x228] sm:$0xff]   ;;  %v26268_v48 = vld [vmem:[%s28452_s3 + $0x200] sm:$0xff]  }
 0x2c7   :  { %21762 = vmatmul.mubr.bf16.gmra.mrb[84].mxu0 %v26168_v28 }
 0x2c8   :  { %21765 = vmatprep.mubr.bf16.mxu0 %v26171_v12 }
 0x2cd   :  { %20610 = vmatmul.mubr.bf16.gmra.mrb[20].mxu1 %v3104_v23  ;;  %v3398_v23 = vrot.slane %v25979_v11, 2 }
 0x2ce   :  { %20613 = vmatprep.mubr.bf16.mxu1 %v3106_v3  ;;  %v3400_v3 = vrot.slane %v25997_v35, 2 }
 0x2cf   :  { %21766 = vmatmul.mubr.bf16.gmra.mrb[88].mxu0 %v26178_v36  ;;  %v3399_v44 = vsel %vm1840_vm2, %v3396_v54, %v3398_v23 }
 0x2d0   :  { %21769 = vmatprep.mubr.bf16.mxu0 %v26182_v13 }
 0x2d5   :  { %20614 = vmatmul.mubr.bf16.gmra.mrb[24].mxu1 %v3108_v15  ;;  %v3401_v15 = vsel %vm1840_vm2, %v3398_v23, %v3400_v3  ;;  %v3410_v23 = vrot.slane %v26037_v42, 2 }
 0x2d6   :  { %20617 = vmatprep.mubr.bf16.mxu1 %v3110_v2  ;;  %v24389_v2 = vld [vmem:[%s28452_s3 + $0x1e8] sm:$0xff]  }
 0x2d7   :  { %21770 = vmatmul.mubr.bf16.gmra.mrb[92].mxu0 %v26182_v13 }
 0x2d8   :  { %21789 = vmatprep.mubr.bf16.mxu0 %v10839_v7  ;;  %v24393_v7 = vld [vmem:[%s28452_s3 + $0x220] sm:$0xff]  }
 0x2dd   :  { %20618 = vmatmul.mubr.bf16.gmra.mrb[28].mxu1 %v3112_v29  ;;  %v3403_v29 = vsel %vm1840_vm2, %v3400_v3, %v3402_v14  ;;  %v3412_v3 = vrot.slane %v26042_v24, 2 }
 0x2de   :  { %20637 = vmatprep.mubr.bf16.mxu1 %v3393_v5  ;;  %v3405_v5 = vsel %vm1840_vm2, %v3402_v14, %v3404_v62 }
 0x2df   :  { %21790 = vmatmul.mubr.bf16.vlgmr.msra.gmra.mrb[64].mxu0 %v10841_v18  ;;  %v10853_v18 = vsel %vm1351_vm1, %v10850_v49, %v10852_v56 }
 0x2e0   :  { %21822 = vmatpush3.bf16.msra.mxu0 %v26144_v21  ;;  %21793 = vmatprep.mubr.bf16.mxu0 %v10843_v0  ;;  %v3397_v21 = vsel %vm1840_vm2, %v3394_v16, %v3396_v54  ;;  %v10855_v0 = vsel %vm1351_vm1, %v10852_v56, %v10854_v4  ;;  %v24396_v16 = vld [vmem:[%s28452_s3 + $0x230] sm:$0xff]   ;;  %v3406_v54 = vrot.slane %v26022_v50, 2  ;;  %v3418_v56 = vrot.slane %v26053_v31, 2 }
 0x2e1   :  { %21823 = vmatprep.subr.bf16.mxu0 %v24383_v55 }
 0x2e4   :  { %21824 = vmatpush3.bf16.msra.mxu0 %v24383_v55  ;;  %v24395_v55 = vld [vmem:[%s28452_s3 + $0x1f8] sm:$0xff]  }
 0x2e5   :  { %20638 = vmatmul.mubr.bf16.vlgmr.msra.gmra.mrb[0].mxu1 %v3395_v10  ;;  %21825 = vmatprep.subr.bf16.mxu0 %v24384_v20  ;;  %v24397_v10 = vld [vmem:[%s28452_s3 + $0x238] sm:$0xff]  }
 0x2e6   :  { %20641 = vmatprep.mubr.bf16.mxu1 %v3397_v21  ;;  %20670 = vmatpush3.bf16.msra.mxu1 %v26160_v19  ;;  %v10848_v19 = vrot.slane %v26111_v45, 1  ;;  %v3407_v21 = vsel %vm1840_vm2, %v3404_v62, %v3406_v54  ;;  %v10803_v62 = vld [vmem:[#allocation3 + $0x110] sm:$0x1] }
 0x2e7   :  { %21794 = vmatmul.mubr.bf16.gmra.mrb[68].mxu0 %v10845_v8  ;;  %20671 = vmatprep.subr.bf16.mxu1 %v24388_v53 }
 0x2e8   :  { %21797 = vmatprep.mubr.bf16.mxu0 %v10847_v46  ;;  %21826 = vmatpush3.bf16.msra.mxu0 %v24384_v20  ;;  %v10849_v9 = vsel %vm1351_vm1, %v10846_v1, %v10848_v19  ;;  %v10851_v63 = vsel %vm1351_vm1, %v10848_v19, %v10850_v49  ;;  %v3408_v20 = vrot.slane %v26034_v40, 2  ;;  %v10856_v1 = vrot.slane %v26155_v37, 1 }
 0x2e9   :  { %21827 = vmatprep.subr.bf16.mxu0 %v24385_v32  ;;  %v10862_v19 = vrot.slane %v26178_v36, 1 }
 0x2ea   :  { %20672 = vmatpush3.bf16.msra.mxu1 %v24388_v53  ;;  %v10858_v53 = vrot.slane %v26168_v28, 1  ;;  %v10857_v8 = vsel %vm1351_vm1, %v10854_v4, %v10856_v1  ;;  %v3411_v49 = vsel %vm1840_vm2, %v3408_v20, %v3410_v23  ;;  %v10868_v4 = vrot.slane %v10803_v62, 1 }
 0x2eb   :  { %20673 = vmatprep.subr.bf16.mxu1 %v24390_v47  ;;  %v3711_v62 = vrot.slane %v25997_v35, 3 }
 0x2ec   :  { %21828 = vmatpush3.bf16.msra.mxu0 %v24385_v32  ;;  %v3409_v32 = vsel %vm1840_vm2, %v3406_v54, %v3408_v20  ;;  %v10859_v46 = vsel %vm1351_vm1, %v10856_v1, %v10858_v53 }
 0x2ed   :  { %20642 = vmatmul.mubr.bf16.gmra.mrb[4].mxu1 %v3399_v44  ;;  %21829 = vmatprep.subr.bf16.mxu0 %v24387_v51 }
 0x2ee   :  { %20645 = vmatprep.mubr.bf16.mxu1 %v3401_v15  ;;  %20674 = vmatpush3.bf16.msra.mxu1 %v24390_v47  ;;  %v26283_v47 = vld [vmem:[%s28452_s3 + $0x240] sm:$0xff]  }
 0x2ef   :  { %21798 = vmatmul.mubr.bf16.gmra.mrb[72].mxu0 %v10849_v9  ;;  %20675 = vmatprep.subr.bf16.mxu1 %v24391_v39  ;;  %v3416_v9 = vrot.slane %v26050_v30, 2 }
 0x2f0   :  { %21801 = vmatprep.mubr.bf16.mxu0 %v10851_v63  ;;  %21830 = vmatpush3.bf16.msra.mxu0 %v24387_v51  ;;  %v10860_v51 = vrot.slane %v26171_v12, 1  ;;  %v10864_v63 = vrot.slane %v26182_v13, 1 }
 0x2f1   :  { %21831 = vmatprep.subr.bf16.mxu0 %v24389_v2 }
 0x2f2   :  { %20676 = vmatpush3.bf16.msra.mxu1 %v24391_v39  ;;  %v3413_v39 = vsel %vm1840_vm2, %v3410_v23, %v3412_v3  ;;  %v10861_v44 = vsel %vm1351_vm1, %v10858_v53, %v10860_v51  ;;  %v10863_v15 = vsel %vm1351_vm1, %v10860_v51, %v10862_v19  ;;  %v3681_v53 = vld [vmem:[#allocation3 + $0x10] sm:$0xf8] }
 0x2f3   :  { %20677 = vmatprep.subr.bf16.mxu1 %v24393_v7 }
 0x2f4   :  { %21832 = vmatpush3.bf16.msra.mxu0 %v24389_v2  ;;  %v3414_v2 = vrot.slane %v26045_v22, 2 }
 0x2f5   :  { %20646 = vmatmul.mubr.bf16.gmra.mrb[8].mxu1 %v3403_v29  ;;  %21833 = vmatprep.subr.bf16.mxu0 %v24392_v52  ;;  %v11127_v29 = vld [vmem:[#allocation3 + $0x90] sm:$0xfc] }
 0x2f6   :  { %20649 = vmatprep.mubr.bf16.mxu1 %v3405_v5  ;;  %20678 = vmatpush3.bf16.msra.mxu1 %v24393_v7  ;;  %v3415_v7 = vsel %vm1840_vm2, %v3412_v3, %v3414_v2  ;;  %v3417_v14 = vsel %vm1840_vm2, %v3414_v2, %v3416_v9  ;;  %v11148_v5 = vrot.slane %v26065_v26, 2  ;;  %v11147_v54 = vrot.slane %v11127_v29, 2  ;;  %v24399_v3 = vld [vmem:[%s28452_s3 + $0x208] sm:$0xff]  }
 0x2f7   :  { %21802 = vmatmul.mubr.bf16.gmra.mrb[76].mxu0 %v10853_v18  ;;  %20679 = vmatprep.subr.bf16.mxu1 %v24394_v6  ;;  %v10869_v18 = vsel %vm1351_vm1, %v10864_v63, %v10868_v4  ;;  %v24404_v2 = vld [vmem:[%s28452_s3 + $0x248] sm:$0xff]   ;;  %v24407_v4 = vld [vmem:[%s28452_s3 + $0x258] sm:$0xff]  }
 0x2f8   :  { %21805 = vmatprep.mubr.bf16.mxu0 %v10855_v0  ;;  %21834 = vmatpush3.bf16.msra.mxu0 %v24392_v52  ;;  %v10865_v52 = vsel %vm1351_vm1, %v10862_v19, %v10864_v63  ;;  %v11149_v20 = vsel %vm1840_vm2, %v11147_v54, %v11148_v5  ;;  %v3705_v19 = vrot.slane %v25956_v60, 3  ;;  %v11162_v54 = vrot.slane %v26133_v41, 2 }
 0x2f9   :  { %21835 = vmatprep.subr.bf16.mxu0 %v24395_v55 }
 0x2fa   :  { %20680 = vmatpush3.bf16.msra.mxu1 %v24394_v6  ;;  %v3420_v6 = vrot.slane %v26058_v43, 2 }
 0x2fb   :  { %20681 = vmatprep.subr.bf16.mxu1 %v24396_v16 }
 0x2fc   :  { %21836 = vmatpush3.bf16.msra.mxu0 %v24395_v55  ;;  %v3419_v55 = vsel %vm1840_vm2, %v3416_v9, %v3418_v56  ;;  %v3421_v0 = vsel %vm1840_vm2, %v3418_v56, %v3420_v6  ;;  %v11160_v56 = vrot.slane %v26130_v61, 2 }
 0x2fd   :  { %20650 = vmatmul.mubr.bf16.gmra.mrb[12].mxu1 %v3407_v21  ;;  %21869 = vmatprep.subr.bf16.mxu0 %v26268_v48  ;;  %v11150_v21 = vrot.slane %v26068_v34, 2 }
 0x2fe   :  { %20653 = vmatprep.mubr.bf16.mxu1 %v3409_v32  ;;  %20682 = vmatpush3.bf16.msra.mxu1 %v24396_v16  ;;  %v3371_v16 = vld [vmem:[#allocation3 + $0x90] sm:$0x3]  ;;  %v3702_v32 = vrot.slane %v3681_v53, 3  ;;  %v24411_v53 = vld [vmem:[%s28452_s3 + $0x238] sm:$0xff]  }
 0x2ff   :  { %21806 = vmatmul.mubr.bf16.gmra.mrb[80].mxu0 %v10857_v8  ;;  %20683 = vmatprep.subr.bf16.mxu1 %v24397_v10  ;;  %v3422_v1 = vrot.slane %v3371_v16, 2  ;;  %v11152_v8 = vrot.slane %v26085_v38, 2  ;;  %v11151_v51 = vsel %vm1840_vm2, %v11148_v5, %v11150_v21  ;;  %v24408_v16 = vld [vmem:[%s28452_s3 + $0x230] sm:$0xff]  }
 0x300   :  { %21809 = vmatprep.mubr.bf16.mxu0 %v10859_v46 }
 0x301   :  { %v3423_v46 = vsel %vm1840_vm2, %v3420_v6, %v3422_v1  ;;  %v24405_v6 = vld [vmem:[%s28452_s3 + $0x228] sm:$0xff]  }
 0x302   :  { %20684 = vmatpush3.bf16.msra.mxu1 %v24397_v10  ;;  %v3703_v10 = vrot.slane %v25953_v25, 3  ;;  %v11153_v25 = vsel %vm1840_vm2, %v11150_v21, %v11152_v8  ;;  %v24410_v1 = vld [vmem:[%s28452_s3 + $0x268] sm:$0xff]  }
 0x303   :  { %20717 = vmatprep.subr.bf16.mxu1 %v26283_v47 }
 0x304   :  { %v3704_v23 = vsel %vm2152_vm3, %v3702_v32, %v3703_v10  ;;  %v3706_v60 = vsel %vm2152_vm3, %v3703_v10, %v3705_v19  ;;  %v11163_v10 = vsel %vm1840_vm2, %v11160_v56, %v11162_v54  ;;  %v24412_v32 = vld [vmem:[%s28452_s3 + $0x270] sm:$0xff]  }
 0x305   :  { %20654 = vmatmul.mubr.bf16.gmra.mrb[16].mxu1 %v3411_v49  ;;  %v3707_v49 = vrot.slane %v25976_v57, 3  ;;  %v24401_v57 = vld [vmem:[%s28452_s3 + $0x218] sm:$0xff]  }
 0x306   :  { %20657 = vmatprep.mubr.bf16.mxu1 %v3413_v39  ;;  %v24400_v39 = vld [vmem:[%s28452_s3 + $0x210] sm:$0xff]  }
 0x307   :  { %21810 = vmatmul.mubr.bf16.gmra.mrb[84].mxu0 %v10861_v44  ;;  %v11154_v44 = vrot.slane %v26089_v33, 2 }
 0x308   :  { %21813 = vmatprep.mubr.bf16.mxu0 %v10863_v15  ;;  %v11156_v15 = vrot.slane %v26108_v17, 2 }
 0x309   :  { %v11155_v9 = vsel %vm1840_vm2, %v11152_v8, %v11154_v44  ;;  %v3717_v8 = vrot.slane %v26022_v50, 3  ;;  %v24413_v50 = vld [vmem:[%s28452_s3 + $0x278] sm:$0xff]  }
 0x30d   :  { %20658 = vmatmul.mubr.bf16.gmra.mrb[20].mxu1 %v3415_v7  ;;  %v24406_v7 = vld [vmem:[%s28452_s3 + $0x250] sm:$0xff]  }
 0x30e   :  { %20661 = vmatprep.mubr.bf16.mxu1 %v3417_v14  ;;  %v3709_v14 = vrot.slane %v25979_v11, 3 }
 0x30f   :  { %21814 = vmatmul.mubr.bf16.gmra.mrb[88].mxu0 %v10865_v52  ;;  %v24403_v52 = vld [vmem:[%s28452_s3 + $0x220] sm:$0xff]  }
 0x310   :  { %21817 = vmatprep.mubr.bf16.mxu0 %v10864_v63  ;;  %v11157_v63 = vsel %vm1840_vm2, %v11154_v44, %v11156_v15  ;;  %v3710_v11 = vsel %vm2152_vm3, %v3707_v49, %v3709_v14  ;;  %v3712_v35 = vsel %vm2152_vm3, %v3709_v14, %v3711_v62  ;;  %v3721_v44 = vrot.slane %v26037_v42, 3 }
 0x315   :  { %20662 = vmatmul.mubr.bf16.gmra.mrb[24].mxu1 %v3419_v55  ;;  %v24409_v55 = vld [vmem:[%s28452_s3 + $0x260] sm:$0xff]  }
 0x316   :  { %20665 = vmatprep.mubr.bf16.mxu1 %v3421_v0  ;;  %v3715_v0 = vrot.slane %v26019_v58, 3 }
 0x317   :  { %21818 = vmatmul.mubr.bf16.gmra.mrb[92].mxu0 %v10869_v18  ;;  %v3713_v18 = vrot.slane %v26000_v59, 3 }
 0x318   :  { %21837 = vmatprep.mubr.bf16.mxu0 %v11149_v20  ;;  %v11164_v20 = vrot.slane %v26152_v27, 2 }
 0x319   :  { %v3714_v59 = vsel %vm2152_vm3, %v3711_v62, %v3713_v18  ;;  %v3716_v58 = vsel %vm2152_vm3, %v3713_v18, %v3715_v0 }
 0x31a   :  { %v11165_v21 = vsel %vm1840_vm2, %v11162_v54, %v11164_v20 }
 0x31d   :  { %20666 = vmatmul.mubr.bf16.gmra.mrb[28].mxu1 %v3423_v46  ;;  %v3719_v46 = vrot.slane %v26034_v40, 3 }
 0x31e   :  { %20685 = vmatprep.mubr.bf16.mxu1 %v3704_v23  ;;  %v26384_v23 = vld [vmem:[%s28452_s3 + $0x240] sm:$0xff]  }
 0x31f   :  { %21838 = vmatmul.mubr.bf16.vlgmr.msra.gmra.mrb[64].mxu0 %v11151_v51  ;;  %v11168_v51 = vrot.slane %v26168_v28, 2  ;;  %v3720_v40 = vsel %vm2152_vm3, %v3717_v8, %v3719_v46 }
 0x320   :  { %21870 = vmatpush3.bf16.msra.mxu0 %v26268_v48  ;;  %21841 = vmatprep.mubr.bf16.mxu0 %v11153_v25  ;;  %v3708_v48 = vsel %vm2152_vm3, %v3705_v19, %v3707_v49  ;;  %v3718_v25 = vsel %vm2152_vm3, %v3715_v0, %v3717_v8  ;;  %v3992_v0 = vld [vmem:[#allocation3 + $0x10] sm:$0xf0] }
 0x321   :  { %21871 = vmatprep.subr.bf16.mxu0 %v24399_v3  ;;  %v4013_v54 = vrot.slane %v3992_v0, 4  ;;  %v24416_v8 = vld [vmem:[%s28452_s3 + $0x250] sm:$0xff]   ;;  %v11478_v0 = vrot.slane %v26168_v28, 3  ;;  %v26506_v28 = vld [vmem:[%s28452_s3 + $0x2c0] sm:$0xff]  }
 0x324   :  { %21872 = vmatpush3.bf16.msra.mxu0 %v24399_v3  ;;  %v11166_v3 = vrot.slane %v26155_v37, 2 }
 0x325   :  { %20686 = vmatmul.mubr.bf16.vlgmr.msra.gmra.mrb[0].mxu1 %v3706_v60  ;;  %21873 = vmatprep.subr.bf16.mxu0 %v24400_v39  ;;  %v11172_v60 = vrot.slane %v26178_v36, 2 }
 0x326   :  { %20689 = vmatprep.mubr.bf16.mxu1 %v3708_v48  ;;  %20718 = vmatpush3.bf16.msra.mxu1 %v26283_v47  ;;  %v11158_v47 = vrot.slane %v26111_v45, 2  ;;  %v11167_v19 = vsel %vm1840_vm2, %v11164_v20, %v11166_v3  ;;  %v11169_v49 = vsel %vm1840_vm2, %v11166_v3, %v11168_v51  ;;  %v3722_v48 = vsel %vm2152_vm3, %v3719_v46, %v3721_v44 }
 0x327   :  { %21842 = vmatmul.mubr.bf16.gmra.mrb[68].mxu0 %v11155_v9  ;;  %20719 = vmatprep.subr.bf16.mxu1 %v24404_v2  ;;  %v11462_v20 = vrot.slane %v26085_v38, 3  ;;  %v24744_v38 = vld [vmem:[#allocation3 + $0x28] sm:$0xff]  ;;  %v11464_v46 = vrot.slane %v26089_v33, 3  ;;  %v11466_v3 = vrot.slane %v26108_v17, 3 }
 0x328   :  { %21845 = vmatprep.mubr.bf16.mxu0 %v11157_v63  ;;  %21874 = vmatpush3.bf16.msra.mxu0 %v24400_v39  ;;  %v11159_v29 = vsel %vm1840_vm2, %v11156_v15, %v11158_v47  ;;  %v11161_v5 = vsel %vm1840_vm2, %v11158_v47, %v11160_v56  ;;  %v26399_v39 = vld [vmem:[%s28452_s3 + $0x280] sm:$0xff]   ;;  %v3723_v15 = vrot.slane %v26042_v24, 3  ;;  %v3725_v24 = vrot.slane %v26045_v22, 3 }
 0x329   :  { %21875 = vmatprep.subr.bf16.mxu0 %v24401_v57  ;;  %v3727_v63 = vrot.slane %v26050_v30, 3  ;;  %v3729_v56 = vrot.slane %v26053_v31, 3  ;;  %v3731_v22 = vrot.slane %v26058_v43, 3  ;;  %v11458_v30 = vrot.slane %v26065_v26, 3  ;;  %v24742_v43 = vld [vmem:[#allocation3 + $0x18] sm:$0xff] }
 0x32a   :  { %20720 = vmatpush3.bf16.msra.mxu1 %v24404_v2  ;;  %v11170_v2 = vrot.slane %v26171_v12, 2  ;;  %v3726_v14 = vsel %vm2152_vm3, %v3723_v15, %v3725_v24  ;;  %v11460_v26 = vrot.slane %v26068_v34, 3  ;;  %v11465_v33 = vsel %vm2152_vm3, %v11462_v20, %v11464_v46 }
 0x32b   :  { %20721 = vmatprep.subr.bf16.mxu1 %v24406_v7  ;;  %v3728_v62 = vsel %vm2152_vm3, %v3725_v24, %v3727_v63  ;;  %v11467_v17 = vsel %vm2152_vm3, %v11464_v46, %v11466_v3  ;;  %v24425_v24 = vld [vmem:[%s28452_s3 + $0x2a0] sm:$0xff]  }
 0x32c   :  { %21876 = vmatpush3.bf16.msra.mxu0 %v24401_v57  ;;  %v3724_v57 = vsel %vm2152_vm3, %v3721_v44, %v3723_v15  ;;  %v11171_v9 = vsel %vm1840_vm2, %v11168_v51, %v11170_v2  ;;  %v11173_v42 = vsel %vm1840_vm2, %v11170_v2, %v11172_v60  ;;  %v24420_v51 = vld [vmem:[%s28452_s3 + $0x288] sm:$0xff]   ;;  %v24746_v44 = vld [vmem:[#allocation3 + $0x38] sm:$0xff]  ;;  %v24419_v2 = vld [vmem:[%s28452_s3 + $0x260] sm:$0xff]  }
 0x32d   :  { %20690 = vmatmul.mubr.bf16.gmra.mrb[4].mxu1 %v3710_v11  ;;  %21877 = vmatprep.subr.bf16.mxu0 %v24403_v52  ;;  %v11437_v11 = vld [vmem:[#allocation3 + $0x90] sm:$0xf8]  ;;  %v4022_v15 = vrot.slane %v24746_v44, 4 }
 0x32e   :  { %20693 = vmatprep.mubr.bf16.mxu1 %v3712_v35  ;;  %20722 = vmatpush3.bf16.msra.mxu1 %v24406_v7  ;;  %v11174_v7 = vrot.slane %v26182_v13, 2  ;;  %v3730_v35 = vsel %vm2152_vm3, %v3727_v63, %v3729_v56  ;;  %v24747_v63 = vld [vmem:[#allocation3 + $0x40] sm:$0xff]  ;;  %v11747_v44 = vld [vmem:[#allocation3 + $0x90] sm:$0xf0] }
 0x32f   :  { %21846 = vmatmul.mubr.bf16.gmra.mrb[72].mxu0 %v11159_v29  ;;  %20723 = vmatprep.subr.bf16.mxu1 %v24407_v4  ;;  %v3732_v29 = vsel %vm2152_vm3, %v3729_v56, %v3731_v22  ;;  %v11474_v56 = vrot.slane %v26152_v27, 3 }
 0x330   :  { %21849 = vmatprep.mubr.bf16.mxu0 %v11161_v5  ;;  %21878 = vmatpush3.bf16.msra.mxu0 %v24403_v52  ;;  %v11128_v52 = vld [vmem:[#allocation3 + $0x110] sm:$0x3]  ;;  %v11175_v47 = vsel %vm1840_vm2, %v11172_v60, %v11174_v7  ;;  %v11470_v60 = vrot.slane %v26130_v61, 3 }
 0x331   :  { %21879 = vmatprep.subr.bf16.mxu0 %v24405_v6  ;;  %v3682_v5 = vld [vmem:[#allocation3 + $0x90] sm:$0x7] }
 0x332   :  { %20724 = vmatpush3.bf16.msra.mxu1 %v24407_v4  ;;  %v11178_v4 = vrot.slane %v11128_v52, 2  ;;  %v3733_v18 = vrot.slane %v3682_v5, 3  ;;  %v24424_v52 = vld [vmem:[%s28452_s3 + $0x270] sm:$0xff]   ;;  %v24750_v5 = vld [vmem:[#allocation3 + $0x58] sm:$0xff] }
 0x333   :  { %20725 = vmatprep.subr.bf16.mxu1 %v24409_v55 }
 0x334   :  { %21880 = vmatpush3.bf16.msra.mxu0 %v24405_v6  ;;  %v11179_v6 = vsel %vm1840_vm2, %v11174_v7, %v11178_v4  ;;  %v24426_v4 = vld [vmem:[%s28452_s3 + $0x2a8] sm:$0xff]  }
 0x335   :  { %20694 = vmatmul.mubr.bf16.gmra.mrb[8].mxu1 %v3714_v59  ;;  %21881 = vmatprep.subr.bf16.mxu0 %v24408_v16 }
 0x336   :  { %20697 = vmatprep.mubr.bf16.mxu1 %v3716_v58  ;;  %20726 = vmatpush3.bf16.msra.mxu1 %v24409_v55  ;;  %v11457_v55 = vrot.slane %v11437_v11, 3  ;;  %v24415_v58 = vld [vmem:[%s28452_s3 + $0x248] sm:$0xff]  }
 0x337   :  { %21850 = vmatmul.mubr.bf16.gmra.mrb[76].mxu0 %v11163_v10  ;;  %20727 = vmatprep.subr.bf16.mxu1 %v24410_v1  ;;  %v11463_v10 = vsel %vm2152_vm3, %v11460_v26, %v11462_v20  ;;  %v24751_v20 = vld [vmem:[#allocation3 + $0x60] sm:$0xff] }
 0x338   :  { %21853 = vmatprep.mubr.bf16.mxu0 %v11165_v21  ;;  %21882 = vmatpush3.bf16.msra.mxu0 %v24408_v16  ;;  %v11459_v31 = vsel %vm2152_vm3, %v11457_v55, %v11458_v30  ;;  %v4014_v16 = vrot.slane %v24742_v43, 4  ;;  %v24743_v21 = vld [vmem:[#allocation3 + $0x20] sm:$0xff]  ;;  %v4030_v55 = vrot.slane %v24750_v5, 4  ;;  %v24429_v43 = vld [vmem:[%s28452_s3 + $0x2b8] sm:$0xff]  }
 0x339   :  { %21883 = vmatprep.subr.bf16.mxu0 %v24411_v53  ;;  %v4016_v34 = vrot.slane %v24743_v21, 4 }
 0x33a   :  { %20728 = vmatpush3.bf16.msra.mxu1 %v24410_v1  ;;  %v3734_v1 = vsel %vm2152_vm3, %v3731_v22, %v3733_v18  ;;  %v4015_v59 = vsel %vm2464_vm4, %v4013_v54, %v4014_v16  ;;  %v11476_v18 = vrot.slane %v26155_v37, 3 }
 0x33b   :  { %20729 = vmatprep.subr.bf16.mxu1 %v24412_v32 }
 0x33c   :  { %21884 = vmatpush3.bf16.msra.mxu0 %v24411_v53  ;;  %v11461_v53 = vsel %vm2152_vm3, %v11458_v30, %v11460_v26  ;;  %v24427_v30 = vld [vmem:[%s28452_s3 + $0x278] sm:$0xff]   ;;  %v11477_v54 = vsel %vm2152_vm3, %v11474_v56, %v11476_v18  ;;  %v11479_v37 = vsel %vm2152_vm3, %v11476_v18, %v11478_v0  ;;  %v24762_v18 = vld [vmem:[#allocation3 + $0xc0] sm:$0xff] }
 0x33d   :  { %20698 = vmatmul.mubr.bf16.gmra.mrb[12].mxu1 %v3718_v25  ;;  %21917 = vmatprep.subr.bf16.mxu0 %v26384_v23  ;;  %v24417_v25 = vld [vmem:[%s28452_s3 + $0x258] sm:$0xff]  }
 0x33e   :  { %20701 = vmatprep.mubr.bf16.mxu1 %v3720_v40  ;;  %20730 = vmatpush3.bf16.msra.mxu1 %v24412_v32  ;;  %v4018_v32 = vrot.slane %v24744_v38, 4  ;;  %v24422_v40 = vld [vmem:[%s28452_s3 + $0x290] sm:$0xff]  }
 0x33f   :  { %21854 = vmatmul.mubr.bf16.gmra.mrb[80].mxu0 %v11167_v19  ;;  %20731 = vmatprep.subr.bf16.mxu1 %v24413_v50  ;;  %v24745_v19 = vld [vmem:[#allocation3 + $0x30] sm:$0xff] }
 0x340   :  { %21857 = vmatprep.mubr.bf16.mxu0 %v11169_v49  ;;  %v4020_v49 = vrot.slane %v24745_v19, 4  ;;  %v24756_v19 = vld [vmem:[#allocation3 + $0x88] sm:$0xff] }
 0x342   :  { %20732 = vmatpush3.bf16.msra.mxu1 %v24413_v50  ;;  %v4017_v50 = vsel %vm2464_vm4, %v4014_v16, %v4016_v34 }
 0x343   :  { %20765 = vmatprep.subr.bf16.mxu1 %v26399_v39 }
 0x345   :  { %20702 = vmatmul.mubr.bf16.gmra.mrb[16].mxu1 %v3722_v48  ;;  %v24423_v48 = vld [vmem:[%s28452_s3 + $0x298] sm:$0xff]  }
 0x346   :  { %20705 = vmatprep.mubr.bf16.mxu1 %v3724_v57  ;;  %v4021_v57 = vsel %vm2464_vm4, %v4018_v32, %v4020_v49 }
 0x347   :  { %21858 = vmatmul.mubr.bf16.gmra.mrb[84].mxu0 %v11171_v9  ;;  %v4023_v9 = vsel %vm2464_vm4, %v4020_v49, %v4022_v15  ;;  %v4042_v49 = vrot.slane %v24756_v19, 4  ;;  %v26602_v19 = vld [vmem:[#allocation3 + $0x60] sm:$0xff] }
 0x348   :  { %21861 = vmatprep.mubr.bf16.mxu0 %v11173_v42  ;;  %v24421_v42 = vld [vmem:[%s28452_s3 + $0x268] sm:$0xff]  }
 0x34d   :  { %20706 = vmatmul.mubr.bf16.gmra.mrb[20].mxu1 %v3726_v14  ;;  %v24748_v14 = vld [vmem:[#allocation3 + $0x48] sm:$0xff] }
 0x34e   :  { %20709 = vmatprep.mubr.bf16.mxu1 %v3728_v62  ;;  %v4026_v62 = vrot.slane %v24748_v14, 4  ;;  %v4303_v14 = vld [vmem:[#allocation3 + $0x20] sm:$0xff] }
 0x34f   :  { %21862 = vmatmul.mubr.bf16.gmra.mrb[88].mxu0 %v11175_v47  ;;  %v11472_v47 = vrot.slane %v26133_v41, 3 }
 0x350   :  { %21865 = vmatprep.mubr.bf16.mxu0 %v11174_v7  ;;  %v4024_v7 = vrot.slane %v24747_v63, 4 }
 0x351   :  { %v11473_v41 = vsel %vm2152_vm3, %v11470_v60, %v11472_v47  ;;  %v11475_v27 = vsel %vm2152_vm3, %v11472_v47, %v11474_v56  ;;  %v24432_v56 = vld [vmem:[%s28452_s3 + $0x290] sm:$0xff]  }
 0x352   :  { %v4025_v22 = vsel %vm2464_vm4, %v4022_v15, %v4024_v7  ;;  %v4027_v11 = vsel %vm2464_vm4, %v4024_v7, %v4026_v62  ;;  %v24757_v15 = vld [vmem:[#allocation3 + $0x98] sm:$0xff] }
 0x355   :  { %20710 = vmatmul.mubr.bf16.gmra.mrb[24].mxu1 %v3730_v35  ;;  %v24428_v35 = vld [vmem:[%s28452_s3 + $0x2b0] sm:$0xff]  }
 0x356   :  { %20713 = vmatprep.mubr.bf16.mxu1 %v3732_v29 }
 0x357   :  { %21866 = vmatmul.mubr.bf16.gmra.mrb[92].mxu0 %v11179_v6  ;;  %v24749_v6 = vld [vmem:[#allocation3 + $0x50] sm:$0xff] }
 0x358   :  { %21885 = vmatprep.mubr.bf16.mxu0 %v11459_v31  ;;  %v4028_v29 = vrot.slane %v24749_v6, 4  ;;  %v26491_v31 = vld [vmem:[%s28452_s3 + $0x280] sm:$0xff]   ;;  %v24433_v6 = vld [vmem:[%s28452_s3 + $0x298] sm:$0xff]  }
 0x35a   :  { %v4029_v16 = vsel %vm2464_vm4, %v4026_v62, %v4028_v29  ;;  %v4031_v26 = vsel %vm2464_vm4, %v4028_v29, %v4030_v55  ;;  %v24431_v62 = vld [vmem:[%s28452_s3 + $0x288] sm:$0xff]  }
 0x35d   :  { %20714 = vmatmul.mubr.bf16.gmra.mrb[28].mxu1 %v3734_v1  ;;  %v4032_v1 = vrot.slane %v24751_v20, 4 }
 0x35e   :  { %20733 = vmatprep.mubr.bf16.mxu1 %v4015_v59  ;;  %v24752_v59 = vld [vmem:[#allocation3 + $0x68] sm:$0xff] }
 0x35f   :  { %21886 = vmatmul.mubr.bf16.vlgmr.msra.gmra.mrb[64].mxu0 %v11461_v53  ;;  %v11480_v53 = vrot.slane %v26171_v12, 3  ;;  %v4033_v21 = vsel %vm2464_vm4, %v4030_v55, %v4032_v1  ;;  %v24754_v12 = vld [vmem:[#allocation3 + $0x78] sm:$0xff]  ;;  %v24438_v55 = vld [vmem:[%s28452_s3 + $0x2d0] sm:$0xff]  }
 0x360   :  { %21918 = vmatpush3.bf16.msra.mxu0 %v26384_v23  ;;  %21889 = vmatprep.mubr.bf16.mxu0 %v11463_v10  ;;  %v4019_v23 = vsel %vm2464_vm4, %v4016_v34, %v4018_v32  ;;  %v11482_v10 = vrot.slane %v26178_v36, 3  ;;  %v11484_v36 = vrot.slane %v26182_v13, 3 }
 0x361   :  { %21919 = vmatprep.subr.bf16.mxu0 %v24415_v58  ;;  %v11481_v38 = vsel %vm2152_vm3, %v11478_v0, %v11480_v53  ;;  %v11778_v0 = vrot.slane %v24762_v18, 4 }
 0x362   :  { %v11483_v32 = vsel %vm2152_vm3, %v11480_v53, %v11482_v10  ;;  %v24764_v53 = vld [vmem:[#allocation3 + $0xd0] sm:$0xff] }
 0x364   :  { %21920 = vmatpush3.bf16.msra.mxu0 %v24415_v58  ;;  %v4034_v58 = vrot.slane %v24752_v59, 4  ;;  %v24441_v59 = vld [vmem:[%s28452_s3 + $0x2e0] sm:$0xff]  }
 0x365   :  { %20734 = vmatmul.mubr.bf16.vlgmr.msra.gmra.mrb[0].mxu1 %v4017_v50  ;;  %21921 = vmatprep.subr.bf16.mxu0 %v24416_v8 }
 0x366   :  { %20737 = vmatprep.mubr.bf16.mxu1 %v4019_v23  ;;  %20766 = vmatpush3.bf16.msra.mxu1 %v26399_v39  ;;  %v11468_v39 = vrot.slane %v26111_v45, 3  ;;  %v4035_v34 = vsel %vm2464_vm4, %v4032_v1, %v4034_v58  ;;  %v11438_v23 = vld [vmem:[#allocation3 + $0x110] sm:$0x7] }
 0x367   :  { %21890 = vmatmul.mubr.bf16.gmra.mrb[68].mxu0 %v11465_v33  ;;  %20767 = vmatprep.subr.bf16.mxu1 %v24420_v51  ;;  %v24755_v33 = vld [vmem:[#allocation3 + $0x80] sm:$0xff] }
 0x368   :  { %21893 = vmatprep.mubr.bf16.mxu0 %v11467_v17  ;;  %21922 = vmatpush3.bf16.msra.mxu0 %v24416_v8  ;;  %v11469_v45 = vsel %vm2152_vm3, %v11466_v3, %v11468_v39  ;;  %v11471_v61 = vsel %vm2152_vm3, %v11468_v39, %v11470_v60  ;;  %v24753_v8 = vld [vmem:[#allocation3 + $0x70] sm:$0xff]  ;;  %v4038_v3 = vrot.slane %v24754_v12, 4  ;;  %v4040_v17 = vrot.slane %v24755_v33, 4 }
 0x369   :  { %21923 = vmatprep.subr.bf16.mxu0 %v24417_v25  ;;  %v4036_v46 = vrot.slane %v24753_v8, 4  ;;  %v26580_v8 = vld [vmem:[#allocation3 + $0x50] sm:$0xff] }
 0x36a   :  { %20768 = vmatpush3.bf16.msra.mxu1 %v24420_v51  ;;  %v4041_v13 = vsel %vm2464_vm4, %v4038_v3, %v4040_v17  ;;  %v4043_v60 = vsel %vm2464_vm4, %v4040_v17, %v4042_v49  ;;  %v24445_v17 = vld [vmem:[%s28452_s3 + $0x2f8] sm:$0xff]  }
 0x36b   :  { %20769 = vmatprep.subr.bf16.mxu1 %v24422_v40  ;;  %v4037_v51 = vsel %vm2464_vm4, %v4034_v58, %v4036_v46  ;;  %v4039_v50 = vsel %vm2464_vm4, %v4036_v46, %v4038_v3  ;;  %v24440_v58 = vld [vmem:[%s28452_s3 + $0x2b0] sm:$0xff]   ;;  %v24443_v46 = vld [vmem:[%s28452_s3 + $0x2b8] sm:$0xff]  }
 0x36c   :  { %21924 = vmatpush3.bf16.msra.mxu0 %v24417_v25  ;;  %v11485_v25 = vsel %vm2152_vm3, %v11482_v10, %v11484_v36  ;;  %v11782_v10 = vrot.slane %v24764_v53, 4 }
 0x36d   :  { %20738 = vmatmul.mubr.bf16.gmra.mrb[4].mxu1 %v4021_v57  ;;  %21925 = vmatprep.subr.bf16.mxu0 %v24419_v2  ;;  %v11767_v57 = vrot.slane %v11747_v44, 4 }
 0x36e   :  { %20741 = vmatprep.mubr.bf16.mxu1 %v4023_v9  ;;  %20770 = vmatpush3.bf16.msra.mxu1 %v24422_v40  ;;  %v11488_v40 = vrot.slane %v11438_v23, 3 }
 0x36f   :  { %21894 = vmatmul.mubr.bf16.gmra.mrb[72].mxu0 %v11469_v45  ;;  %20771 = vmatprep.subr.bf16.mxu1 %v24423_v48  ;;  %v24758_v45 = vld [vmem:[#allocation3 + $0xa0] sm:$0xff] }
 0x370   :  { %21897 = vmatprep.mubr.bf16.mxu0 %v11471_v61  ;;  %21926 = vmatpush3.bf16.msra.mxu0 %v24419_v2  ;;  %v11768_v2 = vrot.slane %v24757_v15, 4  ;;  %v11489_v39 = vsel %vm2152_vm3, %v11484_v36, %v11488_v40  ;;  %v11770_v61 = vrot.slane %v24758_v45, 4  ;;  %v26599_v40 = vld [vmem:[#allocation3 + $0x58] sm:$0xff]  ;;  %v24450_v15 = vld [vmem:[%s28452_s3 + $0x300] sm:$0xff]  }
 0x371   :  { %21927 = vmatprep.subr.bf16.mxu0 %v24421_v42  ;;  %v26619_v45 = vld [vmem:[#allocation2 + $0x100] sm:$0xff] }
 0x372   :  { %20772 = vmatpush3.bf16.msra.mxu1 %v24423_v48  ;;  %v3993_v48 = vld [vmem:[#allocation3 + $0x90] sm:$0xf]  ;;  %v11769_v9 = vsel %vm2464_vm4, %v11767_v57, %v11768_v2 }
 0x373   :  { %20773 = vmatprep.subr.bf16.mxu1 %v24425_v24  ;;  %v26614_v57 = vld [vmem:[#allocation3 + $0x70] sm:$0xff] }
 0x374   :  { %21928 = vmatpush3.bf16.msra.mxu0 %v24421_v42  ;;  %v4044_v42 = vrot.slane %v3993_v48, 4  ;;  %v26611_v48 = vld [vmem:[#allocation3 + $0x68] sm:$0xff] }
 0x375   :  { %20742 = vmatmul.mubr.bf16.gmra.mrb[8].mxu1 %v4025_v22  ;;  %21929 = vmatprep.subr.bf16.mxu0 %v24424_v52 }
 0x376   :  { %20745 = vmatprep.mubr.bf16.mxu1 %v4027_v11  ;;  %20774 = vmatpush3.bf16.msra.mxu1 %v24425_v24  ;;  %v24759_v24 = vld [vmem:[#allocation3 + $0xa8] sm:$0xff]  ;;  %v4045_v7 = vsel %vm2464_vm4, %v4042_v49, %v4044_v42  ;;  %v24761_v11 = vld [vmem:[#allocation3 + $0xb8] sm:$0xff] }
 0x377   :  { %21898 = vmatmul.mubr.bf16.gmra.mrb[76].mxu0 %v11473_v41  ;;  %20775 = vmatprep.subr.bf16.mxu1 %v24426_v4  ;;  %v11772_v63 = vrot.slane %v24759_v24, 4  ;;  %v24436_v41 = vld [vmem:[%s28452_s3 + $0x2c8] sm:$0xff]   ;;  %v26622_v24 = vld [vmem:[#allocation3 + $0x78] sm:$0xff] }
 0x378   :  { %21901 = vmatprep.mubr.bf16.mxu0 %v11475_v27  ;;  %21930 = vmatpush3.bf16.msra.mxu0 %v24424_v52  ;;  %v11771_v52 = vsel %vm2464_vm4, %v11768_v2, %v11770_v61  ;;  %v26536_v27 = vld [vmem:[#allocation3 + $0x28] sm:$0xff]  ;;  %v24768_v2 = vld [vmem:[#allocation3 + $0xf0] sm:$0xff] }
 0x379   :  { %21931 = vmatprep.subr.bf16.mxu0 %v24427_v30  ;;  %v11773_v47 = vsel %vm2464_vm4, %v11770_v61, %v11772_v63  ;;  %v11794_v61 = vrot.slane %v26619_v45, 4 }
 0x37a   :  { %20776 = vmatpush3.bf16.msra.mxu1 %v24426_v4  ;;  %v24760_v4 = vld [vmem:[#allocation3 + $0xb0] sm:$0xff] }
 0x37b   :  { %20777 = vmatprep.subr.bf16.mxu1 %v24428_v35  ;;  %v11774_v22 = vrot.slane %v24760_v4, 4  ;;  %v12057_v4 = vld [vmem:[#allocation3 + $0xa0] sm:$0xff] }
 0x37c   :  { %21932 = vmatpush3.bf16.msra.mxu0 %v24427_v30  ;;  %v11776_v30 = vrot.slane %v24761_v11, 4  ;;  %v4629_v11 = vrot.slane %v26536_v27, 1 }
 0x37d   :  { %20746 = vmatmul.mubr.bf16.gmra.mrb[12].mxu1 %v4029_v16  ;;  %21965 = vmatprep.subr.bf16.mxu0 %v26491_v31  ;;  %v11775_v29 = vsel %vm2464_vm4, %v11772_v63, %v11774_v22  ;;  %v26625_v63 = vld [vmem:[#allocation3 + $0x80] sm:$0xff] }
 0x37e   :  { %20749 = vmatprep.mubr.bf16.mxu1 %v4031_v26  ;;  %20778 = vmatpush3.bf16.msra.mxu1 %v24428_v35  ;;  %v26539_v35 = vld [vmem:[#allocation3 + $0x30] sm:$0xff]  ;;  %v11777_v5 = vsel %vm2464_vm4, %v11774_v22, %v11776_v30  ;;  %v24439_v26 = vld [vmem:[%s28452_s3 + $0x2d8] sm:$0xff]   ;;  %v11779_v20 = vsel %vm2464_vm4, %v11776_v30, %v11778_v0  ;;  %v4577_v22 = vld [vmem:[#allocation3 + $0x20] sm:$0xfe] }
 0x37f   :  { %21902 = vmatmul.mubr.bf16.gmra.mrb[80].mxu0 %v11477_v54  ;;  %20779 = vmatprep.subr.bf16.mxu1 %v24429_v43  ;;  %v26557_v54 = vld [vmem:[#allocation3 + $0x38] sm:$0xff]  ;;  %v4628_v30 = vrot.slane %v4577_v22, 1 }
 0x380   :  { %21905 = vmatprep.mubr.bf16.mxu0 %v11479_v37  ;;  %v26560_v37 = vld [vmem:[#allocation3 + $0x40] sm:$0xff]  ;;  %v4633_v18 = vrot.slane %v26557_v54, 1 }
 0x382   :  { %20780 = vmatpush3.bf16.msra.mxu1 %v24429_v43  ;;  %v24763_v43 = vld [vmem:[#allocation3 + $0xc8] sm:$0xff] }
 0x383   :  { %20813 = vmatprep.subr.bf16.mxu1 %v26506_v28  ;;  %v11780_v16 = vrot.slane %v24763_v43, 4  ;;  %v24452_v43 = vld [vmem:[%s28452_s3 + $0x308] sm:$0xff]  }
 0x385   :  { %20750 = vmatmul.mubr.bf16.gmra.mrb[16].mxu1 %v4033_v21  ;;  %v11781_v1 = vsel %vm2464_vm4, %v11778_v0, %v11780_v16  ;;  %v24765_v21 = vld [vmem:[#allocation3 + $0xd8] sm:$0xff]  ;;  %v11783_v12 = vsel %vm2464_vm4, %v11780_v16, %v11782_v10  ;;  %v24448_v0 = vld [vmem:[%s28452_s3 + $0x2d0] sm:$0xff]  }
 0x386   :  { %20753 = vmatprep.mubr.bf16.mxu1 %v4035_v34  ;;  %v11784_v34 = vrot.slane %v24765_v21, 4  ;;  %v24455_v21 = vld [vmem:[%s28452_s3 + $0x318] sm:$0xff]  }
 0x387   :  { %21906 = vmatmul.mubr.bf16.gmra.mrb[84].mxu0 %v11481_v38  ;;  %v24442_v38 = vld [vmem:[%s28452_s3 + $0x2e8] sm:$0xff]  }
 0x388   :  { %21909 = vmatprep.mubr.bf16.mxu0 %v11483_v32  ;;  %v26577_v32 = vld [vmem:[#allocation3 + $0x48] sm:$0xff]  ;;  %v11785_v3 = vsel %vm2464_vm4, %v11782_v10, %v11784_v34  ;;  %v24451_v10 = vld [vmem:[%s28452_s3 + $0x2e0] sm:$0xff]  }
 0x389   :  { %v4637_v53 = vrot.slane %v26577_v32, 1 }
 0x38d   :  { %20754 = vmatmul.mubr.bf16.gmra.mrb[20].mxu1 %v4037_v51  ;;  %v26594_v51 = vld [vmem:[%s28452_s3 + $0x2c0] sm:$0xff]  }
 0x38e   :  { %20757 = vmatprep.mubr.bf16.mxu1 %v4039_v50  ;;  %v24766_v50 = vld [vmem:[#allocation3 + $0xe0] sm:$0xff] }
 0x38f   :  { %21910 = vmatmul.mubr.bf16.gmra.mrb[88].mxu0 %v11485_v25  ;;  %v11786_v23 = vrot.slane %v24766_v50, 4  ;;  %v24767_v25 = vld [vmem:[#allocation3 + $0xe8] sm:$0xff]  ;;  %v4641_v50 = vrot.slane %v26599_v40, 1 }
 0x390   :  { %21913 = vmatprep.mubr.bf16.mxu0 %v11484_v36  ;;  %v24444_v36 = vld [vmem:[%s28452_s3 + $0x2f0] sm:$0xff]   ;;  %v11788_v33 = vrot.slane %v24767_v25, 4  ;;  %v24458_v25 = vld [vmem:[%s28452_s3 + $0x328] sm:$0xff]  }
 0x391   :  { %v11787_v49 = vsel %vm2464_vm4, %v11784_v34, %v11786_v23 }
 0x392   :  { %v11789_v44 = vsel %vm2464_vm4, %v11786_v23, %v11788_v33  ;;  %v24456_v23 = vld [vmem:[%s28452_s3 + $0x2f0] sm:$0xff]  }
 0x395   :  { %20758 = vmatmul.mubr.bf16.gmra.mrb[24].mxu1 %v4041_v13  ;;  %v11790_v13 = vrot.slane %v24768_v2, 4  ;;  %v24460_v2 = vld [vmem:[%s28452_s3 + $0x330] sm:$0xff]  }
 0x396   :  { %20761 = vmatprep.mubr.bf16.mxu1 %v4043_v60 }
 0x397   :  { %21914 = vmatmul.mubr.bf16.gmra.mrb[92].mxu0 %v11489_v39  ;;  %v24769_v39 = vld [vmem:[#allocation3 + $0xf8] sm:$0xff] }
 0x398   :  { %21933 = vmatprep.mubr.bf16.mxu0 %v11769_v9  ;;  %v11792_v60 = vrot.slane %v24769_v39, 4  ;;  %v11791_v9 = vsel %vm2464_vm4, %v11788_v33, %v11790_v13  ;;  %v4645_v39 = vrot.slane %v26611_v48, 1 }
 0x39a   :  { %v11793_v42 = vsel %vm2464_vm4, %v11790_v13, %v11792_v60  ;;  %v4643_v13 = vrot.slane %v26602_v19, 1 }
 0x39d   :  { %20762 = vmatmul.mubr.bf16.gmra.mrb[28].mxu1 %v4045_v7  ;;  %v11748_v7 = vld [vmem:[#allocation3 + $0x110] sm:$0xf] }
 0x39e   :  { %20781 = vmatprep.mubr.bf16.mxu1 %v4303_v14  ;;  %v11795_v14 = vsel %vm2464_vm4, %v11792_v60, %v11794_v61  ;;  %v26722_v60 = vld [vmem:[%s28452_s3 + $0x300] sm:$0xff]  }
 0x39f   :  { %21934 = vmatmul.mubr.bf16.vlgmr.msra.gmra.mrb[64].mxu0 %v11771_v52  ;;  %v26629_v52 = vld [vmem:[#allocation3 + $0x88] sm:$0xff] }
 0x3a0   :  { %21966 = vmatpush3.bf16.msra.mxu0 %v26491_v31  ;;  %21937 = vmatprep.mubr.bf16.mxu0 %v11773_v47  ;;  %v24435_v31 = vld [vmem:[%s28452_s3 + $0x2a0] sm:$0xff]  }
 0x3a1   :  { %21967 = vmatprep.subr.bf16.mxu0 %v24431_v62 }
 0x3a4   :  { %21968 = vmatpush3.bf16.msra.mxu0 %v24431_v62  ;;  %v11798_v62 = vrot.slane %v11748_v7, 4  ;;  %v26730_v7 = vld [vmem:[#allocation3 + $0xe8] sm:$0xff] }
 0x3a5   :  { %20782 = vmatmul.mubr.bf16.vlgmr.msra.gmra.mrb[0].mxu1 %v26536_v27  ;;  %21969 = vmatprep.subr.bf16.mxu0 %v24432_v56 }
 0x3a6   :  { %20785 = vmatprep.mubr.bf16.mxu1 %v26539_v35  ;;  %20814 = vmatpush3.bf16.msra.mxu1 %v26506_v28  ;;  %v24437_v28 = vld [vmem:[%s28452_s3 + $0x2a8] sm:$0xff]   ;;  %v11799_v47 = vsel %vm2464_vm4, %v11794_v61, %v11798_v62  ;;  %v26738_v62 = vld [vmem:[%s28452_s3 + $0x340] sm:$0xff]  }
 0x3a7   :  { %21938 = vmatmul.mubr.bf16.gmra.mrb[68].mxu0 %v11775_v29  ;;  %20815 = vmatprep.subr.bf16.mxu1 %v24436_v41  ;;  %v24447_v29 = vld [vmem:[%s28452_s3 + $0x2c8] sm:$0xff]  }
 0x3a8   :  { %21941 = vmatprep.mubr.bf16.mxu0 %v11777_v5  ;;  %21970 = vmatpush3.bf16.msra.mxu0 %v24432_v56  ;;  %v26633_v56 = vld [vmem:[#allocation3 + $0x90] sm:$0xff]  ;;  %v26644_v5 = vld [vmem:[#allocation3 + $0xa8] sm:$0xff] }
 0x3a9   :  { %21971 = vmatprep.subr.bf16.mxu0 %v24433_v6 }
 0x3aa   :  { %20816 = vmatpush3.bf16.msra.mxu1 %v24436_v41  ;;  %v26637_v41 = vld [vmem:[#allocation3 + $0x98] sm:$0xff] }
 0x3ab   :  { %20817 = vmatprep.subr.bf16.mxu1 %v24438_v55 }
 0x3ac   :  { %21972 = vmatpush3.bf16.msra.mxu0 %v24433_v6  ;;  %v4630_v6 = vsel %vm1351_vm1, %v4628_v30, %v4629_v11  ;;  %v26746_v30 = vld [vmem:[#allocation3 + $0xf8] sm:$0xff] }
 0x3ad   :  { %20786 = vmatmul.mubr.bf16.gmra.mrb[4].mxu1 %v26557_v54  ;;  %21973 = vmatprep.subr.bf16.mxu0 %v24435_v31 }
 0x3ae   :  { %20789 = vmatprep.mubr.bf16.mxu1 %v26560_v37  ;;  %20818 = vmatpush3.bf16.msra.mxu1 %v24438_v55  ;;  %v26647_v55 = vld [vmem:[#allocation3 + $0xb0] sm:$0xff] }
 0x3af   :  { %21942 = vmatmul.mubr.bf16.gmra.mrb[72].mxu0 %v11779_v20  ;;  %20819 = vmatprep.subr.bf16.mxu1 %v24439_v26  ;;  %v26664_v20 = vld [vmem:[#allocation3 + $0xb8] sm:$0xff] }
 0x3b0   :  { %21945 = vmatprep.mubr.bf16.mxu0 %v11781_v1  ;;  %21974 = vmatpush3.bf16.msra.mxu0 %v24435_v31  ;;  %v4631_v31 = vrot.slane %v26539_v35, 1  ;;  %v26667_v1 = vld [vmem:[#allocation3 + $0xc0] sm:$0xff] }
 0x3b1   :  { %21975 = vmatprep.subr.bf16.mxu0 %v24437_v28 }
 0x3b2   :  { %20820 = vmatpush3.bf16.msra.mxu1 %v24439_v26  ;;  %v4632_v16 = vsel %vm1351_vm1, %v4629_v11, %v4631_v31  ;;  %v4634_v26 = vsel %vm1351_vm1, %v4631_v31, %v4633_v18 }
 0x3b3   :  { %20821 = vmatprep.subr.bf16.mxu1 %v24441_v59 }
 0x3b4   :  { %21976 = vmatpush3.bf16.msra.mxu0 %v24437_v28  ;;  %v24449_v28 = vld [vmem:[%s28452_s3 + $0x2d8] sm:$0xff]  }
 0x3b5   :  { %20790 = vmatmul.mubr.bf16.gmra.mrb[8].mxu1 %v26577_v32  ;;  %21977 = vmatprep.subr.bf16.mxu0 %v24440_v58 }
 0x3b6   :  { %20793 = vmatprep.mubr.bf16.mxu1 %v26580_v8  ;;  %20822 = vmatpush3.bf16.msra.mxu1 %v24441_v59  ;;  %v24454_v59 = vld [vmem:[%s28452_s3 + $0x310] sm:$0xff]  }
 0x3b7   :  { %21946 = vmatmul.mubr.bf16.gmra.mrb[76].mxu0 %v11783_v12  ;;  %20823 = vmatprep.subr.bf16.mxu1 %v24442_v38  ;;  %v26686_v12 = vld [vmem:[#allocation3 + $0xc8] sm:$0xff] }
 0x3b8   :  { %21949 = vmatprep.mubr.bf16.mxu0 %v11785_v3  ;;  %21978 = vmatpush3.bf16.msra.mxu0 %v24440_v58  ;;  %v4635_v58 = vrot.slane %v26560_v37, 1  ;;  %v26689_v3 = vld [vmem:[#allocation3 + $0xd0] sm:$0xff] }
 0x3b9   :  { %21979 = vmatprep.subr.bf16.mxu0 %v24443_v46 }
 0x3ba   :  { %20824 = vmatpush3.bf16.msra.mxu1 %v24442_v38  ;;  %v4636_v34 = vsel %vm1351_vm1, %v4633_v18, %v4635_v58  ;;  %v4638_v38 = vsel %vm1351_vm1, %v4635_v58, %v4637_v53  ;;  %v4593_v58 = vld [vmem:[#allocation3 + $0xa0] sm:$0x1] }
 0x3bb   :  { %20825 = vmatprep.subr.bf16.mxu1 %v24444_v36 }
 0x3bc   :  { %21980 = vmatpush3.bf16.msra.mxu0 %v24443_v46  ;;  %v24453_v46 = vld [vmem:[%s28452_s3 + $0x2e8] sm:$0xff]  }
 0x3bd   :  { %20794 = vmatmul.mubr.bf16.gmra.mrb[12].mxu1 %v26599_v40  ;;  %22013 = vmatprep.subr.bf16.mxu0 %v26594_v51 }
 0x3be   :  { %20797 = vmatprep.mubr.bf16.mxu1 %v26602_v19  ;;  %20826 = vmatpush3.bf16.msra.mxu1 %v24444_v36  ;;  %v24457_v36 = vld [vmem:[%s28452_s3 + $0x320] sm:$0xff]  }
 0x3bf   :  { %21950 = vmatmul.mubr.bf16.gmra.mrb[80].mxu0 %v11787_v49  ;;  %20827 = vmatprep.subr.bf16.mxu1 %v24445_v17  ;;  %v24459_v49 = vld [vmem:[%s28452_s3 + $0x2f8] sm:$0xff]  }
 0x3c0   :  { %21953 = vmatprep.mubr.bf16.mxu0 %v11789_v44  ;;  %v26708_v44 = vld [vmem:[#allocation3 + $0xd8] sm:$0xff] }
 0x3c2   :  { %20828 = vmatpush3.bf16.msra.mxu1 %v24445_v17 }
 0x3c3   :  { %20861 = vmatprep.subr.bf16.mxu1 %v24450_v15 }
 0x3c5   :  { %20798 = vmatmul.mubr.bf16.gmra.mrb[16].mxu1 %v26611_v48 }
 0x3c6   :  { %20801 = vmatprep.mubr.bf16.mxu1 %v26614_v57 }
 0x3c7   :  { %21954 = vmatmul.mubr.bf16.gmra.mrb[84].mxu0 %v11791_v9  ;;  %v24461_v9 = vld [vmem:[%s28452_s3 + $0x338] sm:$0xff]  }
 0x3c8   :  { %21957 = vmatprep.mubr.bf16.mxu0 %v11793_v42  ;;  %v4644_v42 = vsel %vm1351_vm1, %v4641_v50, %v4643_v13 }
 0x3cd   :  { %20802 = vmatmul.mubr.bf16.gmra.mrb[20].mxu1 %v26622_v24 }
 0x3ce   :  { %20805 = vmatprep.mubr.bf16.mxu1 %v26625_v63 }
 0x3cf   :  { %21958 = vmatmul.mubr.bf16.gmra.mrb[88].mxu0 %v11795_v14  ;;  %v26733_v14 = vld [vmem:[#allocation3 + $0xf0] sm:$0xff] }
 0x3d0   :  { %21961 = vmatprep.mubr.bf16.mxu0 %v11794_v61  ;;  %v4646_v61 = vsel %vm1351_vm1, %v4643_v13, %v4645_v39  ;;  %v24464_v13 = vld [vmem:[%s28452_s3 + $0x310] sm:$0xff]  }
 0x3d5   :  { %20806 = vmatmul.mubr.bf16.gmra.mrb[24].mxu1 %v26629_v52 }
 0x3d6   :  { %20809 = vmatprep.mubr.bf16.mxu1 %v26633_v56 }
 0x3d7   :  { %21962 = vmatmul.mubr.bf16.gmra.mrb[92].mxu0 %v11799_v47  ;;  %v4647_v47 = vrot.slane %v26614_v57, 1 }
 0x3d8   :  { %21981 = vmatprep.mubr.bf16.mxu0 %v12057_v4  ;;  %v4649_v4 = vrot.slane %v26622_v24, 1 }
 0x3d9   :  { %v4648_v22 = vsel %vm1351_vm1, %v4645_v39, %v4647_v47  ;;  %v12387_v39 = vrot.slane %v26667_v1, 1 }
 0x3da   :  { %v4650_v11 = vsel %vm1351_vm1, %v4647_v47, %v4649_v4  ;;  %v24465_v47 = vld [vmem:[%s28452_s3 + $0x318] sm:$0xff]  }
 0x3dd   :  { %20810 = vmatmul.mubr.bf16.gmra.mrb[28].mxu1 %v26637_v41 }
 0x3de   :  { %20829 = vmatprep.mubr.bf16.mxu1 %v4630_v6  ;;  %v4651_v6 = vrot.slane %v26625_v63, 1 }
 0x3df   :  { %21982 = vmatmul.mubr.bf16.vlgmr.msra.gmra.mrb[64].mxu0 %v26644_v5 }
 0x3e0   :  { %22014 = vmatpush3.bf16.msra.mxu0 %v26594_v51  ;;  %21985 = vmatprep.mubr.bf16.mxu0 %v26647_v55  ;;  %v4639_v51 = vrot.slane %v26580_v8, 1  ;;  %v4652_v31 = vsel %vm1351_vm1, %v4649_v4, %v4651_v6 }
 0x3e1   :  { %22015 = vmatprep.subr.bf16.mxu0 %v24447_v29 }
 0x3e2   :  { %v4640_v33 = vsel %vm1351_vm1, %v4637_v53, %v4639_v51  ;;  %v4642_v17 = vsel %vm1351_vm1, %v4639_v51, %v4641_v50  ;;  %v12385_v51 = vrot.slane %v26664_v20, 1 }
 0x3e4   :  { %22016 = vmatpush3.bf16.msra.mxu0 %v24447_v29  ;;  %v4653_v29 = vrot.slane %v26629_v52, 1  ;;  %v12388_v4 = vsel %vm1351_vm1, %v12385_v51, %v12387_v39 }
 0x3e5   :  { %20830 = vmatmul.mubr.bf16.vlgmr.msra.gmra.mrb[0].mxu1 %v4632_v16  ;;  %22017 = vmatprep.subr.bf16.mxu0 %v24448_v0  ;;  %v12330_v16 = vld [vmem:[#allocation3 + $0xa0] sm:$0xfe] }
 0x3e6   :  { %20833 = vmatprep.mubr.bf16.mxu1 %v4634_v26  ;;  %20862 = vmatpush3.bf16.msra.mxu1 %v24450_v15  ;;  %v26711_v15 = vld [vmem:[#allocation3 + $0xe0] sm:$0xff]  ;;  %v4654_v18 = vsel %vm1351_vm1, %v4651_v6, %v4653_v29  ;;  %v12381_v26 = vrot.slane %v26644_v5, 1  ;;  %v12380_v53 = vrot.slane %v12330_v16, 1  ;;  %v4946_v6 = vrot.slane %v26560_v37, 2 }
 0x3e7   :  { %21986 = vmatmul.mubr.bf16.gmra.mrb[68].mxu0 %v26664_v20  ;;  %20863 = vmatprep.subr.bf16.mxu1 %v24452_v43 }
 0x3e8   :  { %21989 = vmatprep.mubr.bf16.mxu0 %v26667_v1  ;;  %22018 = vmatpush3.bf16.msra.mxu0 %v24448_v0  ;;  %v4655_v0 = vrot.slane %v26633_v56, 1 }
 0x3e9   :  { %22019 = vmatprep.subr.bf16.mxu0 %v24449_v28 }
 0x3ea   :  { %20864 = vmatpush3.bf16.msra.mxu1 %v24452_v43  ;;  %v4657_v43 = vrot.slane %v26637_v41, 1 }
 0x3eb   :  { %20865 = vmatprep.subr.bf16.mxu1 %v24454_v59 }
 0x3ec   :  { %22020 = vmatpush3.bf16.msra.mxu0 %v24449_v28  ;;  %v4656_v28 = vsel %vm1351_vm1, %v4653_v29, %v4655_v0  ;;  %v4948_v29 = vrot.slane %v26577_v32, 2 }
 0x3ed   :  { %20834 = vmatmul.mubr.bf16.gmra.mrb[4].mxu1 %v4636_v34  ;;  %22021 = vmatprep.subr.bf16.mxu0 %v24451_v10  ;;  %v4918_v34 = vld [vmem:[#allocation3 + $0x20] sm:$0xfc] }
 0x3ee   :  { %20837 = vmatprep.mubr.bf16.mxu1 %v4638_v38  ;;  %20866 = vmatpush3.bf16.msra.mxu1 %v24454_v59  ;;  %v4658_v59 = vsel %vm1351_vm1, %v4655_v0, %v4657_v43  ;;  %v4940_v38 = vrot.slane %v26536_v27, 2  ;;  %v24471_v0 = vld [vmem:[%s28452_s3 + $0x358] sm:$0xff]   ;;  %v4949_v16 = vsel %vm1840_vm2, %v4946_v6, %v4948_v29 }
 0x3ef   :  { %21990 = vmatmul.mubr.bf16.gmra.mrb[72].mxu0 %v26686_v12  ;;  %20867 = vmatprep.subr.bf16.mxu1 %v24455_v21 }
 0x3f0   :  { %21993 = vmatprep.mubr.bf16.mxu0 %v26689_v3  ;;  %22022 = vmatpush3.bf16.msra.mxu0 %v24451_v10  ;;  %v12382_v10 = vsel %vm1351_vm1, %v12380_v53, %v12381_v26  ;;  %v4950_v53 = vrot.slane %v26580_v8, 2 }
 0x3f1   :  { %22023 = vmatprep.subr.bf16.mxu0 %v24453_v46 }
 0x3f2   :  { %20868 = vmatpush3.bf16.msra.mxu1 %v24455_v21  ;;  %v4659_v21 = vrot.slane %v4593_v58, 1  ;;  %v24473_v58 = vld [vmem:[%s28452_s3 + $0x360] sm:$0xff]  }
 0x3f3   :  { %20869 = vmatprep.subr.bf16.mxu1 %v24457_v36 }
 0x3f4   :  { %22024 = vmatpush3.bf16.msra.mxu0 %v24453_v46  ;;  %v12383_v46 = vrot.slane %v26647_v55, 1  ;;  %v4660_v50 = vsel %vm1351_vm1, %v4657_v43, %v4659_v21  ;;  %v24472_v21 = vld [vmem:[%s28452_s3 + $0x330] sm:$0xff]  }
 0x3f5   :  { %20838 = vmatmul.mubr.bf16.gmra.mrb[8].mxu1 %v4640_v33  ;;  %22025 = vmatprep.subr.bf16.mxu0 %v24456_v23 }
 0x3f6   :  { %20841 = vmatprep.mubr.bf16.mxu1 %v4642_v17  ;;  %20870 = vmatpush3.bf16.msra.mxu1 %v24457_v36  ;;  %v4939_v36 = vrot.slane %v4918_v34, 2  ;;  %v12384_v33 = vsel %vm1351_vm1, %v12381_v26, %v12383_v46  ;;  %v12386_v17 = vsel %vm1351_vm1, %v12383_v46, %v12385_v51  ;;  %v24469_v26 = vld [vmem:[%s28452_s3 + $0x328] sm:$0xff]   ;;  %v12395_v34 = vrot.slane %v26711_v15, 1 }
 0x3f7   :  { %21994 = vmatmul.mubr.bf16.gmra.mrb[76].mxu0 %v26708_v44  ;;  %20871 = vmatprep.subr.bf16.mxu1 %v24458_v25  ;;  %v24474_v46 = vld [vmem:[%s28452_s3 + $0x368] sm:$0xff]  }
 0x3f8   :  { %21997 = vmatprep.mubr.bf16.mxu0 %v26711_v15  ;;  %22026 = vmatpush3.bf16.msra.mxu0 %v24456_v23  ;;  %v4941_v23 = vsel %vm1840_vm2, %v4939_v36, %v4940_v38  ;;  %v4951_v36 = vsel %vm1840_vm2, %v4948_v29, %v4950_v53 }
 0x3f9   :  { %22027 = vmatprep.subr.bf16.mxu0 %v24459_v49 }
 0x3fa   :  { %20872 = vmatpush3.bf16.msra.mxu1 %v24458_v25  ;;  %v24463_v25 = vld [vmem:[%s28452_s3 + $0x308] sm:$0xff]  }
 0x3fb   :  { %20873 = vmatprep.subr.bf16.mxu1 %v24460_v2 }
 0x3fc   :  { %22028 = vmatpush3.bf16.msra.mxu0 %v24459_v49  ;;  %v4942_v49 = vrot.slane %v26539_v35, 2 }
 0x3fd   :  { %20842 = vmatmul.mubr.bf16.gmra.mrb[12].mxu1 %v4644_v42  ;;  %22061 = vmatprep.subr.bf16.mxu0 %v26722_v60  ;;  %v24468_v42 = vld [vmem:[%s28452_s3 + $0x348] sm:$0xff]  }
 0x3fe   :  { %20845 = vmatprep.mubr.bf16.mxu1 %v4646_v61  ;;  %20874 = vmatpush3.bf16.msra.mxu1 %v24460_v2  ;;  %v4944_v2 = vrot.slane %v26557_v54, 2  ;;  %v4943_v61 = vsel %vm1840_vm2, %v4940_v38, %v4942_v49  ;;  %v12397_v38 = vrot.slane %v26730_v7, 1 }
 0x3ff   :  { %21998 = vmatmul.mubr.bf16.gmra.mrb[80].mxu0 %v26730_v7  ;;  %20875 = vmatprep.subr.bf16.mxu1 %v24461_v9 }
 0x400   :  { %22001 = vmatprep.mubr.bf16.mxu0 %v26733_v14  ;;  %v4947_v43 = vsel %vm1840_vm2, %v4944_v2, %v4946_v6  ;;  %v12403_v6 = vrot.slane %v26619_v45, 1 }
 0x402   :  { %20876 = vmatpush3.bf16.msra.mxu1 %v24461_v9  ;;  %v12389_v9 = vrot.slane %v26686_v12, 1 }
 0x403   :  { %20909 = vmatprep.subr.bf16.mxu1 %v26738_v62 }
 0x405   :  { %20846 = vmatmul.mubr.bf16.gmra.mrb[16].mxu1 %v4648_v22  ;;  %v12390_v22 = vsel %vm1351_vm1, %v12387_v39, %v12389_v9  ;;  %v12401_v39 = vrot.slane %v26746_v30, 1 }
 0x406   :  { %20849 = vmatprep.mubr.bf16.mxu1 %v4650_v11  ;;  %v24470_v11 = vld [vmem:[%s28452_s3 + $0x350] sm:$0xff]  }
 0x407   :  { %22002 = vmatmul.mubr.bf16.gmra.mrb[84].mxu0 %v26746_v30 }
 0x408   :  { %22005 = vmatprep.mubr.bf16.mxu0 %v26619_v45 }
 0x40d   :  { %20850 = vmatmul.mubr.bf16.gmra.mrb[20].mxu1 %v4652_v31  ;;  %v24467_v31 = vld [vmem:[%s28452_s3 + $0x320] sm:$0xff]  }
 0x40e   :  { %20853 = vmatprep.mubr.bf16.mxu1 %v4654_v18  ;;  %v12393_v18 = vrot.slane %v26708_v44, 1 }
 0x40f   :  { %22006 = vmatmul.mubr.bf16.gmra.mrb[88].mxu0 %v26619_v45 }
 0x410   :  { %22009 = vmatprep.mubr.bf16.mxu0 %v26619_v45 }
 0x415   :  { %20854 = vmatmul.mubr.bf16.gmra.mrb[24].mxu1 %v4656_v28 }
 0x416   :  { %20857 = vmatprep.mubr.bf16.mxu1 %v4658_v59 }
 0x417   :  { %22010 = vmatmul.mubr.bf16.gmra.mrb[92].mxu0 %v26619_v45 }
 0x418   :  { %22029 = vmatprep.mubr.bf16.mxu0 %v12382_v10  ;;  %v4952_v10 = vrot.slane %v26599_v40, 2 }
 0x41a   :  { %v4953_v51 = vsel %vm1840_vm2, %v4950_v53, %v4952_v10  ;;  %v12670_v53 = vld [vmem:[#allocation3 + $0xa0] sm:$0xfc] }
 0x41d   :  { %20858 = vmatmul.mubr.bf16.gmra.mrb[28].mxu1 %v4660_v50  ;;  %v24475_v50 = vld [vmem:[%s28452_s3 + $0x338] sm:$0xff]  }
 0x41e   :  { %20877 = vmatprep.mubr.bf16.mxu1 %v4941_v23  ;;  %v12396_v23 = vsel %vm1351_vm1, %v12393_v18, %v12395_v34 }
 0x41f   :  { %22030 = vmatmul.mubr.bf16.vlgmr.msra.gmra.mrb[64].mxu0 %v12384_v33  ;;  %v24476_v33 = vld [vmem:[%s28452_s3 + $0x370] sm:$0xff]  }
 0x420   :  { %22062 = vmatpush3.bf16.msra.mxu0 %v26722_v60  ;;  %22033 = vmatprep.mubr.bf16.mxu0 %v12386_v17  ;;  %v4945_v60 = vsel %vm1840_vm2, %v4942_v49, %v4944_v2  ;;  %v4954_v17 = vrot.slane %v26602_v19, 2  ;;  %v4956_v49 = vrot.slane %v26611_v48, 2  ;;  %v26840_v2 = vld [vmem:[%s28452_s3 + $0x340] sm:$0xff]  }
 0x421   :  { %22063 = vmatprep.subr.bf16.mxu0 %v24463_v25 }
 0x424   :  { %22064 = vmatpush3.bf16.msra.mxu0 %v24463_v25  ;;  %v12398_v25 = vsel %vm1351_vm1, %v12395_v34, %v12397_v38 }
 0x425   :  { %20878 = vmatmul.mubr.bf16.vlgmr.msra.gmra.mrb[0].mxu1 %v4943_v61  ;;  %22065 = vmatprep.subr.bf16.mxu0 %v24464_v13  ;;  %v4957_v61 = vsel %vm1840_vm2, %v4954_v17, %v4956_v49 }
 0x426   :  { %20881 = vmatprep.mubr.bf16.mxu1 %v4945_v60  ;;  %20910 = vmatpush3.bf16.msra.mxu1 %v26738_v62  ;;  %v12391_v62 = vrot.slane %v26689_v3, 1 }
 0x427   :  { %22034 = vmatmul.mubr.bf16.gmra.mrb[68].mxu0 %v12388_v4  ;;  %20911 = vmatprep.subr.bf16.mxu1 %v24468_v42  ;;  %v26855_v4 = vld [vmem:[%s28452_s3 + $0x380] sm:$0xff]  }
 0x428   :  { %22037 = vmatprep.mubr.bf16.mxu0 %v12390_v22  ;;  %22066 = vmatpush3.bf16.msra.mxu0 %v24464_v13  ;;  %v12392_v28 = vsel %vm1351_vm1, %v12389_v9, %v12391_v62  ;;  %v12394_v59 = vsel %vm1351_vm1, %v12391_v62, %v12393_v18  ;;  %v12399_v13 = vrot.slane %v26733_v14, 1  ;;  %v24477_v9 = vld [vmem:[%s28452_s3 + $0x378] sm:$0xff]   ;;  %v4958_v22 = vrot.slane %v26614_v57, 2 }
 0x429   :  { %22067 = vmatprep.subr.bf16.mxu0 %v24465_v47  ;;  %v12404_v62 = vsel %vm1351_vm1, %v12401_v39, %v12403_v6  ;;  %v4962_v18 = vrot.slane %v26625_v63, 2 }
 0x42a   :  { %20912 = vmatpush3.bf16.msra.mxu1 %v24468_v42  ;;  %v4955_v42 = vsel %vm1840_vm2, %v4952_v10, %v4954_v17  ;;  %v12400_v60 = vsel %vm1351_vm1, %v12397_v38, %v12399_v13  ;;  %v4959_v29 = vsel %vm1840_vm2, %v4956_v49, %v4958_v22  ;;  %v12691_v10 = vrot.slane %v26644_v5, 2 }
 0x42b   :  { %20913 = vmatprep.subr.bf16.mxu1 %v24470_v11  ;;  %v12695_v49 = vrot.slane %v26664_v20, 2 }
 0x42c   :  { %22068 = vmatpush3.bf16.msra.mxu0 %v24465_v47  ;;  %v12402_v47 = vsel %vm1351_vm1, %v12399_v13, %v12401_v39 }
 0x42d   :  { %20882 = vmatmul.mubr.bf16.gmra.mrb[4].mxu1 %v4947_v43  ;;  %22069 = vmatprep.subr.bf16.mxu0 %v24467_v31 }
 0x42e   :  { %20885 = vmatprep.mubr.bf16.mxu1 %v4949_v16  ;;  %20914 = vmatpush3.bf16.msra.mxu1 %v24470_v11  ;;  %v4960_v11 = vrot.slane %v26622_v24, 2 }
 0x42f   :  { %22038 = vmatmul.mubr.bf16.gmra.mrb[72].mxu0 %v12392_v28  ;;  %20915 = vmatprep.subr.bf16.mxu1 %v24471_v0  ;;  %v4966_v28 = vrot.slane %v26633_v56, 2 }
 0x430   :  { %22041 = vmatprep.mubr.bf16.mxu0 %v12394_v59  ;;  %22070 = vmatpush3.bf16.msra.mxu0 %v24467_v31  ;;  %v4961_v31 = vsel %vm1840_vm2, %v4958_v22, %v4960_v11  ;;  %v4963_v43 = vsel %vm1840_vm2, %v4960_v11, %v4962_v18  ;;  %v12697_v22 = vrot.slane %v26667_v1, 2  ;;  %v12699_v11 = vrot.slane %v26686_v12, 2 }
 0x431   :  { %22071 = vmatprep.subr.bf16.mxu0 %v24469_v26 }
 0x432   :  { %20916 = vmatpush3.bf16.msra.mxu1 %v24471_v0  ;;  %v4964_v0 = vrot.slane %v26629_v52, 2 }
 0x433   :  { %20917 = vmatprep.subr.bf16.mxu1 %v24473_v58 }
 0x434   :  { %22072 = vmatpush3.bf16.msra.mxu0 %v24469_v26  ;;  %v4965_v16 = vsel %vm1840_vm2, %v4962_v18, %v4964_v0  ;;  %v12346_v26 = vld [vmem:[#allocation3 + $0x120] sm:$0x1]  ;;  %v5257_v18 = vrot.slane %v26560_v37, 3 }
 0x435   :  { %20886 = vmatmul.mubr.bf16.gmra.mrb[8].mxu1 %v4951_v36  ;;  %22073 = vmatprep.subr.bf16.mxu0 %v24472_v21  ;;  %v12411_v59 = vrot.slane %v12346_v26, 1  ;;  %v12690_v36 = vrot.slane %v12670_v53, 2  ;;  %v24487_v26 = vld [vmem:[%s28452_s3 + $0x398] sm:$0xff]   ;;  %v24489_v53 = vld [vmem:[%s28452_s3 + $0x3a0] sm:$0xff]  }
 0x436   :  { %20889 = vmatprep.mubr.bf16.mxu1 %v4953_v51  ;;  %20918 = vmatpush3.bf16.msra.mxu1 %v24473_v58  ;;  %v4968_v58 = vrot.slane %v26637_v41, 2 }
 0x437   :  { %22042 = vmatmul.mubr.bf16.gmra.mrb[76].mxu0 %v12396_v23  ;;  %20919 = vmatprep.subr.bf16.mxu1 %v24474_v46  ;;  %v12412_v34 = vsel %vm1351_vm1, %v12403_v6, %v12411_v59  ;;  %v12692_v51 = vsel %vm1840_vm2, %v12690_v36, %v12691_v10  ;;  %v5229_v23 = vld [vmem:[#allocation3 + $0x20] sm:$0xf8]  ;;  %v24490_v36 = vld [vmem:[%s28452_s3 + $0x3a8] sm:$0xff]  }
 0x438   :  { %22045 = vmatprep.mubr.bf16.mxu0 %v12398_v25  ;;  %22074 = vmatpush3.bf16.msra.mxu0 %v24472_v21  ;;  %v4967_v21 = vsel %vm1840_vm2, %v4964_v0, %v4966_v28  ;;  %v4969_v38 = vsel %vm1840_vm2, %v4966_v28, %v4968_v58  ;;  %v5251_v25 = vrot.slane %v26536_v27, 3  ;;  %v5250_v17 = vrot.slane %v5229_v23, 3  ;;  %v24485_v28 = vld [vmem:[%s28452_s3 + $0x368] sm:$0xff]  }
 0x439   :  { %22075 = vmatprep.subr.bf16.mxu0 %v24475_v50  ;;  %v5259_v0 = vrot.slane %v26577_v32, 3 }
 0x43a   :  { %20920 = vmatpush3.bf16.msra.mxu1 %v24474_v46  ;;  %v4919_v46 = vld [vmem:[#allocation3 + $0xa0] sm:$0x3]  ;;  %v5252_v39 = vsel %vm2152_vm3, %v5250_v17, %v5251_v25  ;;  %v5267_v17 = vrot.slane %v26611_v48, 3 }
 0x43b   :  { %20921 = vmatprep.subr.bf16.mxu1 %v24476_v33  ;;  %v5260_v32 = vsel %vm2152_vm3, %v5257_v18, %v5259_v0 }
 0x43c   :  { %22076 = vmatpush3.bf16.msra.mxu0 %v24475_v50  ;;  %v4970_v50 = vrot.slane %v4919_v46, 2  ;;  %v12707_v46 = vrot.slane %v26730_v7, 2 }
 0x43d   :  { %20890 = vmatmul.mubr.bf16.gmra.mrb[12].mxu1 %v4955_v42  ;;  %22109 = vmatprep.subr.bf16.mxu0 %v26840_v2 }
 0x43e   :  { %20893 = vmatprep.mubr.bf16.mxu1 %v4957_v61  ;;  %20922 = vmatpush3.bf16.msra.mxu1 %v24476_v33  ;;  %v12693_v33 = vrot.slane %v26647_v55, 2  ;;  %v4971_v13 = vsel %vm1840_vm2, %v4968_v58, %v4970_v50  ;;  %v5253_v61 = vrot.slane %v26539_v35, 3 }
 0x43f   :  { %22046 = vmatmul.mubr.bf16.gmra.mrb[80].mxu0 %v12400_v60  ;;  %20923 = vmatprep.subr.bf16.mxu1 %v24477_v9  ;;  %v5255_v60 = vrot.slane %v26557_v54, 3  ;;  %v24481_v54 = vld [vmem:[%s28452_s3 + $0x358] sm:$0xff]  }
 0x440   :  { %22049 = vmatprep.mubr.bf16.mxu0 %v12402_v47  ;;  %v12694_v42 = vsel %vm1840_vm2, %v12691_v10, %v12693_v33  ;;  %v12696_v27 = vsel %vm1840_vm2, %v12693_v33, %v12695_v49  ;;  %v24480_v47 = vld [vmem:[%s28452_s3 + $0x350] sm:$0xff]   ;;  %v5254_v35 = vsel %vm2152_vm3, %v5251_v25, %v5253_v61  ;;  %v5261_v10 = vrot.slane %v26580_v8, 3 }
 0x441   :  { %v5258_v37 = vsel %vm2152_vm3, %v5255_v60, %v5257_v18  ;;  %v24492_v25 = vld [vmem:[%s28452_s3 + $0x3b0] sm:$0xff]   ;;  %v5265_v33 = vrot.slane %v26602_v19, 3  ;;  %v24493_v19 = vld [vmem:[%s28452_s3 + $0x3b8] sm:$0xff]   ;;  %v12980_v18 = vld [vmem:[#allocation3 + $0xa0] sm:$0xf8] }
 0x442   :  { %20924 = vmatpush3.bf16.msra.mxu1 %v24477_v9  ;;  %v24479_v9 = vld [vmem:[%s28452_s3 + $0x348] sm:$0xff]   ;;  %v5262_v8 = vsel %vm2152_vm3, %v5259_v0, %v5261_v10 }
 0x443   :  { %20957 = vmatprep.subr.bf16.mxu1 %v26855_v4  ;;  %v5268_v48 = vsel %vm2152_vm3, %v5265_v33, %v5267_v17 }
 0x445   :  { %20894 = vmatmul.mubr.bf16.gmra.mrb[16].mxu1 %v4959_v29  ;;  %v12698_v29 = vsel %vm1840_vm2, %v12695_v49, %v12697_v22  ;;  %v26952_v49 = vld [vmem:[%s28452_s3 + $0x380] sm:$0xff]  }
 0x446   :  { %20897 = vmatprep.mubr.bf16.mxu1 %v4961_v31  ;;  %v12700_v31 = vsel %vm1840_vm2, %v12697_v22, %v12699_v11  ;;  %v12713_v22 = vrot.slane %v26619_v45, 2 }
 0x447   :  { %22050 = vmatmul.mubr.bf16.gmra.mrb[84].mxu0 %v12404_v62  ;;  %v24486_v62 = vld [vmem:[%s28452_s3 + $0x390] sm:$0xff]  }
 0x448   :  { %22053 = vmatprep.mubr.bf16.mxu0 %v12403_v6 }
 0x44d   :  { %20898 = vmatmul.mubr.bf16.gmra.mrb[20].mxu1 %v4963_v43  ;;  %v24483_v43 = vld [vmem:[%s28452_s3 + $0x360] sm:$0xff]  }
 0x44e   :  { %20901 = vmatprep.mubr.bf16.mxu1 %v4965_v16  ;;  %v12703_v16 = vrot.slane %v26708_v44, 2 }
 0x44f   :  { %22054 = vmatmul.mubr.bf16.gmra.mrb[88].mxu0 %v12403_v6 }
 0x450   :  { %22057 = vmatprep.mubr.bf16.mxu0 %v12403_v6  ;;  %v24484_v6 = vld [vmem:[%s28452_s3 + $0x388] sm:$0xff]  }
 0x455   :  { %20902 = vmatmul.mubr.bf16.gmra.mrb[24].mxu1 %v4967_v21  ;;  %v5263_v21 = vrot.slane %v26599_v40, 3 }
 0x456   :  { %20905 = vmatprep.mubr.bf16.mxu1 %v4969_v38  ;;  %v12705_v38 = vrot.slane %v26711_v15, 2 }
 0x457   :  { %22058 = vmatmul.mubr.bf16.gmra.mrb[92].mxu0 %v12412_v34  ;;  %v24488_v34 = vld [vmem:[%s28452_s3 + $0x370] sm:$0xff]   ;;  %v5264_v40 = vsel %vm2152_vm3, %v5261_v10, %v5263_v21  ;;  %v24495_v10 = vld [vmem:[%s28452_s3 + $0x388] sm:$0xff]  }
 0x458   :  { %22077 = vmatprep.mubr.bf16.mxu0 %v12692_v51  ;;  %v24491_v51 = vld [vmem:[%s28452_s3 + $0x378] sm:$0xff]   ;;  %v12706_v50 = vsel %vm1840_vm2, %v12703_v16, %v12705_v38  ;;  %v12708_v23 = vsel %vm1840_vm2, %v12705_v38, %v12707_v46  ;;  %v24772_v38 = vld [vmem:[#allocation3 + $0x30] sm:$0xff] }
 0x45d   :  { %20906 = vmatmul.mubr.bf16.gmra.mrb[28].mxu1 %v4971_v13  ;;  %v12709_v13 = vrot.slane %v26733_v14, 2 }
 0x45e   :  { %20925 = vmatprep.mubr.bf16.mxu1 %v5252_v39  ;;  %v12711_v39 = vrot.slane %v26746_v30, 2 }
 0x45f   :  { %22078 = vmatmul.mubr.bf16.vlgmr.msra.gmra.mrb[64].mxu0 %v12694_v42  ;;  %v12710_v42 = vsel %vm1840_vm2, %v12707_v46, %v12709_v13 }
 0x460   :  { %22110 = vmatpush3.bf16.msra.mxu0 %v26840_v2  ;;  %22081 = vmatprep.mubr.bf16.mxu0 %v12696_v27  ;;  %v5256_v2 = vsel %vm2152_vm3, %v5253_v61, %v5255_v60  ;;  %v12712_v27 = vsel %vm1840_vm2, %v12709_v13, %v12711_v39  ;;  %v26967_v61 = vld [vmem:[%s28452_s3 + $0x3c0] sm:$0xff]   ;;  %v5269_v60 = vrot.slane %v26614_v57, 3  ;;  %v5275_v57 = vrot.slane %v26629_v52, 3  ;;  %v24775_v13 = vld [vmem:[#allocation3 + $0x48] sm:$0xff] }
 0x461   :  { %22111 = vmatprep.subr.bf16.mxu0 %v24479_v9 }
 0x464   :  { %22112 = vmatpush3.bf16.msra.mxu0 %v24479_v9  ;;  %v5266_v9 = vsel %vm2152_vm3, %v5263_v21, %v5265_v33  ;;  %v24502_v33 = vld [vmem:[%s28452_s3 + $0x3d0] sm:$0xff]  }
 0x465   :  { %20926 = vmatmul.mubr.bf16.vlgmr.msra.gmra.mrb[0].mxu1 %v5254_v35  ;;  %22113 = vmatprep.subr.bf16.mxu0 %v24480_v47  ;;  %v12714_v35 = vsel %vm1840_vm2, %v12711_v39, %v12713_v22  ;;  %v5570_v39 = vrot.slane %v24775_v13, 4 }
 0x466   :  { %20929 = vmatprep.mubr.bf16.mxu1 %v5256_v2  ;;  %20958 = vmatpush3.bf16.msra.mxu1 %v26855_v4  ;;  %v12701_v4 = vrot.slane %v26689_v3, 2  ;;  %v5273_v2 = vrot.slane %v26625_v63, 3  ;;  %v13001_v63 = vrot.slane %v26644_v5, 3  ;;  %v13003_v5 = vrot.slane %v26647_v55, 3 }
 0x467   :  { %22082 = vmatmul.mubr.bf16.gmra.mrb[68].mxu0 %v12698_v29  ;;  %20959 = vmatprep.subr.bf16.mxu1 %v24484_v6  ;;  %v5277_v29 = vrot.slane %v26633_v56, 3  ;;  %v5564_v55 = vrot.slane %v24772_v38, 4  ;;  %v24783_v38 = vld [vmem:[#allocation3 + $0x80] sm:$0xff] }
 0x468   :  { %22085 = vmatprep.mubr.bf16.mxu0 %v12700_v31  ;;  %22114 = vmatpush3.bf16.msra.mxu0 %v24480_v47  ;;  %v12702_v59 = vsel %vm1840_vm2, %v12699_v11, %v12701_v4  ;;  %v12704_v58 = vsel %vm1840_vm2, %v12701_v4, %v12703_v16  ;;  %v5271_v47 = vrot.slane %v26622_v24, 3  ;;  %v5270_v11 = vsel %vm2152_vm3, %v5267_v17, %v5269_v60  ;;  %v5230_v4 = vld [vmem:[#allocation3 + $0xa0] sm:$0x7] }
 0x469   :  { %22115 = vmatprep.subr.bf16.mxu0 %v24481_v54  ;;  %v5276_v45 = vsel %vm2152_vm3, %v5273_v2, %v5275_v57  ;;  %v5278_v0 = vsel %vm2152_vm3, %v5275_v57, %v5277_v29  ;;  %v13000_v16 = vrot.slane %v12980_v18, 3  ;;  %v13004_v21 = vsel %vm2152_vm3, %v13001_v63, %v13003_v5  ;;  %v24774_v17 = vld [vmem:[#allocation3 + $0x40] sm:$0xff] }
 0x46a   :  { %20960 = vmatpush3.bf16.msra.mxu1 %v24484_v6  ;;  %v5272_v6 = vsel %vm2152_vm3, %v5269_v60, %v5271_v47  ;;  %v5274_v24 = vsel %vm2152_vm3, %v5271_v47, %v5273_v2  ;;  %v24501_v60 = vld [vmem:[%s28452_s3 + $0x3a8] sm:$0xff]   ;;  %v24505_v47 = vld [vmem:[%s28452_s3 + $0x3e0] sm:$0xff]   ;;  %v24504_v2 = vld [vmem:[%s28452_s3 + $0x3b0] sm:$0xff]   ;;  %v13015_v57 = vrot.slane %v26711_v15, 3 }
 0x46b   :  { %20961 = vmatprep.subr.bf16.mxu1 %v24486_v62  ;;  %v13002_v56 = vsel %vm2152_vm3, %v13000_v16, %v13001_v63  ;;  %v24778_v18 = vld [vmem:[#allocation3 + $0x60] sm:$0xff]  ;;  %v13021_v16 = vrot.slane %v26746_v30, 3 }
 0x46c   :  { %22116 = vmatpush3.bf16.msra.mxu0 %v24481_v54  ;;  %v12671_v54 = vld [vmem:[#allocation3 + $0x120] sm:$0x3]  ;;  %v5576_v63 = vrot.slane %v24778_v18, 4  ;;  %v24518_v18 = vld [vmem:[%s28452_s3 + $0x410] sm:$0xff]  }
 0x46d   :  { %20930 = vmatmul.mubr.bf16.gmra.mrb[4].mxu1 %v5258_v37  ;;  %22117 = vmatprep.subr.bf16.mxu0 %v24483_v43  ;;  %v12721_v31 = vrot.slane %v12671_v54, 2  ;;  %v5540_v37 = vld [vmem:[#allocation3 + $0x20] sm:$0xf0] }
 0x46e   :  { %20933 = vmatprep.mubr.bf16.mxu1 %v5260_v32  ;;  %20962 = vmatpush3.bf16.msra.mxu1 %v24486_v62  ;;  %v5279_v62 = vrot.slane %v26637_v41, 3  ;;  %v24771_v41 = vld [vmem:[#allocation3 + $0x28] sm:$0xff]  ;;  %v27070_v30 = vld [vmem:[%s28452_s3 + $0x400] sm:$0xff]  }
 0x46f   :  { %22086 = vmatmul.mubr.bf16.gmra.mrb[72].mxu0 %v12702_v59  ;;  %20963 = vmatprep.subr.bf16.mxu1 %v24487_v26  ;;  %v12722_v52 = vsel %vm1840_vm2, %v12713_v22, %v12721_v31  ;;  %v5562_v32 = vrot.slane %v24771_v41, 4  ;;  %v13005_v59 = vrot.slane %v26664_v20, 3  ;;  %v24773_v20 = vld [vmem:[#allocation3 + $0x38] sm:$0xff] }
 0x470   :  { %22089 = vmatprep.mubr.bf16.mxu0 %v12704_v58  ;;  %22118 = vmatpush3.bf16.msra.mxu0 %v24483_v43  ;;  %v5280_v43 = vsel %vm2152_vm3, %v5277_v29, %v5279_v62  ;;  %v5566_v46 = vrot.slane %v24773_v20, 4  ;;  %v24507_v31 = vld [vmem:[%s28452_s3 + $0x3b8] sm:$0xff]   ;;  %v24784_v20 = vld [vmem:[#allocation3 + $0x88] sm:$0xff] }
 0x471   :  { %22119 = vmatprep.subr.bf16.mxu0 %v24485_v28 }
 0x472   :  { %20964 = vmatpush3.bf16.msra.mxu1 %v24487_v26  ;;  %v5281_v26 = vrot.slane %v5230_v4, 3  ;;  %v13019_v4 = vrot.slane %v26733_v14, 3 }
 0x473   :  { %20965 = vmatprep.subr.bf16.mxu1 %v24489_v53 }
 0x474   :  { %22120 = vmatpush3.bf16.msra.mxu0 %v24485_v28  ;;  %v5561_v28 = vrot.slane %v5540_v37, 4  ;;  %v5282_v58 = vsel %vm2152_vm3, %v5279_v62, %v5281_v26  ;;  %v24508_v62 = vld [vmem:[%s28452_s3 + $0x3f0] sm:$0xff]   ;;  %v13022_v14 = vsel %vm2152_vm3, %v13019_v4, %v13021_v16 }
 0x475   :  { %20934 = vmatmul.mubr.bf16.gmra.mrb[8].mxu1 %v5262_v8  ;;  %22121 = vmatprep.subr.bf16.mxu0 %v24488_v34  ;;  %v13007_v8 = vrot.slane %v26667_v1, 3 }
 0x476   :  { %20937 = vmatprep.mubr.bf16.mxu1 %v5264_v40  ;;  %20966 = vmatpush3.bf16.msra.mxu1 %v24489_v53  ;;  %v5563_v53 = vsel %vm2464_vm4, %v5561_v28, %v5562_v32  ;;  %v13009_v40 = vrot.slane %v26686_v12, 3  ;;  %v24781_v28 = vld [vmem:[#allocation3 + $0x78] sm:$0xff] }
 0x477   :  { %22090 = vmatmul.mubr.bf16.gmra.mrb[76].mxu0 %v12706_v50  ;;  %20967 = vmatprep.subr.bf16.mxu1 %v24490_v36  ;;  %v5565_v50 = vsel %vm2464_vm4, %v5562_v32, %v5564_v55  ;;  %v13008_v1 = vsel %vm2152_vm3, %v13005_v59, %v13007_v8  ;;  %v24780_v32 = vld [vmem:[#allocation3 + $0x70] sm:$0xff] }
 0x478   :  { %22093 = vmatprep.mubr.bf16.mxu0 %v12708_v23  ;;  %22122 = vmatpush3.bf16.msra.mxu0 %v24488_v34  ;;  %v13006_v34 = vsel %vm2152_vm3, %v13003_v5, %v13005_v59  ;;  %v5567_v23 = vsel %vm2464_vm4, %v5564_v55, %v5566_v46  ;;  %v13010_v12 = vsel %vm2152_vm3, %v13007_v8, %v13009_v40  ;;  %v5580_v5 = vrot.slane %v24780_v32, 4  ;;  %v24520_v32 = vld [vmem:[%s28452_s3 + $0x3f0] sm:$0xff]  }
 0x479   :  { %22123 = vmatprep.subr.bf16.mxu0 %v24491_v51  ;;  %v5582_v59 = vrot.slane %v24781_v28, 4  ;;  %v5584_v55 = vrot.slane %v24783_v38, 4  ;;  %v24523_v38 = vld [vmem:[%s28452_s3 + $0x3f8] sm:$0xff]  }
 0x47a   :  { %20968 = vmatpush3.bf16.msra.mxu1 %v24490_v36  ;;  %v24496_v36 = vld [vmem:[%s28452_s3 + $0x390] sm:$0xff]  }
 0x47b   :  { %20969 = vmatprep.subr.bf16.mxu1 %v24492_v25 }
 0x47c   :  { %22124 = vmatpush3.bf16.msra.mxu0 %v24491_v51  ;;  %v24500_v51 = vld [vmem:[%s28452_s3 + $0x3c8] sm:$0xff]  }
 0x47d   :  { %20938 = vmatmul.mubr.bf16.gmra.mrb[12].mxu1 %v5266_v9  ;;  %22157 = vmatprep.subr.bf16.mxu0 %v26952_v49  ;;  %v13011_v9 = vrot.slane %v26689_v3, 3 }
 0x47e   :  { %20941 = vmatprep.mubr.bf16.mxu1 %v5268_v48  ;;  %20970 = vmatpush3.bf16.msra.mxu1 %v24492_v25  ;;  %v24497_v25 = vld [vmem:[%s28452_s3 + $0x398] sm:$0xff]   ;;  %v13013_v48 = vrot.slane %v26708_v44, 3 }
 0x47f   :  { %22094 = vmatmul.mubr.bf16.gmra.mrb[80].mxu0 %v12710_v42  ;;  %20971 = vmatprep.subr.bf16.mxu1 %v24493_v19  ;;  %v24503_v42 = vld [vmem:[%s28452_s3 + $0x3d8] sm:$0xff]   ;;  %v13012_v3 = vsel %vm2152_vm3, %v13009_v40, %v13011_v9  ;;  %v12981_v40 = vld [vmem:[#allocation3 + $0x120] sm:$0x7] }
 0x480   :  { %22097 = vmatprep.mubr.bf16.mxu0 %v12712_v27  ;;  %v13014_v44 = vsel %vm2152_vm3, %v13011_v9, %v13013_v48  ;;  %v13016_v15 = vsel %vm2152_vm3, %v13013_v48, %v13015_v57 }
 0x482   :  { %20972 = vmatpush3.bf16.msra.mxu1 %v24493_v19  ;;  %v24499_v19 = vld [vmem:[%s28452_s3 + $0x3a0] sm:$0xff]  }
 0x483   :  { %21005 = vmatprep.subr.bf16.mxu1 %v26967_v61 }
 0x485   :  { %20942 = vmatmul.mubr.bf16.gmra.mrb[16].mxu1 %v5270_v11 }
 0x486   :  { %20945 = vmatprep.mubr.bf16.mxu1 %v5272_v6  ;;  %v24777_v6 = vld [vmem:[#allocation3 + $0x58] sm:$0xff] }
 0x487   :  { %22098 = vmatmul.mubr.bf16.gmra.mrb[84].mxu0 %v12714_v35  ;;  %v5574_v35 = vrot.slane %v24777_v6, 4 }
 0x488   :  { %22101 = vmatprep.mubr.bf16.mxu0 %v12713_v22 }
 0x489   :  { %v5577_v26 = vsel %vm2464_vm4, %v5574_v35, %v5576_v63 }
 0x48d   :  { %20946 = vmatmul.mubr.bf16.gmra.mrb[20].mxu1 %v5274_v24  ;;  %v13017_v24 = vrot.slane %v26730_v7, 3 }
 0x48e   :  { %20949 = vmatprep.mubr.bf16.mxu1 %v5276_v45  ;;  %v24506_v45 = vld [vmem:[%s28452_s3 + $0x3e8] sm:$0xff]  }
 0x48f   :  { %22102 = vmatmul.mubr.bf16.gmra.mrb[88].mxu0 %v12713_v22  ;;  %v13018_v7 = vsel %vm2152_vm3, %v13015_v57, %v13017_v24  ;;  %v13020_v41 = vsel %vm2152_vm3, %v13017_v24, %v13019_v4  ;;  %v24791_v24 = vld [vmem:[#allocation3 + $0xc8] sm:$0xff] }
 0x490   :  { %22105 = vmatprep.mubr.bf16.mxu0 %v12713_v22  ;;  %v24776_v22 = vld [vmem:[#allocation3 + $0x50] sm:$0xff] }
 0x491   :  { %v5572_v11 = vrot.slane %v24776_v22, 4  ;;  %v24511_v22 = vld [vmem:[%s28452_s3 + $0x3c8] sm:$0xff]  }
 0x493   :  { %v5573_v54 = vsel %vm2464_vm4, %v5570_v39, %v5572_v11  ;;  %v5575_v29 = vsel %vm2464_vm4, %v5572_v11, %v5574_v35  ;;  %v24512_v35 = vld [vmem:[%s28452_s3 + $0x3d0] sm:$0xff]  }
 0x495   :  { %20950 = vmatmul.mubr.bf16.gmra.mrb[24].mxu1 %v5278_v0  ;;  %v24779_v0 = vld [vmem:[#allocation3 + $0x68] sm:$0xff] }
 0x496   :  { %20953 = vmatprep.mubr.bf16.mxu1 %v5280_v43  ;;  %v27055_v43 = vld [vmem:[%s28452_s3 + $0x3c0] sm:$0xff]  }
 0x497   :  { %22106 = vmatmul.mubr.bf16.gmra.mrb[92].mxu0 %v12722_v52  ;;  %v5578_v52 = vrot.slane %v24779_v0, 4  ;;  %v24792_v0 = vld [vmem:[#allocation3 + $0xd0] sm:$0xff] }
 0x498   :  { %22125 = vmatprep.mubr.bf16.mxu0 %v13002_v56  ;;  %v24509_v56 = vld [vmem:[%s28452_s3 + $0x3f8] sm:$0xff]  }
 0x499   :  { %v5579_v37 = vsel %vm2464_vm4, %v5576_v63, %v5578_v52  ;;  %v24515_v63 = vld [vmem:[%s28452_s3 + $0x3e0] sm:$0xff]  }
 0x49d   :  { %20954 = vmatmul.mubr.bf16.gmra.mrb[28].mxu1 %v5282_v58  ;;  %v27072_v58 = vld [vmem:[#allocation2 + $0x100] sm:$0xff] }
 0x49e   :  { %20973 = vmatprep.mubr.bf16.mxu1 %v5563_v53  ;;  %v13023_v53 = vrot.slane %v27072_v58, 3 }
 0x49f   :  { %22126 = vmatmul.mubr.bf16.vlgmr.msra.gmra.mrb[64].mxu0 %v13004_v21  ;;  %v5583_v21 = vsel %vm2464_vm4, %v5580_v5, %v5582_v59 }
 0x4a0   :  { %22158 = vmatpush3.bf16.msra.mxu0 %v26952_v49  ;;  %22129 = vmatprep.mubr.bf16.mxu0 %v13006_v34  ;;  %v5568_v49 = vrot.slane %v24774_v17, 4  ;;  %v13024_v34 = vsel %vm2152_vm3, %v13021_v16, %v13023_v53  ;;  %v24519_v16 = vld [vmem:[%s28452_s3 + $0x418] sm:$0xff]  }
 0x4a1   :  { %22159 = vmatprep.subr.bf16.mxu0 %v24495_v10 }
 0x4a2   :  { %v5569_v27 = vsel %vm2464_vm4, %v5566_v46, %v5568_v49  ;;  %v5586_v46 = vrot.slane %v24784_v20, 4 }
 0x4a4   :  { %22160 = vmatpush3.bf16.msra.mxu0 %v24495_v10  ;;  %v5581_v10 = vsel %vm2464_vm4, %v5578_v52, %v5580_v5  ;;  %v5587_v8 = vsel %vm2464_vm4, %v5584_v55, %v5586_v46  ;;  %v13321_v52 = vrot.slane %v24792_v0, 4  ;;  %v24794_v5 = vld [vmem:[#allocation3 + $0xe0] sm:$0xff]  ;;  %v27218_v0 = vld [vmem:[#allocation3 + $0xc8] sm:$0xff] }
 0x4a5   :  { %20974 = vmatmul.mubr.bf16.vlgmr.msra.gmra.mrb[0].mxu1 %v5565_v50  ;;  %22161 = vmatprep.subr.bf16.mxu0 %v24496_v36  ;;  %v13325_v28 = vrot.slane %v24794_v5, 4  ;;  %v27240_v5 = vld [vmem:[#allocation3 + $0xd8] sm:$0xff] }
 0x4a6   :  { %20977 = vmatprep.mubr.bf16.mxu1 %v5567_v23  ;;  %21006 = vmatpush3.bf16.msra.mxu1 %v26967_v61  ;;  %v5571_v61 = vsel %vm2464_vm4, %v5568_v49, %v5570_v39  ;;  %v13031_v23 = vrot.slane %v12981_v40, 3 }
 0x4a7   :  { %22130 = vmatmul.mubr.bf16.gmra.mrb[68].mxu0 %v13008_v1  ;;  %21007 = vmatprep.subr.bf16.mxu1 %v24500_v51 }
 0x4a8   :  { %22133 = vmatprep.mubr.bf16.mxu0 %v13010_v12  ;;  %22162 = vmatpush3.bf16.msra.mxu0 %v24496_v36  ;;  %v5585_v36 = vsel %vm2464_vm4, %v5582_v59, %v5584_v55  ;;  %v13290_v12 = vld [vmem:[#allocation3 + $0xa0] sm:$0xf0]  ;;  %v13032_v13 = vsel %vm2152_vm3, %v13023_v53, %v13031_v23  ;;  %v24795_v59 = vld [vmem:[#allocation3 + $0xe8] sm:$0xff]  ;;  %v24525_v23 = vld [vmem:[%s28452_s3 + $0x438] sm:$0xff]  }
 0x4a9   :  { %22163 = vmatprep.subr.bf16.mxu0 %v24497_v25  ;;  %v13310_v9 = vrot.slane %v13290_v12, 4 }
 0x4aa   :  { %21008 = vmatpush3.bf16.msra.mxu1 %v24500_v51  ;;  %v24785_v51 = vld [vmem:[#allocation3 + $0x90] sm:$0xff] }
 0x4ab   :  { %21009 = vmatprep.subr.bf16.mxu1 %v24502_v33  ;;  %v5588_v50 = vrot.slane %v24785_v51, 4  ;;  %v24797_v51 = vld [vmem:[#allocation3 + $0xf8] sm:$0xff] }
 0x4ac   :  { %22164 = vmatpush3.bf16.msra.mxu0 %v24497_v25  ;;  %v24786_v25 = vld [vmem:[#allocation3 + $0x98] sm:$0xff] }
 0x4ad   :  { %20978 = vmatmul.mubr.bf16.gmra.mrb[4].mxu1 %v5569_v27  ;;  %22165 = vmatprep.subr.bf16.mxu0 %v24499_v19  ;;  %v5590_v1 = vrot.slane %v24786_v25, 4  ;;  %v5589_v49 = vsel %vm2464_vm4, %v5586_v46, %v5588_v50  ;;  %v24788_v27 = vld [vmem:[#allocation3 + $0xb0] sm:$0xff]  ;;  %v27159_v25 = vld [vmem:[#allocation3 + $0x68] sm:$0xff] }
 0x4ae   :  { %20981 = vmatprep.mubr.bf16.mxu1 %v5571_v61  ;;  %21010 = vmatpush3.bf16.msra.mxu1 %v24502_v33  ;;  %v24787_v33 = vld [vmem:[#allocation3 + $0xa8] sm:$0xff]  ;;  %v13313_v61 = vrot.slane %v24788_v27, 4  ;;  %v24524_v46 = vld [vmem:[%s28452_s3 + $0x430] sm:$0xff]  }
 0x4af   :  { %22134 = vmatmul.mubr.bf16.gmra.mrb[72].mxu0 %v13012_v3  ;;  %21011 = vmatprep.subr.bf16.mxu1 %v24503_v42  ;;  %v13311_v17 = vrot.slane %v24787_v33, 4  ;;  %v5591_v39 = vsel %vm2464_vm4, %v5588_v50, %v5590_v1  ;;  %v13331_v50 = vrot.slane %v24797_v51, 4  ;;  %v24540_v51 = vld [vmem:[%s28452_s3 + $0x470] sm:$0xff]  }
 0x4b0   :  { %22137 = vmatprep.mubr.bf16.mxu0 %v13014_v44  ;;  %22166 = vmatpush3.bf16.msra.mxu0 %v24499_v19  ;;  %v5541_v19 = vld [vmem:[#allocation3 + $0xa0] sm:$0xf] }
 0x4b1   :  { %22167 = vmatprep.subr.bf16.mxu0 %v24501_v60  ;;  %v13312_v48 = vsel %vm2464_vm4, %v13310_v9, %v13311_v17  ;;  %v13314_v11 = vsel %vm2464_vm4, %v13311_v17, %v13313_v61  ;;  %v24530_v17 = vld [vmem:[%s28452_s3 + $0x440] sm:$0xff]   ;;  %v27178_v9 = vld [vmem:[#allocation3 + $0x88] sm:$0xff] }
 0x4b2   :  { %21012 = vmatpush3.bf16.msra.mxu1 %v24503_v42  ;;  %v5592_v42 = vrot.slane %v5541_v19, 4 }
 0x4b3   :  { %21013 = vmatprep.subr.bf16.mxu1 %v24505_v47 }
 0x4b4   :  { %22168 = vmatpush3.bf16.msra.mxu0 %v24501_v60  ;;  %v24789_v60 = vld [vmem:[#allocation3 + $0xb8] sm:$0xff]  ;;  %v5593_v44 = vsel %vm2464_vm4, %v5590_v1, %v5592_v42  ;;  %v27162_v1 = vld [vmem:[#allocation3 + $0x70] sm:$0xff]  ;;  %v13291_v42 = vld [vmem:[#allocation3 + $0x120] sm:$0xf] }
 0x4b5   :  { %20982 = vmatmul.mubr.bf16.gmra.mrb[8].mxu1 %v5573_v54  ;;  %22169 = vmatprep.subr.bf16.mxu0 %v24504_v2  ;;  %v13315_v3 = vrot.slane %v24789_v60, 4  ;;  %v24516_v54 = vld [vmem:[%s28452_s3 + $0x408] sm:$0xff]   ;;  %v13341_v27 = vrot.slane %v13291_v42, 4  ;;  %v27287_v42 = vld [vmem:[%s28452_s3 + $0x480] sm:$0xff]  }
 0x4b6   :  { %20985 = vmatprep.mubr.bf16.mxu1 %v5575_v29  ;;  %21014 = vmatpush3.bf16.msra.mxu1 %v24505_v47  ;;  %v5851_v47 = vld [vmem:[#allocation3 + $0x30] sm:$0xff]  ;;  %v27098_v29 = vld [vmem:[#allocation3 + $0x38] sm:$0xff] }
 0x4b7   :  { %22138 = vmatmul.mubr.bf16.gmra.mrb[76].mxu0 %v13016_v15  ;;  %21015 = vmatprep.subr.bf16.mxu1 %v24506_v45  ;;  %v13316_v6 = vsel %vm2464_vm4, %v13313_v61, %v13315_v3  ;;  %v24513_v15 = vld [vmem:[%s28452_s3 + $0x3d8] sm:$0xff]  }
 0x4b8   :  { %22141 = vmatprep.mubr.bf16.mxu0 %v13018_v7  ;;  %22170 = vmatpush3.bf16.msra.mxu0 %v24504_v2  ;;  %v24790_v2 = vld [vmem:[#allocation3 + $0xc0] sm:$0xff]  ;;  %v27184_v61 = vld [vmem:[#allocation3 + $0x98] sm:$0xff] }
 0x4b9   :  { %22171 = vmatprep.subr.bf16.mxu0 %v24507_v31  ;;  %v13317_v57 = vrot.slane %v24790_v2, 4  ;;  %v24527_v2 = vld [vmem:[%s28452_s3 + $0x408] sm:$0xff]  }
 0x4ba   :  { %21016 = vmatpush3.bf16.msra.mxu1 %v24506_v45  ;;  %v13319_v45 = vrot.slane %v24791_v24, 4  ;;  %v27202_v24 = vld [vmem:[#allocation3 + $0xc0] sm:$0xff] }
 0x4bb   :  { %21017 = vmatprep.subr.bf16.mxu1 %v24508_v62  ;;  %v13318_v7 = vsel %vm2464_vm4, %v13315_v3, %v13317_v57  ;;  %v27188_v3 = vld [vmem:[#allocation3 + $0xa0] sm:$0xff] }
 0x4bc   :  { %22172 = vmatpush3.bf16.msra.mxu0 %v24507_v31  ;;  %v27101_v31 = vld [vmem:[#allocation3 + $0x40] sm:$0xff] }
 0x4bd   :  { %20986 = vmatmul.mubr.bf16.gmra.mrb[12].mxu1 %v5577_v26  ;;  %22205 = vmatprep.subr.bf16.mxu0 %v27055_v43  ;;  %v27122_v26 = vld [vmem:[#allocation3 + $0x50] sm:$0xff] }
 0x4be   :  { %20989 = vmatprep.mubr.bf16.mxu1 %v5579_v37  ;;  %21018 = vmatpush3.bf16.msra.mxu1 %v24508_v62  ;;  %v13320_v62 = vsel %vm2464_vm4, %v13317_v57, %v13319_v45  ;;  %v24517_v37 = vld [vmem:[%s28452_s3 + $0x3e8] sm:$0xff]   ;;  %v27199_v57 = vld [vmem:[#allocation3 + $0xb8] sm:$0xff] }
 0x4bf   :  { %22142 = vmatmul.mubr.bf16.gmra.mrb[80].mxu0 %v13020_v41  ;;  %21019 = vmatprep.subr.bf16.mxu1 %v24509_v56  ;;  %v13322_v41 = vsel %vm2464_vm4, %v13319_v45, %v13321_v52  ;;  %v6179_v45 = vrot.slane %v27101_v31, 1 }
 0x4c0   :  { %22145 = vmatprep.mubr.bf16.mxu0 %v13022_v14 }
 0x4c2   :  { %21020 = vmatpush3.bf16.msra.mxu1 %v24509_v56  ;;  %v27119_v56 = vld [vmem:[#allocation3 + $0x48] sm:$0xff] }
 0x4c3   :  { %21053 = vmatprep.subr.bf16.mxu1 %v27070_v30 }
 0x4c5   :  { %20990 = vmatmul.mubr.bf16.gmra.mrb[16].mxu1 %v5581_v10  ;;  %v24522_v10 = vld [vmem:[%s28452_s3 + $0x428] sm:$0xff]  }
 0x4c6   :  { %20993 = vmatprep.mubr.bf16.mxu1 %v5583_v21  ;;  %v27139_v21 = vld [vmem:[#allocation3 + $0x58] sm:$0xff] }
 0x4c7   :  { %22146 = vmatmul.mubr.bf16.gmra.mrb[84].mxu0 %v13024_v34  ;;  %v27142_v34 = vld [vmem:[#allocation3 + $0x60] sm:$0xff] }
 0x4c8   :  { %22149 = vmatprep.mubr.bf16.mxu0 %v13023_v53 }
 0x4cd   :  { %20994 = vmatmul.mubr.bf16.gmra.mrb[20].mxu1 %v5585_v36  ;;  %v24526_v36 = vld [vmem:[%s28452_s3 + $0x400] sm:$0xff]  }
 0x4ce   :  { %20997 = vmatprep.mubr.bf16.mxu1 %v5587_v8  ;;  %v24796_v8 = vld [vmem:[#allocation3 + $0xf0] sm:$0xff] }
 0x4cf   :  { %22150 = vmatmul.mubr.bf16.gmra.mrb[88].mxu0 %v13023_v53  ;;  %v13329_v40 = vrot.slane %v24796_v8, 4  ;;  %v27262_v8 = vld [vmem:[#allocation3 + $0xe8] sm:$0xff] }
 0x4d0   :  { %22153 = vmatprep.mubr.bf16.mxu0 %v13023_v53  ;;  %v13327_v53 = vrot.slane %v24795_v59, 4  ;;  %v24537_v59 = vld [vmem:[%s28452_s3 + $0x460] sm:$0xff]  }
 0x4d1   :  { %v13332_v33 = vsel %vm2464_vm4, %v13329_v40, %v13331_v50 }
 0x4d2   :  { %v13328_v20 = vsel %vm2464_vm4, %v13325_v28, %v13327_v53  ;;  %v13330_v12 = vsel %vm2464_vm4, %v13327_v53, %v13329_v40  ;;  %v6187_v53 = vrot.slane %v27142_v34, 1  ;;  %v27265_v40 = vld [vmem:[#allocation3 + $0xf0] sm:$0xff] }
 0x4d5   :  { %20998 = vmatmul.mubr.bf16.gmra.mrb[24].mxu1 %v5589_v49  ;;  %v13333_v49 = vrot.slane %v27072_v58, 4 }
 0x4d6   :  { %21001 = vmatprep.mubr.bf16.mxu1 %v5591_v39  ;;  %v27174_v39 = vld [vmem:[#allocation3 + $0x80] sm:$0xff] }
 0x4d7   :  { %22154 = vmatmul.mubr.bf16.gmra.mrb[92].mxu0 %v13032_v13  ;;  %v27171_v13 = vld [vmem:[#allocation3 + $0x78] sm:$0xff]  ;;  %v13334_v19 = vsel %vm2464_vm4, %v13331_v50, %v13333_v49  ;;  %v13342_v60 = vsel %vm2464_vm4, %v13333_v49, %v13341_v27  ;;  %v6191_v50 = vrot.slane %v27162_v1, 1  ;;  %v6195_v27 = vrot.slane %v27174_v39, 1 }
 0x4d8   :  { %22173 = vmatprep.mubr.bf16.mxu0 %v13312_v48  ;;  %v27181_v48 = vld [vmem:[#allocation3 + $0x90] sm:$0xff] }
 0x4dd   :  { %21002 = vmatmul.mubr.bf16.gmra.mrb[28].mxu1 %v5593_v44  ;;  %v13600_v44 = vld [vmem:[#allocation3 + $0xb0] sm:$0xff] }
 0x4de   :  { %21021 = vmatprep.mubr.bf16.mxu1 %v5851_v47  ;;  %v6125_v47 = vld [vmem:[#allocation3 + $0x30] sm:$0xfe] }
 0x4df   :  { %22174 = vmatmul.mubr.bf16.vlgmr.msra.gmra.mrb[64].mxu0 %v13314_v11  ;;  %v6176_v11 = vrot.slane %v6125_v47, 1 }
 0x4e0   :  { %22206 = vmatpush3.bf16.msra.mxu0 %v27055_v43  ;;  %22177 = vmatprep.mubr.bf16.mxu0 %v13316_v6  ;;  %v24793_v43 = vld [vmem:[#allocation3 + $0xd8] sm:$0xff]  ;;  %v27192_v6 = vld [vmem:[#allocation3 + $0xa8] sm:$0xff] }
 0x4e1   :  { %22207 = vmatprep.subr.bf16.mxu0 %v24511_v22  ;;  %v13323_v4 = vrot.slane %v24793_v43, 4  ;;  %v24534_v43 = vld [vmem:[%s28452_s3 + $0x450] sm:$0xff]  }
 0x4e3   :  { %v13324_v14 = vsel %vm2464_vm4, %v13321_v52, %v13323_v4  ;;  %v13326_v55 = vsel %vm2464_vm4, %v13323_v4, %v13325_v28  ;;  %v27221_v52 = vld [vmem:[#allocation3 + $0xd0] sm:$0xff]  ;;  %v6183_v4 = vrot.slane %v27122_v26, 1  ;;  %v27243_v28 = vld [vmem:[#allocation3 + $0xe0] sm:$0xff] }
 0x4e4   :  { %22208 = vmatpush3.bf16.msra.mxu0 %v24511_v22  ;;  %v6177_v22 = vrot.slane %v27098_v29, 1 }
 0x4e5   :  { %21022 = vmatmul.mubr.bf16.vlgmr.msra.gmra.mrb[0].mxu1 %v27098_v29  ;;  %22209 = vmatprep.subr.bf16.mxu0 %v24512_v35 }
 0x4e6   :  { %21025 = vmatprep.mubr.bf16.mxu1 %v27101_v31  ;;  %21054 = vmatpush3.bf16.msra.mxu1 %v27070_v30  ;;  %v24521_v30 = vld [vmem:[%s28452_s3 + $0x420] sm:$0xff]  }
 0x4e7   :  { %22178 = vmatmul.mubr.bf16.gmra.mrb[68].mxu0 %v13318_v7  ;;  %21055 = vmatprep.subr.bf16.mxu1 %v24516_v54  ;;  %v24532_v7 = vld [vmem:[%s28452_s3 + $0x448] sm:$0xff]  }
 0x4e8   :  { %22181 = vmatprep.mubr.bf16.mxu0 %v13320_v62  ;;  %22210 = vmatpush3.bf16.msra.mxu0 %v24512_v35  ;;  %v6178_v35 = vsel %vm1351_vm1, %v6176_v11, %v6177_v22  ;;  %v6180_v62 = vsel %vm1351_vm1, %v6177_v22, %v6179_v45  ;;  %v6199_v22 = vrot.slane %v27181_v48, 1  ;;  %v6201_v11 = vrot.slane %v27184_v61, 1 }
 0x4e9   :  { %22211 = vmatprep.subr.bf16.mxu0 %v24513_v15 }
 0x4ea   :  { %21056 = vmatpush3.bf16.msra.mxu1 %v24516_v54  ;;  %v6181_v54 = vrot.slane %v27119_v56, 1 }
 0x4eb   :  { %21057 = vmatprep.subr.bf16.mxu1 %v24518_v18 }
 0x4ec   :  { %22212 = vmatpush3.bf16.msra.mxu0 %v24513_v15  ;;  %v24528_v15 = vld [vmem:[%s28452_s3 + $0x410] sm:$0xff]  }
 0x4ed   :  { %21026 = vmatmul.mubr.bf16.gmra.mrb[4].mxu1 %v27119_v56  ;;  %22213 = vmatprep.subr.bf16.mxu0 %v24515_v63 }
 0x4ee   :  { %21029 = vmatprep.mubr.bf16.mxu1 %v27122_v26  ;;  %21058 = vmatpush3.bf16.msra.mxu1 %v24518_v18  ;;  %v6182_v18 = vsel %vm1351_vm1, %v6179_v45, %v6181_v54  ;;  %v6203_v45 = vrot.slane %v27188_v3, 1 }
 0x4ef   :  { %22182 = vmatmul.mubr.bf16.gmra.mrb[72].mxu0 %v13322_v41  ;;  %21059 = vmatprep.subr.bf16.mxu1 %v24519_v16  ;;  %v24535_v41 = vld [vmem:[%s28452_s3 + $0x458] sm:$0xff]  }
 0x4f0   :  { %22185 = vmatprep.mubr.bf16.mxu0 %v13324_v14  ;;  %22214 = vmatpush3.bf16.msra.mxu0 %v24515_v63  ;;  %v24529_v63 = vld [vmem:[%s28452_s3 + $0x418] sm:$0xff]   ;;  %v6184_v14 = vsel %vm1351_vm1, %v6181_v54, %v6183_v4  ;;  %v6205_v54 = vrot.slane %v27192_v6, 1 }
 0x4f1   :  { %22215 = vmatprep.subr.bf16.mxu0 %v24517_v37 }
 0x4f2   :  { %21060 = vmatpush3.bf16.msra.mxu1 %v24519_v16  ;;  %v6185_v16 = vrot.slane %v27139_v21, 1 }
 0x4f3   :  { %21061 = vmatprep.subr.bf16.mxu1 %v24521_v30 }
 0x4f4   :  { %22216 = vmatpush3.bf16.msra.mxu0 %v24517_v37  ;;  %v24531_v37 = vld [vmem:[%s28452_s3 + $0x420] sm:$0xff]  }
 0x4f5   :  { %21030 = vmatmul.mubr.bf16.gmra.mrb[8].mxu1 %v27139_v21  ;;  %22217 = vmatprep.subr.bf16.mxu0 %v24520_v32 }
 0x4f6   :  { %21033 = vmatprep.mubr.bf16.mxu1 %v27142_v34  ;;  %21062 = vmatpush3.bf16.msra.mxu1 %v24521_v30  ;;  %v6186_v30 = vsel %vm1351_vm1, %v6183_v4, %v6185_v16 }
 0x4f7   :  { %22186 = vmatmul.mubr.bf16.gmra.mrb[76].mxu0 %v13326_v55  ;;  %21063 = vmatprep.subr.bf16.mxu1 %v24522_v10  ;;  %v24538_v55 = vld [vmem:[%s28452_s3 + $0x468] sm:$0xff]  }
 0x4f8   :  { %22189 = vmatprep.mubr.bf16.mxu0 %v13328_v20  ;;  %22218 = vmatpush3.bf16.msra.mxu0 %v24520_v32  ;;  %v24533_v32 = vld [vmem:[%s28452_s3 + $0x428] sm:$0xff]   ;;  %v6188_v20 = vsel %vm1351_vm1, %v6185_v16, %v6187_v53 }
 0x4f9   :  { %22219 = vmatprep.subr.bf16.mxu0 %v24523_v38 }
 0x4fa   :  { %21064 = vmatpush3.bf16.msra.mxu1 %v24522_v10  ;;  %v6189_v10 = vrot.slane %v27159_v25, 1 }
 0x4fb   :  { %21065 = vmatprep.subr.bf16.mxu1 %v24524_v46 }
 0x4fc   :  { %22220 = vmatpush3.bf16.msra.mxu0 %v24523_v38  ;;  %v24536_v38 = vld [vmem:[%s28452_s3 + $0x430] sm:$0xff]  }
 0x4fd   :  { %21034 = vmatmul.mubr.bf16.gmra.mrb[12].mxu1 %v27159_v25  ;;  %22253 = vmatprep.subr.bf16.mxu0 %v24526_v36 }
 0x4fe   :  { %21037 = vmatprep.mubr.bf16.mxu1 %v27162_v1  ;;  %21066 = vmatpush3.bf16.msra.mxu1 %v24524_v46  ;;  %v6190_v46 = vsel %vm1351_vm1, %v6187_v53, %v6189_v10 }
 0x4ff   :  { %22190 = vmatmul.mubr.bf16.gmra.mrb[80].mxu0 %v13330_v12  ;;  %21067 = vmatprep.subr.bf16.mxu1 %v24525_v23  ;;  %v24542_v12 = vld [vmem:[%s28452_s3 + $0x440] sm:$0xff]  }
 0x500   :  { %22193 = vmatprep.mubr.bf16.mxu0 %v13332_v33  ;;  %v24541_v33 = vld [vmem:[%s28452_s3 + $0x478] sm:$0xff]  }
 0x502   :  { %21068 = vmatpush3.bf16.msra.mxu1 %v24525_v23  ;;  %v6193_v23 = vrot.slane %v27171_v13, 1 }
 0x503   :  { %21101 = vmatprep.subr.bf16.mxu1 %v24530_v17 }
 0x505   :  { %21038 = vmatmul.mubr.bf16.gmra.mrb[16].mxu1 %v27171_v13 }
 0x506   :  { %21041 = vmatprep.mubr.bf16.mxu1 %v27174_v39 }
 0x507   :  { %22194 = vmatmul.mubr.bf16.gmra.mrb[84].mxu0 %v13334_v19  ;;  %v27281_v19 = vld [vmem:[#allocation3 + $0xf8] sm:$0xff] }
 0x508   :  { %22197 = vmatprep.mubr.bf16.mxu0 %v13333_v49 }
 0x50d   :  { %21042 = vmatmul.mubr.bf16.gmra.mrb[20].mxu1 %v27178_v9 }
 0x50e   :  { %21045 = vmatprep.mubr.bf16.mxu1 %v27181_v48 }
 0x50f   :  { %22198 = vmatmul.mubr.bf16.gmra.mrb[88].mxu0 %v13333_v49 }
 0x510   :  { %22201 = vmatprep.mubr.bf16.mxu0 %v13333_v49  ;;  %v6194_v49 = vsel %vm1351_vm1, %v6191_v50, %v6193_v23 }
 0x515   :  { %21046 = vmatmul.mubr.bf16.gmra.mrb[24].mxu1 %v27184_v61 }
 0x516   :  { %21049 = vmatprep.mubr.bf16.mxu1 %v27188_v3 }
 0x517   :  { %22202 = vmatmul.mubr.bf16.gmra.mrb[92].mxu0 %v13342_v60  ;;  %v6197_v60 = vrot.slane %v27178_v9, 1 }
 0x518   :  { %22221 = vmatprep.mubr.bf16.mxu0 %v13600_v44  ;;  %v6196_v44 = vsel %vm1351_vm1, %v6193_v23, %v6195_v27  ;;  %v24548_v23 = vld [vmem:[%s28452_s3 + $0x488] sm:$0xff]  }
 0x519   :  { %v6198_v47 = vsel %vm1351_vm1, %v6195_v27, %v6197_v60 }
 0x51d   :  { %21050 = vmatmul.mubr.bf16.gmra.mrb[28].mxu1 %v27192_v6 }
 0x51e   :  { %21069 = vmatprep.mubr.bf16.mxu1 %v6178_v35  ;;  %v6200_v35 = vsel %vm1351_vm1, %v6197_v60, %v6199_v22  ;;  %v24550_v60 = vld [vmem:[%s28452_s3 + $0x490] sm:$0xff]  }
 0x51f   :  { %22222 = vmatmul.mubr.bf16.vlgmr.msra.gmra.mrb[64].mxu0 %v27199_v57 }
 0x520   :  { %22254 = vmatpush3.bf16.msra.mxu0 %v24526_v36  ;;  %22225 = vmatprep.mubr.bf16.mxu0 %v27202_v24  ;;  %v24539_v36 = vld [vmem:[%s28452_s3 + $0x438] sm:$0xff]  }
 0x521   :  { %22255 = vmatprep.subr.bf16.mxu0 %v24527_v2 }
 0x524   :  { %22256 = vmatpush3.bf16.msra.mxu0 %v24527_v2  ;;  %v6202_v2 = vsel %vm1351_vm1, %v6199_v22, %v6201_v11  ;;  %v24547_v22 = vld [vmem:[%s28452_s3 + $0x460] sm:$0xff]  }
 0x525   :  { %21070 = vmatmul.mubr.bf16.vlgmr.msra.gmra.mrb[0].mxu1 %v6180_v62  ;;  %22257 = vmatprep.subr.bf16.mxu0 %v24528_v15  ;;  %v6204_v62 = vsel %vm1351_vm1, %v6201_v11, %v6203_v45  ;;  %v13936_v11 = vrot.slane %v27262_v8, 1 }
 0x526   :  { %21073 = vmatprep.mubr.bf16.mxu1 %v6182_v18  ;;  %21102 = vmatpush3.bf16.msra.mxu1 %v24530_v17  ;;  %v6192_v17 = vsel %vm1351_vm1, %v6189_v10, %v6191_v50  ;;  %v6206_v18 = vsel %vm1351_vm1, %v6203_v45, %v6205_v54  ;;  %v24543_v10 = vld [vmem:[%s28452_s3 + $0x448] sm:$0xff]   ;;  %v13932_v50 = vrot.slane %v27240_v5, 1 }
 0x527   :  { %22226 = vmatmul.mubr.bf16.gmra.mrb[68].mxu0 %v27218_v0  ;;  %21103 = vmatprep.subr.bf16.mxu1 %v24532_v7 }
 0x528   :  { %22229 = vmatprep.mubr.bf16.mxu0 %v27221_v52  ;;  %22258 = vmatpush3.bf16.msra.mxu0 %v24528_v15  ;;  %v13873_v15 = vld [vmem:[#allocation3 + $0xb0] sm:$0xfe] }
 0x529   :  { %22259 = vmatprep.subr.bf16.mxu0 %v24529_v63 }
 0x52a   :  { %21104 = vmatpush3.bf16.msra.mxu1 %v24532_v7  ;;  %v13924_v7 = vrot.slane %v27199_v57, 1 }
 0x52b   :  { %21105 = vmatprep.subr.bf16.mxu1 %v24534_v43 }
 0x52c   :  { %22260 = vmatpush3.bf16.msra.mxu0 %v24529_v63  ;;  %v6141_v63 = vld [vmem:[#allocation3 + $0xb0] sm:$0x1] }
 0x52d   :  { %21074 = vmatmul.mubr.bf16.gmra.mrb[4].mxu1 %v6184_v14  ;;  %22261 = vmatprep.subr.bf16.mxu0 %v24531_v37  ;;  %v6207_v16 = vrot.slane %v6141_v63, 1  ;;  %v13926_v14 = vrot.slane %v27202_v24, 1  ;;  %v6500_v63 = vrot.slane %v27159_v25, 2 }
 0x52e   :  { %21077 = vmatprep.mubr.bf16.mxu1 %v6186_v30  ;;  %21106 = vmatpush3.bf16.msra.mxu1 %v24534_v43  ;;  %v13923_v43 = vrot.slane %v13873_v15, 1 }
 0x52f   :  { %22230 = vmatmul.mubr.bf16.gmra.mrb[72].mxu0 %v27240_v5  ;;  %21107 = vmatprep.subr.bf16.mxu1 %v24535_v41 }
 0x530   :  { %22233 = vmatprep.mubr.bf16.mxu0 %v27243_v28  ;;  %22262 = vmatpush3.bf16.msra.mxu0 %v24531_v37  ;;  %v13925_v4 = vsel %vm1351_vm1, %v13923_v43, %v13924_v7  ;;  %v6466_v37 = vld [vmem:[#allocation3 + $0x30] sm:$0xfc] }
 0x531   :  { %22263 = vmatprep.subr.bf16.mxu0 %v24533_v32  ;;  %v6487_v30 = vrot.slane %v6466_v37, 2  ;;  %v24552_v43 = vld [vmem:[%s28452_s3 + $0x470] sm:$0xff]   ;;  %v24554_v37 = vld [vmem:[%s28452_s3 + $0x4a8] sm:$0xff]  }
 0x532   :  { %21108 = vmatpush3.bf16.msra.mxu1 %v24535_v41  ;;  %v6488_v41 = vrot.slane %v27098_v29, 2 }
 0x533   :  { %21109 = vmatprep.subr.bf16.mxu1 %v24537_v59 }
 0x534   :  { %22264 = vmatpush3.bf16.msra.mxu0 %v24533_v32  ;;  %v13928_v32 = vrot.slane %v27218_v0, 1  ;;  %v6489_v53 = vsel %vm1840_vm2, %v6487_v30, %v6488_v41  ;;  %v24555_v30 = vld [vmem:[%s28452_s3 + $0x478] sm:$0xff]  }
 0x535   :  { %21078 = vmatmul.mubr.bf16.gmra.mrb[8].mxu1 %v6188_v20  ;;  %22265 = vmatprep.subr.bf16.mxu0 %v24536_v38  ;;  %v6490_v20 = vrot.slane %v27101_v31, 2 }
 0x536   :  { %21081 = vmatprep.mubr.bf16.mxu1 %v6190_v46  ;;  %21110 = vmatpush3.bf16.msra.mxu1 %v24537_v59  ;;  %v6208_v59 = vsel %vm1351_vm1, %v6205_v54, %v6207_v16  ;;  %v6492_v46 = vrot.slane %v27119_v56, 2  ;;  %v24549_v54 = vld [vmem:[%s28452_s3 + $0x468] sm:$0xff]   ;;  %v13940_v16 = vrot.slane %v27281_v19, 1 }
 0x537   :  { %22234 = vmatmul.mubr.bf16.gmra.mrb[76].mxu0 %v27262_v8  ;;  %21111 = vmatprep.subr.bf16.mxu1 %v24538_v55 }
 0x538   :  { %22237 = vmatprep.mubr.bf16.mxu0 %v27265_v40  ;;  %22266 = vmatpush3.bf16.msra.mxu0 %v24536_v38  ;;  %v13927_v38 = vsel %vm1351_vm1, %v13924_v7, %v13926_v14 }
 0x539   :  { %22267 = vmatprep.subr.bf16.mxu0 %v24539_v36 }
 0x53a   :  { %21112 = vmatpush3.bf16.msra.mxu1 %v24538_v55  ;;  %v13929_v55 = vsel %vm1351_vm1, %v13926_v14, %v13928_v32 }
 0x53b   :  { %21113 = vmatprep.subr.bf16.mxu1 %v24540_v51 }
 0x53c   :  { %22268 = vmatpush3.bf16.msra.mxu0 %v24539_v36  ;;  %v24544_v36 = vld [vmem:[%s28452_s3 + $0x450] sm:$0xff]  }
 0x53d   :  { %21082 = vmatmul.mubr.bf16.gmra.mrb[12].mxu1 %v6192_v17  ;;  %22301 = vmatprep.subr.bf16.mxu0 %v24542_v12  ;;  %v24545_v17 = vld [vmem:[%s28452_s3 + $0x458] sm:$0xff]  }
 0x53e   :  { %21085 = vmatprep.mubr.bf16.mxu1 %v6194_v49  ;;  %21114 = vmatpush3.bf16.msra.mxu1 %v24540_v51  ;;  %v13930_v51 = vrot.slane %v27221_v52, 1 }
 0x53f   :  { %22238 = vmatmul.mubr.bf16.gmra.mrb[80].mxu0 %v27281_v19  ;;  %21115 = vmatprep.subr.bf16.mxu1 %v24541_v33 }
 0x540   :  { %22241 = vmatprep.mubr.bf16.mxu0 %v27072_v58  ;;  %v13931_v49 = vsel %vm1351_vm1, %v13928_v32, %v13930_v51  ;;  %v13933_v27 = vsel %vm1351_vm1, %v13930_v51, %v13932_v50 }
 0x542   :  { %21116 = vmatpush3.bf16.msra.mxu1 %v24541_v33  ;;  %v6491_v33 = vsel %vm1840_vm2, %v6488_v41, %v6490_v20 }
 0x543   :  { %21149 = vmatprep.subr.bf16.mxu1 %v27287_v42 }
 0x545   :  { %21086 = vmatmul.mubr.bf16.gmra.mrb[16].mxu1 %v6196_v44  ;;  %v6494_v44 = vrot.slane %v27122_v26, 2 }
 0x546   :  { %21089 = vmatprep.mubr.bf16.mxu1 %v6198_v47  ;;  %v6496_v47 = vrot.slane %v27139_v21, 2 }
 0x547   :  { %22242 = vmatmul.mubr.bf16.gmra.mrb[84].mxu0 %v27072_v58 }
 0x548   :  { %22245 = vmatprep.mubr.bf16.mxu0 %v27072_v58  ;;  %v6497_v45 = vsel %vm1840_vm2, %v6494_v44, %v6496_v47 }
 0x54d   :  { %21090 = vmatmul.mubr.bf16.gmra.mrb[20].mxu1 %v6200_v35  ;;  %v24551_v35 = vld [vmem:[%s28452_s3 + $0x498] sm:$0xff]  }
 0x54e   :  { %21093 = vmatprep.mubr.bf16.mxu1 %v6202_v2  ;;  %v6495_v2 = vsel %vm1840_vm2, %v6492_v46, %v6494_v44 }
 0x54f   :  { %22246 = vmatmul.mubr.bf16.gmra.mrb[88].mxu0 %v27072_v58 }
 0x550   :  { %22249 = vmatprep.mubr.bf16.mxu0 %v27072_v58 }
 0x555   :  { %21094 = vmatmul.mubr.bf16.gmra.mrb[24].mxu1 %v6204_v62  ;;  %v24553_v62 = vld [vmem:[%s28452_s3 + $0x4a0] sm:$0xff]  }
 0x556   :  { %21097 = vmatprep.mubr.bf16.mxu1 %v6206_v18  ;;  %v6498_v18 = vrot.slane %v27142_v34, 2 }
 0x557   :  { %22250 = vmatmul.mubr.bf16.gmra.mrb[92].mxu0 %v27072_v58 }
 0x558   :  { %22269 = vmatprep.mubr.bf16.mxu0 %v13925_v4  ;;  %v13938_v4 = vrot.slane %v27265_v40, 1  ;;  %v6499_v41 = vsel %vm1840_vm2, %v6496_v47, %v6498_v18  ;;  %v6501_v14 = vsel %vm1840_vm2, %v6498_v18, %v6500_v63  ;;  %v13889_v47 = vld [vmem:[#allocation3 + $0x130] sm:$0x1] }
 0x55a   :  { %v13939_v32 = vsel %vm1351_vm1, %v13936_v11, %v13938_v4 }
 0x55d   :  { %21098 = vmatmul.mubr.bf16.gmra.mrb[28].mxu1 %v6208_v59  ;;  %v13941_v59 = vsel %vm1351_vm1, %v13938_v4, %v13940_v16  ;;  %v6799_v4 = vrot.slane %v27098_v29, 3 }
 0x55e   :  { %21117 = vmatprep.mubr.bf16.mxu1 %v6489_v53  ;;  %v24556_v53 = vld [vmem:[%s28452_s3 + $0x4b0] sm:$0xff]  }
 0x55f   :  { %22270 = vmatmul.mubr.bf16.vlgmr.msra.gmra.mrb[64].mxu0 %v13927_v38  ;;  %v6504_v38 = vrot.slane %v27171_v13, 2 }
 0x560   :  { %22302 = vmatpush3.bf16.msra.mxu0 %v24542_v12  ;;  %22273 = vmatprep.mubr.bf16.mxu0 %v13929_v55  ;;  %v6493_v12 = vsel %vm1840_vm2, %v6490_v20, %v6492_v46  ;;  %v27386_v55 = vld [vmem:[%s28452_s3 + $0x480] sm:$0xff]   ;;  %v13942_v20 = vrot.slane %v27072_v58, 1  ;;  %v24557_v46 = vld [vmem:[%s28452_s3 + $0x4b8] sm:$0xff]  }
 0x561   :  { %22303 = vmatprep.subr.bf16.mxu0 %v24543_v10  ;;  %v27399_v58 = vld [vmem:[%s28452_s3 + $0x4c0] sm:$0xff]  }
 0x564   :  { %22304 = vmatpush3.bf16.msra.mxu0 %v24543_v10  ;;  %v6502_v10 = vrot.slane %v27162_v1, 2 }
 0x565   :  { %21118 = vmatmul.mubr.bf16.vlgmr.msra.gmra.mrb[0].mxu1 %v6491_v33  ;;  %22305 = vmatprep.subr.bf16.mxu0 %v24544_v36  ;;  %v6508_v33 = vrot.slane %v27178_v9, 2 }
 0x566   :  { %21121 = vmatprep.mubr.bf16.mxu1 %v6493_v12  ;;  %21150 = vmatpush3.bf16.msra.mxu1 %v27287_v42  ;;  %v13934_v42 = vrot.slane %v27243_v28, 1  ;;  %v6505_v51 = vsel %vm1840_vm2, %v6502_v10, %v6504_v38 }
 0x567   :  { %22274 = vmatmul.mubr.bf16.gmra.mrb[68].mxu0 %v13931_v49  ;;  %21151 = vmatprep.subr.bf16.mxu1 %v24548_v23  ;;  %v6510_v49 = vrot.slane %v27181_v48, 2 }
 0x568   :  { %22277 = vmatprep.mubr.bf16.mxu0 %v13933_v27  ;;  %22306 = vmatpush3.bf16.msra.mxu0 %v24544_v36  ;;  %v13935_v15 = vsel %vm1351_vm1, %v13932_v50, %v13934_v42  ;;  %v13937_v7 = vsel %vm1351_vm1, %v13934_v42, %v13936_v11  ;;  %v6503_v36 = vsel %vm1840_vm2, %v6500_v63, %v6502_v10  ;;  %v6512_v27 = vrot.slane %v27184_v61, 2 }
 0x569   :  { %22307 = vmatprep.subr.bf16.mxu0 %v24545_v17  ;;  %v13943_v50 = vsel %vm1351_vm1, %v13940_v16, %v13942_v20  ;;  %v13954_v42 = vrot.slane %v13889_v47, 1  ;;  %v6516_v11 = vrot.slane %v27192_v6, 2  ;;  %v14236_v16 = vrot.slane %v27202_v24, 2  ;;  %v24565_v47 = vld [vmem:[%s28452_s3 + $0x4a8] sm:$0xff]  }
 0x56a   :  { %21152 = vmatpush3.bf16.msra.mxu1 %v24548_v23  ;;  %v6506_v23 = vrot.slane %v27174_v39, 2  ;;  %v6513_v44 = vsel %vm1840_vm2, %v6510_v49, %v6512_v27  ;;  %v6803_v10 = vrot.slane %v27119_v56, 3 }
 0x56b   :  { %21153 = vmatprep.subr.bf16.mxu1 %v24550_v60 }
 0x56c   :  { %22308 = vmatpush3.bf16.msra.mxu0 %v24545_v17  ;;  %v6507_v12 = vsel %vm1840_vm2, %v6504_v38, %v6506_v23  ;;  %v6509_v17 = vsel %vm1840_vm2, %v6506_v23, %v6508_v33  ;;  %v24560_v38 = vld [vmem:[%s28452_s3 + $0x490] sm:$0xff]  }
 0x56d   :  { %21122 = vmatmul.mubr.bf16.gmra.mrb[4].mxu1 %v6495_v2  ;;  %22309 = vmatprep.subr.bf16.mxu0 %v24547_v22  ;;  %v14234_v2 = vrot.slane %v27199_v57, 2 }
 0x56e   :  { %21125 = vmatprep.mubr.bf16.mxu1 %v6497_v45  ;;  %21154 = vmatpush3.bf16.msra.mxu1 %v24550_v60  ;;  %v6511_v60 = vsel %vm1840_vm2, %v6508_v33, %v6510_v49  ;;  %v24566_v33 = vld [vmem:[%s28452_s3 + $0x4d0] sm:$0xff]   ;;  %v24563_v49 = vld [vmem:[%s28452_s3 + $0x4a0] sm:$0xff]  }
 0x56f   :  { %22278 = vmatmul.mubr.bf16.gmra.mrb[72].mxu0 %v13935_v15  ;;  %21155 = vmatprep.subr.bf16.mxu1 %v24551_v35 }
 0x570   :  { %22281 = vmatprep.mubr.bf16.mxu0 %v13937_v7  ;;  %22310 = vmatpush3.bf16.msra.mxu0 %v24547_v22  ;;  %v6514_v22 = vrot.slane %v27188_v3, 2  ;;  %v6467_v7 = vld [vmem:[#allocation3 + $0xb0] sm:$0x3] }
 0x571   :  { %22311 = vmatprep.subr.bf16.mxu0 %v24549_v54  ;;  %v6518_v63 = vrot.slane %v6467_v7, 2  ;;  %v24570_v7 = vld [vmem:[%s28452_s3 + $0x4e8] sm:$0xff]  }
 0x572   :  { %21156 = vmatpush3.bf16.msra.mxu1 %v24551_v35  ;;  %v14213_v35 = vld [vmem:[#allocation3 + $0xb0] sm:$0xfc]  ;;  %v6515_v45 = vsel %vm1840_vm2, %v6512_v27, %v6514_v22  ;;  %v6517_v15 = vsel %vm1840_vm2, %v6514_v22, %v6516_v11  ;;  %v14246_v27 = vrot.slane %v27262_v8, 2 }
 0x573   :  { %21157 = vmatprep.subr.bf16.mxu1 %v24553_v62 }
 0x574   :  { %22312 = vmatpush3.bf16.msra.mxu0 %v24549_v54  ;;  %v13955_v54 = vsel %vm1351_vm1, %v13942_v20, %v13954_v42 }
 0x575   :  { %21126 = vmatmul.mubr.bf16.gmra.mrb[8].mxu1 %v6499_v41  ;;  %22313 = vmatprep.subr.bf16.mxu0 %v24552_v43  ;;  %v14238_v41 = vrot.slane %v27218_v0, 2 }
 0x576   :  { %21129 = vmatprep.mubr.bf16.mxu1 %v6501_v14  ;;  %21158 = vmatpush3.bf16.msra.mxu1 %v24553_v62  ;;  %v14233_v62 = vrot.slane %v14213_v35, 2  ;;  %v6519_v14 = vsel %vm1840_vm2, %v6516_v11, %v6518_v63  ;;  %v24569_v11 = vld [vmem:[%s28452_s3 + $0x4e0] sm:$0xff]   ;;  %v6809_v35 = vrot.slane %v27142_v34, 3 }
 0x577   :  { %22282 = vmatmul.mubr.bf16.gmra.mrb[76].mxu0 %v13939_v32  ;;  %21159 = vmatprep.subr.bf16.mxu1 %v24554_v37  ;;  %v24559_v32 = vld [vmem:[%s28452_s3 + $0x488] sm:$0xff]   ;;  %v14239_v29 = vsel %vm1840_vm2, %v14236_v16, %v14238_v41 }
 0x578   :  { %22285 = vmatprep.mubr.bf16.mxu0 %v13941_v59  ;;  %22314 = vmatpush3.bf16.msra.mxu0 %v24552_v43  ;;  %v14235_v18 = vsel %vm1840_vm2, %v14233_v62, %v14234_v2  ;;  %v6777_v43 = vld [vmem:[#allocation3 + $0x30] sm:$0xf8]  ;;  %v14237_v59 = vsel %vm1840_vm2, %v14234_v2, %v14236_v16  ;;  %v6811_v2 = vrot.slane %v27159_v25, 3  ;;  %v24571_v62 = vld [vmem:[%s28452_s3 + $0x4b8] sm:$0xff]   ;;  %v6815_v16 = vrot.slane %v27171_v13, 3 }
 0x579   :  { %22315 = vmatprep.subr.bf16.mxu0 %v24555_v30 }
 0x57a   :  { %21160 = vmatpush3.bf16.msra.mxu1 %v24554_v37  ;;  %v6798_v37 = vrot.slane %v6777_v43, 3  ;;  %v6812_v25 = vsel %vm2152_vm3, %v6809_v35, %v6811_v2  ;;  %v24572_v43 = vld [vmem:[%s28452_s3 + $0x4f0] sm:$0xff]  }
 0x57b   :  { %21161 = vmatprep.subr.bf16.mxu1 %v24556_v53 }
 0x57c   :  { %22316 = vmatpush3.bf16.msra.mxu0 %v24555_v30  ;;  %v6800_v30 = vsel %vm2152_vm3, %v6798_v37, %v6799_v4  ;;  %v27494_v37 = vld [vmem:[%s28452_s3 + $0x4c0] sm:$0xff]  }
 0x57d   :  { %21130 = vmatmul.mubr.bf16.gmra.mrb[12].mxu1 %v6503_v36  ;;  %22349 = vmatprep.subr.bf16.mxu0 %v27386_v55  ;;  %v24564_v36 = vld [vmem:[%s28452_s3 + $0x4c8] sm:$0xff]  }
 0x57e   :  { %21133 = vmatprep.mubr.bf16.mxu1 %v6505_v51  ;;  %21162 = vmatpush3.bf16.msra.mxu1 %v24556_v53  ;;  %v6801_v53 = vrot.slane %v27101_v31, 3  ;;  %v24561_v51 = vld [vmem:[%s28452_s3 + $0x498] sm:$0xff]  }
 0x57f   :  { %22286 = vmatmul.mubr.bf16.gmra.mrb[80].mxu0 %v13943_v50  ;;  %21163 = vmatprep.subr.bf16.mxu1 %v24557_v46 }
 0x580   :  { %22289 = vmatprep.mubr.bf16.mxu0 %v13942_v20  ;;  %v6802_v31 = vsel %vm2152_vm3, %v6799_v4, %v6801_v53  ;;  %v6813_v4 = vrot.slane %v27162_v1, 3  ;;  %v24573_v1 = vld [vmem:[%s28452_s3 + $0x4f8] sm:$0xff]  }
 0x582   :  { %21164 = vmatpush3.bf16.msra.mxu1 %v24557_v46  ;;  %v14242_v46 = vrot.slane %v27240_v5, 2  ;;  %v6816_v13 = vsel %vm2152_vm3, %v6813_v4, %v6815_v16 }
 0x583   :  { %21197 = vmatprep.subr.bf16.mxu1 %v27399_v58 }
 0x585   :  { %21134 = vmatmul.mubr.bf16.gmra.mrb[16].mxu1 %v6507_v12  ;;  %v6805_v12 = vrot.slane %v27122_v26, 3 }
 0x586   :  { %21137 = vmatprep.mubr.bf16.mxu1 %v6509_v17  ;;  %v6807_v17 = vrot.slane %v27139_v21, 3 }
 0x587   :  { %22290 = vmatmul.mubr.bf16.gmra.mrb[84].mxu0 %v13942_v20  ;;  %v6806_v26 = vsel %vm2152_vm3, %v6803_v10, %v6805_v12 }
 0x588   :  { %22293 = vmatprep.mubr.bf16.mxu0 %v13942_v20  ;;  %v6810_v34 = vsel %vm2152_vm3, %v6807_v17, %v6809_v35  ;;  %v24800_v35 = vld [vmem:[#allocation3 + $0x40] sm:$0xff] }
 0x58d   :  { %21138 = vmatmul.mubr.bf16.gmra.mrb[20].mxu1 %v6511_v60  ;;  %v24567_v60 = vld [vmem:[%s28452_s3 + $0x4d8] sm:$0xff]  }
 0x58e   :  { %21141 = vmatprep.mubr.bf16.mxu1 %v6513_v44  ;;  %v6808_v44 = vsel %vm2152_vm3, %v6805_v12, %v6807_v17  ;;  %v6778_v12 = vld [vmem:[#allocation3 + $0xb0] sm:$0x7] }
 0x58f   :  { %22294 = vmatmul.mubr.bf16.gmra.mrb[88].mxu0 %v13942_v20 }
 0x590   :  { %22297 = vmatprep.mubr.bf16.mxu0 %v13942_v20  ;;  %v14240_v20 = vrot.slane %v27221_v52, 2 }
 0x592   :  { %v14241_v50 = vsel %vm1840_vm2, %v14238_v41, %v14240_v20  ;;  %v14243_v23 = vsel %vm1840_vm2, %v14240_v20, %v14242_v46  ;;  %v27496_v41 = vld [vmem:[#allocation2 + $0x100] sm:$0xff]  ;;  %v6821_v20 = vrot.slane %v27181_v48, 3  ;;  %v14544_v48 = vrot.slane %v27199_v57, 3 }
 0x593   :  { %v14546_v57 = vrot.slane %v27202_v24, 3  ;;  %v7112_v24 = vrot.slane %v24800_v35, 4  ;;  %v14524_v35 = vld [vmem:[#allocation3 + $0x130] sm:$0x7] }
 0x595   :  { %21142 = vmatmul.mubr.bf16.gmra.mrb[24].mxu1 %v6515_v45  ;;  %v24568_v45 = vld [vmem:[%s28452_s3 + $0x4b0] sm:$0xff]  }
 0x596   :  { %21145 = vmatprep.mubr.bf16.mxu1 %v6517_v15  ;;  %v14250_v15 = vrot.slane %v27281_v19, 2 }
 0x597   :  { %22298 = vmatmul.mubr.bf16.gmra.mrb[92].mxu0 %v13955_v54  ;;  %v14248_v54 = vrot.slane %v27265_v40, 2 }
 0x598   :  { %22317 = vmatprep.mubr.bf16.mxu0 %v14235_v18 }
 0x599   :  { %v14249_v18 = vsel %vm1840_vm2, %v14246_v27, %v14248_v54  ;;  %v14251_v63 = vsel %vm1840_vm2, %v14248_v54, %v14250_v15  ;;  %v14552_v54 = vrot.slane %v27240_v5, 3 }
 0x59d   :  { %21146 = vmatmul.mubr.bf16.gmra.mrb[28].mxu1 %v6519_v14  ;;  %v14252_v14 = vrot.slane %v27496_v41, 2 }
 0x59e   :  { %21165 = vmatprep.mubr.bf16.mxu1 %v6800_v30  ;;  %v6814_v30 = vsel %vm2152_vm3, %v6811_v2, %v6813_v4  ;;  %v24576_v2 = vld [vmem:[%s28452_s3 + $0x4d0] sm:$0xff]   ;;  %v14554_v4 = vrot.slane %v27243_v28, 3 }
 0x59f   :  { %22318 = vmatmul.mubr.bf16.vlgmr.msra.gmra.mrb[64].mxu0 %v14237_v59  ;;  %v27509_v59 = vld [vmem:[%s28452_s3 + $0x500] sm:$0xff]  }
 0x5a0   :  { %22350 = vmatpush3.bf16.msra.mxu0 %v27386_v55  ;;  %22321 = vmatprep.mubr.bf16.mxu0 %v14239_v29  ;;  %v6804_v55 = vsel %vm2152_vm3, %v6801_v53, %v6803_v10  ;;  %v6817_v29 = vrot.slane %v27174_v39, 3  ;;  %v6819_v53 = vrot.slane %v27178_v9, 3 }
 0x5a1   :  { %22351 = vmatprep.subr.bf16.mxu0 %v24559_v32 }
 0x5a2   :  { %v6818_v10 = vsel %vm2152_vm3, %v6815_v16, %v6817_v29  ;;  %v6822_v39 = vsel %vm2152_vm3, %v6819_v53, %v6821_v20  ;;  %v14556_v16 = vrot.slane %v27262_v8, 3 }
 0x5a4   :  { %22352 = vmatpush3.bf16.msra.mxu0 %v24559_v32  ;;  %v14253_v32 = vsel %vm1840_vm2, %v14250_v15, %v14252_v14  ;;  %v24580_v15 = vld [vmem:[%s28452_s3 + $0x508] sm:$0xff]   ;;  %v14557_v8 = vsel %vm2152_vm3, %v14554_v4, %v14556_v16 }
 0x5a5   :  { %21166 = vmatmul.mubr.bf16.vlgmr.msra.gmra.mrb[0].mxu1 %v6802_v31  ;;  %22353 = vmatprep.subr.bf16.mxu0 %v24560_v38  ;;  %v6825_v31 = vrot.slane %v27188_v3, 3 }
 0x5a6   :  { %21169 = vmatprep.mubr.bf16.mxu1 %v6804_v55  ;;  %21198 = vmatpush3.bf16.msra.mxu1 %v27399_v58  ;;  %v14244_v58 = vrot.slane %v27243_v28, 2  ;;  %v14555_v28 = vsel %vm2152_vm3, %v14552_v54, %v14554_v4 }
 0x5a7   :  { %22322 = vmatmul.mubr.bf16.gmra.mrb[68].mxu0 %v14241_v50  ;;  %21199 = vmatprep.subr.bf16.mxu1 %v24564_v36  ;;  %v14523_v50 = vld [vmem:[#allocation3 + $0xb0] sm:$0xf8] }
 0x5a8   :  { %22325 = vmatprep.mubr.bf16.mxu0 %v14243_v23  ;;  %22354 = vmatpush3.bf16.msra.mxu0 %v24560_v38  ;;  %v14245_v22 = vsel %vm1840_vm2, %v14242_v46, %v14244_v58  ;;  %v14247_v42 = vsel %vm1840_vm2, %v14244_v58, %v14246_v27  ;;  %v6820_v38 = vsel %vm2152_vm3, %v6817_v29, %v6819_v53  ;;  %v6823_v46 = vrot.slane %v27184_v61, 3  ;;  %v7088_v58 = vld [vmem:[#allocation3 + $0x30] sm:$0xf0] }
 0x5a9   :  { %22355 = vmatprep.subr.bf16.mxu0 %v24561_v51  ;;  %v14543_v17 = vrot.slane %v14523_v50, 3  ;;  %v24584_v53 = vld [vmem:[%s28452_s3 + $0x4f0] sm:$0xff]  }
 0x5aa   :  { %21200 = vmatpush3.bf16.msra.mxu1 %v24564_v36  ;;  %v6824_v9 = vsel %vm2152_vm3, %v6821_v20, %v6823_v46  ;;  %v14214_v36 = vld [vmem:[#allocation3 + $0x130] sm:$0x3]  ;;  %v6826_v23 = vsel %vm2152_vm3, %v6823_v46, %v6825_v31  ;;  %v24586_v20 = vld [vmem:[%s28452_s3 + $0x528] sm:$0xff]  }
 0x5ab   :  { %21201 = vmatprep.subr.bf16.mxu1 %v24566_v33  ;;  %v14264_v55 = vrot.slane %v14214_v36, 2  ;;  %v14545_v3 = vsel %vm2152_vm3, %v14543_v17, %v14544_v48  ;;  %v24588_v36 = vld [vmem:[%s28452_s3 + $0x530] sm:$0xff]  }
 0x5ac   :  { %22356 = vmatpush3.bf16.msra.mxu0 %v24561_v51  ;;  %v6827_v51 = vrot.slane %v27192_v6, 3  ;;  %v24799_v6 = vld [vmem:[#allocation3 + $0x38] sm:$0xff] }
 0x5ad   :  { %21170 = vmatmul.mubr.bf16.gmra.mrb[4].mxu1 %v6806_v26  ;;  %22357 = vmatprep.subr.bf16.mxu0 %v24563_v49  ;;  %v14265_v61 = vsel %vm1840_vm2, %v14252_v14, %v14264_v55  ;;  %v7110_v27 = vrot.slane %v24799_v6, 4  ;;  %v14548_v26 = vrot.slane %v27218_v0, 3  ;;  %v7114_v0 = vrot.slane %v27119_v56, 4  ;;  %v24577_v56 = vld [vmem:[%s28452_s3 + $0x4d8] sm:$0xff]   ;;  %v24807_v6 = vld [vmem:[#allocation3 + $0x88] sm:$0xff] }
 0x5ae   :  { %21173 = vmatprep.mubr.bf16.mxu1 %v6808_v44  ;;  %21202 = vmatpush3.bf16.msra.mxu1 %v24566_v33  ;;  %v6828_v33 = vsel %vm2152_vm3, %v6825_v31, %v6827_v51  ;;  %v24804_v31 = vld [vmem:[#allocation3 + $0x70] sm:$0xff] }
 0x5af   :  { %22326 = vmatmul.mubr.bf16.gmra.mrb[72].mxu0 %v14245_v22  ;;  %21203 = vmatprep.subr.bf16.mxu1 %v24567_v60  ;;  %v24575_v22 = vld [vmem:[%s28452_s3 + $0x4c8] sm:$0xff]   ;;  %v7124_v55 = vrot.slane %v24804_v31, 4 }
 0x5b0   :  { %22329 = vmatprep.mubr.bf16.mxu0 %v14247_v42  ;;  %22358 = vmatpush3.bf16.msra.mxu0 %v24563_v49  ;;  %v6829_v49 = vrot.slane %v6778_v12, 3  ;;  %v14547_v42 = vsel %vm2152_vm3, %v14544_v48, %v14546_v57  ;;  %v27597_v48 = vld [vmem:[%s28452_s3 + $0x500] sm:$0xff]   ;;  %v24818_v31 = vld [vmem:[#allocation3 + $0xe8] sm:$0xff] }
 0x5b1   :  { %22359 = vmatprep.subr.bf16.mxu0 %v24565_v47 }
 0x5b2   :  { %21204 = vmatpush3.bf16.msra.mxu1 %v24567_v60  ;;  %v7109_v60 = vrot.slane %v7088_v58, 4  ;;  %v6830_v44 = vsel %vm2152_vm3, %v6827_v51, %v6829_v49  ;;  %v24805_v51 = vld [vmem:[#allocation3 + $0x78] sm:$0xff]  ;;  %v24806_v49 = vld [vmem:[#allocation3 + $0x80] sm:$0xff] }
 0x5b3   :  { %21205 = vmatprep.subr.bf16.mxu1 %v24569_v11  ;;  %v7126_v50 = vrot.slane %v24805_v51, 4  ;;  %v7128_v58 = vrot.slane %v24806_v49, 4  ;;  %v24599_v51 = vld [vmem:[%s28452_s3 + $0x558] sm:$0xff]  }
 0x5b4   :  { %22360 = vmatpush3.bf16.msra.mxu0 %v24565_v47  ;;  %v7111_v47 = vsel %vm2464_vm4, %v7109_v60, %v7110_v27 }
 0x5b5   :  { %21174 = vmatmul.mubr.bf16.gmra.mrb[8].mxu1 %v6810_v34  ;;  %22361 = vmatprep.subr.bf16.mxu0 %v24568_v45  ;;  %v7115_v34 = vsel %vm2464_vm4, %v7112_v24, %v7114_v0  ;;  %v7127_v12 = vsel %vm2464_vm4, %v7124_v55, %v7126_v50 }
 0x5b6   :  { %21177 = vmatprep.mubr.bf16.mxu1 %v6812_v25  ;;  %21206 = vmatpush3.bf16.msra.mxu1 %v24569_v11  ;;  %v14549_v11 = vsel %vm2152_vm3, %v14546_v57, %v14548_v26  ;;  %v24582_v25 = vld [vmem:[%s28452_s3 + $0x510] sm:$0xff]   ;;  %v7129_v57 = vsel %vm2464_vm4, %v7126_v50, %v7128_v58  ;;  %v27655_v50 = vld [vmem:[#allocation3 + $0x58] sm:$0xff] }
 0x5b7   :  { %22330 = vmatmul.mubr.bf16.gmra.mrb[76].mxu0 %v14249_v18  ;;  %21207 = vmatprep.subr.bf16.mxu1 %v24570_v7 }
 0x5b8   :  { %22333 = vmatprep.mubr.bf16.mxu0 %v14251_v63  ;;  %22362 = vmatpush3.bf16.msra.mxu0 %v24568_v45  ;;  %v14550_v45 = vrot.slane %v27221_v52, 3  ;;  %v7118_v63 = vrot.slane %v27139_v21, 4 }
 0x5b9   :  { %22363 = vmatprep.subr.bf16.mxu0 %v24571_v62 }
 0x5ba   :  { %21208 = vmatpush3.bf16.msra.mxu1 %v24570_v7  ;;  %v7113_v7 = vsel %vm2464_vm4, %v7110_v27, %v7112_v24  ;;  %v14551_v52 = vsel %vm2152_vm3, %v14548_v26, %v14550_v45  ;;  %v14553_v5 = vsel %vm2152_vm3, %v14550_v45, %v14552_v54  ;;  %v7130_v27 = vrot.slane %v24807_v6, 4  ;;  %v24808_v26 = vld [vmem:[#allocation3 + $0x90] sm:$0xff]  ;;  %v24810_v24 = vld [vmem:[#allocation3 + $0xa0] sm:$0xff]  ;;  %v24811_v45 = vld [vmem:[#allocation3 + $0xa8] sm:$0xff] }
 0x5bb   :  { %21209 = vmatprep.subr.bf16.mxu1 %v24572_v43  ;;  %v7138_v54 = vrot.slane %v24811_v45, 4  ;;  %v24610_v45 = vld [vmem:[%s28452_s3 + $0x580] sm:$0xff]  }
 0x5bc   :  { %22364 = vmatpush3.bf16.msra.mxu0 %v24571_v62  ;;  %v24801_v62 = vld [vmem:[#allocation3 + $0x50] sm:$0xff]  ;;  %v7131_v60 = vsel %vm2464_vm4, %v7128_v58, %v7130_v27  ;;  %v24820_v58 = vld [vmem:[#allocation3 + $0xf8] sm:$0xff] }
 0x5bd   :  { %21178 = vmatmul.mubr.bf16.gmra.mrb[12].mxu1 %v6814_v30  ;;  %22397 = vmatprep.subr.bf16.mxu0 %v27494_v37  ;;  %v7116_v18 = vrot.slane %v24801_v62, 4  ;;  %v24585_v30 = vld [vmem:[%s28452_s3 + $0x520] sm:$0xff]   ;;  %v14870_v6 = vrot.slane %v24820_v58, 4 }
 0x5be   :  { %21181 = vmatprep.mubr.bf16.mxu1 %v6816_v13  ;;  %21210 = vmatpush3.bf16.msra.mxu1 %v24572_v43  ;;  %v24579_v43 = vld [vmem:[%s28452_s3 + $0x4e0] sm:$0xff]  }
 0x5bf   :  { %22334 = vmatmul.mubr.bf16.gmra.mrb[80].mxu0 %v14253_v32  ;;  %21211 = vmatprep.subr.bf16.mxu1 %v24573_v1  ;;  %v7119_v21 = vsel %vm2464_vm4, %v7116_v18, %v7118_v63  ;;  %v24802_v13 = vld [vmem:[#allocation3 + $0x60] sm:$0xff] }
 0x5c0   :  { %22337 = vmatprep.mubr.bf16.mxu0 %v14252_v14  ;;  %v7120_v32 = vrot.slane %v24802_v13, 4  ;;  %v24815_v13 = vld [vmem:[#allocation3 + $0xd0] sm:$0xff] }
 0x5c2   :  { %21212 = vmatpush3.bf16.msra.mxu1 %v24573_v1  ;;  %v24581_v1 = vld [vmem:[%s28452_s3 + $0x4e8] sm:$0xff]   ;;  %v7121_v46 = vsel %vm2464_vm4, %v7118_v63, %v7120_v32 }
 0x5c3   :  { %21245 = vmatprep.subr.bf16.mxu1 %v27509_v59 }
 0x5c5   :  { %21182 = vmatmul.mubr.bf16.gmra.mrb[16].mxu1 %v6818_v10  ;;  %v14558_v10 = vrot.slane %v27265_v40, 3 }
 0x5c6   :  { %21185 = vmatprep.mubr.bf16.mxu1 %v6820_v38  ;;  %v14560_v38 = vrot.slane %v27281_v19, 3 }
 0x5c7   :  { %22338 = vmatmul.mubr.bf16.gmra.mrb[84].mxu0 %v14252_v14  ;;  %v14559_v40 = vsel %vm2152_vm3, %v14556_v16, %v14558_v10  ;;  %v24814_v16 = vld [vmem:[#allocation3 + $0xc8] sm:$0xff] }
 0x5c8   :  { %22341 = vmatprep.mubr.bf16.mxu0 %v14252_v14  ;;  %v14561_v19 = vsel %vm2152_vm3, %v14558_v10, %v14560_v38  ;;  %v27634_v10 = vld [vmem:[#allocation3 + $0x48] sm:$0xff] }
 0x5cd   :  { %21186 = vmatmul.mubr.bf16.gmra.mrb[20].mxu1 %v6822_v39 }
 0x5ce   :  { %21189 = vmatprep.mubr.bf16.mxu1 %v6824_v9  ;;  %v24587_v9 = vld [vmem:[%s28452_s3 + $0x4f8] sm:$0xff]  }
 0x5cf   :  { %22342 = vmatmul.mubr.bf16.gmra.mrb[88].mxu0 %v14252_v14 }
 0x5d0   :  { %22345 = vmatprep.mubr.bf16.mxu0 %v14252_v14  ;;  %v7117_v14 = vsel %vm2464_vm4, %v7114_v0, %v7116_v18  ;;  %v7136_v0 = vrot.slane %v24810_v24, 4  ;;  %v27696_v24 = vld [vmem:[#allocation3 + $0x78] sm:$0xff] }
 0x5d5   :  { %21190 = vmatmul.mubr.bf16.gmra.mrb[24].mxu1 %v6826_v23  ;;  %v14562_v23 = vrot.slane %v27496_v41, 3 }
 0x5d6   :  { %21193 = vmatprep.mubr.bf16.mxu1 %v6828_v33 }
 0x5d7   :  { %22346 = vmatmul.mubr.bf16.gmra.mrb[92].mxu0 %v14265_v61  ;;  %v24589_v61 = vld [vmem:[%s28452_s3 + $0x538] sm:$0xff]   ;;  %v14563_v17 = vsel %vm2152_vm3, %v14560_v38, %v14562_v23  ;;  %v27637_v38 = vld [vmem:[#allocation3 + $0x50] sm:$0xff] }
 0x5d8   :  { %22365 = vmatprep.mubr.bf16.mxu0 %v14545_v3  ;;  %v27610_v3 = vld [vmem:[%s28452_s3 + $0x540] sm:$0xff]  }
 0x5dd   :  { %21194 = vmatmul.mubr.bf16.gmra.mrb[28].mxu1 %v6830_v44  ;;  %v7132_v44 = vrot.slane %v24808_v26, 4  ;;  %v24603_v26 = vld [vmem:[%s28452_s3 + $0x538] sm:$0xff]  }
 0x5de   :  { %21213 = vmatprep.mubr.bf16.mxu1 %v7111_v47  ;;  %v24809_v47 = vld [vmem:[#allocation3 + $0x98] sm:$0xff] }
 0x5df   :  { %22366 = vmatmul.mubr.bf16.vlgmr.msra.gmra.mrb[64].mxu0 %v14547_v42  ;;  %v7133_v42 = vsel %vm2464_vm4, %v7130_v27, %v7132_v44  ;;  %v24602_v27 = vld [vmem:[%s28452_s3 + $0x568] sm:$0xff]  }
 0x5e0   :  { %22398 = vmatpush3.bf16.msra.mxu0 %v27494_v37  ;;  %22369 = vmatprep.mubr.bf16.mxu0 %v14549_v11  ;;  %v24583_v37 = vld [vmem:[%s28452_s3 + $0x518] sm:$0xff]  }
 0x5e1   :  { %22399 = vmatprep.subr.bf16.mxu0 %v24575_v22 }
 0x5e4   :  { %22400 = vmatpush3.bf16.msra.mxu0 %v24575_v22  ;;  %v7134_v22 = vrot.slane %v24809_v47, 4 }
 0x5e5   :  { %21214 = vmatmul.mubr.bf16.vlgmr.msra.gmra.mrb[0].mxu1 %v7113_v7  ;;  %22401 = vmatprep.subr.bf16.mxu0 %v24576_v2  ;;  %v24812_v7 = vld [vmem:[#allocation3 + $0xb8] sm:$0xff] }
 0x5e6   :  { %21217 = vmatprep.mubr.bf16.mxu1 %v7115_v34  ;;  %21246 = vmatpush3.bf16.msra.mxu1 %v27509_v59  ;;  %v24803_v59 = vld [vmem:[#allocation3 + $0x68] sm:$0xff]  ;;  %v7135_v11 = vsel %vm2464_vm4, %v7132_v44, %v7134_v22  ;;  %v14854_v34 = vrot.slane %v24812_v7, 4  ;;  %v27712_v7 = vld [vmem:[#allocation3 + $0x98] sm:$0xff] }
 0x5e7   :  { %22370 = vmatmul.mubr.bf16.gmra.mrb[68].mxu0 %v14551_v52  ;;  %21247 = vmatprep.subr.bf16.mxu1 %v24580_v15  ;;  %v7122_v29 = vrot.slane %v24803_v59, 4  ;;  %v24816_v59 = vld [vmem:[#allocation3 + $0xd8] sm:$0xff] }
 0x5e8   :  { %22373 = vmatprep.mubr.bf16.mxu0 %v14553_v5  ;;  %22402 = vmatpush3.bf16.msra.mxu0 %v24576_v2  ;;  %v14574_v2 = vrot.slane %v14524_v35, 3  ;;  %v7139_v5 = vsel %vm2464_vm4, %v7136_v0, %v7138_v54  ;;  %v24605_v35 = vld [vmem:[%s28452_s3 + $0x578] sm:$0xff]  }
 0x5e9   :  { %22403 = vmatprep.subr.bf16.mxu0 %v24577_v56  ;;  %v7123_v39 = vsel %vm2464_vm4, %v7120_v32, %v7122_v29  ;;  %v7125_v33 = vsel %vm2464_vm4, %v7122_v29, %v7124_v55  ;;  %v14860_v32 = vrot.slane %v24815_v13, 4  ;;  %v14862_v29 = vrot.slane %v24816_v59, 4  ;;  %v24612_v13 = vld [vmem:[%s28452_s3 + $0x588] sm:$0xff]  }
 0x5ea   :  { %21248 = vmatpush3.bf16.msra.mxu1 %v24580_v15  ;;  %v14833_v15 = vld [vmem:[#allocation3 + $0xb0] sm:$0xf0]  ;;  %v14575_v52 = vsel %vm2152_vm3, %v14562_v23, %v14574_v2  ;;  %v14866_v55 = vrot.slane %v24818_v31, 4 }
 0x5eb   :  { %21249 = vmatprep.subr.bf16.mxu1 %v24582_v25  ;;  %v14853_v62 = vrot.slane %v14833_v15, 4  ;;  %v27709_v15 = vld [vmem:[#allocation3 + $0x90] sm:$0xff] }
 0x5ec   :  { %22404 = vmatpush3.bf16.msra.mxu0 %v24577_v56  ;;  %v7137_v56 = vsel %vm2464_vm4, %v7134_v22, %v7136_v0  ;;  %v24604_v22 = vld [vmem:[%s28452_s3 + $0x570] sm:$0xff]   ;;  %v27699_v0 = vld [vmem:[#allocation3 + $0x80] sm:$0xff] }
 0x5ed   :  { %21218 = vmatmul.mubr.bf16.gmra.mrb[4].mxu1 %v7117_v14  ;;  %22405 = vmatprep.subr.bf16.mxu0 %v24579_v43  ;;  %v14855_v18 = vsel %vm2464_vm4, %v14853_v62, %v14854_v34  ;;  %v27722_v62 = vld [vmem:[#allocation3 + $0xb0] sm:$0xff] }
 0x5ee   :  { %21221 = vmatprep.mubr.bf16.mxu1 %v7119_v21  ;;  %21250 = vmatpush3.bf16.msra.mxu1 %v24582_v25  ;;  %v7089_v25 = vld [vmem:[#allocation3 + $0xb0] sm:$0xf]  ;;  %v7399_v21 = vld [vmem:[#allocation3 + $0x40] sm:$0xff] }
 0x5ef   :  { %22374 = vmatmul.mubr.bf16.gmra.mrb[72].mxu0 %v14555_v28  ;;  %21251 = vmatprep.subr.bf16.mxu1 %v24583_v37  ;;  %v7140_v63 = vrot.slane %v7089_v25, 4 }
 0x5f0   :  { %22377 = vmatprep.mubr.bf16.mxu0 %v14557_v8  ;;  %22406 = vmatpush3.bf16.msra.mxu0 %v24579_v43  ;;  %v24813_v43 = vld [vmem:[#allocation3 + $0xc0] sm:$0xff] }
 0x5f1   :  { %22407 = vmatprep.subr.bf16.mxu0 %v24581_v1  ;;  %v14856_v4 = vrot.slane %v24813_v43, 4  ;;  %v7141_v14 = vsel %vm2464_vm4, %v7138_v54, %v7140_v63  ;;  %v27706_v54 = vld [vmem:[#allocation3 + $0x88] sm:$0xff]  ;;  %v7673_v63 = vld [vmem:[#allocation3 + $0x40] sm:$0xfe]  ;;  %v7725_v43 = vrot.slane %v27634_v10, 1 }
 0x5f2   :  { %21252 = vmatpush3.bf16.msra.mxu1 %v24583_v37  ;;  %v14858_v37 = vrot.slane %v24814_v16, 4  ;;  %v27726_v16 = vld [vmem:[#allocation3 + $0xb8] sm:$0xff] }
 0x5f3   :  { %21253 = vmatprep.subr.bf16.mxu1 %v24585_v30  ;;  %v14857_v28 = vsel %vm2464_vm4, %v14854_v34, %v14856_v4  ;;  %v27715_v34 = vld [vmem:[#allocation3 + $0xa0] sm:$0xff] }
 0x5f4   :  { %22408 = vmatpush3.bf16.msra.mxu0 %v24581_v1  ;;  %v24591_v1 = vld [vmem:[%s28452_s3 + $0x508] sm:$0xff]   ;;  %v14859_v8 = vsel %vm2464_vm4, %v14856_v4, %v14858_v37  ;;  %v7724_v4 = vrot.slane %v7673_v63, 1 }
 0x5f5   :  { %21222 = vmatmul.mubr.bf16.gmra.mrb[8].mxu1 %v7121_v46  ;;  %22409 = vmatprep.subr.bf16.mxu0 %v24584_v53  ;;  %v14861_v46 = vsel %vm2464_vm4, %v14858_v37, %v14860_v32 }
 0x5f6   :  { %21225 = vmatprep.mubr.bf16.mxu1 %v7123_v39  ;;  %21254 = vmatpush3.bf16.msra.mxu1 %v24585_v30  ;;  %v24592_v30 = vld [vmem:[%s28452_s3 + $0x510] sm:$0xff]   ;;  %v14863_v39 = vsel %vm2464_vm4, %v14860_v32, %v14862_v29  ;;  %v7726_v37 = vsel %vm1351_vm1, %v7724_v4, %v7725_v43 }
 0x5f7   :  { %22378 = vmatmul.mubr.bf16.gmra.mrb[76].mxu0 %v14559_v40  ;;  %21255 = vmatprep.subr.bf16.mxu1 %v24586_v20  ;;  %v24595_v40 = vld [vmem:[%s28452_s3 + $0x520] sm:$0xff]  }
 0x5f8   :  { %22381 = vmatprep.mubr.bf16.mxu0 %v14561_v19  ;;  %22410 = vmatpush3.bf16.msra.mxu0 %v24584_v53  ;;  %v24596_v53 = vld [vmem:[%s28452_s3 + $0x548] sm:$0xff]   ;;  %v24817_v19 = vld [vmem:[#allocation3 + $0xe0] sm:$0xff] }
 0x5f9   :  { %22411 = vmatprep.subr.bf16.mxu0 %v24587_v9 }
 0x5fa   :  { %21256 = vmatpush3.bf16.msra.mxu1 %v24586_v20  ;;  %v24593_v20 = vld [vmem:[%s28452_s3 + $0x518] sm:$0xff]  }
 0x5fb   :  { %21257 = vmatprep.subr.bf16.mxu1 %v24588_v36 }
 0x5fc   :  { %22412 = vmatpush3.bf16.msra.mxu0 %v24587_v9  ;;  %v24598_v9 = vld [vmem:[%s28452_s3 + $0x550] sm:$0xff]  }
 0x5fd   :  { %21226 = vmatmul.mubr.bf16.gmra.mrb[12].mxu1 %v7125_v33  ;;  %22445 = vmatprep.subr.bf16.mxu0 %v27597_v48 }
 0x5fe   :  { %21229 = vmatprep.mubr.bf16.mxu1 %v7127_v12  ;;  %21258 = vmatpush3.bf16.msra.mxu1 %v24588_v36  ;;  %v14864_v36 = vrot.slane %v24817_v19, 4  ;;  %v24601_v12 = vld [vmem:[%s28452_s3 + $0x560] sm:$0xff]   ;;  %v24615_v19 = vld [vmem:[%s28452_s3 + $0x598] sm:$0xff]  }
 0x5ff   :  { %22382 = vmatmul.mubr.bf16.gmra.mrb[80].mxu0 %v14563_v17  ;;  %21259 = vmatprep.subr.bf16.mxu1 %v24589_v61  ;;  %v24600_v17 = vld [vmem:[%s28452_s3 + $0x530] sm:$0xff]  }
 0x600   :  { %22385 = vmatprep.mubr.bf16.mxu0 %v14562_v23  ;;  %v14867_v33 = vsel %vm2464_vm4, %v14864_v36, %v14866_v55 }
 0x602   :  { %21260 = vmatpush3.bf16.msra.mxu1 %v24589_v61  ;;  %v14865_v61 = vsel %vm2464_vm4, %v14862_v29, %v14864_v36  ;;  %v24609_v29 = vld [vmem:[%s28452_s3 + $0x558] sm:$0xff]  }
 0x603   :  { %21293 = vmatprep.subr.bf16.mxu1 %v27610_v3 }
 0x605   :  { %21230 = vmatmul.mubr.bf16.gmra.mrb[16].mxu1 %v7129_v57  ;;  %v27675_v57 = vld [vmem:[#allocation3 + $0x68] sm:$0xff] }
 0x606   :  { %21233 = vmatprep.mubr.bf16.mxu1 %v7131_v60  ;;  %v27678_v60 = vld [vmem:[#allocation3 + $0x70] sm:$0xff] }
 0x607   :  { %22386 = vmatmul.mubr.bf16.gmra.mrb[84].mxu0 %v14562_v23 }
 0x608   :  { %22389 = vmatprep.mubr.bf16.mxu0 %v14562_v23 }
 0x60d   :  { %21234 = vmatmul.mubr.bf16.gmra.mrb[20].mxu1 %v7133_v42  ;;  %v24606_v42 = vld [vmem:[%s28452_s3 + $0x540] sm:$0xff]  }
 0x60e   :  { %21237 = vmatprep.mubr.bf16.mxu1 %v7135_v11  ;;  %v14872_v11 = vrot.slane %v27496_v41, 4 }
 0x60f   :  { %22390 = vmatmul.mubr.bf16.gmra.mrb[88].mxu0 %v14562_v23 }
 0x610   :  { %22393 = vmatprep.mubr.bf16.mxu0 %v14562_v23  ;;  %v24597_v23 = vld [vmem:[%s28452_s3 + $0x528] sm:$0xff]   ;;  %v14873_v2 = vsel %vm2464_vm4, %v14870_v6, %v14872_v11 }
 0x615   :  { %21238 = vmatmul.mubr.bf16.gmra.mrb[24].mxu1 %v7137_v56  ;;  %v14834_v56 = vld [vmem:[#allocation3 + $0x130] sm:$0xf] }
 0x616   :  { %21241 = vmatprep.mubr.bf16.mxu1 %v7139_v5  ;;  %v27718_v5 = vld [vmem:[#allocation3 + $0xa8] sm:$0xff] }
 0x617   :  { %22394 = vmatmul.mubr.bf16.gmra.mrb[92].mxu0 %v14575_v52  ;;  %v14884_v52 = vrot.slane %v14834_v56, 4  ;;  %v7745_v56 = vrot.slane %v27712_v7, 1  ;;  %v7749_v63 = vrot.slane %v27718_v5, 1 }
 0x618   :  { %22413 = vmatprep.mubr.bf16.mxu0 %v14855_v18  ;;  %v15143_v18 = vld [vmem:[#allocation3 + $0xc0] sm:$0xff] }
 0x619   :  { %v14885_v25 = vsel %vm2464_vm4, %v14872_v11, %v14884_v52 }
 0x61d   :  { %21242 = vmatmul.mubr.bf16.gmra.mrb[28].mxu1 %v7141_v14  ;;  %v24607_v14 = vld [vmem:[%s28452_s3 + $0x548] sm:$0xff]  }
 0x61e   :  { %21261 = vmatprep.mubr.bf16.mxu1 %v7399_v21  ;;  %v27733_v21 = vld [vmem:[#allocation3 + $0xc8] sm:$0xff] }
 0x61f   :  { %22414 = vmatmul.mubr.bf16.vlgmr.msra.gmra.mrb[64].mxu0 %v14857_v28  ;;  %v7727_v28 = vrot.slane %v27637_v38, 1 }
 0x620   :  { %22446 = vmatpush3.bf16.msra.mxu0 %v27597_v48  ;;  %22417 = vmatprep.mubr.bf16.mxu0 %v14859_v8  ;;  %v27658_v48 = vld [vmem:[#allocation3 + $0x60] sm:$0xff]  ;;  %v7729_v8 = vrot.slane %v27655_v50, 1 }
 0x621   :  { %22447 = vmatprep.subr.bf16.mxu0 %v24591_v1  ;;  %v7728_v32 = vsel %vm1351_vm1, %v7725_v43, %v7727_v28 }
 0x622   :  { %v7730_v59 = vsel %vm1351_vm1, %v7727_v28, %v7729_v8  ;;  %v15416_v28 = vld [vmem:[#allocation3 + $0xc0] sm:$0xfe] }
 0x624   :  { %22448 = vmatpush3.bf16.msra.mxu0 %v24591_v1  ;;  %v27736_v1 = vld [vmem:[#allocation3 + $0xd0] sm:$0xff] }
 0x625   :  { %21262 = vmatmul.mubr.bf16.vlgmr.msra.gmra.mrb[0].mxu1 %v27634_v10  ;;  %22449 = vmatprep.subr.bf16.mxu0 %v24592_v30 }
 0x626   :  { %21265 = vmatprep.mubr.bf16.mxu1 %v27637_v38  ;;  %21294 = vmatpush3.bf16.msra.mxu1 %v27610_v3  ;;  %v24819_v3 = vld [vmem:[#allocation3 + $0xf0] sm:$0xff] }
 0x627   :  { %22418 = vmatmul.mubr.bf16.gmra.mrb[68].mxu0 %v14861_v46  ;;  %21295 = vmatprep.subr.bf16.mxu1 %v24596_v53  ;;  %v14868_v49 = vrot.slane %v24819_v3, 4  ;;  %v24614_v46 = vld [vmem:[%s28452_s3 + $0x590] sm:$0xff]   ;;  %v24618_v3 = vld [vmem:[%s28452_s3 + $0x5a8] sm:$0xff]  }
 0x628   :  { %22421 = vmatprep.mubr.bf16.mxu0 %v14863_v39  ;;  %22450 = vmatpush3.bf16.msra.mxu0 %v24592_v30  ;;  %v24608_v30 = vld [vmem:[%s28452_s3 + $0x550] sm:$0xff]   ;;  %v7731_v39 = vrot.slane %v27658_v48, 1 }
 0x629   :  { %22451 = vmatprep.subr.bf16.mxu0 %v24593_v20  ;;  %v14869_v44 = vsel %vm2464_vm4, %v14866_v55, %v14868_v49  ;;  %v14871_v47 = vsel %vm2464_vm4, %v14868_v49, %v14870_v6  ;;  %v24613_v55 = vld [vmem:[%s28452_s3 + $0x568] sm:$0xff]   ;;  %v24619_v6 = vld [vmem:[%s28452_s3 + $0x578] sm:$0xff]  }
 0x62a   :  { %21296 = vmatpush3.bf16.msra.mxu1 %v24596_v53  ;;  %v27752_v53 = vld [vmem:[#allocation3 + $0xd8] sm:$0xff]  ;;  %v7732_v36 = vsel %vm1351_vm1, %v7729_v8, %v7731_v39  ;;  %v15467_v8 = vrot.slane %v27733_v21, 1 }
 0x62b   :  { %21297 = vmatprep.subr.bf16.mxu1 %v24598_v9 }
 0x62c   :  { %22452 = vmatpush3.bf16.msra.mxu0 %v24593_v20  ;;  %v27755_v20 = vld [vmem:[#allocation3 + $0xe0] sm:$0xff] }
 0x62d   :  { %21266 = vmatmul.mubr.bf16.gmra.mrb[4].mxu1 %v27655_v50  ;;  %22453 = vmatprep.subr.bf16.mxu0 %v24595_v40 }
 0x62e   :  { %21269 = vmatprep.mubr.bf16.mxu1 %v27658_v48  ;;  %21298 = vmatpush3.bf16.msra.mxu1 %v24598_v9  ;;  %v7733_v9 = vrot.slane %v27675_v57, 1 }
 0x62f   :  { %22422 = vmatmul.mubr.bf16.gmra.mrb[72].mxu0 %v14865_v61  ;;  %21299 = vmatprep.subr.bf16.mxu1 %v24599_v51  ;;  %v24617_v61 = vld [vmem:[%s28452_s3 + $0x5a0] sm:$0xff]  }
 0x630   :  { %22425 = vmatprep.mubr.bf16.mxu0 %v14867_v33  ;;  %22454 = vmatpush3.bf16.msra.mxu0 %v24595_v40  ;;  %v24611_v40 = vld [vmem:[%s28452_s3 + $0x560] sm:$0xff]   ;;  %v7734_v31 = vsel %vm1351_vm1, %v7731_v39, %v7733_v9  ;;  %v7735_v33 = vrot.slane %v27678_v60, 1 }
 0x631   :  { %22455 = vmatprep.subr.bf16.mxu0 %v24597_v23  ;;  %v8014_v39 = vld [vmem:[#allocation3 + $0x40] sm:$0xfc] }
 0x632   :  { %21300 = vmatpush3.bf16.msra.mxu1 %v24599_v51  ;;  %v27774_v51 = vld [vmem:[#allocation3 + $0xe8] sm:$0xff]  ;;  %v7736_v49 = vsel %vm1351_vm1, %v7733_v9, %v7735_v33  ;;  %v8036_v9 = vrot.slane %v27634_v10, 2 }
 0x633   :  { %21301 = vmatprep.subr.bf16.mxu1 %v24601_v12 }
 0x634   :  { %22456 = vmatpush3.bf16.msra.mxu0 %v24597_v23  ;;  %v27777_v23 = vld [vmem:[#allocation3 + $0xf0] sm:$0xff] }
 0x635   :  { %21270 = vmatmul.mubr.bf16.gmra.mrb[8].mxu1 %v27675_v57  ;;  %22457 = vmatprep.subr.bf16.mxu0 %v24600_v17 }
 0x636   :  { %21273 = vmatprep.mubr.bf16.mxu1 %v27678_v60  ;;  %21302 = vmatpush3.bf16.msra.mxu1 %v24601_v12  ;;  %v7737_v12 = vrot.slane %v27696_v24, 1 }
 0x637   :  { %22426 = vmatmul.mubr.bf16.gmra.mrb[76].mxu0 %v14869_v44  ;;  %21303 = vmatprep.subr.bf16.mxu1 %v24602_v27  ;;  %v7739_v44 = vrot.slane %v27699_v0, 1 }
 0x638   :  { %22429 = vmatprep.mubr.bf16.mxu0 %v14871_v47  ;;  %22458 = vmatpush3.bf16.msra.mxu0 %v24600_v17  ;;  %v24616_v17 = vld [vmem:[%s28452_s3 + $0x570] sm:$0xff]   ;;  %v7738_v58 = vsel %vm1351_vm1, %v7735_v33, %v7737_v12  ;;  %v7741_v47 = vrot.slane %v27706_v54, 1 }
 0x639   :  { %22459 = vmatprep.subr.bf16.mxu0 %v24603_v26 }
 0x63a   :  { %21304 = vmatpush3.bf16.msra.mxu1 %v24602_v27  ;;  %v27796_v27 = vld [vmem:[#allocation3 + $0xf8] sm:$0xff] }
 0x63b   :  { %21305 = vmatprep.subr.bf16.mxu1 %v24604_v22 }
 0x63c   :  { %22460 = vmatpush3.bf16.msra.mxu0 %v24603_v26  ;;  %v24620_v26 = vld [vmem:[%s28452_s3 + $0x5b0] sm:$0xff]  }
 0x63d   :  { %21274 = vmatmul.mubr.bf16.gmra.mrb[12].mxu1 %v27696_v24  ;;  %22493 = vmatprep.subr.bf16.mxu0 %v24606_v42 }
 0x63e   :  { %21277 = vmatprep.mubr.bf16.mxu1 %v27699_v0  ;;  %21306 = vmatpush3.bf16.msra.mxu1 %v24604_v22  ;;  %v24622_v22 = vld [vmem:[%s28452_s3 + $0x580] sm:$0xff]  }
 0x63f   :  { %22430 = vmatmul.mubr.bf16.gmra.mrb[80].mxu0 %v14873_v2  ;;  %21307 = vmatprep.subr.bf16.mxu1 %v24605_v35  ;;  %v27817_v2 = vld [vmem:[%s28452_s3 + $0x5c0] sm:$0xff]  }
 0x640   :  { %22433 = vmatprep.mubr.bf16.mxu0 %v14872_v11 }
 0x642   :  { %21308 = vmatpush3.bf16.msra.mxu1 %v24605_v35  ;;  %v7742_v35 = vsel %vm1351_vm1, %v7739_v44, %v7741_v47 }
 0x643   :  { %21341 = vmatprep.subr.bf16.mxu1 %v24610_v45 }
 0x645   :  { %21278 = vmatmul.mubr.bf16.gmra.mrb[16].mxu1 %v27706_v54 }
 0x646   :  { %21281 = vmatprep.mubr.bf16.mxu1 %v27709_v15 }
 0x647   :  { %22434 = vmatmul.mubr.bf16.gmra.mrb[84].mxu0 %v14872_v11 }
 0x648   :  { %22437 = vmatprep.mubr.bf16.mxu0 %v14872_v11 }
 0x64d   :  { %21282 = vmatmul.mubr.bf16.gmra.mrb[20].mxu1 %v27712_v7 }
 0x64e   :  { %21285 = vmatprep.mubr.bf16.mxu1 %v27715_v34 }
 0x64f   :  { %22438 = vmatmul.mubr.bf16.gmra.mrb[88].mxu0 %v14872_v11 }
 0x650   :  { %22441 = vmatprep.mubr.bf16.mxu0 %v14872_v11  ;;  %v7740_v11 = vsel %vm1351_vm1, %v7737_v12, %v7739_v44 }
 0x655   :  { %21286 = vmatmul.mubr.bf16.gmra.mrb[24].mxu1 %v27718_v5 }
 0x656   :  { %21289 = vmatprep.mubr.bf16.mxu1 %v27722_v62 }
 0x657   :  { %22442 = vmatmul.mubr.bf16.gmra.mrb[92].mxu0 %v14885_v25 }
 0x658   :  { %22461 = vmatprep.mubr.bf16.mxu0 %v15143_v18  ;;  %v7747_v18 = vrot.slane %v27715_v34, 1 }
 0x65a   :  { %v7748_v43 = vsel %vm1351_vm1, %v7745_v56, %v7747_v18  ;;  %v7750_v4 = vsel %vm1351_vm1, %v7747_v18, %v7749_v63  ;;  %v24631_v18 = vld [vmem:[%s28452_s3 + $0x5d8] sm:$0xff]  }
 0x65d   :  { %21290 = vmatmul.mubr.bf16.gmra.mrb[28].mxu1 %v27726_v16 }
 0x65e   :  { %21309 = vmatprep.mubr.bf16.mxu1 %v7726_v37  ;;  %v7751_v37 = vrot.slane %v27722_v62, 1 }
 0x65f   :  { %22462 = vmatmul.mubr.bf16.vlgmr.msra.gmra.mrb[64].mxu0 %v27733_v21 }
 0x660   :  { %22494 = vmatpush3.bf16.msra.mxu0 %v24606_v42  ;;  %22465 = vmatprep.mubr.bf16.mxu0 %v27736_v1  ;;  %v24621_v42 = vld [vmem:[%s28452_s3 + $0x5b8] sm:$0xff]  }
 0x661   :  { %22495 = vmatprep.subr.bf16.mxu0 %v24607_v14 }
 0x664   :  { %22496 = vmatpush3.bf16.msra.mxu0 %v24607_v14  ;;  %v7753_v14 = vrot.slane %v27726_v16, 1 }
 0x665   :  { %21310 = vmatmul.mubr.bf16.vlgmr.msra.gmra.mrb[0].mxu1 %v7728_v32  ;;  %22497 = vmatprep.subr.bf16.mxu0 %v24608_v30  ;;  %v7689_v32 = vld [vmem:[#allocation3 + $0xc0] sm:$0x1] }
 0x666   :  { %21313 = vmatprep.mubr.bf16.mxu1 %v7730_v59  ;;  %21342 = vmatpush3.bf16.msra.mxu1 %v24610_v45  ;;  %v7743_v45 = vrot.slane %v27709_v15, 1  ;;  %v15466_v59 = vrot.slane %v15416_v28, 1  ;;  %v24633_v28 = vld [vmem:[%s28452_s3 + $0x5e0] sm:$0xff]  }
 0x667   :  { %22466 = vmatmul.mubr.bf16.gmra.mrb[68].mxu0 %v27752_v53  ;;  %21343 = vmatprep.subr.bf16.mxu1 %v24612_v13 }
 0x668   :  { %22469 = vmatprep.mubr.bf16.mxu0 %v27755_v20  ;;  %22498 = vmatpush3.bf16.msra.mxu0 %v24608_v30  ;;  %v7744_v52 = vsel %vm1351_vm1, %v7741_v47, %v7743_v45  ;;  %v7746_v25 = vsel %vm1351_vm1, %v7743_v45, %v7745_v56  ;;  %v7752_v30 = vsel %vm1351_vm1, %v7749_v63, %v7751_v37  ;;  %v8042_v45 = vrot.slane %v27658_v48, 2 }
 0x669   :  { %22499 = vmatprep.subr.bf16.mxu0 %v24609_v29  ;;  %v8044_v56 = vrot.slane %v27675_v57, 2 }
 0x66a   :  { %21344 = vmatpush3.bf16.msra.mxu1 %v24612_v13  ;;  %v7754_v13 = vsel %vm1351_vm1, %v7751_v37, %v7753_v14 }
 0x66b   :  { %21345 = vmatprep.subr.bf16.mxu1 %v24614_v46 }
 0x66c   :  { %22500 = vmatpush3.bf16.msra.mxu0 %v24609_v29  ;;  %v15468_v29 = vsel %vm1351_vm1, %v15466_v59, %v15467_v8  ;;  %v24634_v59 = vld [vmem:[%s28452_s3 + $0x5e8] sm:$0xff]  }
 0x66d   :  { %21314 = vmatmul.mubr.bf16.gmra.mrb[4].mxu1 %v7732_v36  ;;  %22501 = vmatprep.subr.bf16.mxu0 %v24611_v40  ;;  %v15471_v36 = vrot.slane %v27752_v53, 1 }
 0x66e   :  { %21317 = vmatprep.mubr.bf16.mxu1 %v7734_v31  ;;  %21346 = vmatpush3.bf16.msra.mxu1 %v24614_v46  ;;  %v7755_v46 = vrot.slane %v7689_v32, 1  ;;  %v15481_v32 = vrot.slane %v27496_v41, 1 }
 0x66f   :  { %22470 = vmatmul.mubr.bf16.gmra.mrb[72].mxu0 %v27774_v51  ;;  %21347 = vmatprep.subr.bf16.mxu1 %v24615_v19 }
 0x670   :  { %22473 = vmatprep.mubr.bf16.mxu0 %v27777_v23  ;;  %22502 = vmatpush3.bf16.msra.mxu0 %v24611_v40  ;;  %v15469_v40 = vrot.slane %v27736_v1, 1  ;;  %v7756_v31 = vsel %vm1351_vm1, %v7753_v14, %v7755_v46 }
 0x671   :  { %22503 = vmatprep.subr.bf16.mxu0 %v24613_v55 }
 0x672   :  { %21348 = vmatpush3.bf16.msra.mxu1 %v24615_v19  ;;  %v8035_v19 = vrot.slane %v8014_v39, 2  ;;  %v15470_v33 = vsel %vm1351_vm1, %v15467_v8, %v15469_v40  ;;  %v15472_v12 = vsel %vm1351_vm1, %v15469_v40, %v15471_v36  ;;  %v8046_v8 = vrot.slane %v27678_v60, 2  ;;  %v24635_v39 = vld [vmem:[%s28452_s3 + $0x5b8] sm:$0xff]  }
 0x673   :  { %21349 = vmatprep.subr.bf16.mxu1 %v24617_v61  ;;  %v8050_v40 = vrot.slane %v27699_v0, 2 }
 0x674   :  { %22504 = vmatpush3.bf16.msra.mxu0 %v24613_v55  ;;  %v8037_v55 = vsel %vm1840_vm2, %v8035_v19, %v8036_v9  ;;  %v8052_v19 = vrot.slane %v27706_v54, 2 }
 0x675   :  { %21318 = vmatmul.mubr.bf16.gmra.mrb[8].mxu1 %v7736_v49  ;;  %22505 = vmatprep.subr.bf16.mxu0 %v24616_v17  ;;  %v24624_v49 = vld [vmem:[%s28452_s3 + $0x590] sm:$0xff]  }
 0x676   :  { %21321 = vmatprep.mubr.bf16.mxu1 %v7738_v58  ;;  %21350 = vmatpush3.bf16.msra.mxu1 %v24617_v61  ;;  %v24623_v61 = vld [vmem:[%s28452_s3 + $0x588] sm:$0xff]   ;;  %v15473_v58 = vrot.slane %v27755_v20, 1 }
 0x677   :  { %22474 = vmatmul.mubr.bf16.gmra.mrb[76].mxu0 %v27796_v27  ;;  %21351 = vmatprep.subr.bf16.mxu1 %v24618_v3 }
 0x678   :  { %22477 = vmatprep.mubr.bf16.mxu0 %v27496_v41  ;;  %22506 = vmatpush3.bf16.msra.mxu0 %v24616_v17  ;;  %v8038_v17 = vrot.slane %v27637_v38, 2 }
 0x679   :  { %22507 = vmatprep.subr.bf16.mxu0 %v24619_v6 }
 0x67a   :  { %21352 = vmatpush3.bf16.msra.mxu1 %v24618_v3  ;;  %v8040_v3 = vrot.slane %v27655_v50, 2  ;;  %v8039_v44 = vsel %vm1840_vm2, %v8036_v9, %v8038_v17  ;;  %v24636_v9 = vld [vmem:[%s28452_s3 + $0x5f0] sm:$0xff]  }
 0x67b   :  { %21353 = vmatprep.subr.bf16.mxu1 %v24620_v26 }
 0x67c   :  { %22508 = vmatpush3.bf16.msra.mxu0 %v24619_v6  ;;  %v15475_v6 = vrot.slane %v27774_v51, 1  ;;  %v8041_v47 = vsel %vm1840_vm2, %v8038_v17, %v8040_v3  ;;  %v8043_v63 = vsel %vm1840_vm2, %v8040_v3, %v8042_v45  ;;  %v8056_v17 = vrot.slane %v27712_v7, 2 }
 0x67d   :  { %21322 = vmatmul.mubr.bf16.gmra.mrb[12].mxu1 %v7740_v11  ;;  %22541 = vmatprep.subr.bf16.mxu0 %v24622_v22 }
 0x67e   :  { %21325 = vmatprep.mubr.bf16.mxu1 %v7742_v35  ;;  %21354 = vmatpush3.bf16.msra.mxu1 %v24620_v26  ;;  %v24628_v26 = vld [vmem:[%s28452_s3 + $0x5c8] sm:$0xff]   ;;  %v15476_v11 = vsel %vm1351_vm1, %v15473_v58, %v15475_v6  ;;  %v24630_v35 = vld [vmem:[%s28452_s3 + $0x5d0] sm:$0xff]  }
 0x67f   :  { %22478 = vmatmul.mubr.bf16.gmra.mrb[80].mxu0 %v27496_v41  ;;  %21355 = vmatprep.subr.bf16.mxu1 %v24621_v42 }
 0x680   :  { %22481 = vmatprep.mubr.bf16.mxu0 %v27496_v41 }
 0x682   :  { %21356 = vmatpush3.bf16.msra.mxu1 %v24621_v42  ;;  %v15474_v42 = vsel %vm1351_vm1, %v15471_v36, %v15473_v58  ;;  %v27914_v36 = vld [vmem:[%s28452_s3 + $0x5c0] sm:$0xff]   ;;  %v8058_v58 = vrot.slane %v27715_v34, 2 }
 0x683   :  { %21389 = vmatprep.subr.bf16.mxu1 %v27817_v2 }
 0x685   :  { %21326 = vmatmul.mubr.bf16.gmra.mrb[16].mxu1 %v7744_v52  ;;  %v24627_v52 = vld [vmem:[%s28452_s3 + $0x5a0] sm:$0xff]  }
 0x686   :  { %21329 = vmatprep.mubr.bf16.mxu1 %v7746_v25  ;;  %v15479_v25 = vrot.slane %v27796_v27, 1 }
 0x687   :  { %22482 = vmatmul.mubr.bf16.gmra.mrb[84].mxu0 %v27496_v41 }
 0x688   :  { %22485 = vmatprep.mubr.bf16.mxu0 %v27496_v41 }
 0x68d   :  { %21330 = vmatmul.mubr.bf16.gmra.mrb[20].mxu1 %v7748_v43  ;;  %v8045_v43 = vsel %vm1840_vm2, %v8042_v45, %v8044_v56  ;;  %v15777_v45 = vrot.slane %v27733_v21, 2 }
 0x68e   :  { %21333 = vmatprep.mubr.bf16.mxu1 %v7750_v4  ;;  %v24629_v4 = vld [vmem:[%s28452_s3 + $0x5a8] sm:$0xff]  }
 0x68f   :  { %22486 = vmatmul.mubr.bf16.gmra.mrb[88].mxu0 %v27496_v41 }
 0x690   :  { %22489 = vmatprep.mubr.bf16.mxu0 %v27496_v41 }
 0x695   :  { %21334 = vmatmul.mubr.bf16.gmra.mrb[24].mxu1 %v7752_v30  ;;  %v8048_v30 = vrot.slane %v27696_v24, 2 }
 0x696   :  { %21337 = vmatprep.mubr.bf16.mxu1 %v7754_v13  ;;  %v24632_v13 = vld [vmem:[%s28452_s3 + $0x5b0] sm:$0xff]  }
 0x697   :  { %22490 = vmatmul.mubr.bf16.gmra.mrb[92].mxu0 %v27496_v41  ;;  %v8049_v46 = vsel %vm1840_vm2, %v8046_v8, %v8048_v30  ;;  %v15482_v41 = vsel %vm1351_vm1, %v15479_v25, %v15481_v32 }
 0x698   :  { %22509 = vmatprep.mubr.bf16.mxu0 %v15468_v29  ;;  %v8047_v29 = vsel %vm1840_vm2, %v8044_v56, %v8046_v8  ;;  %v15781_v8 = vrot.slane %v27752_v53, 2 }
 0x69d   :  { %21338 = vmatmul.mubr.bf16.gmra.mrb[28].mxu1 %v7756_v31  ;;  %v24637_v31 = vld [vmem:[%s28452_s3 + $0x5f8] sm:$0xff]  }
 0x69e   :  { %21357 = vmatprep.mubr.bf16.mxu1 %v8037_v55  ;;  %v8051_v55 = vsel %vm1840_vm2, %v8048_v30, %v8050_v40 }
 0x69f   :  { %22510 = vmatmul.mubr.bf16.vlgmr.msra.gmra.mrb[64].mxu0 %v15470_v33  ;;  %v27925_v33 = vld [vmem:[%s28452_s3 + $0x600] sm:$0xff]  }
 0x6a0   :  { %22542 = vmatpush3.bf16.msra.mxu0 %v24622_v22  ;;  %22513 = vmatprep.mubr.bf16.mxu0 %v15472_v12  ;;  %v24625_v22 = vld [vmem:[%s28452_s3 + $0x598] sm:$0xff]   ;;  %v8054_v12 = vrot.slane %v27709_v15, 2 }
 0x6a1   :  { %22543 = vmatprep.subr.bf16.mxu0 %v24623_v61 }
 0x6a2   :  { %v8055_v3 = vsel %vm1840_vm2, %v8052_v19, %v8054_v12 }
 0x6a4   :  { %22544 = vmatpush3.bf16.msra.mxu0 %v24623_v61  ;;  %v8053_v61 = vsel %vm1840_vm2, %v8050_v40, %v8052_v19  ;;  %v15785_v40 = vrot.slane %v27774_v51, 2  ;;  %v24644_v19 = vld [vmem:[%s28452_s3 + $0x608] sm:$0xff]  }
 0x6a5   :  { %21358 = vmatmul.mubr.bf16.vlgmr.msra.gmra.mrb[0].mxu1 %v8039_v44  ;;  %22545 = vmatprep.subr.bf16.mxu0 %v24624_v49 }
 0x6a6   :  { %21361 = vmatprep.mubr.bf16.mxu1 %v8041_v47  ;;  %21390 = vmatpush3.bf16.msra.mxu1 %v27817_v2  ;;  %v15477_v2 = vrot.slane %v27777_v23, 1  ;;  %v15432_v47 = vld [vmem:[#allocation3 + $0x140] sm:$0x1] }
 0x6a7   :  { %22514 = vmatmul.mubr.bf16.gmra.mrb[68].mxu0 %v15474_v42  ;;  %21391 = vmatprep.subr.bf16.mxu1 %v24628_v26  ;;  %v15497_v42 = vrot.slane %v15432_v47, 1 }
 0x6a8   :  { %22517 = vmatprep.mubr.bf16.mxu0 %v15476_v11  ;;  %22546 = vmatpush3.bf16.msra.mxu0 %v24624_v49  ;;  %v15478_v37 = vsel %vm1351_vm1, %v15475_v6, %v15477_v2  ;;  %v15480_v14 = vsel %vm1351_vm1, %v15477_v2, %v15479_v25  ;;  %v8057_v49 = vsel %vm1840_vm2, %v8054_v12, %v8056_v17  ;;  %v8060_v6 = vrot.slane %v27718_v5, 2  ;;  %v8015_v25 = vld [vmem:[#allocation3 + $0xc0] sm:$0x3] }
 0x6a9   :  { %22547 = vmatprep.subr.bf16.mxu0 %v24625_v22  ;;  %v8064_v11 = vrot.slane %v27726_v16, 2 }
 0x6aa   :  { %21392 = vmatpush3.bf16.msra.mxu1 %v24628_v26  ;;  %v8059_v26 = vsel %vm1840_vm2, %v8056_v17, %v8058_v58  ;;  %v8061_v44 = vsel %vm1840_vm2, %v8058_v58, %v8060_v6  ;;  %v24646_v17 = vld [vmem:[%s28452_s3 + $0x610] sm:$0xff]   ;;  %v24643_v58 = vld [vmem:[%s28452_s3 + $0x5e0] sm:$0xff]  }
 0x6ab   :  { %21393 = vmatprep.subr.bf16.mxu1 %v24630_v35 }
 0x6ac   :  { %22548 = vmatpush3.bf16.msra.mxu0 %v24625_v22  ;;  %v8062_v22 = vrot.slane %v27722_v62, 2 }
 0x6ad   :  { %21362 = vmatmul.mubr.bf16.gmra.mrb[4].mxu1 %v8043_v63  ;;  %22549 = vmatprep.subr.bf16.mxu0 %v24627_v52 }
 0x6ae   :  { %21365 = vmatprep.mubr.bf16.mxu1 %v8045_v43  ;;  %21394 = vmatpush3.bf16.msra.mxu1 %v24630_v35  ;;  %v15756_v35 = vld [vmem:[#allocation3 + $0xc0] sm:$0xfc]  ;;  %v8063_v56 = vsel %vm1840_vm2, %v8060_v6, %v8062_v22  ;;  %v8065_v2 = vsel %vm1840_vm2, %v8062_v22, %v8064_v11  ;;  %v8066_v43 = vrot.slane %v8015_v25, 2  ;;  %v15789_v6 = vrot.slane %v27796_v27, 2  ;;  %v24645_v22 = vld [vmem:[%s28452_s3 + $0x5e8] sm:$0xff]  }
 0x6af   :  { %22518 = vmatmul.mubr.bf16.gmra.mrb[72].mxu0 %v15478_v37  ;;  %21395 = vmatprep.subr.bf16.mxu1 %v24631_v18  ;;  %v8347_v37 = vrot.slane %v27634_v10, 3 }
 0x6b0   :  { %22521 = vmatprep.mubr.bf16.mxu0 %v15480_v14  ;;  %22550 = vmatpush3.bf16.msra.mxu0 %v24627_v52  ;;  %v15498_v52 = vsel %vm1351_vm1, %v15481_v32, %v15497_v42  ;;  %v15779_v14 = vrot.slane %v27736_v1, 2  ;;  %v8067_v30 = vsel %vm1840_vm2, %v8064_v11, %v8066_v43 }
 0x6b1   :  { %22551 = vmatprep.subr.bf16.mxu0 %v24629_v4 }
 0x6b2   :  { %21396 = vmatpush3.bf16.msra.mxu1 %v24631_v18  ;;  %v15776_v18 = vrot.slane %v15756_v35, 2  ;;  %v24649_v35 = vld [vmem:[%s28452_s3 + $0x620] sm:$0xff]  }
 0x6b3   :  { %21397 = vmatprep.subr.bf16.mxu1 %v24633_v28 }
 0x6b4   :  { %22552 = vmatpush3.bf16.msra.mxu0 %v24629_v4  ;;  %v15778_v63 = vsel %vm1840_vm2, %v15776_v18, %v15777_v45  ;;  %v8325_v4 = vld [vmem:[#allocation3 + $0x40] sm:$0xf8]  ;;  %v24650_v18 = vld [vmem:[%s28452_s3 + $0x628] sm:$0xff]  }
 0x6b5   :  { %21366 = vmatmul.mubr.bf16.gmra.mrb[8].mxu1 %v8047_v29  ;;  %22553 = vmatprep.subr.bf16.mxu0 %v24632_v13  ;;  %v15782_v29 = vsel %vm1840_vm2, %v15779_v14, %v15781_v8 }
 0x6b6   :  { %21369 = vmatprep.mubr.bf16.mxu1 %v8049_v46  ;;  %21398 = vmatpush3.bf16.msra.mxu1 %v24633_v28  ;;  %v8346_v28 = vrot.slane %v8325_v4, 3  ;;  %v8349_v46 = vrot.slane %v27637_v38, 3  ;;  %v24651_v4 = vld [vmem:[%s28452_s3 + $0x5f8] sm:$0xff]  }
 0x6b7   :  { %22522 = vmatmul.mubr.bf16.gmra.mrb[76].mxu0 %v15482_v41  ;;  %21399 = vmatprep.subr.bf16.mxu1 %v24634_v59  ;;  %v24640_v41 = vld [vmem:[%s28452_s3 + $0x5d0] sm:$0xff]  }
 0x6b8   :  { %22525 = vmatprep.mubr.bf16.mxu0 %v15481_v32  ;;  %22554 = vmatpush3.bf16.msra.mxu0 %v24632_v13  ;;  %v8348_v13 = vsel %vm2152_vm3, %v8346_v28, %v8347_v37  ;;  %v8361_v28 = vrot.slane %v27699_v0, 3 }
 0x6b9   :  { %22555 = vmatprep.subr.bf16.mxu0 %v24635_v39 }
 0x6ba   :  { %21400 = vmatpush3.bf16.msra.mxu1 %v24634_v59  ;;  %v15780_v59 = vsel %vm1840_vm2, %v15777_v45, %v15779_v14  ;;  %v8357_v45 = vrot.slane %v27678_v60, 3  ;;  %v24652_v14 = vld [vmem:[%s28452_s3 + $0x630] sm:$0xff]  }
 0x6bb   :  { %21401 = vmatprep.subr.bf16.mxu1 %v24636_v9 }
 0x6bc   :  { %22556 = vmatpush3.bf16.msra.mxu0 %v24635_v39  ;;  %v8351_v39 = vrot.slane %v27655_v50, 3 }
 0x6bd   :  { %21370 = vmatmul.mubr.bf16.gmra.mrb[12].mxu1 %v8051_v55  ;;  %22589 = vmatprep.subr.bf16.mxu0 %v27914_v36  ;;  %v24641_v55 = vld [vmem:[%s28452_s3 + $0x5d8] sm:$0xff]  }
 0x6be   :  { %21373 = vmatprep.mubr.bf16.mxu1 %v8053_v61  ;;  %21402 = vmatpush3.bf16.msra.mxu1 %v24636_v9  ;;  %v15783_v9 = vrot.slane %v27755_v20, 2 }
 0x6bf   :  { %22526 = vmatmul.mubr.bf16.gmra.mrb[80].mxu0 %v15481_v32  ;;  %21403 = vmatprep.subr.bf16.mxu1 %v24637_v31 }
 0x6c0   :  { %22529 = vmatprep.mubr.bf16.mxu0 %v15481_v32  ;;  %v15784_v61 = vsel %vm1840_vm2, %v15781_v8, %v15783_v9  ;;  %v15786_v12 = vsel %vm1840_vm2, %v15783_v9, %v15785_v40  ;;  %v8363_v8 = vrot.slane %v27706_v54, 3  ;;  %v8369_v9 = vrot.slane %v27715_v34, 3 }
 0x6c2   :  { %21404 = vmatpush3.bf16.msra.mxu1 %v24637_v31  ;;  %v8350_v31 = vsel %vm2152_vm3, %v8347_v37, %v8349_v46 }
 0x6c3   :  { %21437 = vmatprep.subr.bf16.mxu1 %v27925_v33 }
 0x6c5   :  { %21374 = vmatmul.mubr.bf16.gmra.mrb[16].mxu1 %v8055_v3  ;;  %v8353_v3 = vrot.slane %v27658_v48, 3 }
 0x6c6   :  { %21377 = vmatprep.mubr.bf16.mxu1 %v8057_v49  ;;  %v8355_v49 = vrot.slane %v27675_v57, 3 }
 0x6c7   :  { %22530 = vmatmul.mubr.bf16.gmra.mrb[84].mxu0 %v15481_v32 }
 0x6c8   :  { %22533 = vmatprep.mubr.bf16.mxu0 %v15481_v32  ;;  %v8356_v47 = vsel %vm2152_vm3, %v8353_v3, %v8355_v49 }
 0x6cd   :  { %21378 = vmatmul.mubr.bf16.gmra.mrb[20].mxu1 %v8059_v26  ;;  %v24647_v26 = vld [vmem:[%s28452_s3 + $0x618] sm:$0xff]  }
 0x6ce   :  { %21381 = vmatprep.mubr.bf16.mxu1 %v8061_v44  ;;  %v8354_v44 = vsel %vm2152_vm3, %v8351_v39, %v8353_v3  ;;  %v16087_v3 = vrot.slane %v27733_v21, 3 }
 0x6cf   :  { %22534 = vmatmul.mubr.bf16.gmra.mrb[88].mxu0 %v15481_v32 }
 0x6d0   :  { %22537 = vmatprep.mubr.bf16.mxu0 %v15481_v32  ;;  %v24639_v32 = vld [vmem:[%s28452_s3 + $0x5c8] sm:$0xff]  }
 0x6d5   :  { %21382 = vmatmul.mubr.bf16.gmra.mrb[24].mxu1 %v8063_v56  ;;  %v8359_v56 = vrot.slane %v27696_v24, 3 }
 0x6d6   :  { %21385 = vmatprep.mubr.bf16.mxu1 %v8065_v2  ;;  %v28000_v2 = vld [vmem:[#allocation2 + $0x100] sm:$0xff] }
 0x6d7   :  { %22538 = vmatmul.mubr.bf16.gmra.mrb[92].mxu0 %v15498_v52  ;;  %v24648_v52 = vld [vmem:[%s28452_s3 + $0x5f0] sm:$0xff]   ;;  %v15791_v25 = vrot.slane %v28000_v2, 2  ;;  %v8360_v43 = vsel %vm2152_vm3, %v8357_v45, %v8359_v56 }
 0x6d8   :  { %22557 = vmatprep.mubr.bf16.mxu0 %v15778_v63  ;;  %v8358_v63 = vsel %vm2152_vm3, %v8355_v49, %v8357_v45  ;;  %v16091_v45 = vrot.slane %v27752_v53, 3 }
 0x6d9   :  { %v15792_v37 = vsel %vm1840_vm2, %v15789_v6, %v15791_v25 }
 0x6dd   :  { %21386 = vmatmul.mubr.bf16.gmra.mrb[28].mxu1 %v8067_v30  ;;  %v24654_v30 = vld [vmem:[%s28452_s3 + $0x600] sm:$0xff]  }
 0x6de   :  { %21405 = vmatprep.mubr.bf16.mxu1 %v8348_v13  ;;  %v24653_v13 = vld [vmem:[%s28452_s3 + $0x638] sm:$0xff]  }
 0x6df   :  { %22558 = vmatmul.mubr.bf16.vlgmr.msra.gmra.mrb[64].mxu0 %v15780_v59  ;;  %v8364_v59 = vsel %vm2152_vm3, %v8361_v28, %v8363_v8 }
 0x6e0   :  { %22590 = vmatpush3.bf16.msra.mxu0 %v27914_v36  ;;  %22561 = vmatprep.mubr.bf16.mxu0 %v15782_v29  ;;  %v8352_v36 = vsel %vm2152_vm3, %v8349_v46, %v8351_v39  ;;  %v8365_v29 = vrot.slane %v27709_v15, 3  ;;  %v8367_v46 = vrot.slane %v27712_v7, 3 }
 0x6e1   :  { %22591 = vmatprep.subr.bf16.mxu0 %v24639_v32 }
 0x6e2   :  { %v8366_v39 = vsel %vm2152_vm3, %v8363_v8, %v8365_v29 }
 0x6e4   :  { %22592 = vmatpush3.bf16.msra.mxu0 %v24639_v32  ;;  %v8362_v32 = vsel %vm2152_vm3, %v8359_v56, %v8361_v28 }
 0x6e5   :  { %21406 = vmatmul.mubr.bf16.vlgmr.msra.gmra.mrb[0].mxu1 %v8350_v31  ;;  %22593 = vmatprep.subr.bf16.mxu0 %v24640_v41 }
 0x6e6   :  { %21409 = vmatprep.mubr.bf16.mxu1 %v8352_v36  ;;  %21438 = vmatpush3.bf16.msra.mxu1 %v27925_v33  ;;  %v15787_v33 = vrot.slane %v27777_v23, 2  ;;  %v15757_v36 = vld [vmem:[#allocation3 + $0x140] sm:$0x3] }
 0x6e7   :  { %22562 = vmatmul.mubr.bf16.gmra.mrb[68].mxu0 %v15784_v61  ;;  %21439 = vmatprep.subr.bf16.mxu1 %v24644_v19  ;;  %v15807_v61 = vrot.slane %v15757_v36, 2  ;;  %v16101_v36 = vrot.slane %v28000_v2, 3 }
 0x6e8   :  { %22565 = vmatprep.mubr.bf16.mxu0 %v15786_v12  ;;  %22594 = vmatpush3.bf16.msra.mxu0 %v24640_v41  ;;  %v15788_v42 = vsel %vm1840_vm2, %v15785_v40, %v15787_v33  ;;  %v15790_v11 = vsel %vm1840_vm2, %v15787_v33, %v15789_v6  ;;  %v8368_v41 = vsel %vm2152_vm3, %v8365_v29, %v8367_v46  ;;  %v8371_v40 = vrot.slane %v27718_v5, 3  ;;  %v8326_v6 = vld [vmem:[#allocation3 + $0xc0] sm:$0x7] }
 0x6e9   :  { %22595 = vmatprep.subr.bf16.mxu0 %v24641_v55  ;;  %v8375_v12 = vrot.slane %v27726_v16, 3  ;;  %v16097_v29 = vrot.slane %v27777_v23, 3 }
 0x6ea   :  { %21440 = vmatpush3.bf16.msra.mxu1 %v24644_v19  ;;  %v8370_v19 = vsel %vm2152_vm3, %v8367_v46, %v8369_v9  ;;  %v8372_v31 = vsel %vm2152_vm3, %v8369_v9, %v8371_v40  ;;  %v16099_v46 = vrot.slane %v27796_v27, 3 }
 0x6eb   :  { %21441 = vmatprep.subr.bf16.mxu1 %v24646_v17 }
 0x6ec   :  { %22596 = vmatpush3.bf16.msra.mxu0 %v24641_v55  ;;  %v8373_v55 = vrot.slane %v27722_v62, 3  ;;  %v16100_v9 = vsel %vm2152_vm3, %v16097_v29, %v16099_v46 }
 0x6ed   :  { %21410 = vmatmul.mubr.bf16.gmra.mrb[4].mxu1 %v8354_v44  ;;  %22597 = vmatprep.subr.bf16.mxu0 %v24643_v58 }
 0x6ee   :  { %21413 = vmatprep.mubr.bf16.mxu1 %v8356_v47  ;;  %21442 = vmatpush3.bf16.msra.mxu1 %v24646_v17  ;;  %v16066_v17 = vld [vmem:[#allocation3 + $0xc0] sm:$0xf8]  ;;  %v8374_v49 = vsel %vm2152_vm3, %v8371_v40, %v8373_v55  ;;  %v8376_v33 = vsel %vm2152_vm3, %v8373_v55, %v8375_v12  ;;  %v8377_v47 = vrot.slane %v8326_v6, 3  ;;  %v8668_v40 = vrot.slane %v27678_v60, 4  ;;  %v24661_v60 = vld [vmem:[%s28452_s3 + $0x638] sm:$0xff]  }
 0x6ef   :  { %22566 = vmatmul.mubr.bf16.gmra.mrb[72].mxu0 %v15788_v42  ;;  %21443 = vmatprep.subr.bf16.mxu1 %v24647_v26  ;;  %v8658_v42 = vrot.slane %v27634_v10, 4 }
 0x6f0   :  { %22569 = vmatprep.mubr.bf16.mxu0 %v15790_v11  ;;  %22598 = vmatpush3.bf16.msra.mxu0 %v24643_v58  ;;  %v15808_v58 = vsel %vm1840_vm2, %v15791_v25, %v15807_v61  ;;  %v16089_v11 = vrot.slane %v27736_v1, 3  ;;  %v8378_v56 = vsel %vm2152_vm3, %v8375_v12, %v8377_v47  ;;  %v8672_v12 = vrot.slane %v27699_v0, 4  ;;  %v16067_v47 = vld [vmem:[#allocation3 + $0x140] sm:$0x7] }
 0x6f1   :  { %22599 = vmatprep.subr.bf16.mxu0 %v24645_v22 }
 0x6f2   :  { %21444 = vmatpush3.bf16.msra.mxu1 %v24647_v26  ;;  %v16086_v26 = vrot.slane %v16066_v17, 3  ;;  %v16092_v10 = vsel %vm2152_vm3, %v16089_v11, %v16091_v45  ;;  %v8674_v17 = vrot.slane %v27706_v54, 4  ;;  %v8680_v54 = vrot.slane %v27715_v34, 4 }
 0x6f3   :  { %21445 = vmatprep.subr.bf16.mxu1 %v24649_v35  ;;  %v16397_v34 = vrot.slane %v27733_v21, 4 }
 0x6f4   :  { %22600 = vmatpush3.bf16.msra.mxu0 %v24645_v22  ;;  %v16088_v44 = vsel %vm2152_vm3, %v16086_v26, %v16087_v3  ;;  %v8636_v22 = vld [vmem:[#allocation3 + $0x40] sm:$0xf0]  ;;  %v8682_v26 = vrot.slane %v27718_v5, 4 }
 0x6f5   :  { %21414 = vmatmul.mubr.bf16.gmra.mrb[8].mxu1 %v8358_v63  ;;  %22601 = vmatprep.subr.bf16.mxu0 %v24648_v52  ;;  %v8660_v63 = vrot.slane %v27637_v38, 4  ;;  %v24657_v38 = vld [vmem:[%s28452_s3 + $0x618] sm:$0xff]  }
 0x6f6   :  { %21417 = vmatprep.mubr.bf16.mxu1 %v8360_v43  ;;  %21446 = vmatpush3.bf16.msra.mxu1 %v24649_v35  ;;  %v8657_v35 = vrot.slane %v8636_v22, 4  ;;  %v8662_v43 = vrot.slane %v27655_v50, 4  ;;  %v16117_v22 = vrot.slane %v16067_v47, 3 }
 0x6f7   :  { %22570 = vmatmul.mubr.bf16.gmra.mrb[76].mxu0 %v15792_v37  ;;  %21447 = vmatprep.subr.bf16.mxu1 %v24650_v18  ;;  %v16093_v37 = vrot.slane %v27755_v20, 3  ;;  %v8661_v28 = vsel %vm2464_vm4, %v8658_v42, %v8660_v63 }
 0x6f8   :  { %22573 = vmatprep.mubr.bf16.mxu0 %v15791_v25  ;;  %22602 = vmatpush3.bf16.msra.mxu0 %v24648_v52  ;;  %v8659_v52 = vsel %vm2464_vm4, %v8657_v35, %v8658_v42  ;;  %v8663_v8 = vsel %vm2464_vm4, %v8660_v63, %v8662_v43  ;;  %v8686_v42 = vrot.slane %v27726_v16, 4  ;;  %v16118_v5 = vsel %vm2152_vm3, %v16101_v36, %v16117_v22 }
 0x6f9   :  { %22603 = vmatprep.subr.bf16.mxu0 %v24651_v4  ;;  %v16094_v50 = vsel %vm2152_vm3, %v16091_v45, %v16093_v37  ;;  %v16399_v16 = vrot.slane %v27736_v1, 4 }
 0x6fa   :  { %21448 = vmatpush3.bf16.msra.mxu1 %v24650_v18  ;;  %v16090_v18 = vsel %vm2152_vm3, %v16087_v3, %v16089_v11  ;;  %v16376_v11 = vld [vmem:[#allocation3 + $0xc0] sm:$0xf0] }
 0x6fb   :  { %21449 = vmatprep.subr.bf16.mxu1 %v24652_v14 }
 0x6fc   :  { %22604 = vmatpush3.bf16.msra.mxu0 %v24651_v4  ;;  %v24656_v4 = vld [vmem:[%s28452_s3 + $0x610] sm:$0xff]  }
 0x6fd   :  { %21418 = vmatmul.mubr.bf16.gmra.mrb[12].mxu1 %v8362_v32  ;;  %22637 = vmatprep.subr.bf16.mxu0 %v24654_v30  ;;  %v8666_v32 = vrot.slane %v27675_v57, 4 }
 0x6fe   :  { %21421 = vmatprep.mubr.bf16.mxu1 %v8364_v59  ;;  %21450 = vmatpush3.bf16.msra.mxu1 %v24652_v14  ;;  %v16095_v14 = vrot.slane %v27774_v51, 3  ;;  %v24658_v59 = vld [vmem:[%s28452_s3 + $0x620] sm:$0xff]  }
 0x6ff   :  { %22574 = vmatmul.mubr.bf16.gmra.mrb[80].mxu0 %v15791_v25  ;;  %21451 = vmatprep.subr.bf16.mxu1 %v24653_v13  ;;  %v8669_v55 = vsel %vm2464_vm4, %v8666_v32, %v8668_v40 }
 0x700   :  { %22577 = vmatprep.mubr.bf16.mxu0 %v15791_v25  ;;  %v16098_v57 = vsel %vm2152_vm3, %v16095_v14, %v16097_v29 }
 0x702   :  { %21452 = vmatpush3.bf16.msra.mxu1 %v24653_v13  ;;  %v8664_v13 = vrot.slane %v27658_v48, 4  ;;  %v24659_v48 = vld [vmem:[%s28452_s3 + $0x628] sm:$0xff]  }
 0x705   :  { %21422 = vmatmul.mubr.bf16.gmra.mrb[16].mxu1 %v8366_v39  ;;  %v8665_v39 = vsel %vm2464_vm4, %v8662_v43, %v8664_v13  ;;  %v16403_v43 = vrot.slane %v27755_v20, 4  ;;  %v16411_v20 = vrot.slane %v28000_v2, 4 }
 0x706   :  { %21425 = vmatprep.mubr.bf16.mxu1 %v8368_v41  ;;  %v8667_v41 = vsel %vm2464_vm4, %v8664_v13, %v8666_v32 }
 0x707   :  { %22578 = vmatmul.mubr.bf16.gmra.mrb[84].mxu0 %v15791_v25 }
 0x708   :  { %22581 = vmatprep.mubr.bf16.mxu0 %v15791_v25 }
 0x70d   :  { %21426 = vmatmul.mubr.bf16.gmra.mrb[20].mxu1 %v8370_v19  ;;  %v8670_v19 = vrot.slane %v27696_v24, 4  ;;  %v16102_v24 = vsel %vm2152_vm3, %v16099_v46, %v16101_v36 }
 0x70e   :  { %21429 = vmatprep.mubr.bf16.mxu1 %v8372_v31  ;;  %v24660_v31 = vld [vmem:[%s28452_s3 + $0x630] sm:$0xff]  }
 0x70f   :  { %22582 = vmatmul.mubr.bf16.gmra.mrb[88].mxu0 %v15791_v25  ;;  %v8671_v61 = vsel %vm2464_vm4, %v8668_v40, %v8670_v19  ;;  %v8673_v3 = vsel %vm2464_vm4, %v8670_v19, %v8672_v12  ;;  %v28137_v40 = vld [vmem:[%s28455_s5] sm:$0xff] }
 0x710   :  { %22585 = vmatprep.mubr.bf16.mxu0 %v15791_v25  ;;  %v24655_v25 = vld [vmem:[%s28452_s3 + $0x608] sm:$0xff]  }
 0x715   :  { %21430 = vmatmul.mubr.bf16.gmra.mrb[24].mxu1 %v8374_v49  ;;  %v8675_v49 = vsel %vm2464_vm4, %v8672_v12, %v8674_v17 }
 0x716   :  { %21433 = vmatprep.mubr.bf16.mxu1 %v8376_v33  ;;  %v8678_v33 = vrot.slane %v27712_v7, 4  ;;  %v8684_v7 = vrot.slane %v27722_v62, 4 }
 0x717   :  { %22586 = vmatmul.mubr.bf16.gmra.mrb[92].mxu0 %v15808_v58  ;;  %v8676_v58 = vrot.slane %v27709_v15, 4  ;;  %v8683_v15 = vsel %vm2464_vm4, %v8680_v54, %v8682_v26 }
 0x718   :  { %22605 = vmatprep.mubr.bf16.mxu0 %v16088_v44  ;;  %v8681_v44 = vsel %vm2464_vm4, %v8678_v33, %v8680_v54  ;;  %v8685_v35 = vsel %vm2464_vm4, %v8682_v26, %v8684_v7  ;;  %v8687_v45 = vsel %vm2464_vm4, %v8684_v7, %v8686_v42 }
 0x719   :  { %v8677_v0 = vsel %vm2464_vm4, %v8674_v17, %v8676_v58  ;;  %v8679_v6 = vsel %vm2464_vm4, %v8676_v58, %v8678_v33 }
 0x71d   :  { %21434 = vmatmul.mubr.bf16.gmra.mrb[28].mxu1 %v8378_v56  ;;  %v8637_v56 = vld [vmem:[#allocation3 + $0xc0] sm:$0xf] }
 0x71e   :  { %21453 = vmatprep.mubr.bf16.mxu1 %v8659_v52  ;;  %v16396_v52 = vrot.slane %v16376_v11, 4 }
 0x71f   :  { %22606 = vmatmul.mubr.bf16.vlgmr.msra.gmra.mrb[64].mxu0 %v16090_v18  ;;  %v16401_v18 = vrot.slane %v27752_v53, 4  ;;  %v16407_v53 = vrot.slane %v27777_v23, 4 }
 0x720   :  { %22638 = vmatpush3.bf16.msra.mxu0 %v24654_v30  ;;  %22609 = vmatprep.mubr.bf16.mxu0 %v16092_v10  ;;  %v16096_v30 = vsel %vm2152_vm3, %v16093_v37, %v16095_v14  ;;  %v16398_v62 = vsel %vm2464_vm4, %v16396_v52, %v16397_v34  ;;  %v16400_v10 = vsel %vm2464_vm4, %v16397_v34, %v16399_v16  ;;  %v16409_v14 = vrot.slane %v27796_v27, 4 }
 0x721   :  { %22639 = vmatprep.subr.bf16.mxu0 %v24655_v25  ;;  %v16402_v63 = vsel %vm2464_vm4, %v16399_v16, %v16401_v18  ;;  %v16404_v37 = vsel %vm2464_vm4, %v16401_v18, %v16403_v43 }
 0x724   :  { %22640 = vmatpush3.bf16.msra.mxu0 %v24655_v25  ;;  %v8688_v25 = vrot.slane %v8637_v56, 4 }
 0x725   :  { %21454 = vmatmul.mubr.bf16.vlgmr.msra.gmra.mrb[0].mxu1 %v8661_v28  ;;  %22641 = vmatprep.subr.bf16.mxu0 %v24656_v4 }
 0x726   :  { %21457 = vmatprep.mubr.bf16.mxu1 %v8663_v8  ;;  %v8689_v21 = vsel %vm2464_vm4, %v8686_v42, %v8688_v25  ;;  %v16410_v8 = vsel %vm2464_vm4, %v16407_v53, %v16409_v14 }
 0x727   :  { %22610 = vmatmul.mubr.bf16.gmra.mrb[68].mxu0 %v16094_v50  ;;  %v28128_v50 = vld [vmem:[%s28454_s4] ss:$0 sm:$0xff] }
 0x728   :  { %22613 = vmatprep.mubr.bf16.mxu0 %v16096_v30  ;;  %22642 = vmatpush3.bf16.msra.mxu0 %v24656_v4  ;;  %v16405_v4 = vrot.slane %v27774_v51, 4  ;;  %v16412_v51 = vsel %vm2464_vm4, %v16409_v14, %v16411_v20 }
 0x729   :  { %22643 = vmatprep.subr.bf16.mxu0 %v24657_v38 }
 0x72a   :  { %v16406_v1 = vsel %vm2464_vm4, %v16403_v43, %v16405_v4  ;;  %v16408_v28 = vsel %vm2464_vm4, %v16405_v4, %v16407_v53 }
 0x72c   :  { %22644 = vmatpush3.bf16.msra.mxu0 %v24657_v38  ;;  %v16377_v38 = vld [vmem:[#allocation3 + $0x140] sm:$0xf] }
 0x72d   :  { %21458 = vmatmul.mubr.bf16.gmra.mrb[4].mxu1 %v8665_v39  ;;  %22645 = vmatprep.subr.bf16.mxu0 %v24658_v59  ;;  %v16427_v23 = vrot.slane %v16377_v38, 4 }
 0x72e   :  { %21461 = vmatprep.mubr.bf16.mxu1 %v8667_v41 }
 0x72f   :  { %22614 = vmatmul.mubr.bf16.gmra.mrb[72].mxu0 %v16098_v57  ;;  %v16428_v27 = vsel %vm2464_vm4, %v16411_v20, %v16427_v23 }
 0x730   :  { %22617 = vmatprep.mubr.bf16.mxu0 %v16100_v9  ;;  %22646 = vmatpush3.bf16.msra.mxu0 %v24658_v59 }
 0x731   :  { %22647 = vmatprep.subr.bf16.mxu0 %v24659_v48 }
 0x734   :  { %22648 = vmatpush3.bf16.msra.mxu0 %v24659_v48 }
 0x735   :  { %21462 = vmatmul.mubr.bf16.gmra.mrb[8].mxu1 %v8669_v55  ;;  %22649 = vmatprep.subr.bf16.mxu0 %v24660_v31 }
 0x736   :  { %21465 = vmatprep.mubr.bf16.mxu1 %v8671_v61 }
 0x737   :  { %22618 = vmatmul.mubr.bf16.gmra.mrb[76].mxu0 %v16102_v24 }
 0x738   :  { %22621 = vmatprep.mubr.bf16.mxu0 %v16101_v36  ;;  %22650 = vmatpush3.bf16.msra.mxu0 %v24660_v31  ;;  %v18839_v31 = vcombine.high %v28137_v40, %v28137_v40 }
 0x739   :  { %22651 = vmatprep.subr.bf16.mxu0 %v24661_v60 }
 0x73c   :  { %22652 = vmatpush3.bf16.msra.mxu0 %v24661_v60 }
 0x73d   :  { %21466 = vmatmul.mubr.bf16.gmra.mrb[12].mxu1 %v8673_v3 }
 0x73e   :  { %21469 = vmatprep.mubr.bf16.mxu1 %v8675_v49 }
 0x73f   :  { %22622 = vmatmul.mubr.bf16.gmra.mrb[80].mxu0 %v16101_v36 }
 0x740   :  { %22625 = vmatprep.mubr.bf16.mxu0 %v16101_v36 }
 0x745   :  { %21470 = vmatmul.mubr.bf16.gmra.mrb[16].mxu1 %v8677_v0 }
 0x746   :  { %21473 = vmatprep.mubr.bf16.mxu1 %v8679_v6 }
 0x747   :  { %22626 = vmatmul.mubr.bf16.gmra.mrb[84].mxu0 %v16101_v36 }
 0x748   :  { %22629 = vmatprep.mubr.bf16.mxu0 %v16101_v36 }
 0x74d   :  { %21474 = vmatmul.mubr.bf16.gmra.mrb[20].mxu1 %v8681_v44 }
 0x74e   :  { %21477 = vmatprep.mubr.bf16.mxu1 %v8683_v15 }
 0x74f   :  { %22630 = vmatmul.mubr.bf16.gmra.mrb[88].mxu0 %v16101_v36 }
 0x750   :  { %22633 = vmatprep.mubr.bf16.mxu0 %v16101_v36 }
 0x755   :  { %21478 = vmatmul.mubr.bf16.gmra.mrb[24].mxu1 %v8685_v35 }
 0x756   :  { %21481 = vmatprep.mubr.bf16.mxu1 %v8687_v45 }
 0x757   :  { %22634 = vmatmul.mubr.bf16.gmra.mrb[92].mxu0 %v16118_v5 }
 0x758   :  { %22653 = vmatprep.mubr.bf16.mxu0 %v16398_v62 }
 0x75d   :  { %21482 = vmatmul.mubr.bf16.gmra.mrb[28].mxu1 %v8689_v21 }
 0x75e   :  { %17205 = vmatprep.mubr.bf16.mxu1 %v18839_v31 }
 0x75f   :  { %22654 = vmatmul.mubr.bf16.vlgmr.msra.gmra.mrb[64].mxu0 %v16400_v10 }
 0x760   :  { %22657 = vmatprep.mubr.bf16.mxu0 %v16402_v63 }
 0x767   :  { %22658 = vmatmul.mubr.bf16.gmra.mrb[68].mxu0 %v16404_v37 }
 0x768   :  { %22661 = vmatprep.mubr.bf16.mxu0 %v16406_v1 }
 0x76f   :  { %22662 = vmatmul.mubr.bf16.gmra.mrb[72].mxu0 %v16408_v28 }
 0x770   :  { %22665 = vmatprep.mubr.bf16.mxu0 %v16410_v8 }
 0x777   :  { %22666 = vmatmul.mubr.bf16.gmra.mrb[76].mxu0 %v16412_v51 }
 0x778   :  { %22669 = vmatprep.mubr.bf16.mxu0 %v16411_v20 }
 0x77f   :  { %22670 = vmatmul.mubr.bf16.gmra.mrb[80].mxu0 %v16411_v20 }
 0x780   :  { %22673 = vmatprep.mubr.bf16.mxu0 %v16411_v20 }
 0x787   :  { %22674 = vmatmul.mubr.bf16.gmra.mrb[84].mxu0 %v16411_v20 }
 0x788   :  { %22677 = vmatprep.mubr.bf16.mxu0 %v16411_v20 }
 0x78f   :  { %22678 = vmatmul.mubr.bf16.gmra.mrb[88].mxu0 %v16411_v20 }
 0x790   :  { %22681 = vmatprep.mubr.bf16.mxu0 %v16411_v20 }
 0x797   :  { %22682 = vmatmul.mubr.bf16.gmra.mrb[92].mxu0 %v16428_v27 }
 0x7f8   :  { %v21455_v2 = vpop.f32.mrb[0].mxu1 }
 0x7f9   :  { %v8956_v30 = vadd.f32 %v21455_v2, %v28128_v50  ;;  %v8788_v13 = vpop.f32.mrb[1].mxu1 }
 0x7fa   :  { %v8954_v32 = vadd.f32 %v28128_v50, %v8788_v13  ;;  %v21456_v59 = vpop.f32.mrb[2].mxu1 }
 0x7fb   :  { %v8957_v29 = vadd.f32 %v21456_v59, %v28128_v50  ;;  %v8791_v46 = vpop.f32.mrb[3].mxu1  ;;  %v8988_v41 = vmax.f32 %v8956_v30, 0.0 }
 0x7fc   :  { %v8955_v39 = vadd.f32 %v28128_v50, %v8791_v46  ;;  %v8986_v57 = vmax.f32 %v8954_v32, 0.0 }
 0x7fd   :  { %v8989_v48 = vmax.f32 %v8957_v29, 0.0 }
 0x7fe   :  { %v8987_v9 = vmax.f32 %v8955_v39, 0.0 }
 0x7ff   :  { %v9019_v19 = vpack.c.bf16 %v8989_v48, %v8988_v41 }
 0x800   :  { %v9018_v36 = vpack.c.bf16 %v8987_v9, %v8986_v57  ;;  %v21459_v55 = vpop.f32.mrb[4].mxu1 }
 0x801   :  { %v8960_v61 = vadd.f32 %v21459_v55, %v28128_v50  ;;  %v8804_v60 = vpop.f32.mrb[5].mxu1  ;;  %v16857_v42 = vrot.slane %v9019_v19, 1 }
 0x802   :  { %9034 = vst [vmem:[#allocation2] sm:$0xff] %v9018_v36  ;;  %v8958_v24 = vadd.f32 %v28128_v50, %v8804_v60  ;;  %v21460_v12 = vpop.f32.mrb[6].mxu1 }
 0x803   :  { %v8961_v17 = vadd.f32 %v21460_v12, %v28128_v50  ;;  %v8807_v3 = vpop.f32.mrb[7].mxu1  ;;  %v8992_v58 = vmax.f32 %v8960_v61, 0.0 }
 0x804   :  { %v8959_v49 = vadd.f32 %v28128_v50, %v8807_v3  ;;  %v8990_v0 = vmax.f32 %v8958_v24, 0.0 }
 0x805   :  { %v8993_v33 = vmax.f32 %v8961_v17, 0.0 }
 0x806   :  { %v8991_v6 = vmax.f32 %v8959_v49, 0.0 }
 0x807   :  { %v28145_v54 = vpack.c.bf16 %v8993_v33, %v8992_v58 }
 0x808   :  { %v9020_v26 = vpack.c.bf16 %v8991_v6, %v8990_v0  ;;  %v21463_v44 = vpop.f32.mrb[8].mxu1 }
 0x809   :  { %v16821_v15 = vld [vmem:[#allocation2] sm:$0xfe]  ;;  %v16861_v47 = vrot.slane %v28145_v54, 1  ;;  %v8964_v7 = vadd.f32 %v21463_v44, %v28128_v50  ;;  %v8820_v22 = vpop.f32.mrb[9].mxu1 }
 0x80a   :  { %v16856_v11 = vrot.slane %v16821_v15, 1  ;;  %9036 = vst [vmem:[#allocation2 + $0x10] sm:$0xff] %v9020_v26  ;;  %v16859_v34 = vrot.slane %v9020_v26, 1  ;;  %v8962_v35 = vadd.f32 %v28128_v50, %v8820_v22  ;;  %v21464_v5 = vpop.f32.mrb[10].mxu1 }
 0x80b   :  { %v8965_v45 = vadd.f32 %v21464_v5, %v28128_v50  ;;  %v8823_v56 = vpop.f32.mrb[11].mxu1  ;;  %v8996_v25 = vmax.f32 %v8964_v7, 0.0 }
 0x80c   :  { %v16858_v52 = vsel %vm1351_vm1, %v16856_v11, %v16857_v42  ;;  %v16862_v62 = vsel %vm1351_vm1, %v16859_v34, %v16861_v47  ;;  %v8963_v16 = vadd.f32 %v28128_v50, %v8823_v56  ;;  %v16860_v63 = vsel %vm1351_vm1, %v16857_v42, %v16859_v34 }
 0x80d   :  { %v16953_v18 = vmax.bf16 %v16858_v52, %v9018_v36  ;;  %v16955_v21 = vmax.bf16 %v16862_v62, %v9020_v26  ;;  %v8997_v10 = vmax.f32 %v8965_v45, 0.0  ;;  %v8994_v43 = vmax.f32 %v8962_v35, 0.0 }
 0x80e   :  { %v8995_v4 = vmax.f32 %v8963_v16, 0.0  ;;  %v16954_v37 = vmax.bf16 %v16860_v63, %v9019_v19 }
 0x80f   :  { %v16987_v1 = vmax.bf16 %v16953_v18, %v9020_v26  ;;  %v9023_v53 = vpack.c.bf16 %v8997_v10, %v8996_v25 }
 0x810   :  { %v9022_v14 = vpack.c.bf16 %v8995_v4, %v8994_v43  ;;  %v21467_v28 = vpop.f32.mrb[12].mxu1  ;;  %v28156_v8 = vmax.bf16 %v16954_v37, %v28145_v54 }
 0x811   :  { %v17019_v20 = vld [vmem:[#allocation2 + $0x10] sm:$0xfe]  ;;  %v16865_v51 = vrot.slane %v9023_v53, 1  ;;  %v8968_v38 = vadd.f32 %v21467_v28, %v28128_v50  ;;  %v8836_v23 = vpop.f32.mrb[13].mxu1 }
 0x812   :  { %v17025_v27 = vrot.slane %v17019_v20, 1  ;;  %v16863_v2 = vrot.slane %v9022_v14, 1  ;;  %v16989_v30 = vmax.bf16 %v16955_v21, %v9022_v14  ;;  %v8966_v13 = vadd.f32 %v28128_v50, %v8836_v23  ;;  %v21468_v32 = vpop.f32.mrb[14].mxu1 }
 0x813   :  { %v8969_v59 = vadd.f32 %v21468_v32, %v28128_v50  ;;  %v8839_v29 = vpop.f32.mrb[15].mxu1  ;;  %v9000_v41 = vmax.f32 %v8968_v38, 0.0 }
 0x814   :  { %v17026_v46 = vsel %vm1351_vm1, %v17025_v27, %v16861_v47  ;;  %v16866_v39 = vsel %vm1351_vm1, %v16863_v2, %v16865_v51  ;;  %v8967_v48 = vadd.f32 %v28128_v50, %v8839_v29  ;;  %v8998_v36 = vmax.f32 %v8966_v13, 0.0 }
 0x815   :  { %v28164_v57 = vmax.bf16 %v17026_v46, %v16987_v1  ;;  %v16957_v9 = vmax.bf16 %v16866_v39, %v9022_v14  ;;  %v28166_v19 = vmax.bf16 %v16989_v30, %v16866_v39  ;;  %v9001_v31 = vmax.f32 %v8969_v59, 0.0 }
 0x816   :  { %v8999_v55 = vmax.f32 %v8967_v48, 0.0  ;;  %v28169_v61 = vsel %vm1351_vm1, %v16861_v47, %v16863_v2 }
 0x817   :  { %17069 = vst [vmem:[#allocation3] sm:$0xff] %v28164_v57  ;;  %17071 = vst [vmem:[#allocation3 + $0x10] sm:$0xff] %v28166_v19  ;;  %v9025_v60 = vpack.c.bf16 %v9001_v31, %v9000_v41  ;;  %v16956_v24 = vmax.bf16 %v28169_v61, %v28145_v54  ;;  %v17038_v12 = vmax.bf16 %v28156_v8, %v28169_v61 }
 0x818   :  { %v9024_v17 = vpack.c.bf16 %v8999_v55, %v8998_v36  ;;  %v21471_v3 = vpop.f32.mrb[16].mxu1 }
 0x819   :  { %v16869_v49 = vrot.slane %v9025_v60, 1  ;;  %v8972_v58 = vadd.f32 %v21471_v3, %v28128_v50  ;;  %v8852_v33 = vpop.f32.mrb[17].mxu1  ;;  %v16990_v0 = vmax.bf16 %v16956_v24, %v9023_v53 }
 0x81a   :  { %v16867_v6 = vrot.slane %v9024_v17, 1  ;;  %v16991_v26 = vmax.bf16 %v16957_v9, %v9024_v17  ;;  %v8970_v44 = vadd.f32 %v28128_v50, %v8852_v33  ;;  %v21472_v15 = vpop.f32.mrb[18].mxu1 }
 0x81b   :  { %v8973_v47 = vadd.f32 %v21472_v15, %v28128_v50  ;;  %v8855_v7 = vpop.f32.mrb[19].mxu1  ;;  %v9004_v42 = vmax.f32 %v8972_v58, 0.0 }
 0x81c   :  { %v16868_v54 = vsel %vm1351_vm1, %v16865_v51, %v16867_v6  ;;  %v16870_v22 = vsel %vm1351_vm1, %v16867_v6, %v16869_v49  ;;  %v8971_v11 = vadd.f32 %v28128_v50, %v8855_v7  ;;  %v9002_v56 = vmax.f32 %v8970_v44, 0.0 }
 0x81d   :  { %v16958_v34 = vmax.bf16 %v16868_v54, %v9023_v53  ;;  %v16959_v35 = vmax.bf16 %v16870_v22, %v9024_v17  ;;  %v28183_v5 = vmax.bf16 %v16991_v26, %v16870_v22  ;;  %v9005_v45 = vmax.f32 %v8973_v47, 0.0 }
 0x81e   :  { %v9003_v52 = vmax.f32 %v8971_v11, 0.0  ;;  %v28185_v62 = vmax.bf16 %v16990_v0, %v16868_v54 }
 0x81f   :  { %17073 = vst [vmem:[#allocation3 + $0x20] sm:$0xff] %v28183_v5  ;;  %v9027_v25 = vpack.c.bf16 %v9005_v45, %v9004_v42  ;;  %v16992_v16 = vmax.bf16 %v16958_v34, %v9025_v60 }
 0x820   :  { %v9026_v18 = vpack.c.bf16 %v9003_v52, %v9002_v56  ;;  %v21475_v21 = vpop.f32.mrb[20].mxu1  ;;  %17072 = vst [vmem:[#allocation3 + $0x18] sm:$0xff] %v28185_v62 }
 0x821   :  { %v16873_v10 = vrot.slane %v9027_v25, 1  ;;  %v8868_v63 = vpop.f32.mrb[21].mxu1  ;;  %v8976_v37 = vadd.f32 %v21475_v21, %v28128_v50 }
 0x822   :  { %v16871_v43 = vrot.slane %v9026_v18, 1  ;;  %v16993_v4 = vmax.bf16 %v16959_v35, %v9026_v18  ;;  %v8974_v1 = vadd.f32 %v28128_v50, %v8868_v63  ;;  %v21476_v53 = vpop.f32.mrb[22].mxu1 }
 0x823   :  { %v8977_v14 = vadd.f32 %v21476_v53, %v28128_v50  ;;  %v8871_v28 = vpop.f32.mrb[23].mxu1  ;;  %v9008_v13 = vmax.f32 %v8976_v37, 0.0 }
 0x824   :  { %v16872_v20 = vsel %vm1351_vm1, %v16869_v49, %v16871_v43  ;;  %v16874_v51 = vsel %vm1351_vm1, %v16871_v43, %v16873_v10  ;;  %v8975_v38 = vadd.f32 %v28128_v50, %v8871_v28  ;;  %v9006_v32 = vmax.f32 %v8974_v1, 0.0 }
 0x825   :  { %v16960_v23 = vmax.bf16 %v16872_v20, %v9025_v60  ;;  %v16961_v27 = vmax.bf16 %v16874_v51, %v9026_v18  ;;  %v28195_v2 = vmax.bf16 %v16992_v16, %v16872_v20  ;;  %v28197_v30 = vmax.bf16 %v16993_v4, %v16874_v51 }
 0x826   :  { %v9009_v59 = vmax.f32 %v8977_v14, 0.0  ;;  %v9007_v29 = vmax.f32 %v8975_v38, 0.0 }
 0x827   :  { %17074 = vst [vmem:[#allocation3 + $0x28] sm:$0xff] %v28195_v2  ;;  %17075 = vst [vmem:[#allocation3 + $0x30] sm:$0xff] %v28197_v30  ;;  %v16994_v46 = vmax.bf16 %v16960_v23, %v9027_v25 }
 0x828   :  { %v9029_v39 = vpack.c.bf16 %v9009_v59, %v9008_v13  ;;  %v9028_v41 = vpack.c.bf16 %v9007_v29, %v9006_v32  ;;  %v21479_v48 = vpop.f32.mrb[24].mxu1 }
 0x829   :  { %v8980_v9 = vadd.f32 %v21479_v48, %v28128_v50  ;;  %v8884_v31 = vpop.f32.mrb[25].mxu1 }
 0x82a   :  { %v16877_v36 = vrot.slane %v9029_v39, 1  ;;  %v16875_v55 = vrot.slane %v9028_v41, 1  ;;  %v16995_v60 = vmax.bf16 %v16961_v27, %v9028_v41  ;;  %v8978_v24 = vadd.f32 %v28128_v50, %v8884_v31  ;;  %v21480_v17 = vpop.f32.mrb[26].mxu1 }
 0x82b   :  { %v8981_v3 = vadd.f32 %v21480_v17, %v28128_v50  ;;  %v8887_v49 = vpop.f32.mrb[27].mxu1  ;;  %v9012_v47 = vmax.f32 %v8980_v9, 0.0 }
 0x82c   :  { %v16876_v58 = vsel %vm1351_vm1, %v16873_v10, %v16875_v55  ;;  %v16878_v33 = vsel %vm1351_vm1, %v16875_v55, %v16877_v36  ;;  %v8979_v0 = vadd.f32 %v28128_v50, %v8887_v49  ;;  %v9010_v7 = vmax.f32 %v8978_v24, 0.0 }
 0x82d   :  { %v16962_v6 = vmax.bf16 %v16876_v58, %v9027_v25  ;;  %v16963_v26 = vmax.bf16 %v16878_v33, %v9028_v41  ;;  %v28207_v44 = vmax.bf16 %v16994_v46, %v16876_v58  ;;  %v17045_v15 = vmax.bf16 %v16995_v60, %v16878_v33 }
 0x82e   :  { %v9013_v54 = vmax.f32 %v8981_v3, 0.0  ;;  %v9011_v22 = vmax.f32 %v8979_v0, 0.0 }
 0x82f   :  { %17076 = vst [vmem:[#allocation3 + $0x38] sm:$0xff] %v28207_v44  ;;  %17077 = vst [vmem:[#allocation3 + $0x40] sm:$0xff] %v17045_v15  ;;  %v16996_v42 = vmax.bf16 %v16962_v6, %v9029_v39  ;;  %20117 = vmatprep.subr.bf16.mxu1 %v17045_v15 }
 0x830   :  { %v28210_v11 = vpack.c.bf16 %v9013_v54, %v9012_v47  ;;  %v9030_v34 = vpack.c.bf16 %v9011_v22, %v9010_v7  ;;  %v21483_v35 = vpop.f32.mrb[28].mxu1  ;;  %20118 = vmatpush3.bf16.msra.mxu1 %v28164_v57 }
 0x831   :  { %v8984_v45 = vadd.f32 %v21483_v35, %v28128_v50  ;;  %v8900_v56 = vpop.f32.mrb[29].mxu1 }
 0x832   :  { %v16881_v52 = vrot.slane %v28210_v11, 1  ;;  %v16879_v25 = vrot.slane %v9030_v34, 1  ;;  %v16997_v16 = vmax.bf16 %v16963_v26, %v9030_v34  ;;  %v8982_v18 = vadd.f32 %v28128_v50, %v8900_v56  ;;  %v21484_v21 = vpop.f32.mrb[30].mxu1  ;;  %v22655_v10 = vpop.f32.mrb[64].mxu0 }
 0x833   :  { %v9016_v63 = vmax.f32 %v8984_v45, 0.0  ;;  %v8985_v43 = vadd.f32 %v21484_v21, %v28128_v50  ;;  %v8903_v4 = vpop.f32.mrb[31].mxu1  ;;  %v16527_v37 = vpop.f32.mrb[65].mxu0  ;;  %v16695_v14 = vadd.f32 %v22655_v10, %v28128_v50 }
 0x834   :  { %v16880_v1 = vsel %vm1351_vm1, %v16877_v36, %v16879_v25  ;;  %v16882_v57 = vsel %vm1351_vm1, %v16879_v25, %v16881_v52  ;;  %v8983_v53 = vadd.f32 %v28128_v50, %v8903_v4  ;;  %v22656_v28 = vpop.f32.mrb[66].mxu0  ;;  %v9014_v13 = vmax.f32 %v8982_v18, 0.0 }
 0x835   :  { %v16964_v20 = vmax.bf16 %v16880_v1, %v9029_v39  ;;  %v16965_v51 = vmax.bf16 %v16882_v57, %v9030_v34  ;;  %v17046_v38 = vmax.bf16 %v16996_v42, %v16880_v1  ;;  %v17047_v23 = vmax.bf16 %v16997_v16, %v16882_v57  ;;  %v16530_v27 = vpop.f32.mrb[67].mxu0 }
 0x836   :  { %v9017_v32 = vmax.f32 %v8985_v43, 0.0  ;;  %v9015_v59 = vmax.f32 %v8983_v53, 0.0  ;;  %v16693_v29 = vadd.f32 %v28128_v50, %v16527_v37  ;;  %v16696_v41 = vadd.f32 %v22656_v28, %v28128_v50 }
 0x837   :  { %17078 = vst [vmem:[#allocation3 + $0x48] sm:$0xff] %v17046_v38  ;;  %17079 = vst [vmem:[#allocation3 + $0x50] sm:$0xff] %v17047_v23  ;;  %v16998_v46 = vmax.bf16 %v16964_v20, %v28210_v11  ;;  %v16694_v48 = vadd.f32 %v28128_v50, %v16530_v27  ;;  %20119 = vmatprep.subr.bf16.mxu1 %v17046_v38  ;;  %v16727_v31 = vmax.f32 %v16695_v14, 0.0 }
 0x838   :  { %v9033_v9 = vpack.c.bf16 %v9017_v32, %v9016_v63  ;;  %v9032_v39 = vpack.c.bf16 %v9015_v59, %v9014_v13  ;;  %20120 = vmatpush3.bf16.msra.mxu1 %v17038_v12  ;;  %v16725_v36 = vmax.f32 %v16693_v29, 0.0  ;;  %v16728_v55 = vmax.f32 %v16696_v41, 0.0 }
 0x839   :  { %v16726_v60 = vmax.f32 %v16694_v48, 0.0  ;;  %20121 = vmatprep.subr.bf16.mxu1 %v17047_v23 }
 0x83a   :  { %v16885_v24 = vrot.slane %v9033_v9, 1  ;;  %v16883_v17 = vrot.slane %v9032_v39, 1  ;;  %v16999_v3 = vmax.bf16 %v16965_v51, %v9032_v39  ;;  %v22659_v49 = vpop.f32.mrb[68].mxu0  ;;  %v28228_v58 = vpack.c.bf16 %v16728_v55, %v16727_v31 }
 0x83b   :  { %v16757_v33 = vpack.c.bf16 %v16726_v60, %v16725_v36  ;;  %v16543_v0 = vpop.f32.mrb[69].mxu0  ;;  %v16699_v42 = vadd.f32 %v22659_v49, %v28128_v50 }
 0x83c   :  { %v16884_v6 = vsel %vm1351_vm1, %v16881_v52, %v16883_v17  ;;  %v16886_v26 = vsel %vm1351_vm1, %v16883_v17, %v16885_v24  ;;  %v22660_v15 = vpop.f32.mrb[70].mxu0  ;;  %20122 = vmatpush3.bf16.msra.mxu1 %v28166_v19  ;;  %v16889_v54 = vrot.slane %v28228_v58, 1  ;;  %v16697_v34 = vadd.f32 %v28128_v50, %v16543_v0  ;;  %v28268_v0 = vld [vmem:[%s28455_s5 + $0x8] sm:$0xff] }
 0x83d   :  { %v16966_v8 = vmax.bf16 %v16884_v6, %v28210_v11  ;;  %v16967_v61 = vmax.bf16 %v16886_v26, %v9032_v39  ;;  %v17048_v12 = vmax.bf16 %v16998_v46, %v16884_v6  ;;  %v17049_v47 = vmax.bf16 %v16999_v3, %v16886_v26  ;;  %v16546_v7 = vpop.f32.mrb[71].mxu0 }
 0x83e   :  { %v16887_v22 = vrot.slane %v16757_v33, 1  ;;  %v16700_v56 = vadd.f32 %v22660_v15, %v28128_v50  ;;  %v16698_v19 = vadd.f32 %v28128_v50, %v16546_v7  ;;  %v16731_v10 = vmax.f32 %v16699_v42, 0.0 }
 0x83f   :  { %17080 = vst [vmem:[#allocation3 + $0x58] sm:$0xff] %v17048_v12  ;;  %17081 = vst [vmem:[#allocation3 + $0x60] sm:$0xff] %v17049_v47  ;;  %v17000_v35 = vmax.bf16 %v16966_v8, %v9033_v9  ;;  %v17001_v45 = vmax.bf16 %v16967_v61, %v16757_v33  ;;  %20123 = vmatprep.subr.bf16.mxu1 %v17048_v12  ;;  %v16729_v63 = vmax.f32 %v16697_v34, 0.0 }
 0x840   :  { %v16888_v11 = vsel %vm1351_vm1, %v16885_v24, %v16887_v22  ;;  %v16890_v52 = vsel %vm1351_vm1, %v16887_v22, %v16889_v54  ;;  %20124 = vmatpush3.bf16.msra.mxu1 %v28185_v62  ;;  %v16732_v43 = vmax.f32 %v16700_v56, 0.0  ;;  %v16730_v4 = vmax.f32 %v16698_v19, 0.0 }
 0x841   :  { %v16968_v25 = vmax.bf16 %v16888_v11, %v9033_v9  ;;  %v16969_v16 = vmax.bf16 %v16890_v52, %v16757_v33  ;;  %v17050_v18 = vmax.bf16 %v17000_v35, %v16888_v11  ;;  %v17051_v21 = vmax.bf16 %v17001_v45, %v16890_v52  ;;  %20125 = vmatprep.subr.bf16.mxu1 %v17049_v47 }
 0x842   :  { %v22663_v37 = vpop.f32.mrb[72].mxu0  ;;  %v28243_v53 = vpack.c.bf16 %v16732_v43, %v16731_v10  ;;  %v16759_v14 = vpack.c.bf16 %v16730_v4, %v16729_v63  ;;  %v18838_v7 = vcombine.low %v28137_v40, %v28137_v40 }
 0x843   :  { %17082 = vst [vmem:[#allocation3 + $0x68] sm:$0xff] %v17050_v18  ;;  %17083 = vst [vmem:[#allocation3 + $0x70] sm:$0xff] %v17051_v21  ;;  %v17002_v1 = vmax.bf16 %v16968_v25, %v28228_v58  ;;  %v16559_v57 = vpop.f32.mrb[73].mxu0  ;;  %v16703_v62 = vadd.f32 %v22663_v37, %v28128_v50 }
 0x844   :  { %v22664_v28 = vpop.f32.mrb[74].mxu0  ;;  %20126 = vmatpush3.bf16.msra.mxu1 %v28183_v5  ;;  %v16893_v38 = vrot.slane %v28243_v53, 1  ;;  %v16891_v23 = vrot.slane %v16759_v14, 1  ;;  %v17003_v27 = vmax.bf16 %v16969_v16, %v16759_v14  ;;  %v16701_v13 = vadd.f32 %v28128_v50, %v16559_v57 }
 0x845   :  { %v16704_v20 = vadd.f32 %v22664_v28, %v28128_v50  ;;  %v16562_v51 = vpop.f32.mrb[75].mxu0  ;;  %20127 = vmatprep.subr.bf16.mxu1 %v17050_v18  ;;  %v16735_v41 = vmax.f32 %v16703_v62, 0.0 }
 0x846   :  { %v16702_v59 = vadd.f32 %v28128_v50, %v16562_v51  ;;  %v16892_v29 = vsel %vm1351_vm1, %v16889_v54, %v16891_v23  ;;  %v16894_v46 = vsel %vm1351_vm1, %v16891_v23, %v16893_v38  ;;  %v16733_v31 = vmax.f32 %v16701_v13, 0.0 }
 0x847   :  { %v16736_v32 = vmax.f32 %v16704_v20, 0.0  ;;  %v16970_v5 = vmax.bf16 %v16892_v29, %v28228_v58  ;;  %v16971_v48 = vmax.bf16 %v16894_v46, %v16759_v14  ;;  %v17052_v9 = vmax.bf16 %v17002_v1, %v16892_v29 }
 0x848   :  { %20128 = vmatpush3.bf16.msra.mxu1 %v28195_v2  ;;  %v28255_v39 = vmax.bf16 %v17003_v27, %v16894_v46  ;;  %v16734_v55 = vmax.f32 %v16702_v59, 0.0 }
 0x849   :  { %20129 = vmatprep.subr.bf16.mxu1 %v17051_v21  ;;  %v28257_v36 = vpack.c.bf16 %v16736_v32, %v16735_v41  ;;  %17084 = vst [vmem:[#allocation3 + $0x78] sm:$0xff] %v17052_v9  ;;  %v17004_v24 = vmax.bf16 %v16970_v5, %v28243_v53 }
 0x84a   :  { %v22667_v60 = vpop.f32.mrb[76].mxu0  ;;  %17085 = vst [vmem:[#allocation3 + $0x80] sm:$0xff] %v28255_v39  ;;  %v16761_v49 = vpack.c.bf16 %v16734_v55, %v16733_v31 }
 0x84b   :  { %v16707_v17 = vadd.f32 %v22667_v60, %v28128_v50  ;;  %v16575_v2 = vpop.f32.mrb[77].mxu0  ;;  %v16897_v3 = vrot.slane %v28257_v36, 1 }
 0x84c   :  { %v16705_v58 = vadd.f32 %v28128_v50, %v16575_v2  ;;  %v22668_v33 = vpop.f32.mrb[78].mxu0  ;;  %20130 = vmatpush3.bf16.msra.mxu1 %v28197_v30  ;;  %v16895_v15 = vrot.slane %v16761_v49, 1  ;;  %v17005_v8 = vmax.bf16 %v16971_v48, %v16761_v49  ;;  %v18841_v30 = vcombine.high %v28268_v0, %v28268_v0 }
 0x84d   :  { %v16708_v6 = vadd.f32 %v22668_v33, %v28128_v50  ;;  %v16578_v26 = vpop.f32.mrb[79].mxu0  ;;  %20131 = vmatprep.subr.bf16.mxu1 %v17052_v9  ;;  %v16739_v12 = vmax.f32 %v16707_v17, 0.0 }
 0x84e   :  { %v16706_v61 = vadd.f32 %v28128_v50, %v16578_v26  ;;  %v16896_v54 = vsel %vm1351_vm1, %v16893_v38, %v16895_v15  ;;  %v16898_v22 = vsel %vm1351_vm1, %v16895_v15, %v16897_v3  ;;  %v16737_v42 = vmax.f32 %v16705_v58, 0.0 }
 0x84f   :  { %v16740_v47 = vmax.f32 %v16708_v6, 0.0  ;;  %v16972_v35 = vmax.bf16 %v16896_v54, %v28243_v53  ;;  %v16973_v45 = vmax.bf16 %v16898_v22, %v16761_v49  ;;  %v28280_v56 = vmax.bf16 %v17004_v24, %v16896_v54 }
 0x850   :  { %v16738_v34 = vmax.f32 %v16706_v61, 0.0  ;;  %20132 = vmatpush3.bf16.msra.mxu1 %v28207_v44  ;;  %v28282_v19 = vmax.bf16 %v17005_v8, %v16898_v22 }
 0x851   :  { %v16764_v11 = vpack.c.bf16 %v16740_v47, %v16739_v12  ;;  %17086 = vst [vmem:[#allocation3 + $0x88] sm:$0xff] %v28280_v56  ;;  %v17006_v25 = vmax.bf16 %v16972_v35, %v28257_v36 }
 0x852   :  { %v16763_v40 = vpack.c.bf16 %v16738_v34, %v16737_v42  ;;  %v22671_v52 = vpop.f32.mrb[80].mxu0  ;;  %17087 = vst [vmem:[#allocation3 + $0x90] sm:$0xff] %v28282_v19 }
 0x853   :  { %v16711_v16 = vadd.f32 %v22671_v52, %v28128_v50  ;;  %v16591_v18 = vpop.f32.mrb[81].mxu0  ;;  %17206 = vmatmul.mubr.bf16.vlgmr.msra.gmra.mrb[32].mxu1 %v18838_v7  ;;  %v16901_v44 = vrot.slane %v16764_v11, 1 }
 0x854   :  { %v16899_v21 = vrot.slane %v16763_v40, 1  ;;  %v17007_v10 = vmax.bf16 %v16973_v45, %v16763_v40  ;;  %v16709_v63 = vadd.f32 %v28128_v50, %v16591_v18  ;;  %v22672_v43 = vpop.f32.mrb[82].mxu0  ;;  %17245 = vmatprep.mubr.bf16.mxu1 %v18841_v30 }
 0x855   :  { %v16712_v4 = vadd.f32 %v22672_v43, %v28128_v50  ;;  %v16594_v37 = vpop.f32.mrb[83].mxu0  ;;  %v16743_v51 = vmax.f32 %v16711_v16, 0.0 }
 0x856   :  { %v16900_v1 = vsel %vm1351_vm1, %v16897_v3, %v16899_v21  ;;  %v16902_v57 = vsel %vm1351_vm1, %v16899_v21, %v16901_v44  ;;  %v16710_v53 = vadd.f32 %v28128_v50, %v16594_v37  ;;  %v16741_v38 = vmax.f32 %v16709_v63, 0.0 }
 0x857   :  { %v16974_v14 = vmax.bf16 %v16900_v1, %v28257_v36  ;;  %v16975_v62 = vmax.bf16 %v16902_v57, %v16763_v40  ;;  %v28294_v28 = vmax.bf16 %v17006_v25, %v16900_v1  ;;  %v28296_v20 = vmax.bf16 %v17007_v10, %v16902_v57 }
 0x858   :  { %v16744_v23 = vmax.f32 %v16712_v4, 0.0  ;;  %v16742_v27 = vmax.f32 %v16710_v53, 0.0 }
 0x859   :  { %17088 = vst [vmem:[#allocation3 + $0x98] sm:$0xff] %v28294_v28  ;;  %17089 = vst [vmem:[#allocation3 + $0xa0] sm:$0xff] %v28296_v20  ;;  %v17008_v13 = vmax.bf16 %v16974_v14, %v16764_v11 }
 0x85a   :  { %v16766_v32 = vpack.c.bf16 %v16744_v23, %v16743_v51  ;;  %v16765_v59 = vpack.c.bf16 %v16742_v27, %v16741_v38  ;;  %v22675_v29 = vpop.f32.mrb[84].mxu0 }
 0x85b   :  { %v16715_v46 = vadd.f32 %v22675_v29, %v28128_v50  ;;  %v16607_v41 = vpop.f32.mrb[85].mxu0 }
 0x85c   :  { %v16905_v5 = vrot.slane %v16766_v32, 1  ;;  %v16903_v48 = vrot.slane %v16765_v59, 1  ;;  %v17009_v9 = vmax.bf16 %v16975_v62, %v16765_v59  ;;  %v16713_v31 = vadd.f32 %v28128_v50, %v16607_v41  ;;  %v22676_v36 = vpop.f32.mrb[86].mxu0 }
 0x85d   :  { %v16716_v55 = vadd.f32 %v22676_v36, %v28128_v50  ;;  %v16610_v60 = vpop.f32.mrb[87].mxu0  ;;  %v16747_v6 = vmax.f32 %v16715_v46, 0.0  ;;  %v16822_v36 = vld [vmem:[#allocation2 + $0x100] sm:$0x1] }
 0x85e   :  { %v16904_v24 = vsel %vm1351_vm1, %v16901_v44, %v16903_v48  ;;  %v16906_v17 = vsel %vm1351_vm1, %v16903_v48, %v16905_v5  ;;  %v16714_v2 = vadd.f32 %v28128_v50, %v16610_v60  ;;  %v16745_v26 = vmax.f32 %v16713_v31, 0.0 }
 0x85f   :  { %v16976_v3 = vmax.bf16 %v16904_v24, %v16764_v11  ;;  %v16977_v49 = vmax.bf16 %v16906_v17, %v16765_v59  ;;  %v28306_v58 = vmax.bf16 %v17008_v13, %v16904_v24  ;;  %v28308_v33 = vmax.bf16 %v17009_v9, %v16906_v17 }
 0x860   :  { %v16748_v15 = vmax.f32 %v16716_v55, 0.0  ;;  %v16746_v8 = vmax.f32 %v16714_v2, 0.0  ;;  %v17020_v2 = vld [vmem:[#allocation2 + $0x110] sm:$0x1] }
 0x861   :  { %17090 = vst [vmem:[#allocation3 + $0xa8] sm:$0xff] %v28306_v58  ;;  %17091 = vst [vmem:[#allocation3 + $0xb0] sm:$0xff] %v28308_v33  ;;  %v17010_v61 = vmax.bf16 %v16976_v3, %v16766_v32 }
 0x862   :  { %v16768_v12 = vpack.c.bf16 %v16748_v15, %v16747_v6  ;;  %v16767_v47 = vpack.c.bf16 %v16746_v8, %v16745_v26  ;;  %v22679_v7 = vpop.f32.mrb[88].mxu0  ;;  %v16919_v6 = vrot.slane %v16822_v36, 1  ;;  %v17031_v15 = vrot.slane %v17020_v2, 1  ;;  %v24704_v36 = vld [vmem:[%s28457_s8 + $0x70] sm:$0xff]  }
 0x863   :  { %v16719_v30 = vadd.f32 %v22679_v7, %v28128_v50  ;;  %v16623_v54 = vpop.f32.mrb[89].mxu0 }
 0x864   :  { %v16909_v22 = vrot.slane %v16768_v12, 1  ;;  %v16907_v42 = vrot.slane %v16767_v47, 1  ;;  %v17011_v34 = vmax.bf16 %v16977_v49, %v16767_v47  ;;  %v16717_v35 = vadd.f32 %v28128_v50, %v16623_v54  ;;  %v22680_v45 = vpop.f32.mrb[90].mxu0 }
 0x865   :  { %v16720_v11 = vadd.f32 %v22680_v45, %v28128_v50  ;;  %v16626_v40 = vpop.f32.mrb[91].mxu0  ;;  %v16751_v63 = vmax.f32 %v16719_v30, 0.0 }
 0x866   :  { %v16908_v52 = vsel %vm1351_vm1, %v16905_v5, %v16907_v42  ;;  %v16910_v25 = vsel %vm1351_vm1, %v16907_v42, %v16909_v22  ;;  %v16718_v16 = vadd.f32 %v28128_v50, %v16626_v40  ;;  %v16749_v43 = vmax.f32 %v16717_v35, 0.0 }
 0x867   :  { %v16978_v18 = vmax.bf16 %v16908_v52, %v16766_v32  ;;  %v16979_v44 = vmax.bf16 %v16910_v25, %v16767_v47  ;;  %v28318_v21 = vmax.bf16 %v17010_v61, %v16908_v52  ;;  %v17061_v10 = vmax.bf16 %v17011_v34, %v16910_v25  ;;  %v24822_v47 = vld [vmem:[#allocation2 + $0x100] sm:$0xff] }
 0x868   :  { %v16752_v4 = vmax.f32 %v16720_v11, 0.0  ;;  %v16750_v37 = vmax.f32 %v16718_v16, 0.0  ;;  %v17029_v7 = vrot.slane %v24822_v47, 1 }
 0x869   :  { %17092 = vst [vmem:[#allocation3 + $0xb8] sm:$0xff] %v28318_v21  ;;  %17093 = vst [vmem:[#allocation3 + $0xc0] sm:$0xff] %v17061_v10  ;;  %v17012_v1 = vmax.bf16 %v16978_v18, %v16768_v12  ;;  %20139 = vmatprep.subr.bf16.mxu1 %v17061_v10 }
 0x86a   :  { %v16770_v57 = vpack.c.bf16 %v16752_v4, %v16751_v63  ;;  %v16769_v53 = vpack.c.bf16 %v16750_v37, %v16749_v43  ;;  %v22683_v14 = vpop.f32.mrb[92].mxu0  ;;  %20140 = vmatpush3.bf16.msra.mxu1 %v28255_v39  ;;  %v24676_v63 = vld [vmem:[%s28456_s6 + $0x24] ss:$8 sps:$4 sm:$0xff]   ;;  %v24674_v43 = vld [vmem:[%s28456_s6 + $0x20] ss:$8 sps:$4 sm:$0xff]  }
 0x86b   :  { %v16723_v62 = vadd.f32 %v22683_v14, %v28128_v50  ;;  %v16639_v51 = vpop.f32.mrb[93].mxu0  ;;  %v24679_v4 = vld [vmem:[%s28456_s6 + $0x34] ss:$8 sps:$4 sm:$0xff]   ;;  %v24677_v37 = vld [vmem:[%s28456_s6 + $0x30] ss:$8 sps:$4 sm:$0xff]  }
 0x86c   :  { %v16913_v38 = vrot.slane %v16770_v57, 1  ;;  %v16911_v23 = vrot.slane %v16769_v53, 1  ;;  %v17013_v27 = vmax.bf16 %v16979_v44, %v16769_v53  ;;  %v16721_v13 = vadd.f32 %v28128_v50, %v16639_v51  ;;  %v22684_v32 = vpop.f32.mrb[94].mxu0  ;;  %v24683_v14 = vld [vmem:[%s28456_s6 + $0x50] ss:$8 sps:$4 sm:$0xff]  }
 0x86d   :  { %v16724_v59 = vadd.f32 %v22684_v32, %v28128_v50  ;;  %v16642_v29 = vpop.f32.mrb[95].mxu0  ;;  %v16755_v55 = vmax.f32 %v16723_v62, 0.0  ;;  %v18840_v44 = vcombine.low %v28268_v0, %v28268_v0  ;;  %v24686_v62 = vld [vmem:[%s28456_s6 + $0x60] ss:$8 sps:$4 sm:$0xff]   ;;  %v24688_v51 = vld [vmem:[%s28456_s6 + $0x64] ss:$8 sps:$4 sm:$0xff]  }
 0x86e   :  { %v16912_v46 = vsel %vm1351_vm1, %v16909_v22, %v16911_v23  ;;  %v16914_v41 = vsel %vm1351_vm1, %v16911_v23, %v16913_v38  ;;  %v16722_v5 = vadd.f32 %v28128_v50, %v16642_v29  ;;  %v16753_v60 = vmax.f32 %v16721_v13, 0.0  ;;  %v24691_v23 = vld [vmem:[%s28456_s6 + $0x74] ss:$8 sps:$4 sm:$0xff]   ;;  %v24693_v13 = vld [vmem:[%s28457_s8] sm:$0xff]   ;;  %v24694_v32 = vld [vmem:[%s28457_s8 + $0x48] sm:$0xff]  }
 0x86f   :  { %v16980_v48 = vmax.bf16 %v16912_v46, %v16768_v12  ;;  %v16981_v39 = vmax.bf16 %v16914_v41, %v16769_v53  ;;  %v17062_v9 = vmax.bf16 %v17012_v1, %v16912_v46  ;;  %v17063_v31 = vmax.bf16 %v17013_v27, %v16914_v41  ;;  %v24682_v1 = vld [vmem:[%s28456_s6 + $0x44] ss:$8 sps:$4 sm:$0xff]   ;;  %v24685_v53 = vld [vmem:[%s28456_s6 + $0x54] ss:$8 sps:$4 sm:$0xff]  }
 0x870   :  { %v16756_v24 = vmax.f32 %v16724_v59, 0.0  ;;  %v16754_v17 = vmax.f32 %v16722_v5, 0.0  ;;  %v24692_v27 = vld [vmem:[%s28457_s8 + $0x40] sm:$0xff]   ;;  %v24695_v59 = vld [vmem:[%s28457_s8 + $0x8] sm:$0xff]   ;;  %v24696_v29 = vld [vmem:[%s28457_s8 + $0x50] sm:$0xff]  }
 0x871   :  { %17094 = vst [vmem:[#allocation3 + $0xc8] sm:$0xff] %v17062_v9  ;;  %17095 = vst [vmem:[#allocation3 + $0xd0] sm:$0xff] %v17063_v31  ;;  %v17014_v3 = vmax.bf16 %v16980_v48, %v16770_v57  ;;  %20141 = vmatprep.subr.bf16.mxu1 %v17062_v9  ;;  %20183 = vmatprep.subr.bf16.mxu0 %v24692_v27  ;;  %v24697_v46 = vld [vmem:[%s28457_s8 + $0x10] sm:$0xff]   ;;  %v24698_v41 = vld [vmem:[%s28457_s8 + $0x58] sm:$0xff]  }
 0x872   :  { %v16772_v49 = vpack.c.bf16 %v16756_v24, %v16755_v55  ;;  %v16771_v26 = vpack.c.bf16 %v16754_v17, %v16753_v60  ;;  %20142 = vmatpush3.bf16.msra.mxu1 %v28280_v56  ;;  %v17032_v56 = vsel %vm1351_vm1, %v17029_v7, %v17031_v15  ;;  %20184 = vmatpush3.bf16.msra.mxu0 %v24693_v13  ;;  %v24699_v5 = vld [vmem:[%s28457_s8 + $0x18] sm:$0xff]   ;;  %v24700_v48 = vld [vmem:[%s28457_s8 + $0x60] sm:$0xff]   ;;  %v24702_v9 = vld [vmem:[%s28457_s8 + $0x68] sm:$0xff]  }
 0x873   :  { %20143 = vmatprep.subr.bf16.mxu1 %v17063_v31  ;;  %20185 = vmatprep.subr.bf16.mxu0 %v24694_v32  ;;  %v24703_v31 = vld [vmem:[%s28457_s8 + $0x28] sm:$0xff]   ;;  %v24705_v55 = vld [vmem:[%s28457_s8 + $0x30] sm:$0xff]  }
 0x874   :  { %v16917_v50 = vrot.slane %v16772_v49, 1  ;;  %v16915_v8 = vrot.slane %v16771_v26, 1  ;;  %v17015_v61 = vmax.bf16 %v16981_v39, %v16771_v26  ;;  %v24701_v39 = vld [vmem:[%s28457_s8 + $0x20] sm:$0xff]  }
 0x876   :  { %v16920_v12 = vsel %vm1351_vm1, %v16917_v50, %v16919_v6  ;;  %v16916_v30 = vsel %vm1351_vm1, %v16913_v38, %v16915_v8  ;;  %v16918_v54 = vsel %vm1351_vm1, %v16915_v8, %v16917_v50  ;;  %20144 = vmatpush3.bf16.msra.mxu1 %v28282_v19  ;;  %v17028_v25 = vsel %vm1351_vm1, %v16917_v50, %v17029_v7  ;;  %v24689_v38 = vld [vmem:[%s28456_s6 + $0x70] ss:$8 sps:$4 sm:$0xff]  }
 0x877   :  { %v16984_v22 = vmax.bf16 %v16920_v12, %v16772_v49  ;;  %v16982_v42 = vmax.bf16 %v16916_v30, %v16770_v57  ;;  %v16983_v34 = vmax.bf16 %v16918_v54, %v16771_v26  ;;  %v17064_v35 = vmax.bf16 %v17014_v3, %v16916_v30  ;;  %v24680_v57 = vld [vmem:[%s28456_s6 + $0x40] ss:$8 sps:$4 sm:$0xff]   ;;  %20186 = vmatpush3.bf16.msra.mxu0 %v24695_v59 }
 0x878   :  { %v17065_v45 = vmax.bf16 %v17015_v61, %v16918_v54  ;;  %20187 = vmatprep.subr.bf16.mxu0 %v24696_v29 }
 0x879   :  { %v17018_v11 = vmax.bf16 %v24822_v47, %v16984_v22  ;;  %v17016_v40 = vmax.bf16 %v16982_v42, %v16772_v49  ;;  %v17017_v52 = vmax.bf16 %v24822_v47, %v16983_v34  ;;  %17096 = vst [vmem:[#allocation3 + $0xd8] sm:$0xff] %v17064_v35  ;;  %20145 = vmatprep.subr.bf16.mxu1 %v17064_v35  ;;  %v24706_v42 = vld [vmem:[%s28457_s8 + $0x78] sm:$0xff]   ;;  %v17312_v35 = vlaneseq }
 0x87a   :  { %17097 = vst [vmem:[#allocation3 + $0xe0] sm:$0xff] %v17065_v45  ;;  %20146 = vmatpush3.bf16.msra.mxu1 %v28294_v28  ;;  %v17103_v28 = vld [vmem:[%s28455_s5 + $0x10] sm:$0xff]  ;;  %v24707_v34 = vld [vmem:[%s28457_s8 + $0x38] sm:$0xff]  }
 0x87b   :  { %v17068_v16 = vmax.bf16 %v17032_v56, %v17018_v11  ;;  %v17066_v18 = vmax.bf16 %v17028_v25, %v17016_v40  ;;  %v17067_v19 = vmax.bf16 %v17029_v7, %v17017_v52  ;;  %20147 = vmatprep.subr.bf16.mxu1 %v17065_v45  ;;  %v18843_v10 = vcombine.high %v17103_v28, %v17103_v28  ;;  %v17310_v11 = vld [vmem:[%s28458_s7] sm:$0x3] }
 0x87c   :  { %v18842_v0 = vcombine.low %v17103_v28, %v17103_v28  ;;  %20188 = vmatpush3.bf16.msra.mxu0 %v24697_v46  ;;  %v17313_v56 = vshrl.u32 %v17312_v35, 7 }
 0x87d   :  { %17100 = vst [vmem:[#allocation3 + $0xf8] sm:$0xff] %v17068_v16  ;;  %17098 = vst [vmem:[#allocation3 + $0xe8] sm:$0xff] %v17066_v18  ;;  %20189 = vmatprep.subr.bf16.mxu0 %v24698_v41 }
 0x87e   :  { %17099 = vst [vmem:[#allocation3 + $0xf0] sm:$0xff] %v17067_v19  ;;  %20148 = vmatpush3.bf16.msra.mxu1 %v28296_v20  ;;  %v24668_v20 = vld [vmem:[%s28456_s6] ss:$8 sps:$4 sm:$0xff]   ;;  %v17314_v45 = vsub.s32 0, %v17313_v56  ;;  %v17318_v40 = vsub.s32 1, %v17313_v56 }
 0x87f   :  { %20149 = vmatprep.subr.bf16.mxu1 %v17066_v18 }
 0x880   :  { %20190 = vmatpush3.bf16.msra.mxu0 %v24699_v5  ;;  %v17315_v52 = vrot.slane %v17310_v11, %v17314_v45  ;;  %v17319_v25 = vrot.slane %v17310_v11, %v17318_v40 }
 0x881   :  { %20191 = vmatprep.subr.bf16.mxu0 %v24700_v48 }
 0x882   :  { %20150 = vmatpush3.bf16.msra.mxu1 %v28306_v58  ;;  %v24670_v58 = vld [vmem:[%s28456_s6 + $0x4] ss:$8 sps:$4 sm:$0xff]  }
 0x883   :  { %20151 = vmatprep.subr.bf16.mxu1 %v17067_v19 }
 0x884   :  { %20192 = vmatpush3.bf16.msra.mxu0 %v24701_v39 }
 0x885   :  { %20193 = vmatprep.subr.bf16.mxu0 %v24702_v9 }
 0x886   :  { %20152 = vmatpush3.bf16.msra.mxu1 %v28308_v33  ;;  %v24673_v33 = vld [vmem:[%s28456_s6 + $0x14] ss:$8 sps:$4 sm:$0xff]  }
 0x887   :  { %20153 = vmatprep.subr.bf16.mxu1 %v17068_v16 }
 0x888   :  { %20194 = vmatpush3.bf16.msra.mxu0 %v24703_v31 }
 0x889   :  { %20195 = vmatprep.subr.bf16.mxu0 %v24704_v36 }
 0x88a   :  { %20154 = vmatpush3.bf16.msra.mxu1 %v28318_v21  ;;  %v24671_v21 = vld [vmem:[%s28456_s6 + $0x10] ss:$8 sps:$4 sm:$0xff]  }
 0x88b   :  { %20161 = vmatprep.subr.bf16.mxu1 %v24822_v47 }
 0x88c   :  { %20196 = vmatpush3.bf16.msra.mxu0 %v24705_v55 }
 0x88d   :  { %17246 = vmatmul.mubr.bf16.vlgmr.msra.gmra.mrb[36].mxu1 %v18840_v44  ;;  %20197 = vmatprep.subr.bf16.mxu0 %v24706_v42 }
 0x88e   :  { %20162 = vmatpush3.bf16.msra.mxu1 %v24822_v47  ;;  %17285 = vmatprep.mubr.bf16.mxu1 %v18843_v10 }
 0x88f   :  { %20163 = vmatprep.subr.bf16.mxu1 %v24822_v47 }
 0x890   :  { %20198 = vmatpush3.bf16.msra.mxu0 %v24707_v34 }
 0x892   :  { %20164 = vmatpush3.bf16.msra.mxu1 %v24822_v47 }
 0x893   :  { %20165 = vmatprep.subr.bf16.mxu1 %v24822_v47 }
 0x896   :  { %20166 = vmatpush3.bf16.msra.mxu1 %v24822_v47 }
 0x897   :  { %20167 = vmatprep.subr.bf16.mxu1 %v24822_v47 }
 0x89a   :  { %20168 = vmatpush3.bf16.msra.mxu1 %v24822_v47 }
 0x89b   :  { %20169 = vmatprep.subr.bf16.mxu1 %v24822_v47 }
 0x89e   :  { %20170 = vmatpush3.bf16.msra.mxu1 %v24822_v47 }
 0x89f   :  { %20171 = vmatprep.subr.bf16.mxu1 %v24822_v47 }
 0x8a2   :  { %20172 = vmatpush3.bf16.msra.mxu1 %v24822_v47 }
 0x8a3   :  { %20173 = vmatprep.subr.bf16.mxu1 %v24822_v47 }
 0x8a6   :  { %20174 = vmatpush3.bf16.msra.mxu1 %v24822_v47 }
 0x8a7   :  { %20175 = vmatprep.subr.bf16.mxu1 %v24822_v47 }
 0x8aa   :  { %20176 = vmatpush3.bf16.msra.mxu1 %v24822_v47 }
 0x8ab   :  { %17402 = vmatprep.subr.bf16.mxu1 %v24670_v58 }
 0x8ad   :  { %17286 = vmatmul.mubr.bf16.vlgmr.msra.gmra.mrb[40].mxu1 %v18842_v0 }
 0x8ae   :  { %17434 = vmatprep.mubr.bf16.mxu1 %v24822_v47  ;;  %17403 = vmatpush1.bf16.msra.mxu1 %v24668_v20 }
 0x8af   :  { %17404 = vmatprep.subr.bf16.mxu1 %v24673_v33 }
 0x8b2   :  { %17405 = vmatpush1.bf16.msra.mxu1 %v24671_v21 }
 0x8b3   :  { %17406 = vmatprep.subr.bf16.mxu1 %v24676_v63  ;;  %v18860_v63 = vld [vmem:[%s28459_s9] ss:$0 sm:$0xff] }
 0x8b6   :  { %17407 = vmatpush1.bf16.msra.mxu1 %v24674_v43 }
 0x8b7   :  { %17408 = vmatprep.subr.bf16.mxu1 %v24679_v4 }
 0x8ba   :  { %17409 = vmatpush1.bf16.msra.mxu1 %v24677_v37 }
 0x8bb   :  { %17410 = vmatprep.subr.bf16.mxu1 %v24682_v1 }
 0x8be   :  { %17411 = vmatpush1.bf16.msra.mxu1 %v24680_v57 }
 0x8bf   :  { %17412 = vmatprep.subr.bf16.mxu1 %v24685_v53 }
 0x8c2   :  { %17413 = vmatpush1.bf16.msra.mxu1 %v24683_v14 }
 0x8c3   :  { %17414 = vmatprep.subr.bf16.mxu1 %v24688_v51 }
 0x8c6   :  { %17415 = vmatpush1.bf16.msra.mxu1 %v24686_v62 }
 0x8c7   :  { %17416 = vmatprep.subr.bf16.mxu1 %v24691_v23 }
 0x8ca   :  { %17417 = vmatpush1.bf16.msra.mxu1 %v24689_v38 }
 0x926   :  { %v20133_v60 = vpop.f32.mrb[32].mxu1 }
 0x927   :  { %v20134_v24 = vpop.f32.mrb[33].mxu1 }
 0x928   :  { %v20135_v17 = vadd.f32 %v20134_v24, %v20133_v60  ;;  %v20136_v2 = vpop.f32.mrb[34].mxu1 }
 0x929   :  { %v20137_v3 = vpop.f32.mrb[35].mxu1 }
 0x960   :  { %v20155_v49 = vpop.f32.mrb[36].mxu1 }
 0x961   :  { %v20156_v6 = vpop.f32.mrb[37].mxu1 }
 0x962   :  { %v20157_v26 = vadd.f32 %v20156_v6, %v20155_v49  ;;  %v20158_v50 = vpop.f32.mrb[38].mxu1 }
 0x963   :  { %v20159_v15 = vpop.f32.mrb[39].mxu1 }
 0x964   :  { %v17248_v8 = vadd.f32 %v20157_v26, %v20135_v17 }
 0x980   :  { %v20177_v61 = vpop.f32.mrb[40].mxu1 }
 0x981   :  { %v20178_v12 = vpop.f32.mrb[41].mxu1 }
 0x982   :  { %v20179_v47 = vadd.f32 %v20178_v12, %v20177_v61  ;;  %v20180_v7 = vpop.f32.mrb[42].mxu1 }
 0x983   :  { %v20181_v30 = vpop.f32.mrb[43].mxu1 }
 0x984   :  { %v17288_v54 = vadd.f32 %v20179_v47, %v17248_v8 }
 0x986   :  { %v17293_v22 = vpack.c.bf16 %v17288_v54, %v17288_v54 }
 0x988   :  { %17435 = vmatmul.mubr.bf16.vlgmr.msra.gmra.mrb[44].mxu1 %v17293_v22 }
 0xa5b   :  { %v17436_v16 = vpop.f32.mrb[44].mxu1 }
 0xa5c   :  { %v17437_v18 = vadd.f32 %v17436_v16, %v17315_v52  ;;  %v17438_v19 = vpop.f32.mrb[45].mxu1 }
 0xa5d   :  { %v17439_v28 = vadd.f32 %v17438_v19, %v17319_v25  ;;  %v17440_v44 = vpop.f32.mrb[46].mxu1 }
 0xa5e   :  { %v17443_v10 = vmax.f32 %v17437_v18, 0.0  ;;  %v17441_v0 = vpop.f32.mrb[47].mxu1 }
 0xa5f   :  { %v17444_v20 = vmax.f32 %v17439_v28, 0.0 }
 0xa60   :  { %v17445_v33 = vpack.c.bf16 %v17443_v10, %v17443_v10 }
 0xa61   :  { %v17446_v58 = vpack.c.bf16 %v17444_v20, %v17444_v20 }
 0xa63   :  { %17614 = vmatprep.mubr.bf16.mxu0 %v17446_v58 }
 0xa64   :  { %17615 = vmatmul.mubr.bf16.vlgmr.msra.gmra.mrb[96].mxu0 %v17445_v33 }
 0xb37   :  { %v20199_v21 = vpop.f32.mrb[96].mxu0 }
 0xb38   :  { %v20200_v43 = vpop.f32.mrb[97].mxu0 }
 0xb39   :  { %v20201_v4 = vadd.f32 %v20200_v43, %v20199_v21  ;;  %v20202_v37 = vpop.f32.mrb[98].mxu0 }
 0xb3a   :  { %v20203_v1 = vpop.f32.mrb[99].mxu0 }
 0xb3b   :  { %v17617_v57 = vadd.f32 %v20201_v4, %v18860_v63 }
 0xb3d   :  { %17622 = vst [vmem:[%s28460_s10] sm:$0xff] %v17617_v57 }

</bundles_post_ra>
